<compile_context>
chip_gen: v7x
topology: tpu7x:2x2x1
jax: 0.10.0
libtpu: 0.0.40
codegen_flags: <defaults>
</compile_context>

<pallas_src>
import functools

import numpy as np
import jax
import jax.numpy as jnp
from jax.experimental import pallas as pl
from jax.experimental.pallas import tpu as pltpu

KSIZE = 5
C_HID = 12


# ----------------------------------------------------------------------------
# Fused kernel: conv1+sig -> conv2+sig -> conv3+sig -> flatten -> fc
# ----------------------------------------------------------------------------
def _fused_net_kernel(cols1_ref, w1_ref, b1_ref,
                      s2_ref, w2_ref, b2_ref,
                      s3_ref, w3_ref, b3_ref,
                      wfc_ref, bfc_ref,
                      out_ref,
                      cols_buf, flat_buf, *, batch):
    f32 = jnp.float32

    def sigmoid(z):                      # torch.nn.Sigmoid (f32 elementwise/EUP)
        return 1.0 / (1.0 + jnp.exp(-z))

    # ---- layer 1: Conv2d(3->12, k5, s2, p2) + Sigmoid ------------------------
    # cols1: (128, B*256) host-side im2col of the input, K zero-padded 75->128.
    a1 = sigmoid(jnp.dot(w1_ref[...], cols1_ref[...],
                         preferred_element_type=f32) + b1_ref[...])   # (12, B*256)

    # zero the shared im2col buffer once (rows 300:384 are K-padding -> stay 0)
    cols_buf[...] = jnp.zeros_like(cols_buf)

    def conv_gather(act, hw_in, s_ref, w_ref, b_ref):
        """act: (12, B*hw_in) -> sigmoid(conv(act)) as (12, B*64) (8x8 output)."""
        for b in range(batch):
            # exact spatial gather (incl. zero padding) as one MXU matmul:
            # u[c, k*64 + howo] = padded_input[b, c, tap(kh, kw, ho, wo)]
            u = jnp.dot(act[:, b * hw_in:(b + 1) * hw_in], s_ref[...],
                        preferred_element_type=f32)                   # (12, 1600)
            # re-pack into im2col layout: rows (k*12 + c), cols (b*64 + ho*8+wo)
            for k in range(KSIZE * KSIZE):
                cols_buf[C_HID * k:C_HID * (k + 1), 64 * b:64 * (b + 1)] = (
                    u[:, 64 * k:64 * (k + 1)])
        z = jnp.dot(w_ref[...], cols_buf[...],
                    preferred_element_type=f32) + b_ref[...]          # (12, B*64)
        return sigmoid(z)

    # ---- layer 2: Conv2d(12->12, k5, s2, p2) + Sigmoid  (16x16 -> 8x8) -------
    a2 = conv_gather(a1, 256, s2_ref, w2_ref, b2_ref)                 # (12, B*64)
    # ---- layer 3: Conv2d(12->12, k5, s1, p2) + Sigmoid  (8x8 -> 8x8) ---------
    a3 = conv_gather(a2, 64, s3_ref, w3_ref, b3_ref)                  # (12, B*64)

    # ---- flatten to PyTorch NCHW .view order: flat[b, c*64+hw] = a3[c, b*64+hw]
    for c in range(C_HID):
        for b in range(batch):
            flat_buf[b:b + 1, 64 * c:64 * (c + 1)] = a3[c:c + 1, 64 * b:64 * (b + 1)]

    # ---- fc: Linear(768, 100)  (N zero-padded 100 -> 128, sliced outside) ----
    out_ref[...] = (jnp.dot(flat_buf[...], wfc_ref[...],
                            preferred_element_type=f32) + bfc_ref[...])


# ----------------------------------------------------------------------------
# One-time host-side packing (weights transposed / padded, gather matrices)
# ----------------------------------------------------------------------------
def _gather_matrix(h_in, stride, h_out, k=KSIZE, pad=KSIZE // 2):
    """0/1 matrix S: (h_in*h_in, 25*h_out*h_out).
    (A_b @ S)[c, (kh*5+kw)*64 + ho*h_out + wo] == padded A_b at (s*ho+kh-2, s*wo+kw-2)."""
    hw_in, hw_out = h_in * h_in, h_out * h_out
    s = np.zeros((hw_in, k * k * hw_out), np.float32)
    for kh in range(k):
        for kw in range(k):
            kk = kh * k + kw
            for ho in range(h_out):
                hi = stride * ho + kh - pad
                if not (0 <= hi < h_in):
                    continue
                for wo in range(h_out):
                    wi = stride * wo + kw - pad
                    if 0 <= wi < h_in:
                        s[hi * h_in + wi, kk * hw_out + ho * h_out + wo] = 1.0
    return jnp.asarray(s)


def prepare_params(params):
    """Re-pack PyTorch-layout weights once (outside the jitted forward)."""
    f32 = jnp.float32
    w1 = params["w1"].reshape(C_HID, 3 * KSIZE * KSIZE).astype(f32)    # (12,75), (c,kh,kw)
    w1p = jnp.zeros((C_HID, 128), f32).at[:, :75].set(w1)

    def pack_conv(w):  # (12,12,5,5) -> (12,384), column order (kh, kw, cin), zero-padded
        wf = jnp.transpose(w, (0, 2, 3, 1)).reshape(C_HID, KSIZE * KSIZE * C_HID)
        return jnp.zeros((C_HID, 384), f32).at[:, :300].set(wf.astype(f32))

    wfc_t = params["wfc"].T.astype(f32)                                # (768, 100)
    return {
        "w1": w1p, "b1": params["b1"].reshape(C_HID, 1).astype(f32),
        "w2": pack_conv(params["w2"]), "b2": params["b2"].reshape(C_HID, 1).astype(f32),
        "w3": pack_conv(params["w3"]), "b3": params["b3"].reshape(C_HID, 1).astype(f32),
        "wfc": jnp.zeros((768, 128), f32).at[:, :100].set(wfc_t),
        "bfc": jnp.zeros((1, 128), f32).at[0, :100].set(params["bfc"].astype(f32)),
        "s2": _gather_matrix(16, 2, 8),     # (256, 1600)
        "s3": _gather_matrix(8, 1, 8),      # (64, 1600)
    }


def _build_cols1(x):
    """Host-side im2col for layer 1 only (depends only on the network input).
    Returns (128, B*256): rows (cin*25 + kh*5 + kw) zero-padded 75->128,
    columns (b*256 + ho*16 + wo)."""
    B = x.shape[0]
    xp = jnp.pad(x.astype(jnp.float32), ((0, 0), (0, 0), (2, 2), (2, 2)))
    patches = []
    for kh in range(KSIZE):
        for kw in range(KSIZE):
            patches.append(xp[:, :, kh:kh + 32:2, kw:kw + 32:2])       # (B, 3, 16, 16)
    cols = jnp.stack(patches, axis=2)                                  # (B, 3, 25, 16, 16)
    cols = cols.transpose(1, 2, 0, 3, 4).reshape(3 * KSIZE * KSIZE, B * 256)
    return jnp.zeros((128, B * 256), jnp.float32).at[:75, :].set(cols)


# ----------------------------------------------------------------------------
# Forward pass (single fused pallas_call)
# ----------------------------------------------------------------------------
def net_forward(x, prep):
    B = x.shape[0]
    cols1 = _build_cols1(x)

    def fs(shape):                       # full-array block at grid point 0
        return pl.BlockSpec(shape, lambda i: (0,) * len(shape))

    out = pl.pallas_call(
        functools.partial(_fused_net_kernel, batch=B),
        out_shape=jax.ShapeDtypeStruct((B, 128), jnp.float32),
        grid=(1,),
        in_specs=[
            fs((128, B * 256)), fs((C_HID, 128)), fs((C_HID, 1)),
            fs((256, 1600)), fs((C_HID, 384)), fs((C_HID, 1)),
            fs((64, 1600)), fs((C_HID, 384)), fs((C_HID, 1)),
            fs((768, 128)), fs((1, 128)),
        ],
        out_specs=fs((B, 128)),
        scratch_shapes=[
            pltpu.VMEM((384, B * 64), jnp.float32),   # shared in-kernel im2col buffer
            pltpu.VMEM((B, 768), jnp.float32),        # NCHW-flattened features for fc
        ],
        compiler_params=pltpu.CompilerParams(
            dimension_semantics=("arbitrary",),
            vmem_limit_bytes=32 * 1024 * 1024,
        ),
    )(cols1, prep["w1"], prep["b1"],
      prep["s2"], prep["w2"], prep["b2"],
      prep["s3"], prep["w3"], prep["b3"],
      prep["wfc"], prep["bfc"])
    return out[:, :100]


def init_params(key):
    ks = jax.random.split(key, 8)

    def u(k, shape, fan_in):             # PyTorch-style uniform(-1/sqrt(fan_in), ...)
        bound = 1.0 / (fan_in ** 0.5)
        return jax.random.uniform(k, shape, jnp.float32, -bound, bound)

    return {
        "w1": u(ks[0], (12, 3, 5, 5), 3 * 25),
        "b1": u(ks[1], (12,), 3 * 25),
        "w2": u(ks[2], (12, 12, 5, 5), 12 * 25),
        "b2": u(ks[3], (12,), 12 * 25),
        "w3": u(ks[4], (12, 12, 5, 5), 12 * 25),
        "b3": u(ks[5], (12,), 12 * 25),
        "wfc": u(ks[6], (100, 768), 768),
        "bfc": u(ks[7], (100,), 768),
    }


if __name__ == "__main__":
    key = jax.random.PRNGKey(0)
    kx, kp = jax.random.split(key)
    # Input must be 32x32 so the NCHW flatten yields 12*8*8 == 768 for Linear(768, 100).
    x = jax.random.normal(kx, (2, 3, 32, 32), jnp.float32)
    params = init_params(kp)
    prep = prepare_params(params)        # one-time weight re-packing / gather matrices
    fwd = jax.jit(net_forward)
    out = fwd(x, prep)
    jax.block_until_ready(out)
    assert out.shape == (2, 100) and out.dtype == jnp.float32
    print("KERNEL_OK")
</pallas_src>

<mosaic_0001>
module attributes {stable_mosaic.version = 11 : i64} {
  func.func @_fused_net_kernel(%arg0: i32, %arg1: memref<128x512xf32, #tpu.memory_space<vmem>>, %arg2: memref<12x128xf32, #tpu.memory_space<vmem>>, %arg3: memref<12x1xf32, #tpu.memory_space<vmem>>, %arg4: memref<256x1600xf32, #tpu.memory_space<vmem>>, %arg5: memref<12x384xf32, #tpu.memory_space<vmem>>, %arg6: memref<12x1xf32, #tpu.memory_space<vmem>>, %arg7: memref<64x1600xf32, #tpu.memory_space<vmem>>, %arg8: memref<12x384xf32, #tpu.memory_space<vmem>>, %arg9: memref<12x1xf32, #tpu.memory_space<vmem>>, %arg10: memref<768x128xf32, #tpu.memory_space<vmem>>, %arg11: memref<1x128xf32, #tpu.memory_space<vmem>>, %arg12: memref<2x128xf32, #tpu.memory_space<vmem>>, %arg13: memref<384x128xf32, #tpu.memory_space<vmem>>, %arg14: memref<2x768xf32, #tpu.memory_space<vmem>>) attributes {dimension_semantics = [#tpu.dimension_semantics<arbitrary>], iteration_bounds = array<i64: 1>, scalar_prefetch = 0 : i64, scratch_operands = 2 : i64, tpu.core_type = #tpu.core_type<tc>, window_params = [{pipeline_mode = #tpu.pipeline_mode<synchronous>, transform_indices = @transform_0, window_bounds = array<i64: 128, 512>}, {pipeline_mode = #tpu.pipeline_mode<synchronous>, transform_indices = @transform_1, window_bounds = array<i64: 12, 128>}, {pipeline_mode = #tpu.pipeline_mode<synchronous>, transform_indices = @transform_2, window_bounds = array<i64: 12, 1>}, {pipeline_mode = #tpu.pipeline_mode<synchronous>, transform_indices = @transform_3, window_bounds = array<i64: 256, 1600>}, {pipeline_mode = #tpu.pipeline_mode<synchronous>, transform_indices = @transform_4, window_bounds = array<i64: 12, 384>}, {pipeline_mode = #tpu.pipeline_mode<synchronous>, transform_indices = @transform_5, window_bounds = array<i64: 12, 1>}, {pipeline_mode = #tpu.pipeline_mode<synchronous>, transform_indices = @transform_6, window_bounds = array<i64: 64, 1600>}, {pipeline_mode = #tpu.pipeline_mode<synchronous>, transform_indices = @transform_7, window_bounds = array<i64: 12, 384>}, {pipeline_mode = #tpu.pipeline_mode<synchronous>, transform_indices = @transform_8, window_bounds = array<i64: 12, 1>}, {pipeline_mode = #tpu.pipeline_mode<synchronous>, transform_indices = @transform_9, window_bounds = array<i64: 768, 128>}, {pipeline_mode = #tpu.pipeline_mode<synchronous>, transform_indices = @transform_10, window_bounds = array<i64: 1, 128>}, {pipeline_mode = #tpu.pipeline_mode<synchronous>, transform_indices = @transform_11, window_bounds = array<i64: 2, 128>}]} {
    %c0 = arith.constant 0 : index
    %c0_0 = arith.constant 0 : index
    %0 = vector.load %arg2[%c0, %c0_0] : memref<12x128xf32, #tpu.memory_space<vmem>>, vector<12x128xf32>
    %c0_1 = arith.constant 0 : index
    %c0_2 = arith.constant 0 : index
    %1 = vector.load %arg1[%c0_1, %c0_2] : memref<128x512xf32, #tpu.memory_space<vmem>>, vector<128x512xf32>
    %cst = arith.constant dense<0.000000e+00> : vector<12x512xf32>
    %2 = tpu.matmul %0, %1, %cst {dimension_numbers = #tpu.dot_dimension_numbers<[1], [0], [0], [1], [0, 0, 1, 1], [], []>} : vector<12x128xf32>, vector<128x512xf32>, vector<12x512xf32> -> vector<12x512xf32>
    %c0_3 = arith.constant 0 : index
    %c0_4 = arith.constant 0 : index
    %3 = vector.load %arg3[%c0_3, %c0_4] : memref<12x1xf32, #tpu.memory_space<vmem>>, vector<12x1xf32>
    %4 = vector.broadcast %3 : vector<12x1xf32> to vector<12x512xf32>
    %5 = arith.addf %2, %4 : vector<12x512xf32>
    %cst_5 = arith.constant 0.000000e+00 : f32
    %6 = vector.broadcast %cst_5 : f32 to vector<12x512xf32>
    %7 = arith.subf %6, %5 : vector<12x512xf32>
    %8 = math.exp %7 : vector<12x512xf32>
    %cst_6 = arith.constant 1.000000e+00 : f32
    %9 = vector.broadcast %cst_6 : f32 to vector<12x512xf32>
    %10 = arith.addf %9, %8 : vector<12x512xf32>
    %cst_7 = arith.constant 1.000000e+00 : f32
    %11 = vector.broadcast %cst_7 : f32 to vector<12x512xf32>
    %12 = arith.divf %11, %10 : vector<12x512xf32>
    %cst_8 = arith.constant 0.000000e+00 : f32
    %13 = vector.broadcast %cst_8 : f32 to vector<384x128xf32>
    %c0_9 = arith.constant 0 : index
    %c0_10 = arith.constant 0 : index
    %14 = vector.load %arg13[%c0_9, %c0_10] : memref<384x128xf32, #tpu.memory_space<vmem>>, vector<384x128xf32>
    tpu.vector_store %arg13[%c0_9, %c0_10], %13 {strides = array<i32>} : memref<384x128xf32, #tpu.memory_space<vmem>>, vector<384x128xf32>,
    %15 = vector.extract_strided_slice %12 {offsets = [0, 0], sizes = [12, 256], strides = [1, 1]} : vector<12x512xf32> to vector<12x256xf32>
    %c0_11 = arith.constant 0 : index
    %c0_12 = arith.constant 0 : index
    %16 = vector.load %arg4[%c0_11, %c0_12] : memref<256x1600xf32, #tpu.memory_space<vmem>>, vector<256x1600xf32>
    %cst_13 = arith.constant dense<0.000000e+00> : vector<12x1600xf32>
    %17 = tpu.matmul %15, %16, %cst_13 {dimension_numbers = #tpu.dot_dimension_numbers<[1], [0], [0], [1], [0, 0, 1, 1], [], []>} : vector<12x256xf32>, vector<256x1600xf32>, vector<12x1600xf32> -> vector<12x1600xf32>
    %18 = vector.extract_strided_slice %17 {offsets = [0, 0], sizes = [12, 64], strides = [1, 1]} : vector<12x1600xf32> to vector<12x64xf32>
    %c0_14 = arith.constant 0 : index
    %c0_15 = arith.constant 0 : index
    %19 = vector.load %arg13[%c0_14, %c0_15] : memref<384x128xf32, #tpu.memory_space<vmem>>, vector<12x64xf32>
    tpu.vector_store %arg13[%c0_14, %c0_15], %18 {strides = array<i32>} : memref<384x128xf32, #tpu.memory_space<vmem>>, vector<12x64xf32>,
    %20 = vector.extract_strided_slice %17 {offsets = [0, 64], sizes = [12, 64], strides = [1, 1]} : vector<12x1600xf32> to vector<12x64xf32>
    %c12 = arith.constant 12 : index
    %c0_16 = arith.constant 0 : index
    %21 = vector.load %arg13[%c12, %c0_16] : memref<384x128xf32, #tpu.memory_space<vmem>>, vector<12x64xf32>
    tpu.vector_store %arg13[%c12, %c0_16], %20 {strides = array<i32>} : memref<384x128xf32, #tpu.memory_space<vmem>>, vector<12x64xf32>,
    %22 = vector.extract_strided_slice %17 {offsets = [0, 128], sizes = [12, 64], strides = [1, 1]} : vector<12x1600xf32> to vector<12x64xf32>
    %c24 = arith.constant 24 : index
    %c0_17 = arith.constant 0 : index
    %23 = vector.load %arg13[%c24, %c0_17] : memref<384x128xf32, #tpu.memory_space<vmem>>, vector<12x64xf32>
    tpu.vector_store %arg13[%c24, %c0_17], %22 {strides = array<i32>} : memref<384x128xf32, #tpu.memory_space<vmem>>, vector<12x64xf32>,
    %24 = vector.extract_strided_slice %17 {offsets = [0, 192], sizes = [12, 64], strides = [1, 1]} : vector<12x1600xf32> to vector<12x64xf32>
    %c36 = arith.constant 36 : index
    %c0_18 = arith.constant 0 : index
    %25 = vector.load %arg13[%c36, %c0_18] : memref<384x128xf32, #tpu.memory_space<vmem>>, vector<12x64xf32>
    tpu.vector_store %arg13[%c36, %c0_18], %24 {strides = array<i32>} : memref<384x128xf32, #tpu.memory_space<vmem>>, vector<12x64xf32>,
    %26 = vector.extract_strided_slice %17 {offsets = [0, 256], sizes = [12, 64], strides = [1, 1]} : vector<12x1600xf32> to vector<12x64xf32>
    %c48 = arith.constant 48 : index
    %c0_19 = arith.constant 0 : index
    %27 = vector.load %arg13[%c48, %c0_19] : memref<384x128xf32, #tpu.memory_space<vmem>>, vector<12x64xf32>
    tpu.vector_store %arg13[%c48, %c0_19], %26 {strides = array<i32>} : memref<384x128xf32, #tpu.memory_space<vmem>>, vector<12x64xf32>,
    %28 = vector.extract_strided_slice %17 {offsets = [0, 320], sizes = [12, 64], strides = [1, 1]} : vector<12x1600xf32> to vector<12x64xf32>
    %c60 = arith.constant 60 : index
    %c0_20 = arith.constant 0 : index
    %29 = vector.load %arg13[%c60, %c0_20] : memref<384x128xf32, #tpu.memory_space<vmem>>, vector<12x64xf32>
    tpu.vector_store %arg13[%c60, %c0_20], %28 {strides = array<i32>} : memref<384x128xf32, #tpu.memory_space<vmem>>, vector<12x64xf32>,
    %30 = vector.extract_strided_slice %17 {offsets = [0, 384], sizes = [12, 64], strides = [1, 1]} : vector<12x1600xf32> to vector<12x64xf32>
    %c72 = arith.constant 72 : index
    %c0_21 = arith.constant 0 : index
    %31 = vector.load %arg13[%c72, %c0_21] : memref<384x128xf32, #tpu.memory_space<vmem>>, vector<12x64xf32>
    tpu.vector_store %arg13[%c72, %c0_21], %30 {strides = array<i32>} : memref<384x128xf32, #tpu.memory_space<vmem>>, vector<12x64xf32>,
    %32 = vector.extract_strided_slice %17 {offsets = [0, 448], sizes = [12, 64], strides = [1, 1]} : vector<12x1600xf32> to vector<12x64xf32>
    %c84 = arith.constant 84 : index
    %c0_22 = arith.constant 0 : index
    %33 = vector.load %arg13[%c84, %c0_22] : memref<384x128xf32, #tpu.memory_space<vmem>>, vector<12x64xf32>
    tpu.vector_store %arg13[%c84, %c0_22], %32 {strides = array<i32>} : memref<384x128xf32, #tpu.memory_space<vmem>>, vector<12x64xf32>,
    %34 = vector.extract_strided_slice %17 {offsets = [0, 512], sizes = [12, 64], strides = [1, 1]} : vector<12x1600xf32> to vector<12x64xf32>
    %c96 = arith.constant 96 : index
    %c0_23 = arith.constant 0 : index
    %35 = vector.load %arg13[%c96, %c0_23] : memref<384x128xf32, #tpu.memory_space<vmem>>, vector<12x64xf32>
    tpu.vector_store %arg13[%c96, %c0_23], %34 {strides = array<i32>} : memref<384x128xf32, #tpu.memory_space<vmem>>, vector<12x64xf32>,
    %36 = vector.extract_strided_slice %17 {offsets = [0, 576], sizes = [12, 64], strides = [1, 1]} : vector<12x1600xf32> to vector<12x64xf32>
    %c108 = arith.constant 108 : index
    %c0_24 = arith.constant 0 : index
    %37 = vector.load %arg13[%c108, %c0_24] : memref<384x128xf32, #tpu.memory_space<vmem>>, vector<12x64xf32>
    tpu.vector_store %arg13[%c108, %c0_24], %36 {strides = array<i32>} : memref<384x128xf32, #tpu.memory_space<vmem>>, vector<12x64xf32>,
    %38 = vector.extract_strided_slice %17 {offsets = [0, 640], sizes = [12, 64], strides = [1, 1]} : vector<12x1600xf32> to vector<12x64xf32>
    %c120 = arith.constant 120 : index
    %c0_25 = arith.constant 0 : index
    %39 = vector.load %arg13[%c120, %c0_25] : memref<384x128xf32, #tpu.memory_space<vmem>>, vector<12x64xf32>
    tpu.vector_store %arg13[%c120, %c0_25], %38 {strides = array<i32>} : memref<384x128xf32, #tpu.memory_space<vmem>>, vector<12x64xf32>,
    %40 = vector.extract_strided_slice %17 {offsets = [0, 704], sizes = [12, 64], strides = [1, 1]} : vector<12x1600xf32> to vector<12x64xf32>
    %c132 = arith.constant 132 : index
    %c0_26 = arith.constant 0 : index
    %41 = vector.load %arg13[%c132, %c0_26] : memref<384x128xf32, #tpu.memory_space<vmem>>, vector<12x64xf32>
    tpu.vector_store %arg13[%c132, %c0_26], %40 {strides = array<i32>} : memref<384x128xf32, #tpu.memory_space<vmem>>, vector<12x64xf32>,
    %42 = vector.extract_strided_slice %17 {offsets = [0, 768], sizes = [12, 64], strides = [1, 1]} : vector<12x1600xf32> to vector<12x64xf32>
    %c144 = arith.constant 144 : index
    %c0_27 = arith.constant 0 : index
    %43 = vector.load %arg13[%c144, %c0_27] : memref<384x128xf32, #tpu.memory_space<vmem>>, vector<12x64xf32>
    tpu.vector_store %arg13[%c144, %c0_27], %42 {strides = array<i32>} : memref<384x128xf32, #tpu.memory_space<vmem>>, vector<12x64xf32>,
    %44 = vector.extract_strided_slice %17 {offsets = [0, 832], sizes = [12, 64], strides = [1, 1]} : vector<12x1600xf32> to vector<12x64xf32>
    %c156 = arith.constant 156 : index
    %c0_28 = arith.constant 0 : index
    %45 = vector.load %arg13[%c156, %c0_28] : memref<384x128xf32, #tpu.memory_space<vmem>>, vector<12x64xf32>
    tpu.vector_store %arg13[%c156, %c0_28], %44 {strides = array<i32>} : memref<384x128xf32, #tpu.memory_space<vmem>>, vector<12x64xf32>,
    %46 = vector.extract_strided_slice %17 {offsets = [0, 896], sizes = [12, 64], strides = [1, 1]} : vector<12x1600xf32> to vector<12x64xf32>
    %c168 = arith.constant 168 : index
    %c0_29 = arith.constant 0 : index
    %47 = vector.load %arg13[%c168, %c0_29] : memref<384x128xf32, #tpu.memory_space<vmem>>, vector<12x64xf32>
    tpu.vector_store %arg13[%c168, %c0_29], %46 {strides = array<i32>} : memref<384x128xf32, #tpu.memory_space<vmem>>, vector<12x64xf32>,
    %48 = vector.extract_strided_slice %17 {offsets = [0, 960], sizes = [12, 64], strides = [1, 1]} : vector<12x1600xf32> to vector<12x64xf32>
    %c180 = arith.constant 180 : index
    %c0_30 = arith.constant 0 : index
    %49 = vector.load %arg13[%c180, %c0_30] : memref<384x128xf32, #tpu.memory_space<vmem>>, vector<12x64xf32>
    tpu.vector_store %arg13[%c180, %c0_30], %48 {strides = array<i32>} : memref<384x128xf32, #tpu.memory_space<vmem>>, vector<12x64xf32>,
    %50 = vector.extract_strided_slice %17 {offsets = [0, 1024], sizes = [12, 64], strides = [1, 1]} : vector<12x1600xf32> to vector<12x64xf32>
    %c192 = arith.constant 192 : index
    %c0_31 = arith.constant 0 : index
    %51 = vector.load %arg13[%c192, %c0_31] : memref<384x128xf32, #tpu.memory_space<vmem>>, vector<12x64xf32>
    tpu.vector_store %arg13[%c192, %c0_31], %50 {strides = array<i32>} : memref<384x128xf32, #tpu.memory_space<vmem>>, vector<12x64xf32>,
    %52 = vector.extract_strided_slice %17 {offsets = [0, 1088], sizes = [12, 64], strides = [1, 1]} : vector<12x1600xf32> to vector<12x64xf32>
    %c204 = arith.constant 204 : index
    %c0_32 = arith.constant 0 : index
    %53 = vector.load %arg13[%c204, %c0_32] : memref<384x128xf32, #tpu.memory_space<vmem>>, vector<12x64xf32>
    tpu.vector_store %arg13[%c204, %c0_32], %52 {strides = array<i32>} : memref<384x128xf32, #tpu.memory_space<vmem>>, vector<12x64xf32>,
    %54 = vector.extract_strided_slice %17 {offsets = [0, 1152], sizes = [12, 64], strides = [1, 1]} : vector<12x1600xf32> to vector<12x64xf32>
    %c216 = arith.constant 216 : index
    %c0_33 = arith.constant 0 : index
    %55 = vector.load %arg13[%c216, %c0_33] : memref<384x128xf32, #tpu.memory_space<vmem>>, vector<12x64xf32>
    tpu.vector_store %arg13[%c216, %c0_33], %54 {strides = array<i32>} : memref<384x128xf32, #tpu.memory_space<vmem>>, vector<12x64xf32>,
    %56 = vector.extract_strided_slice %17 {offsets = [0, 1216], sizes = [12, 64], strides = [1, 1]} : vector<12x1600xf32> to vector<12x64xf32>
    %c228 = arith.constant 228 : index
    %c0_34 = arith.constant 0 : index
    %57 = vector.load %arg13[%c228, %c0_34] : memref<384x128xf32, #tpu.memory_space<vmem>>, vector<12x64xf32>
    tpu.vector_store %arg13[%c228, %c0_34], %56 {strides = array<i32>} : memref<384x128xf32, #tpu.memory_space<vmem>>, vector<12x64xf32>,
    %58 = vector.extract_strided_slice %17 {offsets = [0, 1280], sizes = [12, 64], strides = [1, 1]} : vector<12x1600xf32> to vector<12x64xf32>
    %c240 = arith.constant 240 : index
    %c0_35 = arith.constant 0 : index
    %59 = vector.load %arg13[%c240, %c0_35] : memref<384x128xf32, #tpu.memory_space<vmem>>, vector<12x64xf32>
    tpu.vector_store %arg13[%c240, %c0_35], %58 {strides = array<i32>} : memref<384x128xf32, #tpu.memory_space<vmem>>, vector<12x64xf32>,
    %60 = vector.extract_strided_slice %17 {offsets = [0, 1344], sizes = [12, 64], strides = [1, 1]} : vector<12x1600xf32> to vector<12x64xf32>
    %c252 = arith.constant 252 : index
    %c0_36 = arith.constant 0 : index
    %61 = vector.load %arg13[%c252, %c0_36] : memref<384x128xf32, #tpu.memory_space<vmem>>, vector<12x64xf32>
    tpu.vector_store %arg13[%c252, %c0_36], %60 {strides = array<i32>} : memref<384x128xf32, #tpu.memory_space<vmem>>, vector<12x64xf32>,
    %62 = vector.extract_strided_slice %17 {offsets = [0, 1408], sizes = [12, 64], strides = [1, 1]} : vector<12x1600xf32> to vector<12x64xf32>
    %c264 = arith.constant 264 : index
    %c0_37 = arith.constant 0 : index
    %63 = vector.load %arg13[%c264, %c0_37] : memref<384x128xf32, #tpu.memory_space<vmem>>, vector<12x64xf32>
    tpu.vector_store %arg13[%c264, %c0_37], %62 {strides = array<i32>} : memref<384x128xf32, #tpu.memory_space<vmem>>, vector<12x64xf32>,
    %64 = vector.extract_strided_slice %17 {offsets = [0, 1472], sizes = [12, 64], strides = [1, 1]} : vector<12x1600xf32> to vector<12x64xf32>
    %c276 = arith.constant 276 : index
    %c0_38 = arith.constant 0 : index
    %65 = vector.load %arg13[%c276, %c0_38] : memref<384x128xf32, #tpu.memory_space<vmem>>, vector<12x64xf32>
    tpu.vector_store %arg13[%c276, %c0_38], %64 {strides = array<i32>} : memref<384x128xf32, #tpu.memory_space<vmem>>, vector<12x64xf32>,
    %66 = vector.extract_strided_slice %17 {offsets = [0, 1536], sizes = [12, 64], strides = [1, 1]} : vector<12x1600xf32> to vector<12x64xf32>
    %c288 = arith.constant 288 : index
    %c0_39 = arith.constant 0 : index
    %67 = vector.load %arg13[%c288, %c0_39] : memref<384x128xf32, #tpu.memory_space<vmem>>, vector<12x64xf32>
    tpu.vector_store %arg13[%c288, %c0_39], %66 {strides = array<i32>} : memref<384x128xf32, #tpu.memory_space<vmem>>, vector<12x64xf32>,
    %68 = vector.extract_strided_slice %12 {offsets = [0, 256], sizes = [12, 256], strides = [1, 1]} : vector<12x512xf32> to vector<12x256xf32>
    %c0_40 = arith.constant 0 : index
    %c0_41 = arith.constant 0 : index
    %69 = vector.load %arg4[%c0_40, %c0_41] : memref<256x1600xf32, #tpu.memory_space<vmem>>, vector<256x1600xf32>
    %cst_42 = arith.constant dense<0.000000e+00> : vector<12x1600xf32>
    %70 = tpu.matmul %68, %69, %cst_42 {dimension_numbers = #tpu.dot_dimension_numbers<[1], [0], [0], [1], [0, 0, 1, 1], [], []>} : vector<12x256xf32>, vector<256x1600xf32>, vector<12x1600xf32> -> vector<12x1600xf32>
    %71 = vector.extract_strided_slice %70 {offsets = [0, 0], sizes = [12, 64], strides = [1, 1]} : vector<12x1600xf32> to vector<12x64xf32>
    %c0_43 = arith.constant 0 : index
    %c64 = arith.constant 64 : index
    %72 = vector.load %arg13[%c0_43, %c64] : memref<384x128xf32, #tpu.memory_space<vmem>>, vector<12x64xf32>
    tpu.vector_store %arg13[%c0_43, %c64], %71 {strides = array<i32>} : memref<384x128xf32, #tpu.memory_space<vmem>>, vector<12x64xf32>,
    %73 = vector.extract_strided_slice %70 {offsets = [0, 64], sizes = [12, 64], strides = [1, 1]} : vector<12x1600xf32> to vector<12x64xf32>
    %c12_44 = arith.constant 12 : index
    %c64_45 = arith.constant 64 : index
    %74 = vector.load %arg13[%c12_44, %c64_45] : memref<384x128xf32, #tpu.memory_space<vmem>>, vector<12x64xf32>
    tpu.vector_store %arg13[%c12_44, %c64_45], %73 {strides = array<i32>} : memref<384x128xf32, #tpu.memory_space<vmem>>, vector<12x64xf32>,
    %75 = vector.extract_strided_slice %70 {offsets = [0, 128], sizes = [12, 64], strides = [1, 1]} : vector<12x1600xf32> to vector<12x64xf32>
    %c24_46 = arith.constant 24 : index
    %c64_47 = arith.constant 64 : index
    %76 = vector.load %arg13[%c24_46, %c64_47] : memref<384x128xf32, #tpu.memory_space<vmem>>, vector<12x64xf32>
    tpu.vector_store %arg13[%c24_46, %c64_47], %75 {strides = array<i32>} : memref<384x128xf32, #tpu.memory_space<vmem>>, vector<12x64xf32>,
    %77 = vector.extract_strided_slice %70 {offsets = [0, 192], sizes = [12, 64], strides = [1, 1]} : vector<12x1600xf32> to vector<12x64xf32>
    %c36_48 = arith.constant 36 : index
    %c64_49 = arith.constant 64 : index
    %78 = vector.load %arg13[%c36_48, %c64_49] : memref<384x128xf32, #tpu.memory_space<vmem>>, vector<12x64xf32>
    tpu.vector_store %arg13[%c36_48, %c64_49], %77 {strides = array<i32>} : memref<384x128xf32, #tpu.memory_space<vmem>>, vector<12x64xf32>,
    %79 = vector.extract_strided_slice %70 {offsets = [0, 256], sizes = [12, 64], strides = [1, 1]} : vector<12x1600xf32> to vector<12x64xf32>
    %c48_50 = arith.constant 48 : index
    %c64_51 = arith.constant 64 : index
    %80 = vector.load %arg13[%c48_50, %c64_51] : memref<384x128xf32, #tpu.memory_space<vmem>>, vector<12x64xf32>
    tpu.vector_store %arg13[%c48_50, %c64_51], %79 {strides = array<i32>} : memref<384x128xf32, #tpu.memory_space<vmem>>, vector<12x64xf32>,
    %81 = vector.extract_strided_slice %70 {offsets = [0, 320], sizes = [12, 64], strides = [1, 1]} : vector<12x1600xf32> to vector<12x64xf32>
    %c60_52 = arith.constant 60 : index
    %c64_53 = arith.constant 64 : index
    %82 = vector.load %arg13[%c60_52, %c64_53] : memref<384x128xf32, #tpu.memory_space<vmem>>, vector<12x64xf32>
    tpu.vector_store %arg13[%c60_52, %c64_53], %81 {strides = array<i32>} : memref<384x128xf32, #tpu.memory_space<vmem>>, vector<12x64xf32>,
    %83 = vector.extract_strided_slice %70 {offsets = [0, 384], sizes = [12, 64], strides = [1, 1]} : vector<12x1600xf32> to vector<12x64xf32>
    %c72_54 = arith.constant 72 : index
    %c64_55 = arith.constant 64 : index
    %84 = vector.load %arg13[%c72_54, %c64_55] : memref<384x128xf32, #tpu.memory_space<vmem>>, vector<12x64xf32>
    tpu.vector_store %arg13[%c72_54, %c64_55], %83 {strides = array<i32>} : memref<384x128xf32, #tpu.memory_space<vmem>>, vector<12x64xf32>,
    %85 = vector.extract_strided_slice %70 {offsets = [0, 448], sizes = [12, 64], strides = [1, 1]} : vector<12x1600xf32> to vector<12x64xf32>
    %c84_56 = arith.constant 84 : index
    %c64_57 = arith.constant 64 : index
    %86 = vector.load %arg13[%c84_56, %c64_57] : memref<384x128xf32, #tpu.memory_space<vmem>>, vector<12x64xf32>
    tpu.vector_store %arg13[%c84_56, %c64_57], %85 {strides = array<i32>} : memref<384x128xf32, #tpu.memory_space<vmem>>, vector<12x64xf32>,
    %87 = vector.extract_strided_slice %70 {offsets = [0, 512], sizes = [12, 64], strides = [1, 1]} : vector<12x1600xf32> to vector<12x64xf32>
    %c96_58 = arith.constant 96 : index
    %c64_59 = arith.constant 64 : index
    %88 = vector.load %arg13[%c96_58, %c64_59] : memref<384x128xf32, #tpu.memory_space<vmem>>, vector<12x64xf32>
    tpu.vector_store %arg13[%c96_58, %c64_59], %87 {strides = array<i32>} : memref<384x128xf32, #tpu.memory_space<vmem>>, vector<12x64xf32>,
    %89 = vector.extract_strided_slice %70 {offsets = [0, 576], sizes = [12, 64], strides = [1, 1]} : vector<12x1600xf32> to vector<12x64xf32>
    %c108_60 = arith.constant 108 : index
    %c64_61 = arith.constant 64 : index
    %90 = vector.load %arg13[%c108_60, %c64_61] : memref<384x128xf32, #tpu.memory_space<vmem>>, vector<12x64xf32>
    tpu.vector_store %arg13[%c108_60, %c64_61], %89 {strides = array<i32>} : memref<384x128xf32, #tpu.memory_space<vmem>>, vector<12x64xf32>,
    %91 = vector.extract_strided_slice %70 {offsets = [0, 640], sizes = [12, 64], strides = [1, 1]} : vector<12x1600xf32> to vector<12x64xf32>
    %c120_62 = arith.constant 120 : index
    %c64_63 = arith.constant 64 : index
    %92 = vector.load %arg13[%c120_62, %c64_63] : memref<384x128xf32, #tpu.memory_space<vmem>>, vector<12x64xf32>
    tpu.vector_store %arg13[%c120_62, %c64_63], %91 {strides = array<i32>} : memref<384x128xf32, #tpu.memory_space<vmem>>, vector<12x64xf32>,
    %93 = vector.extract_strided_slice %70 {offsets = [0, 704], sizes = [12, 64], strides = [1, 1]} : vector<12x1600xf32> to vector<12x64xf32>
    %c132_64 = arith.constant 132 : index
    %c64_65 = arith.constant 64 : index
    %94 = vector.load %arg13[%c132_64, %c64_65] : memref<384x128xf32, #tpu.memory_space<vmem>>, vector<12x64xf32>
    tpu.vector_store %arg13[%c132_64, %c64_65], %93 {strides = array<i32>} : memref<384x128xf32, #tpu.memory_space<vmem>>, vector<12x64xf32>,
    %95 = vector.extract_strided_slice %70 {offsets = [0, 768], sizes = [12, 64], strides = [1, 1]} : vector<12x1600xf32> to vector<12x64xf32>
    %c144_66 = arith.constant 144 : index
    %c64_67 = arith.constant 64 : index
    %96 = vector.load %arg13[%c144_66, %c64_67] : memref<384x128xf32, #tpu.memory_space<vmem>>, vector<12x64xf32>
    tpu.vector_store %arg13[%c144_66, %c64_67], %95 {strides = array<i32>} : memref<384x128xf32, #tpu.memory_space<vmem>>, vector<12x64xf32>,
    %97 = vector.extract_strided_slice %70 {offsets = [0, 832], sizes = [12, 64], strides = [1, 1]} : vector<12x1600xf32> to vector<12x64xf32>
    %c156_68 = arith.constant 156 : index
    %c64_69 = arith.constant 64 : index
    %98 = vector.load %arg13[%c156_68, %c64_69] : memref<384x128xf32, #tpu.memory_space<vmem>>, vector<12x64xf32>
    tpu.vector_store %arg13[%c156_68, %c64_69], %97 {strides = array<i32>} : memref<384x128xf32, #tpu.memory_space<vmem>>, vector<12x64xf32>,
    %99 = vector.extract_strided_slice %70 {offsets = [0, 896], sizes = [12, 64], strides = [1, 1]} : vector<12x1600xf32> to vector<12x64xf32>
    %c168_70 = arith.constant 168 : index
    %c64_71 = arith.constant 64 : index
    %100 = vector.load %arg13[%c168_70, %c64_71] : memref<384x128xf32, #tpu.memory_space<vmem>>, vector<12x64xf32>
    tpu.vector_store %arg13[%c168_70, %c64_71], %99 {strides = array<i32>} : memref<384x128xf32, #tpu.memory_space<vmem>>, vector<12x64xf32>,
    %101 = vector.extract_strided_slice %70 {offsets = [0, 960], sizes = [12, 64], strides = [1, 1]} : vector<12x1600xf32> to vector<12x64xf32>
    %c180_72 = arith.constant 180 : index
    %c64_73 = arith.constant 64 : index
    %102 = vector.load %arg13[%c180_72, %c64_73] : memref<384x128xf32, #tpu.memory_space<vmem>>, vector<12x64xf32>
    tpu.vector_store %arg13[%c180_72, %c64_73], %101 {strides = array<i32>} : memref<384x128xf32, #tpu.memory_space<vmem>>, vector<12x64xf32>,
    %103 = vector.extract_strided_slice %70 {offsets = [0, 1024], sizes = [12, 64], strides = [1, 1]} : vector<12x1600xf32> to vector<12x64xf32>
    %c192_74 = arith.constant 192 : index
    %c64_75 = arith.constant 64 : index
    %104 = vector.load %arg13[%c192_74, %c64_75] : memref<384x128xf32, #tpu.memory_space<vmem>>, vector<12x64xf32>
    tpu.vector_store %arg13[%c192_74, %c64_75], %103 {strides = array<i32>} : memref<384x128xf32, #tpu.memory_space<vmem>>, vector<12x64xf32>,
    %105 = vector.extract_strided_slice %70 {offsets = [0, 1088], sizes = [12, 64], strides = [1, 1]} : vector<12x1600xf32> to vector<12x64xf32>
    %c204_76 = arith.constant 204 : index
    %c64_77 = arith.constant 64 : index
    %106 = vector.load %arg13[%c204_76, %c64_77] : memref<384x128xf32, #tpu.memory_space<vmem>>, vector<12x64xf32>
    tpu.vector_store %arg13[%c204_76, %c64_77], %105 {strides = array<i32>} : memref<384x128xf32, #tpu.memory_space<vmem>>, vector<12x64xf32>,
    %107 = vector.extract_strided_slice %70 {offsets = [0, 1152], sizes = [12, 64], strides = [1, 1]} : vector<12x1600xf32> to vector<12x64xf32>
    %c216_78 = arith.constant 216 : index
    %c64_79 = arith.constant 64 : index
    %108 = vector.load %arg13[%c216_78, %c64_79] : memref<384x128xf32, #tpu.memory_space<vmem>>, vector<12x64xf32>
    tpu.vector_store %arg13[%c216_78, %c64_79], %107 {strides = array<i32>} : memref<384x128xf32, #tpu.memory_space<vmem>>, vector<12x64xf32>,
    %109 = vector.extract_strided_slice %70 {offsets = [0, 1216], sizes = [12, 64], strides = [1, 1]} : vector<12x1600xf32> to vector<12x64xf32>
    %c228_80 = arith.constant 228 : index
    %c64_81 = arith.constant 64 : index
    %110 = vector.load %arg13[%c228_80, %c64_81] : memref<384x128xf32, #tpu.memory_space<vmem>>, vector<12x64xf32>
    tpu.vector_store %arg13[%c228_80, %c64_81], %109 {strides = array<i32>} : memref<384x128xf32, #tpu.memory_space<vmem>>, vector<12x64xf32>,
    %111 = vector.extract_strided_slice %70 {offsets = [0, 1280], sizes = [12, 64], strides = [1, 1]} : vector<12x1600xf32> to vector<12x64xf32>
    %c240_82 = arith.constant 240 : index
    %c64_83 = arith.constant 64 : index
    %112 = vector.load %arg13[%c240_82, %c64_83] : memref<384x128xf32, #tpu.memory_space<vmem>>, vector<12x64xf32>
    tpu.vector_store %arg13[%c240_82, %c64_83], %111 {strides = array<i32>} : memref<384x128xf32, #tpu.memory_space<vmem>>, vector<12x64xf32>,
    %113 = vector.extract_strided_slice %70 {offsets = [0, 1344], sizes = [12, 64], strides = [1, 1]} : vector<12x1600xf32> to vector<12x64xf32>
    %c252_84 = arith.constant 252 : index
    %c64_85 = arith.constant 64 : index
    %114 = vector.load %arg13[%c252_84, %c64_85] : memref<384x128xf32, #tpu.memory_space<vmem>>, vector<12x64xf32>
    tpu.vector_store %arg13[%c252_84, %c64_85], %113 {strides = array<i32>} : memref<384x128xf32, #tpu.memory_space<vmem>>, vector<12x64xf32>,
    %115 = vector.extract_strided_slice %70 {offsets = [0, 1408], sizes = [12, 64], strides = [1, 1]} : vector<12x1600xf32> to vector<12x64xf32>
    %c264_86 = arith.constant 264 : index
    %c64_87 = arith.constant 64 : index
    %116 = vector.load %arg13[%c264_86, %c64_87] : memref<384x128xf32, #tpu.memory_space<vmem>>, vector<12x64xf32>
    tpu.vector_store %arg13[%c264_86, %c64_87], %115 {strides = array<i32>} : memref<384x128xf32, #tpu.memory_space<vmem>>, vector<12x64xf32>,
    %117 = vector.extract_strided_slice %70 {offsets = [0, 1472], sizes = [12, 64], strides = [1, 1]} : vector<12x1600xf32> to vector<12x64xf32>
    %c276_88 = arith.constant 276 : index
    %c64_89 = arith.constant 64 : index
    %118 = vector.load %arg13[%c276_88, %c64_89] : memref<384x128xf32, #tpu.memory_space<vmem>>, vector<12x64xf32>
    tpu.vector_store %arg13[%c276_88, %c64_89], %117 {strides = array<i32>} : memref<384x128xf32, #tpu.memory_space<vmem>>, vector<12x64xf32>,
    %119 = vector.extract_strided_slice %70 {offsets = [0, 1536], sizes = [12, 64], strides = [1, 1]} : vector<12x1600xf32> to vector<12x64xf32>
    %c288_90 = arith.constant 288 : index
    %c64_91 = arith.constant 64 : index
    %120 = vector.load %arg13[%c288_90, %c64_91] : memref<384x128xf32, #tpu.memory_space<vmem>>, vector<12x64xf32>
    tpu.vector_store %arg13[%c288_90, %c64_91], %119 {strides = array<i32>} : memref<384x128xf32, #tpu.memory_space<vmem>>, vector<12x64xf32>,
    %c0_92 = arith.constant 0 : index
    %c0_93 = arith.constant 0 : index
    %121 = vector.load %arg5[%c0_92, %c0_93] : memref<12x384xf32, #tpu.memory_space<vmem>>, vector<12x384xf32>
    %c0_94 = arith.constant 0 : index
    %c0_95 = arith.constant 0 : index
    %122 = vector.load %arg13[%c0_94, %c0_95] : memref<384x128xf32, #tpu.memory_space<vmem>>, vector<384x128xf32>
    %cst_96 = arith.constant dense<0.000000e+00> : vector<12x128xf32>
    %123 = tpu.matmul %121, %122, %cst_96 {dimension_numbers = #tpu.dot_dimension_numbers<[1], [0], [0], [1], [0, 0, 1, 1], [], []>} : vector<12x384xf32>, vector<384x128xf32>, vector<12x128xf32> -> vector<12x128xf32>
    %c0_97 = arith.constant 0 : index
    %c0_98 = arith.constant 0 : index
    %124 = vector.load %arg6[%c0_97, %c0_98] : memref<12x1xf32, #tpu.memory_space<vmem>>, vector<12x1xf32>
    %125 = vector.broadcast %124 : vector<12x1xf32> to vector<12x128xf32>
    %126 = arith.addf %123, %125 : vector<12x128xf32>
    %cst_99 = arith.constant 0.000000e+00 : f32
    %127 = vector.broadcast %cst_99 : f32 to vector<12x128xf32>
    %128 = arith.subf %127, %126 : vector<12x128xf32>
    %129 = math.exp %128 : vector<12x128xf32>
    %cst_100 = arith.constant 1.000000e+00 : f32
    %130 = vector.broadcast %cst_100 : f32 to vector<12x128xf32>
    %131 = arith.addf %130, %129 : vector<12x128xf32>
    %cst_101 = arith.constant 1.000000e+00 : f32
    %132 = vector.broadcast %cst_101 : f32 to vector<12x128xf32>
    %133 = arith.divf %132, %131 : vector<12x128xf32>
    %134 = vector.extract_strided_slice %133 {offsets = [0, 0], sizes = [12, 64], strides = [1, 1]} : vector<12x128xf32> to vector<12x64xf32>
    %c0_102 = arith.constant 0 : index
    %c0_103 = arith.constant 0 : index
    %135 = vector.load %arg7[%c0_102, %c0_103] : memref<64x1600xf32, #tpu.memory_space<vmem>>, vector<64x1600xf32>
    %cst_104 = arith.constant dense<0.000000e+00> : vector<12x1600xf32>
    %136 = tpu.matmul %134, %135, %cst_104 {dimension_numbers = #tpu.dot_dimension_numbers<[1], [0], [0], [1], [0, 0, 1, 1], [], []>} : vector<12x64xf32>, vector<64x1600xf32>, vector<12x1600xf32> -> vector<12x1600xf32>
    %137 = vector.extract_strided_slice %136 {offsets = [0, 0], sizes = [12, 64], strides = [1, 1]} : vector<12x1600xf32> to vector<12x64xf32>
    %c0_105 = arith.constant 0 : index
    %c0_106 = arith.constant 0 : index
    %138 = vector.load %arg13[%c0_105, %c0_106] : memref<384x128xf32, #tpu.memory_space<vmem>>, vector<12x64xf32>
    tpu.vector_store %arg13[%c0_105, %c0_106], %137 {strides = array<i32>} : memref<384x128xf32, #tpu.memory_space<vmem>>, vector<12x64xf32>,
    %139 = vector.extract_strided_slice %136 {offsets = [0, 64], sizes = [12, 64], strides = [1, 1]} : vector<12x1600xf32> to vector<12x64xf32>
    %c12_107 = arith.constant 12 : index
    %c0_108 = arith.constant 0 : index
    %140 = vector.load %arg13[%c12_107, %c0_108] : memref<384x128xf32, #tpu.memory_space<vmem>>, vector<12x64xf32>
    tpu.vector_store %arg13[%c12_107, %c0_108], %139 {strides = array<i32>} : memref<384x128xf32, #tpu.memory_space<vmem>>, vector<12x64xf32>,
    %141 = vector.extract_strided_slice %136 {offsets = [0, 128], sizes = [12, 64], strides = [1, 1]} : vector<12x1600xf32> to vector<12x64xf32>
    %c24_109 = arith.constant 24 : index
    %c0_110 = arith.constant 0 : index
    %142 = vector.load %arg13[%c24_109, %c0_110] : memref<384x128xf32, #tpu.memory_space<vmem>>, vector<12x64xf32>
    tpu.vector_store %arg13[%c24_109, %c0_110], %141 {strides = array<i32>} : memref<384x128xf32, #tpu.memory_space<vmem>>, vector<12x64xf32>,
    %143 = vector.extract_strided_slice %136 {offsets = [0, 192], sizes = [12, 64], strides = [1, 1]} : vector<12x1600xf32> to vector<12x64xf32>
    %c36_111 = arith.constant 36 : index
    %c0_112 = arith.constant 0 : index
    %144 = vector.load %arg13[%c36_111, %c0_112] : memref<384x128xf32, #tpu.memory_space<vmem>>, vector<12x64xf32>
    tpu.vector_store %arg13[%c36_111, %c0_112], %143 {strides = array<i32>} : memref<384x128xf32, #tpu.memory_space<vmem>>, vector<12x64xf32>,
    %145 = vector.extract_strided_slice %136 {offsets = [0, 256], sizes = [12, 64], strides = [1, 1]} : vector<12x1600xf32> to vector<12x64xf32>
    %c48_113 = arith.constant 48 : index
    %c0_114 = arith.constant 0 : index
    %146 = vector.load %arg13[%c48_113, %c0_114] : memref<384x128xf32, #tpu.memory_space<vmem>>, vector<12x64xf32>
    tpu.vector_store %arg13[%c48_113, %c0_114], %145 {strides = array<i32>} : memref<384x128xf32, #tpu.memory_space<vmem>>, vector<12x64xf32>,
    %147 = vector.extract_strided_slice %136 {offsets = [0, 320], sizes = [12, 64], strides = [1, 1]} : vector<12x1600xf32> to vector<12x64xf32>
    %c60_115 = arith.constant 60 : index
    %c0_116 = arith.constant 0 : index
    %148 = vector.load %arg13[%c60_115, %c0_116] : memref<384x128xf32, #tpu.memory_space<vmem>>, vector<12x64xf32>
    tpu.vector_store %arg13[%c60_115, %c0_116], %147 {strides = array<i32>} : memref<384x128xf32, #tpu.memory_space<vmem>>, vector<12x64xf32>,
    %149 = vector.extract_strided_slice %136 {offsets = [0, 384], sizes = [12, 64], strides = [1, 1]} : vector<12x1600xf32> to vector<12x64xf32>
    %c72_117 = arith.constant 72 : index
    %c0_118 = arith.constant 0 : index
    %150 = vector.load %arg13[%c72_117, %c0_118] : memref<384x128xf32, #tpu.memory_space<vmem>>, vector<12x64xf32>
    tpu.vector_store %arg13[%c72_117, %c0_118], %149 {strides = array<i32>} : memref<384x128xf32, #tpu.memory_space<vmem>>, vector<12x64xf32>,
    %151 = vector.extract_strided_slice %136 {offsets = [0, 448], sizes = [12, 64], strides = [1, 1]} : vector<12x1600xf32> to vector<12x64xf32>
    %c84_119 = arith.constant 84 : index
    %c0_120 = arith.constant 0 : index
    %152 = vector.load %arg13[%c84_119, %c0_120] : memref<384x128xf32, #tpu.memory_space<vmem>>, vector<12x64xf32>
    tpu.vector_store %arg13[%c84_119, %c0_120], %151 {strides = array<i32>} : memref<384x128xf32, #tpu.memory_space<vmem>>, vector<12x64xf32>,
    %153 = vector.extract_strided_slice %136 {offsets = [0, 512], sizes = [12, 64], strides = [1, 1]} : vector<12x1600xf32> to vector<12x64xf32>
    %c96_121 = arith.constant 96 : index
    %c0_122 = arith.constant 0 : index
    %154 = vector.load %arg13[%c96_121, %c0_122] : memref<384x128xf32, #tpu.memory_space<vmem>>, vector<12x64xf32>
    tpu.vector_store %arg13[%c96_121, %c0_122], %153 {strides = array<i32>} : memref<384x128xf32, #tpu.memory_space<vmem>>, vector<12x64xf32>,
    %155 = vector.extract_strided_slice %136 {offsets = [0, 576], sizes = [12, 64], strides = [1, 1]} : vector<12x1600xf32> to vector<12x64xf32>
    %c108_123 = arith.constant 108 : index
    %c0_124 = arith.constant 0 : index
    %156 = vector.load %arg13[%c108_123, %c0_124] : memref<384x128xf32, #tpu.memory_space<vmem>>, vector<12x64xf32>
    tpu.vector_store %arg13[%c108_123, %c0_124], %155 {strides = array<i32>} : memref<384x128xf32, #tpu.memory_space<vmem>>, vector<12x64xf32>,
    %157 = vector.extract_strided_slice %136 {offsets = [0, 640], sizes = [12, 64], strides = [1, 1]} : vector<12x1600xf32> to vector<12x64xf32>
    %c120_125 = arith.constant 120 : index
    %c0_126 = arith.constant 0 : index
    %158 = vector.load %arg13[%c120_125, %c0_126] : memref<384x128xf32, #tpu.memory_space<vmem>>, vector<12x64xf32>
    tpu.vector_store %arg13[%c120_125, %c0_126], %157 {strides = array<i32>} : memref<384x128xf32, #tpu.memory_space<vmem>>, vector<12x64xf32>,
    %159 = vector.extract_strided_slice %136 {offsets = [0, 704], sizes = [12, 64], strides = [1, 1]} : vector<12x1600xf32> to vector<12x64xf32>
    %c132_127 = arith.constant 132 : index
    %c0_128 = arith.constant 0 : index
    %160 = vector.load %arg13[%c132_127, %c0_128] : memref<384x128xf32, #tpu.memory_space<vmem>>, vector<12x64xf32>
    tpu.vector_store %arg13[%c132_127, %c0_128], %159 {strides = array<i32>} : memref<384x128xf32, #tpu.memory_space<vmem>>, vector<12x64xf32>,
    %161 = vector.extract_strided_slice %136 {offsets = [0, 768], sizes = [12, 64], strides = [1, 1]} : vector<12x1600xf32> to vector<12x64xf32>
    %c144_129 = arith.constant 144 : index
    %c0_130 = arith.constant 0 : index
    %162 = vector.load %arg13[%c144_129, %c0_130] : memref<384x128xf32, #tpu.memory_space<vmem>>, vector<12x64xf32>
    tpu.vector_store %arg13[%c144_129, %c0_130], %161 {strides = array<i32>} : memref<384x128xf32, #tpu.memory_space<vmem>>, vector<12x64xf32>,
    %163 = vector.extract_strided_slice %136 {offsets = [0, 832], sizes = [12, 64], strides = [1, 1]} : vector<12x1600xf32> to vector<12x64xf32>
    %c156_131 = arith.constant 156 : index
    %c0_132 = arith.constant 0 : index
    %164 = vector.load %arg13[%c156_131, %c0_132] : memref<384x128xf32, #tpu.memory_space<vmem>>, vector<12x64xf32>
    tpu.vector_store %arg13[%c156_131, %c0_132], %163 {strides = array<i32>} : memref<384x128xf32, #tpu.memory_space<vmem>>, vector<12x64xf32>,
    %165 = vector.extract_strided_slice %136 {offsets = [0, 896], sizes = [12, 64], strides = [1, 1]} : vector<12x1600xf32> to vector<12x64xf32>
    %c168_133 = arith.constant 168 : index
    %c0_134 = arith.constant 0 : index
    %166 = vector.load %arg13[%c168_133, %c0_134] : memref<384x128xf32, #tpu.memory_space<vmem>>, vector<12x64xf32>
    tpu.vector_store %arg13[%c168_133, %c0_134], %165 {strides = array<i32>} : memref<384x128xf32, #tpu.memory_space<vmem>>, vector<12x64xf32>,
    %167 = vector.extract_strided_slice %136 {offsets = [0, 960], sizes = [12, 64], strides = [1, 1]} : vector<12x1600xf32> to vector<12x64xf32>
    %c180_135 = arith.constant 180 : index
    %c0_136 = arith.constant 0 : index
    %168 = vector.load %arg13[%c180_135, %c0_136] : memref<384x128xf32, #tpu.memory_space<vmem>>, vector<12x64xf32>
    tpu.vector_store %arg13[%c180_135, %c0_136], %167 {strides = array<i32>} : memref<384x128xf32, #tpu.memory_space<vmem>>, vector<12x64xf32>,
    %169 = vector.extract_strided_slice %136 {offsets = [0, 1024], sizes = [12, 64], strides = [1, 1]} : vector<12x1600xf32> to vector<12x64xf32>
    %c192_137 = arith.constant 192 : index
    %c0_138 = arith.constant 0 : index
    %170 = vector.load %arg13[%c192_137, %c0_138] : memref<384x128xf32, #tpu.memory_space<vmem>>, vector<12x64xf32>
    tpu.vector_store %arg13[%c192_137, %c0_138], %169 {strides = array<i32>} : memref<384x128xf32, #tpu.memory_space<vmem>>, vector<12x64xf32>,
    %171 = vector.extract_strided_slice %136 {offsets = [0, 1088], sizes = [12, 64], strides = [1, 1]} : vector<12x1600xf32> to vector<12x64xf32>
    %c204_139 = arith.constant 204 : index
    %c0_140 = arith.constant 0 : index
    %172 = vector.load %arg13[%c204_139, %c0_140] : memref<384x128xf32, #tpu.memory_space<vmem>>, vector<12x64xf32>
    tpu.vector_store %arg13[%c204_139, %c0_140], %171 {strides = array<i32>} : memref<384x128xf32, #tpu.memory_space<vmem>>, vector<12x64xf32>,
    %173 = vector.extract_strided_slice %136 {offsets = [0, 1152], sizes = [12, 64], strides = [1, 1]} : vector<12x1600xf32> to vector<12x64xf32>
    %c216_141 = arith.constant 216 : index
    %c0_142 = arith.constant 0 : index
    %174 = vector.load %arg13[%c216_141, %c0_142] : memref<384x128xf32, #tpu.memory_space<vmem>>, vector<12x64xf32>
    tpu.vector_store %arg13[%c216_141, %c0_142], %173 {strides = array<i32>} : memref<384x128xf32, #tpu.memory_space<vmem>>, vector<12x64xf32>,
    %175 = vector.extract_strided_slice %136 {offsets = [0, 1216], sizes = [12, 64], strides = [1, 1]} : vector<12x1600xf32> to vector<12x64xf32>
    %c228_143 = arith.constant 228 : index
    %c0_144 = arith.constant 0 : index
    %176 = vector.load %arg13[%c228_143, %c0_144] : memref<384x128xf32, #tpu.memory_space<vmem>>, vector<12x64xf32>
    tpu.vector_store %arg13[%c228_143, %c0_144], %175 {strides = array<i32>} : memref<384x128xf32, #tpu.memory_space<vmem>>, vector<12x64xf32>,
    %177 = vector.extract_strided_slice %136 {offsets = [0, 1280], sizes = [12, 64], strides = [1, 1]} : vector<12x1600xf32> to vector<12x64xf32>
    %c240_145 = arith.constant 240 : index
    %c0_146 = arith.constant 0 : index
    %178 = vector.load %arg13[%c240_145, %c0_146] : memref<384x128xf32, #tpu.memory_space<vmem>>, vector<12x64xf32>
    tpu.vector_store %arg13[%c240_145, %c0_146], %177 {strides = array<i32>} : memref<384x128xf32, #tpu.memory_space<vmem>>, vector<12x64xf32>,
    %179 = vector.extract_strided_slice %136 {offsets = [0, 1344], sizes = [12, 64], strides = [1, 1]} : vector<12x1600xf32> to vector<12x64xf32>
    %c252_147 = arith.constant 252 : index
    %c0_148 = arith.constant 0 : index
    %180 = vector.load %arg13[%c252_147, %c0_148] : memref<384x128xf32, #tpu.memory_space<vmem>>, vector<12x64xf32>
    tpu.vector_store %arg13[%c252_147, %c0_148], %179 {strides = array<i32>} : memref<384x128xf32, #tpu.memory_space<vmem>>, vector<12x64xf32>,
    %181 = vector.extract_strided_slice %136 {offsets = [0, 1408], sizes = [12, 64], strides = [1, 1]} : vector<12x1600xf32> to vector<12x64xf32>
    %c264_149 = arith.constant 264 : index
    %c0_150 = arith.constant 0 : index
    %182 = vector.load %arg13[%c264_149, %c0_150] : memref<384x128xf32, #tpu.memory_space<vmem>>, vector<12x64xf32>
    tpu.vector_store %arg13[%c264_149, %c0_150], %181 {strides = array<i32>} : memref<384x128xf32, #tpu.memory_space<vmem>>, vector<12x64xf32>,
    %183 = vector.extract_strided_slice %136 {offsets = [0, 1472], sizes = [12, 64], strides = [1, 1]} : vector<12x1600xf32> to vector<12x64xf32>
    %c276_151 = arith.constant 276 : index
    %c0_152 = arith.constant 0 : index
    %184 = vector.load %arg13[%c276_151, %c0_152] : memref<384x128xf32, #tpu.memory_space<vmem>>, vector<12x64xf32>
    tpu.vector_store %arg13[%c276_151, %c0_152], %183 {strides = array<i32>} : memref<384x128xf32, #tpu.memory_space<vmem>>, vector<12x64xf32>,
    %185 = vector.extract_strided_slice %136 {offsets = [0, 1536], sizes = [12, 64], strides = [1, 1]} : vector<12x1600xf32> to vector<12x64xf32>
    %c288_153 = arith.constant 288 : index
    %c0_154 = arith.constant 0 : index
    %186 = vector.load %arg13[%c288_153, %c0_154] : memref<384x128xf32, #tpu.memory_space<vmem>>, vector<12x64xf32>
    tpu.vector_store %arg13[%c288_153, %c0_154], %185 {strides = array<i32>} : memref<384x128xf32, #tpu.memory_space<vmem>>, vector<12x64xf32>,
    %187 = vector.extract_strided_slice %133 {offsets = [0, 64], sizes = [12, 64], strides = [1, 1]} : vector<12x128xf32> to vector<12x64xf32>
    %c0_155 = arith.constant 0 : index
    %c0_156 = arith.constant 0 : index
    %188 = vector.load %arg7[%c0_155, %c0_156] : memref<64x1600xf32, #tpu.memory_space<vmem>>, vector<64x1600xf32>
    %cst_157 = arith.constant dense<0.000000e+00> : vector<12x1600xf32>
    %189 = tpu.matmul %187, %188, %cst_157 {dimension_numbers = #tpu.dot_dimension_numbers<[1], [0], [0], [1], [0, 0, 1, 1], [], []>} : vector<12x64xf32>, vector<64x1600xf32>, vector<12x1600xf32> -> vector<12x1600xf32>
    %190 = vector.extract_strided_slice %189 {offsets = [0, 0], sizes = [12, 64], strides = [1, 1]} : vector<12x1600xf32> to vector<12x64xf32>
    %c0_158 = arith.constant 0 : index
    %c64_159 = arith.constant 64 : index
    %191 = vector.load %arg13[%c0_158, %c64_159] : memref<384x128xf32, #tpu.memory_space<vmem>>, vector<12x64xf32>
    tpu.vector_store %arg13[%c0_158, %c64_159], %190 {strides = array<i32>} : memref<384x128xf32, #tpu.memory_space<vmem>>, vector<12x64xf32>,
    %192 = vector.extract_strided_slice %189 {offsets = [0, 64], sizes = [12, 64], strides = [1, 1]} : vector<12x1600xf32> to vector<12x64xf32>
    %c12_160 = arith.constant 12 : index
    %c64_161 = arith.constant 64 : index
    %193 = vector.load %arg13[%c12_160, %c64_161] : memref<384x128xf32, #tpu.memory_space<vmem>>, vector<12x64xf32>
    tpu.vector_store %arg13[%c12_160, %c64_161], %192 {strides = array<i32>} : memref<384x128xf32, #tpu.memory_space<vmem>>, vector<12x64xf32>,
    %194 = vector.extract_strided_slice %189 {offsets = [0, 128], sizes = [12, 64], strides = [1, 1]} : vector<12x1600xf32> to vector<12x64xf32>
    %c24_162 = arith.constant 24 : index
    %c64_163 = arith.constant 64 : index
    %195 = vector.load %arg13[%c24_162, %c64_163] : memref<384x128xf32, #tpu.memory_space<vmem>>, vector<12x64xf32>
    tpu.vector_store %arg13[%c24_162, %c64_163], %194 {strides = array<i32>} : memref<384x128xf32, #tpu.memory_space<vmem>>, vector<12x64xf32>,
    %196 = vector.extract_strided_slice %189 {offsets = [0, 192], sizes = [12, 64], strides = [1, 1]} : vector<12x1600xf32> to vector<12x64xf32>
    %c36_164 = arith.constant 36 : index
    %c64_165 = arith.constant 64 : index
    %197 = vector.load %arg13[%c36_164, %c64_165] : memref<384x128xf32, #tpu.memory_space<vmem>>, vector<12x64xf32>
    tpu.vector_store %arg13[%c36_164, %c64_165], %196 {strides = array<i32>} : memref<384x128xf32, #tpu.memory_space<vmem>>, vector<12x64xf32>,
    %198 = vector.extract_strided_slice %189 {offsets = [0, 256], sizes = [12, 64], strides = [1, 1]} : vector<12x1600xf32> to vector<12x64xf32>
    %c48_166 = arith.constant 48 : index
    %c64_167 = arith.constant 64 : index
    %199 = vector.load %arg13[%c48_166, %c64_167] : memref<384x128xf32, #tpu.memory_space<vmem>>, vector<12x64xf32>
    tpu.vector_store %arg13[%c48_166, %c64_167], %198 {strides = array<i32>} : memref<384x128xf32, #tpu.memory_space<vmem>>, vector<12x64xf32>,
    %200 = vector.extract_strided_slice %189 {offsets = [0, 320], sizes = [12, 64], strides = [1, 1]} : vector<12x1600xf32> to vector<12x64xf32>
    %c60_168 = arith.constant 60 : index
    %c64_169 = arith.constant 64 : index
    %201 = vector.load %arg13[%c60_168, %c64_169] : memref<384x128xf32, #tpu.memory_space<vmem>>, vector<12x64xf32>
    tpu.vector_store %arg13[%c60_168, %c64_169], %200 {strides = array<i32>} : memref<384x128xf32, #tpu.memory_space<vmem>>, vector<12x64xf32>,
    %202 = vector.extract_strided_slice %189 {offsets = [0, 384], sizes = [12, 64], strides = [1, 1]} : vector<12x1600xf32> to vector<12x64xf32>
    %c72_170 = arith.constant 72 : index
    %c64_171 = arith.constant 64 : index
    %203 = vector.load %arg13[%c72_170, %c64_171] : memref<384x128xf32, #tpu.memory_space<vmem>>, vector<12x64xf32>
    tpu.vector_store %arg13[%c72_170, %c64_171], %202 {strides = array<i32>} : memref<384x128xf32, #tpu.memory_space<vmem>>, vector<12x64xf32>,
    %204 = vector.extract_strided_slice %189 {offsets = [0, 448], sizes = [12, 64], strides = [1, 1]} : vector<12x1600xf32> to vector<12x64xf32>
    %c84_172 = arith.constant 84 : index
    %c64_173 = arith.constant 64 : index
    %205 = vector.load %arg13[%c84_172, %c64_173] : memref<384x128xf32, #tpu.memory_space<vmem>>, vector<12x64xf32>
    tpu.vector_store %arg13[%c84_172, %c64_173], %204 {strides = array<i32>} : memref<384x128xf32, #tpu.memory_space<vmem>>, vector<12x64xf32>,
    %206 = vector.extract_strided_slice %189 {offsets = [0, 512], sizes = [12, 64], strides = [1, 1]} : vector<12x1600xf32> to vector<12x64xf32>
    %c96_174 = arith.constant 96 : index
    %c64_175 = arith.constant 64 : index
    %207 = vector.load %arg13[%c96_174, %c64_175] : memref<384x128xf32, #tpu.memory_space<vmem>>, vector<12x64xf32>
    tpu.vector_store %arg13[%c96_174, %c64_175], %206 {strides = array<i32>} : memref<384x128xf32, #tpu.memory_space<vmem>>, vector<12x64xf32>,
    %208 = vector.extract_strided_slice %189 {offsets = [0, 576], sizes = [12, 64], strides = [1, 1]} : vector<12x1600xf32> to vector<12x64xf32>
    %c108_176 = arith.constant 108 : index
    %c64_177 = arith.constant 64 : index
    %209 = vector.load %arg13[%c108_176, %c64_177] : memref<384x128xf32, #tpu.memory_space<vmem>>, vector<12x64xf32>
    tpu.vector_store %arg13[%c108_176, %c64_177], %208 {strides = array<i32>} : memref<384x128xf32, #tpu.memory_space<vmem>>, vector<12x64xf32>,
    %210 = vector.extract_strided_slice %189 {offsets = [0, 640], sizes = [12, 64], strides = [1, 1]} : vector<12x1600xf32> to vector<12x64xf32>
    %c120_178 = arith.constant 120 : index
    %c64_179 = arith.constant 64 : index
    %211 = vector.load %arg13[%c120_178, %c64_179] : memref<384x128xf32, #tpu.memory_space<vmem>>, vector<12x64xf32>
    tpu.vector_store %arg13[%c120_178, %c64_179], %210 {strides = array<i32>} : memref<384x128xf32, #tpu.memory_space<vmem>>, vector<12x64xf32>,
    %212 = vector.extract_strided_slice %189 {offsets = [0, 704], sizes = [12, 64], strides = [1, 1]} : vector<12x1600xf32> to vector<12x64xf32>
    %c132_180 = arith.constant 132 : index
    %c64_181 = arith.constant 64 : index
    %213 = vector.load %arg13[%c132_180, %c64_181] : memref<384x128xf32, #tpu.memory_space<vmem>>, vector<12x64xf32>
    tpu.vector_store %arg13[%c132_180, %c64_181], %212 {strides = array<i32>} : memref<384x128xf32, #tpu.memory_space<vmem>>, vector<12x64xf32>,
    %214 = vector.extract_strided_slice %189 {offsets = [0, 768], sizes = [12, 64], strides = [1, 1]} : vector<12x1600xf32> to vector<12x64xf32>
    %c144_182 = arith.constant 144 : index
    %c64_183 = arith.constant 64 : index
    %215 = vector.load %arg13[%c144_182, %c64_183] : memref<384x128xf32, #tpu.memory_space<vmem>>, vector<12x64xf32>
    tpu.vector_store %arg13[%c144_182, %c64_183], %214 {strides = array<i32>} : memref<384x128xf32, #tpu.memory_space<vmem>>, vector<12x64xf32>,
    %216 = vector.extract_strided_slice %189 {offsets = [0, 832], sizes = [12, 64], strides = [1, 1]} : vector<12x1600xf32> to vector<12x64xf32>
    %c156_184 = arith.constant 156 : index
    %c64_185 = arith.constant 64 : index
    %217 = vector.load %arg13[%c156_184, %c64_185] : memref<384x128xf32, #tpu.memory_space<vmem>>, vector<12x64xf32>
    tpu.vector_store %arg13[%c156_184, %c64_185], %216 {strides = array<i32>} : memref<384x128xf32, #tpu.memory_space<vmem>>, vector<12x64xf32>,
    %218 = vector.extract_strided_slice %189 {offsets = [0, 896], sizes = [12, 64], strides = [1, 1]} : vector<12x1600xf32> to vector<12x64xf32>
    %c168_186 = arith.constant 168 : index
    %c64_187 = arith.constant 64 : index
    %219 = vector.load %arg13[%c168_186, %c64_187] : memref<384x128xf32, #tpu.memory_space<vmem>>, vector<12x64xf32>
    tpu.vector_store %arg13[%c168_186, %c64_187], %218 {strides = array<i32>} : memref<384x128xf32, #tpu.memory_space<vmem>>, vector<12x64xf32>,
    %220 = vector.extract_strided_slice %189 {offsets = [0, 960], sizes = [12, 64], strides = [1, 1]} : vector<12x1600xf32> to vector<12x64xf32>
    %c180_188 = arith.constant 180 : index
    %c64_189 = arith.constant 64 : index
    %221 = vector.load %arg13[%c180_188, %c64_189] : memref<384x128xf32, #tpu.memory_space<vmem>>, vector<12x64xf32>
    tpu.vector_store %arg13[%c180_188, %c64_189], %220 {strides = array<i32>} : memref<384x128xf32, #tpu.memory_space<vmem>>, vector<12x64xf32>,
    %222 = vector.extract_strided_slice %189 {offsets = [0, 1024], sizes = [12, 64], strides = [1, 1]} : vector<12x1600xf32> to vector<12x64xf32>
    %c192_190 = arith.constant 192 : index
    %c64_191 = arith.constant 64 : index
    %223 = vector.load %arg13[%c192_190, %c64_191] : memref<384x128xf32, #tpu.memory_space<vmem>>, vector<12x64xf32>
    tpu.vector_store %arg13[%c192_190, %c64_191], %222 {strides = array<i32>} : memref<384x128xf32, #tpu.memory_space<vmem>>, vector<12x64xf32>,
    %224 = vector.extract_strided_slice %189 {offsets = [0, 1088], sizes = [12, 64], strides = [1, 1]} : vector<12x1600xf32> to vector<12x64xf32>
    %c204_192 = arith.constant 204 : index
    %c64_193 = arith.constant 64 : index
    %225 = vector.load %arg13[%c204_192, %c64_193] : memref<384x128xf32, #tpu.memory_space<vmem>>, vector<12x64xf32>
    tpu.vector_store %arg13[%c204_192, %c64_193], %224 {strides = array<i32>} : memref<384x128xf32, #tpu.memory_space<vmem>>, vector<12x64xf32>,
    %226 = vector.extract_strided_slice %189 {offsets = [0, 1152], sizes = [12, 64], strides = [1, 1]} : vector<12x1600xf32> to vector<12x64xf32>
    %c216_194 = arith.constant 216 : index
    %c64_195 = arith.constant 64 : index
    %227 = vector.load %arg13[%c216_194, %c64_195] : memref<384x128xf32, #tpu.memory_space<vmem>>, vector<12x64xf32>
    tpu.vector_store %arg13[%c216_194, %c64_195], %226 {strides = array<i32>} : memref<384x128xf32, #tpu.memory_space<vmem>>, vector<12x64xf32>,
    %228 = vector.extract_strided_slice %189 {offsets = [0, 1216], sizes = [12, 64], strides = [1, 1]} : vector<12x1600xf32> to vector<12x64xf32>
    %c228_196 = arith.constant 228 : index
    %c64_197 = arith.constant 64 : index
    %229 = vector.load %arg13[%c228_196, %c64_197] : memref<384x128xf32, #tpu.memory_space<vmem>>, vector<12x64xf32>
    tpu.vector_store %arg13[%c228_196, %c64_197], %228 {strides = array<i32>} : memref<384x128xf32, #tpu.memory_space<vmem>>, vector<12x64xf32>,
    %230 = vector.extract_strided_slice %189 {offsets = [0, 1280], sizes = [12, 64], strides = [1, 1]} : vector<12x1600xf32> to vector<12x64xf32>
    %c240_198 = arith.constant 240 : index
    %c64_199 = arith.constant 64 : index
    %231 = vector.load %arg13[%c240_198, %c64_199] : memref<384x128xf32, #tpu.memory_space<vmem>>, vector<12x64xf32>
    tpu.vector_store %arg13[%c240_198, %c64_199], %230 {strides = array<i32>} : memref<384x128xf32, #tpu.memory_space<vmem>>, vector<12x64xf32>,
    %232 = vector.extract_strided_slice %189 {offsets = [0, 1344], sizes = [12, 64], strides = [1, 1]} : vector<12x1600xf32> to vector<12x64xf32>
    %c252_200 = arith.constant 252 : index
    %c64_201 = arith.constant 64 : index
    %233 = vector.load %arg13[%c252_200, %c64_201] : memref<384x128xf32, #tpu.memory_space<vmem>>, vector<12x64xf32>
    tpu.vector_store %arg13[%c252_200, %c64_201], %232 {strides = array<i32>} : memref<384x128xf32, #tpu.memory_space<vmem>>, vector<12x64xf32>,
    %234 = vector.extract_strided_slice %189 {offsets = [0, 1408], sizes = [12, 64], strides = [1, 1]} : vector<12x1600xf32> to vector<12x64xf32>
    %c264_202 = arith.constant 264 : index
    %c64_203 = arith.constant 64 : index
    %235 = vector.load %arg13[%c264_202, %c64_203] : memref<384x128xf32, #tpu.memory_space<vmem>>, vector<12x64xf32>
    tpu.vector_store %arg13[%c264_202, %c64_203], %234 {strides = array<i32>} : memref<384x128xf32, #tpu.memory_space<vmem>>, vector<12x64xf32>,
    %236 = vector.extract_strided_slice %189 {offsets = [0, 1472], sizes = [12, 64], strides = [1, 1]} : vector<12x1600xf32> to vector<12x64xf32>
    %c276_204 = arith.constant 276 : index
    %c64_205 = arith.constant 64 : index
    %237 = vector.load %arg13[%c276_204, %c64_205] : memref<384x128xf32, #tpu.memory_space<vmem>>, vector<12x64xf32>
    tpu.vector_store %arg13[%c276_204, %c64_205], %236 {strides = array<i32>} : memref<384x128xf32, #tpu.memory_space<vmem>>, vector<12x64xf32>,
    %238 = vector.extract_strided_slice %189 {offsets = [0, 1536], sizes = [12, 64], strides = [1, 1]} : vector<12x1600xf32> to vector<12x64xf32>
    %c288_206 = arith.constant 288 : index
    %c64_207 = arith.constant 64 : index
    %239 = vector.load %arg13[%c288_206, %c64_207] : memref<384x128xf32, #tpu.memory_space<vmem>>, vector<12x64xf32>
    tpu.vector_store %arg13[%c288_206, %c64_207], %238 {strides = array<i32>} : memref<384x128xf32, #tpu.memory_space<vmem>>, vector<12x64xf32>,
    %c0_208 = arith.constant 0 : index
    %c0_209 = arith.constant 0 : index
    %240 = vector.load %arg8[%c0_208, %c0_209] : memref<12x384xf32, #tpu.memory_space<vmem>>, vector<12x384xf32>
    %c0_210 = arith.constant 0 : index
    %c0_211 = arith.constant 0 : index
    %241 = vector.load %arg13[%c0_210, %c0_211] : memref<384x128xf32, #tpu.memory_space<vmem>>, vector<384x128xf32>
    %cst_212 = arith.constant dense<0.000000e+00> : vector<12x128xf32>
    %242 = tpu.matmul %240, %241, %cst_212 {dimension_numbers = #tpu.dot_dimension_numbers<[1], [0], [0], [1], [0, 0, 1, 1], [], []>} : vector<12x384xf32>, vector<384x128xf32>, vector<12x128xf32> -> vector<12x128xf32>
    %c0_213 = arith.constant 0 : index
    %c0_214 = arith.constant 0 : index
    %243 = vector.load %arg9[%c0_213, %c0_214] : memref<12x1xf32, #tpu.memory_space<vmem>>, vector<12x1xf32>
    %244 = vector.broadcast %243 : vector<12x1xf32> to vector<12x128xf32>
    %245 = arith.addf %242, %244 : vector<12x128xf32>
    %cst_215 = arith.constant 0.000000e+00 : f32
    %246 = vector.broadcast %cst_215 : f32 to vector<12x128xf32>
    %247 = arith.subf %246, %245 : vector<12x128xf32>
    %248 = math.exp %247 : vector<12x128xf32>
    %cst_216 = arith.constant 1.000000e+00 : f32
    %249 = vector.broadcast %cst_216 : f32 to vector<12x128xf32>
    %250 = arith.addf %249, %248 : vector<12x128xf32>
    %cst_217 = arith.constant 1.000000e+00 : f32
    %251 = vector.broadcast %cst_217 : f32 to vector<12x128xf32>
    %252 = arith.divf %251, %250 : vector<12x128xf32>
    %253 = vector.extract_strided_slice %252 {offsets = [0, 0], sizes = [1, 64], strides = [1, 1]} : vector<12x128xf32> to vector<1x64xf32>
    %c0_218 = arith.constant 0 : index
    %c0_219 = arith.constant 0 : index
    %254 = vector.load %arg14[%c0_218, %c0_219] : memref<2x768xf32, #tpu.memory_space<vmem>>, vector<1x64xf32>
    tpu.vector_store %arg14[%c0_218, %c0_219], %253 {strides = array<i32>} : memref<2x768xf32, #tpu.memory_space<vmem>>, vector<1x64xf32>,
    %255 = vector.extract_strided_slice %252 {offsets = [0, 64], sizes = [1, 64], strides = [1, 1]} : vector<12x128xf32> to vector<1x64xf32>
    %c1 = arith.constant 1 : index
    %c0_220 = arith.constant 0 : index
    %256 = vector.load %arg14[%c1, %c0_220] : memref<2x768xf32, #tpu.memory_space<vmem>>, vector<1x64xf32>
    tpu.vector_store %arg14[%c1, %c0_220], %255 {strides = array<i32>} : memref<2x768xf32, #tpu.memory_space<vmem>>, vector<1x64xf32>,
    %257 = vector.extract_strided_slice %252 {offsets = [1, 0], sizes = [1, 64], strides = [1, 1]} : vector<12x128xf32> to vector<1x64xf32>
    %c0_221 = arith.constant 0 : index
    %c64_222 = arith.constant 64 : index
    %258 = vector.load %arg14[%c0_221, %c64_222] : memref<2x768xf32, #tpu.memory_space<vmem>>, vector<1x64xf32>
    tpu.vector_store %arg14[%c0_221, %c64_222], %257 {strides = array<i32>} : memref<2x768xf32, #tpu.memory_space<vmem>>, vector<1x64xf32>,
    %259 = vector.extract_strided_slice %252 {offsets = [1, 64], sizes = [1, 64], strides = [1, 1]} : vector<12x128xf32> to vector<1x64xf32>
    %c1_223 = arith.constant 1 : index
    %c64_224 = arith.constant 64 : index
    %260 = vector.load %arg14[%c1_223, %c64_224] : memref<2x768xf32, #tpu.memory_space<vmem>>, vector<1x64xf32>
    tpu.vector_store %arg14[%c1_223, %c64_224], %259 {strides = array<i32>} : memref<2x768xf32, #tpu.memory_space<vmem>>, vector<1x64xf32>,
    %261 = vector.extract_strided_slice %252 {offsets = [2, 0], sizes = [1, 64], strides = [1, 1]} : vector<12x128xf32> to vector<1x64xf32>
    %c0_225 = arith.constant 0 : index
    %c128 = arith.constant 128 : index
    %262 = vector.load %arg14[%c0_225, %c128] : memref<2x768xf32, #tpu.memory_space<vmem>>, vector<1x64xf32>
    tpu.vector_store %arg14[%c0_225, %c128], %261 {strides = array<i32>} : memref<2x768xf32, #tpu.memory_space<vmem>>, vector<1x64xf32>,
    %263 = vector.extract_strided_slice %252 {offsets = [2, 64], sizes = [1, 64], strides = [1, 1]} : vector<12x128xf32> to vector<1x64xf32>
    %c1_226 = arith.constant 1 : index
    %c128_227 = arith.constant 128 : index
    %264 = vector.load %arg14[%c1_226, %c128_227] : memref<2x768xf32, #tpu.memory_space<vmem>>, vector<1x64xf32>
    tpu.vector_store %arg14[%c1_226, %c128_227], %263 {strides = array<i32>} : memref<2x768xf32, #tpu.memory_space<vmem>>, vector<1x64xf32>,
    %265 = vector.extract_strided_slice %252 {offsets = [3, 0], sizes = [1, 64], strides = [1, 1]} : vector<12x128xf32> to vector<1x64xf32>
    %c0_228 = arith.constant 0 : index
    %c192_229 = arith.constant 192 : index
    %266 = vector.load %arg14[%c0_228, %c192_229] : memref<2x768xf32, #tpu.memory_space<vmem>>, vector<1x64xf32>
    tpu.vector_store %arg14[%c0_228, %c192_229], %265 {strides = array<i32>} : memref<2x768xf32, #tpu.memory_space<vmem>>, vector<1x64xf32>,
    %267 = vector.extract_strided_slice %252 {offsets = [3, 64], sizes = [1, 64], strides = [1, 1]} : vector<12x128xf32> to vector<1x64xf32>
    %c1_230 = arith.constant 1 : index
    %c192_231 = arith.constant 192 : index
    %268 = vector.load %arg14[%c1_230, %c192_231] : memref<2x768xf32, #tpu.memory_space<vmem>>, vector<1x64xf32>
    tpu.vector_store %arg14[%c1_230, %c192_231], %267 {strides = array<i32>} : memref<2x768xf32, #tpu.memory_space<vmem>>, vector<1x64xf32>,
    %269 = vector.extract_strided_slice %252 {offsets = [4, 0], sizes = [1, 64], strides = [1, 1]} : vector<12x128xf32> to vector<1x64xf32>
    %c0_232 = arith.constant 0 : index
    %c256 = arith.constant 256 : index
    %270 = vector.load %arg14[%c0_232, %c256] : memref<2x768xf32, #tpu.memory_space<vmem>>, vector<1x64xf32>
    tpu.vector_store %arg14[%c0_232, %c256], %269 {strides = array<i32>} : memref<2x768xf32, #tpu.memory_space<vmem>>, vector<1x64xf32>,
    %271 = vector.extract_strided_slice %252 {offsets = [4, 64], sizes = [1, 64], strides = [1, 1]} : vector<12x128xf32> to vector<1x64xf32>
    %c1_233 = arith.constant 1 : index
    %c256_234 = arith.constant 256 : index
    %272 = vector.load %arg14[%c1_233, %c256_234] : memref<2x768xf32, #tpu.memory_space<vmem>>, vector<1x64xf32>
    tpu.vector_store %arg14[%c1_233, %c256_234], %271 {strides = array<i32>} : memref<2x768xf32, #tpu.memory_space<vmem>>, vector<1x64xf32>,
    %273 = vector.extract_strided_slice %252 {offsets = [5, 0], sizes = [1, 64], strides = [1, 1]} : vector<12x128xf32> to vector<1x64xf32>
    %c0_235 = arith.constant 0 : index
    %c320 = arith.constant 320 : index
    %274 = vector.load %arg14[%c0_235, %c320] : memref<2x768xf32, #tpu.memory_space<vmem>>, vector<1x64xf32>
    tpu.vector_store %arg14[%c0_235, %c320], %273 {strides = array<i32>} : memref<2x768xf32, #tpu.memory_space<vmem>>, vector<1x64xf32>,
    %275 = vector.extract_strided_slice %252 {offsets = [5, 64], sizes = [1, 64], strides = [1, 1]} : vector<12x128xf32> to vector<1x64xf32>
    %c1_236 = arith.constant 1 : index
    %c320_237 = arith.constant 320 : index
    %276 = vector.load %arg14[%c1_236, %c320_237] : memref<2x768xf32, #tpu.memory_space<vmem>>, vector<1x64xf32>
    tpu.vector_store %arg14[%c1_236, %c320_237], %275 {strides = array<i32>} : memref<2x768xf32, #tpu.memory_space<vmem>>, vector<1x64xf32>,
    %277 = vector.extract_strided_slice %252 {offsets = [6, 0], sizes = [1, 64], strides = [1, 1]} : vector<12x128xf32> to vector<1x64xf32>
    %c0_238 = arith.constant 0 : index
    %c384 = arith.constant 384 : index
    %278 = vector.load %arg14[%c0_238, %c384] : memref<2x768xf32, #tpu.memory_space<vmem>>, vector<1x64xf32>
    tpu.vector_store %arg14[%c0_238, %c384], %277 {strides = array<i32>} : memref<2x768xf32, #tpu.memory_space<vmem>>, vector<1x64xf32>,
    %279 = vector.extract_strided_slice %252 {offsets = [6, 64], sizes = [1, 64], strides = [1, 1]} : vector<12x128xf32> to vector<1x64xf32>
    %c1_239 = arith.constant 1 : index
    %c384_240 = arith.constant 384 : index
    %280 = vector.load %arg14[%c1_239, %c384_240] : memref<2x768xf32, #tpu.memory_space<vmem>>, vector<1x64xf32>
    tpu.vector_store %arg14[%c1_239, %c384_240], %279 {strides = array<i32>} : memref<2x768xf32, #tpu.memory_space<vmem>>, vector<1x64xf32>,
    %281 = vector.extract_strided_slice %252 {offsets = [7, 0], sizes = [1, 64], strides = [1, 1]} : vector<12x128xf32> to vector<1x64xf32>
    %c0_241 = arith.constant 0 : index
    %c448 = arith.constant 448 : index
    %282 = vector.load %arg14[%c0_241, %c448] : memref<2x768xf32, #tpu.memory_space<vmem>>, vector<1x64xf32>
    tpu.vector_store %arg14[%c0_241, %c448], %281 {strides = array<i32>} : memref<2x768xf32, #tpu.memory_space<vmem>>, vector<1x64xf32>,
    %283 = vector.extract_strided_slice %252 {offsets = [7, 64], sizes = [1, 64], strides = [1, 1]} : vector<12x128xf32> to vector<1x64xf32>
    %c1_242 = arith.constant 1 : index
    %c448_243 = arith.constant 448 : index
    %284 = vector.load %arg14[%c1_242, %c448_243] : memref<2x768xf32, #tpu.memory_space<vmem>>, vector<1x64xf32>
    tpu.vector_store %arg14[%c1_242, %c448_243], %283 {strides = array<i32>} : memref<2x768xf32, #tpu.memory_space<vmem>>, vector<1x64xf32>,
    %285 = vector.extract_strided_slice %252 {offsets = [8, 0], sizes = [1, 64], strides = [1, 1]} : vector<12x128xf32> to vector<1x64xf32>
    %c0_244 = arith.constant 0 : index
    %c512 = arith.constant 512 : index
    %286 = vector.load %arg14[%c0_244, %c512] : memref<2x768xf32, #tpu.memory_space<vmem>>, vector<1x64xf32>
    tpu.vector_store %arg14[%c0_244, %c512], %285 {strides = array<i32>} : memref<2x768xf32, #tpu.memory_space<vmem>>, vector<1x64xf32>,
    %287 = vector.extract_strided_slice %252 {offsets = [8, 64], sizes = [1, 64], strides = [1, 1]} : vector<12x128xf32> to vector<1x64xf32>
    %c1_245 = arith.constant 1 : index
    %c512_246 = arith.constant 512 : index
    %288 = vector.load %arg14[%c1_245, %c512_246] : memref<2x768xf32, #tpu.memory_space<vmem>>, vector<1x64xf32>
    tpu.vector_store %arg14[%c1_245, %c512_246], %287 {strides = array<i32>} : memref<2x768xf32, #tpu.memory_space<vmem>>, vector<1x64xf32>,
    %289 = vector.extract_strided_slice %252 {offsets = [9, 0], sizes = [1, 64], strides = [1, 1]} : vector<12x128xf32> to vector<1x64xf32>
    %c0_247 = arith.constant 0 : index
    %c576 = arith.constant 576 : index
    %290 = vector.load %arg14[%c0_247, %c576] : memref<2x768xf32, #tpu.memory_space<vmem>>, vector<1x64xf32>
    tpu.vector_store %arg14[%c0_247, %c576], %289 {strides = array<i32>} : memref<2x768xf32, #tpu.memory_space<vmem>>, vector<1x64xf32>,
    %291 = vector.extract_strided_slice %252 {offsets = [9, 64], sizes = [1, 64], strides = [1, 1]} : vector<12x128xf32> to vector<1x64xf32>
    %c1_248 = arith.constant 1 : index
    %c576_249 = arith.constant 576 : index
    %292 = vector.load %arg14[%c1_248, %c576_249] : memref<2x768xf32, #tpu.memory_space<vmem>>, vector<1x64xf32>
    tpu.vector_store %arg14[%c1_248, %c576_249], %291 {strides = array<i32>} : memref<2x768xf32, #tpu.memory_space<vmem>>, vector<1x64xf32>,
    %293 = vector.extract_strided_slice %252 {offsets = [10, 0], sizes = [1, 64], strides = [1, 1]} : vector<12x128xf32> to vector<1x64xf32>
    %c0_250 = arith.constant 0 : index
    %c640 = arith.constant 640 : index
    %294 = vector.load %arg14[%c0_250, %c640] : memref<2x768xf32, #tpu.memory_space<vmem>>, vector<1x64xf32>
    tpu.vector_store %arg14[%c0_250, %c640], %293 {strides = array<i32>} : memref<2x768xf32, #tpu.memory_space<vmem>>, vector<1x64xf32>,
    %295 = vector.extract_strided_slice %252 {offsets = [10, 64], sizes = [1, 64], strides = [1, 1]} : vector<12x128xf32> to vector<1x64xf32>
    %c1_251 = arith.constant 1 : index
    %c640_252 = arith.constant 640 : index
    %296 = vector.load %arg14[%c1_251, %c640_252] : memref<2x768xf32, #tpu.memory_space<vmem>>, vector<1x64xf32>
    tpu.vector_store %arg14[%c1_251, %c640_252], %295 {strides = array<i32>} : memref<2x768xf32, #tpu.memory_space<vmem>>, vector<1x64xf32>,
    %297 = vector.extract_strided_slice %252 {offsets = [11, 0], sizes = [1, 64], strides = [1, 1]} : vector<12x128xf32> to vector<1x64xf32>
    %c0_253 = arith.constant 0 : index
    %c704 = arith.constant 704 : index
    %298 = vector.load %arg14[%c0_253, %c704] : memref<2x768xf32, #tpu.memory_space<vmem>>, vector<1x64xf32>
    tpu.vector_store %arg14[%c0_253, %c704], %297 {strides = array<i32>} : memref<2x768xf32, #tpu.memory_space<vmem>>, vector<1x64xf32>,
    %299 = vector.extract_strided_slice %252 {offsets = [11, 64], sizes = [1, 64], strides = [1, 1]} : vector<12x128xf32> to vector<1x64xf32>
    %c1_254 = arith.constant 1 : index
    %c704_255 = arith.constant 704 : index
    %300 = vector.load %arg14[%c1_254, %c704_255] : memref<2x768xf32, #tpu.memory_space<vmem>>, vector<1x64xf32>
    tpu.vector_store %arg14[%c1_254, %c704_255], %299 {strides = array<i32>} : memref<2x768xf32, #tpu.memory_space<vmem>>, vector<1x64xf32>,
    %c0_256 = arith.constant 0 : index
    %c0_257 = arith.constant 0 : index
    %301 = vector.load %arg14[%c0_256, %c0_257] : memref<2x768xf32, #tpu.memory_space<vmem>>, vector<2x768xf32>
    %c0_258 = arith.constant 0 : index
    %c0_259 = arith.constant 0 : index
    %302 = vector.load %arg10[%c0_258, %c0_259] : memref<768x128xf32, #tpu.memory_space<vmem>>, vector<768x128xf32>
    %cst_260 = arith.constant dense<0.000000e+00> : vector<2x128xf32>
    %303 = tpu.matmul %301, %302, %cst_260 {dimension_numbers = #tpu.dot_dimension_numbers<[1], [0], [0], [1], [0, 0, 1, 1], [], []>} : vector<2x768xf32>, vector<768x128xf32>, vector<2x128xf32> -> vector<2x128xf32>
    %c0_261 = arith.constant 0 : index
    %c0_262 = arith.constant 0 : index
    %304 = vector.load %arg11[%c0_261, %c0_262] : memref<1x128xf32, #tpu.memory_space<vmem>>, vector<1x128xf32>
    %305 = vector.broadcast %304 : vector<1x128xf32> to vector<2x128xf32>
    %306 = arith.addf %303, %305 : vector<2x128xf32>
    %c0_263 = arith.constant 0 : index
    %c0_264 = arith.constant 0 : index
    %307 = vector.load %arg12[%c0_263, %c0_264] : memref<2x128xf32, #tpu.memory_space<vmem>>, vector<2x128xf32>
    tpu.vector_store %arg12[%c0_263, %c0_264], %306 {strides = array<i32>} : memref<2x128xf32, #tpu.memory_space<vmem>>, vector<2x128xf32>,
    return
  }
  func.func @transform_0(%arg0: i32) -> (i32, i32) {
    %c0_i32 = arith.constant 0 : i32
    %c0_i32_0 = arith.constant 0 : i32
    %c0_i32_1 = arith.constant 0 : i32
    return %c0_i32, %c0_i32_0 : i32, i32
  }
  func.func @transform_1(%arg0: i32) -> (i32, i32) {
    %c0_i32 = arith.constant 0 : i32
    %c0_i32_0 = arith.constant 0 : i32
    %c0_i32_1 = arith.constant 0 : i32
    return %c0_i32, %c0_i32_0 : i32, i32
  }
  func.func @transform_2(%arg0: i32) -> (i32, i32) {
    %c0_i32 = arith.constant 0 : i32
    %c0_i32_0 = arith.constant 0 : i32
    %c0_i32_1 = arith.constant 0 : i32
    return %c0_i32, %c0_i32_0 : i32, i32
  }
  func.func @transform_3(%arg0: i32) -> (i32, i32) {
    %c0_i32 = arith.constant 0 : i32
    %c0_i32_0 = arith.constant 0 : i32
    %c0_i32_1 = arith.constant 0 : i32
    return %c0_i32, %c0_i32_0 : i32, i32
  }
  func.func @transform_4(%arg0: i32) -> (i32, i32) {
    %c0_i32 = arith.constant 0 : i32
    %c0_i32_0 = arith.constant 0 : i32
    %c0_i32_1 = arith.constant 0 : i32
    return %c0_i32, %c0_i32_0 : i32, i32
  }
  func.func @transform_5(%arg0: i32) -> (i32, i32) {
    %c0_i32 = arith.constant 0 : i32
    %c0_i32_0 = arith.constant 0 : i32
    %c0_i32_1 = arith.constant 0 : i32
    return %c0_i32, %c0_i32_0 : i32, i32
  }
  func.func @transform_6(%arg0: i32) -> (i32, i32) {
    %c0_i32 = arith.constant 0 : i32
    %c0_i32_0 = arith.constant 0 : i32
    %c0_i32_1 = arith.constant 0 : i32
    return %c0_i32, %c0_i32_0 : i32, i32
  }
  func.func @transform_7(%arg0: i32) -> (i32, i32) {
    %c0_i32 = arith.constant 0 : i32
    %c0_i32_0 = arith.constant 0 : i32
    %c0_i32_1 = arith.constant 0 : i32
    return %c0_i32, %c0_i32_0 : i32, i32
  }
  func.func @transform_8(%arg0: i32) -> (i32, i32) {
    %c0_i32 = arith.constant 0 : i32
    %c0_i32_0 = arith.constant 0 : i32
    %c0_i32_1 = arith.constant 0 : i32
    return %c0_i32, %c0_i32_0 : i32, i32
  }
  func.func @transform_9(%arg0: i32) -> (i32, i32) {
    %c0_i32 = arith.constant 0 : i32
    %c0_i32_0 = arith.constant 0 : i32
    %c0_i32_1 = arith.constant 0 : i32
    return %c0_i32, %c0_i32_0 : i32, i32
  }
  func.func @transform_10(%arg0: i32) -> (i32, i32) {
    %c0_i32 = arith.constant 0 : i32
    %c0_i32_0 = arith.constant 0 : i32
    %c0_i32_1 = arith.constant 0 : i32
    return %c0_i32, %c0_i32_0 : i32, i32
  }
  func.func @transform_11(%arg0: i32) -> (i32, i32) {
    %c0_i32 = arith.constant 0 : i32
    %c0_i32_0 = arith.constant 0 : i32
    %c0_i32_1 = arith.constant 0 : i32
    return %c0_i32, %c0_i32_0 : i32, i32
  }
}

</mosaic_0001>

<bundles_post_ra>
// kernel: net_forward.1
= control target key start
LH: loop header
LB: loop body
LE: loop exit
PB: predicated region body
PF: predicated region fallthrough
CT: control target
= control target key end

     0   :  { %v6980_v7 = vmov 0.0   ;;  %v6981_v13 = vmov 0   ;;  %s11261_s0 = inlined_call_operand.vmem [shape: f32[128,512], index: 0, kind: input, shape index: {}]   ;;  %s11262_s1 = inlined_call_operand.vmem [shape: f32[12,128], index: 1, kind: input, shape index: {}]   ;;  %s11263_s2 = inlined_call_operand.vmem [shape: f32[12,1], index: 2, kind: input, shape index: {}]   ;;  %s11264_s3 = inlined_call_operand.vmem [shape: f32[256,1600], index: 3, kind: input, shape index: {}]   ;;  %s11265_s4 = inlined_call_operand.vmem [shape: f32[12,384], index: 4, kind: input, shape index: {}]   ;;  %s11266_s5 = inlined_call_operand.vmem [shape: f32[12,1], index: 5, kind: input, shape index: {}]   ;;  %s11267_s6 = inlined_call_operand.vmem [shape: f32[64,1600], index: 6, kind: input, shape index: {}]   ;;  %s11268_s7 = inlined_call_operand.vmem [shape: f32[12,384], index: 7, kind: input, shape index: {}]   ;;  %s11269_s8 = inlined_call_operand.vmem [shape: f32[12,1], index: 8, kind: input, shape index: {}]   ;;  %s11270_s9 = inlined_call_operand.vmem [shape: f32[768,128], index: 9, kind: input, shape index: {}]   ;;  %s11271_s10 = inlined_call_operand.vmem [shape: f32[1,128], index: 10, kind: input, shape index: {}]   ;;  %s11272_s11 = inlined_call_operand.hbm [shape: f32[2,128], index: 11, kind: output, shape index: {}]  }
   0x1   :  { %v42_v0 = vld [vmem:[%s11261_s0 + $0x8] sm:$0xff]  ;;  %v44_v2 = vld [vmem:[%s11261_s0 + $0x18] sm:$0xff]  ;;  %v41_v5 = vld [vmem:[%s11261_s0] sm:$0xff]  ;;  %181 = vmatprep.mubr.f32.mxu0 %v6980_v7  ;;  %319 = vst [vmem:[#allocation2] sm:$0xff] %v6980_v7  ;;  %258 = vmatprep.mubr.f32.mxu1 %v6980_v7 }
   0x2   :  { %v46_v1 = vld [vmem:[%s11261_s0 + $0x28] sm:$0xff]  ;;  %v48_v4 = vld [vmem:[%s11261_s0 + $0x38] sm:$0xff]  ;;  %v45_v6 = vld [vmem:[%s11261_s0 + $0x20] sm:$0xff]  ;;  %320 = vst [vmem:[#allocation2 + $0x8] sm:$0xff] %v6980_v7  ;;  %6903 = vset.pattern.permute.xlu0 %v6981_v13  ;;  %6904 = vset.pattern.permute.xlu1 %v6981_v13 }
   0x3   :  { %v5554_v3 = vpack.c.bf16 %v46_v1, %v42_v0  ;;  %321 = vst [vmem:[#allocation2 + $0x10] sm:$0xff] %v6980_v7  ;;  %322 = vst [vmem:[#allocation2 + $0x18] sm:$0xff] %v6980_v7  ;;  %v5586_v8 = vpack.c.bf16 %v48_v4, %v44_v2  ;;  %v5556_v9 = vpack.c.bf16 %v45_v6, %v41_v5  ;;  %v43_v10 = vld [vmem:[%s11261_s0 + $0x10] sm:$0xff]  ;;  %v50_v12 = vld [vmem:[%s11261_s0 + $0x48] sm:$0xff] }
   0x4   :  { %323 = vst [vmem:[#allocation2 + $0x20] sm:$0xff] %v6980_v7  ;;  %324 = vst [vmem:[#allocation2 + $0x28] sm:$0xff] %v6980_v7  ;;  %v47_v11 = vld [vmem:[%s11261_s0 + $0x30] sm:$0xff]  ;;  %v54_v15 = vld [vmem:[%s11261_s0 + $0x68] sm:$0xff] }
   0x5   :  { %325 = vst [vmem:[#allocation2 + $0x30] sm:$0xff] %v6980_v7  ;;  %326 = vst [vmem:[#allocation2 + $0x38] sm:$0xff] %v6980_v7  ;;  %5555 = vmatprep.subr.bf16.mxu0 %v5554_v3  ;;  %v5588_v14 = vpack.c.bf16 %v47_v11, %v43_v10  ;;  %v52_v16 = vld [vmem:[%s11261_s0 + $0x58] sm:$0xff]  ;;  %5587 = vmatprep.subr.bf16.mxu1 %v5586_v8  ;;  %v5558_v18 = vpack.c.bf16 %v54_v15, %v50_v12  ;;  %v49_v20 = vld [vmem:[%s11261_s0 + $0x40] sm:$0xff] }
   0x6   :  { %327 = vst [vmem:[#allocation2 + $0x40] sm:$0xff] %v6980_v7  ;;  %328 = vst [vmem:[#allocation2 + $0x48] sm:$0xff] %v6980_v7  ;;  %v56_v17 = vld [vmem:[%s11261_s0 + $0x78] sm:$0xff]  ;;  %5557 = vmatpush1.bf16.msra.mxu0 %v5556_v9  ;;  %v53_v21 = vld [vmem:[%s11261_s0 + $0x60] sm:$0xff] }
   0x7   :  { %329 = vst [vmem:[#allocation2 + $0x50] sm:$0xff] %v6980_v7  ;;  %330 = vst [vmem:[#allocation2 + $0x58] sm:$0xff] %v6980_v7  ;;  %v5590_v19 = vpack.c.bf16 %v56_v17, %v52_v16  ;;  %v51_v22 = vld [vmem:[%s11261_s0 + $0x50] sm:$0xff]  ;;  %5589 = vmatpush1.bf16.msra.mxu1 %v5588_v14  ;;  %v5560_v23 = vpack.c.bf16 %v53_v21, %v49_v20  ;;  %v58_v25 = vld [vmem:[%s11261_s0 + $0x88] sm:$0xff]  ;;  %5559 = vmatprep.subr.bf16.mxu0 %v5558_v18 }
   0x8   :  { %331 = vst [vmem:[#allocation2 + $0x60] sm:$0xff] %v6980_v7  ;;  %332 = vst [vmem:[#allocation2 + $0x68] sm:$0xff] %v6980_v7  ;;  %v55_v24 = vld [vmem:[%s11261_s0 + $0x70] sm:$0xff]  ;;  %v62_v26 = vld [vmem:[%s11261_s0 + $0xa8] sm:$0xff] }
   0x9   :  { %333 = vst [vmem:[#allocation2 + $0x70] sm:$0xff] %v6980_v7  ;;  %334 = vst [vmem:[#allocation2 + $0x78] sm:$0xff] %v6980_v7  ;;  %5591 = vmatprep.subr.bf16.mxu1 %v5590_v19  ;;  %v5592_v27 = vpack.c.bf16 %v55_v24, %v51_v22  ;;  %v5562_v28 = vpack.c.bf16 %v62_v26, %v58_v25  ;;  %v60_v29 = vld [vmem:[%s11261_s0 + $0x98] sm:$0xff]  ;;  %v57_v31 = vld [vmem:[%s11261_s0 + $0x80] sm:$0xff] }
   0xa   :  { %335 = vst [vmem:[#allocation2 + $0x80] sm:$0xff] %v6980_v7  ;;  %336 = vst [vmem:[#allocation2 + $0x88] sm:$0xff] %v6980_v7  ;;  %v64_v30 = vld [vmem:[%s11261_s0 + $0xb8] sm:$0xff]  ;;  %v61_v33 = vld [vmem:[%s11261_s0 + $0xa0] sm:$0xff]  ;;  %5561 = vmatpush1.bf16.msra.mxu0 %v5560_v23 }
   0xb   :  { %337 = vst [vmem:[#allocation2 + $0x90] sm:$0xff] %v6980_v7  ;;  %338 = vst [vmem:[#allocation2 + $0x98] sm:$0xff] %v6980_v7  ;;  %v5594_v32 = vpack.c.bf16 %v64_v30, %v60_v29  ;;  %v59_v34 = vld [vmem:[%s11261_s0 + $0x90] sm:$0xff]  ;;  %v5564_v36 = vpack.c.bf16 %v61_v33, %v57_v31  ;;  %v66_v37 = vld [vmem:[%s11261_s0 + $0xc8] sm:$0xff]  ;;  %5593 = vmatpush1.bf16.msra.mxu1 %v5592_v27  ;;  %5563 = vmatprep.subr.bf16.mxu0 %v5562_v28 }
   0xc   :  { %339 = vst [vmem:[#allocation2 + $0xa0] sm:$0xff] %v6980_v7  ;;  %340 = vst [vmem:[#allocation2 + $0xa8] sm:$0xff] %v6980_v7  ;;  %v63_v35 = vld [vmem:[%s11261_s0 + $0xb0] sm:$0xff]  ;;  %v70_v38 = vld [vmem:[%s11261_s0 + $0xe8] sm:$0xff] }
   0xd   :  { %341 = vst [vmem:[#allocation2 + $0xb0] sm:$0xff] %v6980_v7  ;;  %342 = vst [vmem:[#allocation2 + $0xb8] sm:$0xff] %v6980_v7  ;;  %v68_v39 = vld [vmem:[%s11261_s0 + $0xd8] sm:$0xff]  ;;  %v5596_v40 = vpack.c.bf16 %v63_v35, %v59_v34  ;;  %v5566_v41 = vpack.c.bf16 %v70_v38, %v66_v37  ;;  %v65_v43 = vld [vmem:[%s11261_s0 + $0xc0] sm:$0xff]  ;;  %5595 = vmatprep.subr.bf16.mxu1 %v5594_v32 }
   0xe   :  { %343 = vst [vmem:[#allocation2 + $0xc0] sm:$0xff] %v6980_v7  ;;  %344 = vst [vmem:[#allocation2 + $0xc8] sm:$0xff] %v6980_v7  ;;  %v72_v42 = vld [vmem:[%s11261_s0 + $0xf8] sm:$0xff]  ;;  %v69_v44 = vld [vmem:[%s11261_s0 + $0xe0] sm:$0xff]  ;;  %5565 = vmatpush1.bf16.msra.mxu0 %v5564_v36 }
   0xf   :  { %345 = vst [vmem:[#allocation2 + $0xd0] sm:$0xff] %v6980_v7  ;;  %346 = vst [vmem:[#allocation2 + $0xd8] sm:$0xff] %v6980_v7  ;;  %v5598_v45 = vpack.c.bf16 %v72_v42, %v68_v39  ;;  %v67_v46 = vld [vmem:[%s11261_s0 + $0xd0] sm:$0xff]  ;;  %v74_v48 = vld [vmem:[%s11261_s0 + $0x108] sm:$0xff]  ;;  %v5568_v52 = vpack.c.bf16 %v69_v44, %v65_v43  ;;  %5597 = vmatpush1.bf16.msra.mxu1 %v5596_v40  ;;  %5567 = vmatprep.subr.bf16.mxu0 %v5566_v41 }
  0x10   :  { %347 = vst [vmem:[#allocation2 + $0xe0] sm:$0xff] %v6980_v7  ;;  %348 = vst [vmem:[#allocation2 + $0xe8] sm:$0xff] %v6980_v7  ;;  %v71_v47 = vld [vmem:[%s11261_s0 + $0xf0] sm:$0xff]  ;;  %v78_v49 = vld [vmem:[%s11261_s0 + $0x128] sm:$0xff] }
  0x11   :  { %349 = vst [vmem:[#allocation2 + $0xf0] sm:$0xff] %v6980_v7  ;;  %350 = vst [vmem:[#allocation2 + $0xf8] sm:$0xff] %v6980_v7  ;;  %v76_v50 = vld [vmem:[%s11261_s0 + $0x118] sm:$0xff]  ;;  %v5600_v53 = vpack.c.bf16 %v71_v47, %v67_v46  ;;  %v5570_v54 = vpack.c.bf16 %v78_v49, %v74_v48  ;;  %v73_v55 = vld [vmem:[%s11261_s0 + $0x100] sm:$0xff]  ;;  %5599 = vmatprep.subr.bf16.mxu1 %v5598_v45 }
  0x12   :  { %351 = vst [vmem:[#allocation2 + $0x100] sm:$0xff] %v6980_v7  ;;  %352 = vst [vmem:[#allocation2 + $0x108] sm:$0xff] %v6980_v7  ;;  %v80_v51 = vld [vmem:[%s11261_s0 + $0x138] sm:$0xff]  ;;  %v77_v56 = vld [vmem:[%s11261_s0 + $0x120] sm:$0xff]  ;;  %5569 = vmatpush1.bf16.msra.mxu0 %v5568_v52 }
  0x13   :  { %353 = vst [vmem:[#allocation2 + $0x110] sm:$0xff] %v6980_v7  ;;  %354 = vst [vmem:[#allocation2 + $0x118] sm:$0xff] %v6980_v7  ;;  %v75_v57 = vld [vmem:[%s11261_s0 + $0x110] sm:$0xff]  ;;  %v5602_v58 = vpack.c.bf16 %v80_v51, %v76_v50  ;;  %v82_v60 = vld [vmem:[%s11261_s0 + $0x148] sm:$0xff]  ;;  %v5572_v0 = vpack.c.bf16 %v77_v56, %v73_v55  ;;  %5601 = vmatpush1.bf16.msra.mxu1 %v5600_v53  ;;  %5571 = vmatprep.subr.bf16.mxu0 %v5570_v54 }
  0x14   :  { %355 = vst [vmem:[#allocation2 + $0x120] sm:$0xff] %v6980_v7  ;;  %356 = vst [vmem:[#allocation2 + $0x128] sm:$0xff] %v6980_v7  ;;  %v79_v59 = vld [vmem:[%s11261_s0 + $0x130] sm:$0xff]  ;;  %v86_v61 = vld [vmem:[%s11261_s0 + $0x168] sm:$0xff] }
  0x15   :  { %357 = vst [vmem:[#allocation2 + $0x130] sm:$0xff] %v6980_v7  ;;  %v84_v62 = vld [vmem:[%s11261_s0 + $0x158] sm:$0xff]  ;;  %v5604_v1 = vpack.c.bf16 %v79_v59, %v75_v57  ;;  %v5574_v2 = vpack.c.bf16 %v86_v61, %v82_v60  ;;  %v81_v3 = vld [vmem:[%s11261_s0 + $0x140] sm:$0xff]  ;;  %v83_v5 = vld [vmem:[%s11261_s0 + $0x150] sm:$0xff]  ;;  %5603 = vmatprep.subr.bf16.mxu1 %v5602_v58 }
  0x16   :  { %v88_v63 = vld [vmem:[%s11261_s0 + $0x178] sm:$0xff]  ;;  %v85_v4 = vld [vmem:[%s11261_s0 + $0x160] sm:$0xff]  ;;  %v87_v8 = vld [vmem:[%s11261_s0 + $0x170] sm:$0xff]  ;;  %5573 = vmatpush1.bf16.msra.mxu0 %v5572_v0 }
  0x17   :  { %v5606_v6 = vpack.c.bf16 %v88_v63, %v84_v62  ;;  %v90_v9 = vld [vmem:[%s11261_s0 + $0x188] sm:$0xff]  ;;  %v92_v11 = vld [vmem:[%s11261_s0 + $0x198] sm:$0xff]  ;;  %v5576_v13 = vpack.c.bf16 %v85_v4, %v81_v3  ;;  %v89_v14 = vld [vmem:[%s11261_s0 + $0x180] sm:$0xff]  ;;  %5605 = vmatpush1.bf16.msra.mxu1 %v5604_v1  ;;  %5575 = vmatprep.subr.bf16.mxu0 %v5574_v2  ;;  %v5608_v15 = vpack.c.bf16 %v87_v8, %v83_v5 }
  0x18   :  { %v94_v10 = vld [vmem:[%s11261_s0 + $0x1a8] sm:$0xff]  ;;  %v96_v12 = vld [vmem:[%s11261_s0 + $0x1b8] sm:$0xff]  ;;  %v93_v17 = vld [vmem:[%s11261_s0 + $0x1a0] sm:$0xff] }
  0x19   :  { %v5578_v16 = vpack.c.bf16 %v94_v10, %v90_v9  ;;  %v91_v18 = vld [vmem:[%s11261_s0 + $0x190] sm:$0xff]  ;;  %5607 = vmatprep.subr.bf16.mxu1 %v5606_v6  ;;  %v5610_v20 = vpack.c.bf16 %v96_v12, %v92_v11  ;;  %v98_v21 = vld [vmem:[%s11261_s0 + $0x1c8] sm:$0xff]  ;;  %v105_v23 = vld [vmem:[%s11263_s2] sm:$0xff]  ;;  %v5580_v26 = vpack.c.bf16 %v93_v17, %v89_v14 }
  0x1a   :  { %v95_v19 = vld [vmem:[%s11261_s0 + $0x1b0] sm:$0xff]  ;;  %v102_v22 = vld [vmem:[%s11261_s0 + $0x1e8] sm:$0xff]  ;;  %v100_v24 = vld [vmem:[%s11261_s0 + $0x1d8] sm:$0xff]  ;;  %109 = vperm.xlu0 %6903, %v105_v23   ;;  %5577 = vmatpush1.bf16.msra.mxu0 %v5576_v13 }
  0x1b   :  { %v104_v25 = vld [vmem:[%s11261_s0 + $0x1f8] sm:$0xff]  ;;  %v106_v27 = vld [vmem:[%s11263_s2 + $0x8] sm:$0xf]  ;;  %5609 = vmatpush1.bf16.msra.mxu1 %v5608_v15  ;;  %5579 = vmatprep.subr.bf16.mxu0 %v5578_v16  ;;  %v5612_v28 = vpack.c.bf16 %v95_v19, %v91_v18  ;;  %v5582_v29 = vpack.c.bf16 %v102_v22, %v98_v21  ;;  %v97_v30 = vld [vmem:[%s11261_s0 + $0x1c0] sm:$0xff] }
  0x1c   :  { %v101_v31 = vld [vmem:[%s11261_s0 + $0x1e0] sm:$0xff]  ;;  %v99_v32 = vld [vmem:[%s11261_s0 + $0x1d0] sm:$0xff]  ;;  %5611 = vmatprep.subr.bf16.mxu1 %v5610_v20  ;;  %v5614_v33 = vpack.c.bf16 %v104_v25, %v100_v24  ;;  %v368_v35 = vld [vmem:[%s11264_s3 + $0x8] sm:$0xff] }
  0x1d   :  { %v103_v34 = vld [vmem:[%s11261_s0 + $0x1f0] sm:$0xff]  ;;  %v370_v37 = vld [vmem:[%s11264_s3 + $0x18] sm:$0xff]  ;;  %v383_v38 = vld [vmem:[%s11264_s3 + $0x80] sm:$0xff]  ;;  %v5584_v39 = vpack.c.bf16 %v101_v31, %v97_v30 }
  0x1e   :  { %v381_v36 = vld [vmem:[%s11264_s3 + $0x70] sm:$0xff]  ;;  %114 = vperm.xlu0 %6903, %v106_v27   ;;  %5581 = vmatpush1.bf16.msra.mxu0 %v5580_v26  ;;  %v5616_v40 = vpack.c.bf16 %v103_v34, %v99_v32  ;;  %v5682_v42 = vpack.c.bf16 %v383_v38, %v370_v37  ;;  %v367_v43 = vld [vmem:[%s11264_s3] sm:$0xff]  ;;  %v380_v44 = vld [vmem:[%s11264_s3 + $0x68] sm:$0xff] }
  0x1f   :  { %5613 = vmatpush1.bf16.msra.mxu1 %v5612_v28  ;;  %5583 = vmatprep.subr.bf16.mxu0 %v5582_v29  ;;  %v5618_v41 = vpack.c.bf16 %v381_v36, %v368_v35  ;;  %v369_v45 = vld [vmem:[%s11264_s3 + $0x10] sm:$0xff]  ;;  %v382_v46 = vld [vmem:[%s11264_s3 + $0x78] sm:$0xff]  ;;  %v407_v48 = vld [vmem:[%s11264_s3 + $0x140] sm:$0xff]  ;;  %v5620_v52 = vpack.c.bf16 %v380_v44, %v367_v43 }
  0x20   :  { %5615 = vmatprep.subr.bf16.mxu1 %v5614_v33  ;;  %v394_v47 = vld [vmem:[%s11264_s3 + $0xd8] sm:$0xff]  ;;  %v39_v49 = vld [vmem:[%s11262_s1] sm:$0xff]  ;;  %v396_v50 = vld [vmem:[%s11264_s3 + $0xe8] sm:$0xff]  ;;  %v5684_v53 = vpack.c.bf16 %v382_v46, %v369_v45 }
  0x21   :  { %v409_v51 = vld [vmem:[%s11264_s3 + $0x150] sm:$0xff]  ;;  %v5622_v54 = vpack.c.bf16 %v407_v48, %v394_v47  ;;  %v406_v56 = vld [vmem:[%s11264_s3 + $0x138] sm:$0xff]  ;;  %v395_v57 = vld [vmem:[%s11264_s3 + $0xe0] sm:$0xff] }
  0x22   :  { %5585 = vmatpush1.bf16.msra.mxu0 %v5584_v39  ;;  %v393_v55 = vld [vmem:[%s11264_s3 + $0xd0] sm:$0xff]  ;;  %v5686_v58 = vpack.c.bf16 %v409_v51, %v396_v50  ;;  %v408_v59 = vld [vmem:[%s11264_s3 + $0x148] sm:$0xff]  ;;  %v422_v63 = vld [vmem:[%s11264_s3 + $0x1b8] sm:$0xff] }
  0x23   :  { %5617 = vmatpush1.bf16.msra.mxu1 %v5616_v40  ;;  %5619 = vmatprep.subr.bf16.mxu0 %v5618_v41  ;;  %v420_v60 = vld [vmem:[%s11264_s3 + $0x1a8] sm:$0xff]  ;;  %v433_v61 = vld [vmem:[%s11264_s3 + $0x210] sm:$0xff]  ;;  %v435_v0 = vld [vmem:[%s11264_s3 + $0x220] sm:$0xff]  ;;  %v5624_v1 = vpack.c.bf16 %v406_v56, %v393_v55  ;;  %v5688_v2 = vpack.c.bf16 %v408_v59, %v395_v57 }
  0x24   :  { %5683 = vmatprep.subr.bf16.mxu1 %v5682_v42  ;;  %v40_v62 = vld [vmem:[%s11262_s1 + $0x8] sm:$0xf]  ;;  %v5626_v3 = vpack.c.bf16 %v433_v61, %v420_v60  ;;  %v419_v4 = vld [vmem:[%s11264_s3 + $0x1a0] sm:$0xff]  ;;  %v421_v6 = vld [vmem:[%s11264_s3 + $0x1b0] sm:$0xff] }
  0x25   :  { %182 = vmatmul.mubr.f32.vlgmr.msra.gmra.mrb[0].mxu0 %v39_v49  ;;  %v432_v5 = vld [vmem:[%s11264_s3 + $0x208] sm:$0xff]  ;;  %v434_v8 = vld [vmem:[%s11264_s3 + $0x218] sm:$0xff]  ;;  %v459_v10 = vld [vmem:[%s11264_s3 + $0x2e0] sm:$0xff] }
  0x26   :  { %259 = vmatmul.mubr.f32.vlgmr.msra.gmra.mrb[0].mxu1 %v39_v49  ;;  %187 = vmatprep.mubr.f32.mxu0 %v6980_v7  ;;  %v446_v9 = vld [vmem:[%s11264_s3 + $0x278] sm:$0xff]  ;;  %v448_v11 = vld [vmem:[%s11264_s3 + $0x288] sm:$0xff]  ;;  %v461_v12 = vld [vmem:[%s11264_s3 + $0x2f0] sm:$0xff]  ;;  %v5628_v13 = vpack.c.bf16 %v432_v5, %v419_v4  ;;  %v5692_v14 = vpack.c.bf16 %v434_v8, %v421_v6 }
  0x27   :  { %264 = vmatprep.mubr.f32.mxu1 %v6980_v7  ;;  %5621 = vmatpush1.bf16.msra.mxu0 %v5620_v52  ;;  %v5690_v7 = vpack.c.bf16 %v435_v0, %v422_v63  ;;  %v5630_v15 = vpack.c.bf16 %v459_v10, %v446_v9  ;;  %v445_v16 = vld [vmem:[%s11264_s3 + $0x270] sm:$0xff]  ;;  %v458_v17 = vld [vmem:[%s11264_s3 + $0x2d8] sm:$0xff]  ;;  %v447_v18 = vld [vmem:[%s11264_s3 + $0x280] sm:$0xff]  ;;  %v5694_v19 = vpack.c.bf16 %v461_v12, %v448_v11 }
  0x28   :  { %5685 = vmatpush1.bf16.msra.mxu1 %v5684_v53  ;;  %5623 = vmatprep.subr.bf16.mxu0 %v5622_v54  ;;  %v460_v20 = vld [vmem:[%s11264_s3 + $0x2e8] sm:$0xff]  ;;  %v485_v22 = vld [vmem:[%s11264_s3 + $0x3b0] sm:$0xff]  ;;  %v474_v23 = vld [vmem:[%s11264_s3 + $0x358] sm:$0xff] }
  0x29   :  { %188 = vmatmul.mubr.f32.gmra.mrb[2].mxu0 %v40_v62  ;;  %5687 = vmatprep.subr.bf16.mxu1 %v5686_v58  ;;  %v472_v21 = vld [vmem:[%s11264_s3 + $0x348] sm:$0xff]  ;;  %v487_v24 = vld [vmem:[%s11264_s3 + $0x3c0] sm:$0xff] }
  0x2a   :  { %265 = vmatmul.mubr.f32.gmra.mrb[2].mxu1 %v40_v62 }
  0x2b   :  { %5625 = vmatpush1.bf16.msra.mxu0 %v5624_v1 }
  0x2c   :  { %5689 = vmatpush1.bf16.msra.mxu1 %v5688_v2  ;;  %5627 = vmatprep.subr.bf16.mxu0 %v5626_v3 }
  0x2d   :  { %5691 = vmatprep.subr.bf16.mxu1 %v5690_v7 }
  0x2e   :  { %16 = vsyncpa [#allocation5], 0  ;;  %v5632_v25 = vpack.c.bf16 %v458_v17, %v445_v16  ;;  %v5696_v26 = vpack.c.bf16 %v460_v20, %v447_v18  ;;  %v5634_v27 = vpack.c.bf16 %v485_v22, %v472_v21  ;;  %v471_v28 = vld [vmem:[%s11264_s3 + $0x340] sm:$0xff]  ;;  %v484_v29 = vld [vmem:[%s11264_s3 + $0x3a8] sm:$0xff]  ;;  %v5698_v31 = vpack.c.bf16 %v487_v24, %v474_v23  ;;  %s6982_s12 = smov 64  }
  0x2f   :  { %5629 = vmatpush1.bf16.msra.mxu0 %v5628_v13  ;;  %v473_v30 = vld [vmem:[%s11264_s3 + $0x350] sm:$0xff]  ;;  %v486_v32 = vld [vmem:[%s11264_s3 + $0x3b8] sm:$0xff]  ;;  %v511_v34 = vld [vmem:[%s11264_s3 + $0x480] sm:$0xff]  ;;  %v5636_v37 = vpack.c.bf16 %v484_v29, %v471_v28  ;;  %vm1320_vm0 = vcmask 523264   ;;  %vm1322_vm1 = vcmask 519168   ;;  %vm2429_vm2 = vcmask 1048064  }
  0x30   :  { %5693 = vmatpush1.bf16.msra.mxu1 %v5692_v14  ;;  %5631 = vmatprep.subr.bf16.mxu0 %v5630_v15  ;;  %v498_v33 = vld [vmem:[%s11264_s3 + $0x418] sm:$0xff]  ;;  %v500_v35 = vld [vmem:[%s11264_s3 + $0x428] sm:$0xff]  ;;  %v513_v36 = vld [vmem:[%s11264_s3 + $0x490] sm:$0xff]  ;;  %v5700_v38 = vpack.c.bf16 %v486_v32, %v473_v30  ;;  %vm2431_vm3 = vcmask 1043968   ;;  %vm4629_vm4 = vcmask 516096   ;;  %vm4648_vm5 = vcmask 1040896  }
  0x31   :  { %5695 = vmatprep.subr.bf16.mxu1 %v5694_v19  ;;  %v5638_v39 = vpack.c.bf16 %v511_v34, %v498_v33  ;;  %v497_v40 = vld [vmem:[%s11264_s3 + $0x410] sm:$0xff]  ;;  %v510_v41 = vld [vmem:[%s11264_s3 + $0x478] sm:$0xff]  ;;  %v499_v42 = vld [vmem:[%s11264_s3 + $0x420] sm:$0xff]  ;;  %v5702_v43 = vpack.c.bf16 %v513_v36, %v500_v35 }
  0x32   :  { %v512_v44 = vld [vmem:[%s11264_s3 + $0x488] sm:$0xff]  ;;  %v537_v46 = vld [vmem:[%s11264_s3 + $0x550] sm:$0xff]  ;;  %v526_v47 = vld [vmem:[%s11264_s3 + $0x4f8] sm:$0xff]  ;;  %v5640_v49 = vpack.c.bf16 %v510_v41, %v497_v40 }
  0x33   :  { %5633 = vmatpush1.bf16.msra.mxu0 %v5632_v25  ;;  %v524_v45 = vld [vmem:[%s11264_s3 + $0x4e8] sm:$0xff]  ;;  %v539_v48 = vld [vmem:[%s11264_s3 + $0x560] sm:$0xff]  ;;  %v5704_v50 = vpack.c.bf16 %v512_v44, %v499_v42  ;;  %v525_v54 = vld [vmem:[%s11264_s3 + $0x4f0] sm:$0xff] }
  0x34   :  { %5697 = vmatpush1.bf16.msra.mxu1 %v5696_v26  ;;  %5635 = vmatprep.subr.bf16.mxu0 %v5634_v27  ;;  %v5642_v51 = vpack.c.bf16 %v537_v46, %v524_v45  ;;  %v523_v52 = vld [vmem:[%s11264_s3 + $0x4e0] sm:$0xff]  ;;  %v536_v53 = vld [vmem:[%s11264_s3 + $0x548] sm:$0xff]  ;;  %v5706_v55 = vpack.c.bf16 %v539_v48, %v526_v47  ;;  %v538_v56 = vld [vmem:[%s11264_s3 + $0x558] sm:$0xff] }
  0x35   :  { %5699 = vmatprep.subr.bf16.mxu1 %v5698_v31  ;;  %v550_v57 = vld [vmem:[%s11264_s3 + $0x5b8] sm:$0xff]  ;;  %v563_v58 = vld [vmem:[%s11264_s3 + $0x620] sm:$0xff]  ;;  %v552_v59 = vld [vmem:[%s11264_s3 + $0x5c8] sm:$0xff]  ;;  %v5644_v61 = vpack.c.bf16 %v536_v53, %v523_v52  ;;  %v5708_v62 = vpack.c.bf16 %v538_v56, %v525_v54 }
  0x36   :  { %v565_v60 = vld [vmem:[%s11264_s3 + $0x630] sm:$0xff]  ;;  %v5646_v63 = vpack.c.bf16 %v563_v58, %v550_v57  ;;  %v562_v1 = vld [vmem:[%s11264_s3 + $0x618] sm:$0xff]  ;;  %v551_v3 = vld [vmem:[%s11264_s3 + $0x5c0] sm:$0xff] }
  0x37   :  { %5637 = vmatpush1.bf16.msra.mxu0 %v5636_v37  ;;  %v549_v0 = vld [vmem:[%s11264_s3 + $0x5b0] sm:$0xff]  ;;  %v5710_v2 = vpack.c.bf16 %v565_v60, %v552_v59  ;;  %v564_v4 = vld [vmem:[%s11264_s3 + $0x628] sm:$0xff]  ;;  %v578_v9 = vld [vmem:[%s11264_s3 + $0x698] sm:$0xff] }
  0x38   :  { %5701 = vmatpush1.bf16.msra.mxu1 %v5700_v38  ;;  %5639 = vmatprep.subr.bf16.mxu0 %v5638_v39  ;;  %v5648_v5 = vpack.c.bf16 %v562_v1, %v549_v0  ;;  %v5712_v6 = vpack.c.bf16 %v564_v4, %v551_v3  ;;  %v576_v7 = vld [vmem:[%s11264_s3 + $0x688] sm:$0xff]  ;;  %v589_v8 = vld [vmem:[%s11264_s3 + $0x6f0] sm:$0xff]  ;;  %v591_v11 = vld [vmem:[%s11264_s3 + $0x700] sm:$0xff] }
  0x39   :  { %5703 = vmatprep.subr.bf16.mxu1 %v5702_v43  ;;  %v5650_v10 = vpack.c.bf16 %v589_v8, %v576_v7  ;;  %v5714_v12 = vpack.c.bf16 %v591_v11, %v578_v9  ;;  %v575_v13 = vld [vmem:[%s11264_s3 + $0x680] sm:$0xff]  ;;  %v588_v14 = vld [vmem:[%s11264_s3 + $0x6e8] sm:$0xff]  ;;  %v577_v15 = vld [vmem:[%s11264_s3 + $0x690] sm:$0xff] }
  0x3a   :  { %v5652_v16 = vpack.c.bf16 %v588_v14, %v575_v13  ;;  %v590_v17 = vld [vmem:[%s11264_s3 + $0x6f8] sm:$0xff]  ;;  %v615_v20 = vld [vmem:[%s11264_s3 + $0x7c0] sm:$0xff]  ;;  %v604_v21 = vld [vmem:[%s11264_s3 + $0x768] sm:$0xff] }
  0x3b   :  { %5641 = vmatpush1.bf16.msra.mxu0 %v5640_v49  ;;  %v5716_v18 = vpack.c.bf16 %v590_v17, %v577_v15  ;;  %v602_v19 = vld [vmem:[%s11264_s3 + $0x758] sm:$0xff]  ;;  %v617_v23 = vld [vmem:[%s11264_s3 + $0x7d0] sm:$0xff]  ;;  %v603_v28 = vld [vmem:[%s11264_s3 + $0x760] sm:$0xff] }
  0x3c   :  { %5705 = vmatpush1.bf16.msra.mxu1 %v5704_v50  ;;  %5643 = vmatprep.subr.bf16.mxu0 %v5642_v51  ;;  %v5654_v22 = vpack.c.bf16 %v615_v20, %v602_v19  ;;  %v601_v24 = vld [vmem:[%s11264_s3 + $0x750] sm:$0xff]  ;;  %v614_v25 = vld [vmem:[%s11264_s3 + $0x7b8] sm:$0xff]  ;;  %v5718_v26 = vpack.c.bf16 %v617_v23, %v604_v21  ;;  %v616_v29 = vld [vmem:[%s11264_s3 + $0x7c8] sm:$0xff] }
  0x3d   :  { %5707 = vmatprep.subr.bf16.mxu1 %v5706_v55  ;;  %v5656_v27 = vpack.c.bf16 %v614_v25, %v601_v24  ;;  %v5720_v30 = vpack.c.bf16 %v616_v29, %v603_v28  ;;  %v628_v31 = vld [vmem:[%s11264_s3 + $0x828] sm:$0xff]  ;;  %v641_v32 = vld [vmem:[%s11264_s3 + $0x890] sm:$0xff]  ;;  %v630_v33 = vld [vmem:[%s11264_s3 + $0x838] sm:$0xff] }
  0x3e   :  { %v5658_v34 = vpack.c.bf16 %v641_v32, %v628_v31  ;;  %v643_v35 = vld [vmem:[%s11264_s3 + $0x8a0] sm:$0xff]  ;;  %v640_v37 = vld [vmem:[%s11264_s3 + $0x888] sm:$0xff]  ;;  %v629_v40 = vld [vmem:[%s11264_s3 + $0x830] sm:$0xff] }
  0x3f   :  { %5645 = vmatpush1.bf16.msra.mxu0 %v5644_v61  ;;  %v627_v36 = vld [vmem:[%s11264_s3 + $0x820] sm:$0xff]  ;;  %v5722_v38 = vpack.c.bf16 %v643_v35, %v630_v33  ;;  %v642_v41 = vld [vmem:[%s11264_s3 + $0x898] sm:$0xff]  ;;  %v656_v45 = vld [vmem:[%s11264_s3 + $0x908] sm:$0xff] }
  0x40   :  { %5709 = vmatpush1.bf16.msra.mxu1 %v5708_v62  ;;  %5647 = vmatprep.subr.bf16.mxu0 %v5646_v63  ;;  %v5660_v39 = vpack.c.bf16 %v640_v37, %v627_v36  ;;  %v5724_v42 = vpack.c.bf16 %v642_v41, %v629_v40  ;;  %v654_v43 = vld [vmem:[%s11264_s3 + $0x8f8] sm:$0xff]  ;;  %v667_v44 = vld [vmem:[%s11264_s3 + $0x960] sm:$0xff]  ;;  %v669_v47 = vld [vmem:[%s11264_s3 + $0x970] sm:$0xff] }
  0x41   :  { %5711 = vmatprep.subr.bf16.mxu1 %v5710_v2  ;;  %v5662_v46 = vpack.c.bf16 %v667_v44, %v654_v43  ;;  %v653_v48 = vld [vmem:[%s11264_s3 + $0x8f0] sm:$0xff]  ;;  %v666_v49 = vld [vmem:[%s11264_s3 + $0x958] sm:$0xff]  ;;  %v5726_v50 = vpack.c.bf16 %v669_v47, %v656_v45  ;;  %v655_v52 = vld [vmem:[%s11264_s3 + $0x900] sm:$0xff] }
  0x42   :  { %v5664_v51 = vpack.c.bf16 %v666_v49, %v653_v48  ;;  %v668_v53 = vld [vmem:[%s11264_s3 + $0x968] sm:$0xff]  ;;  %v693_v56 = vld [vmem:[%s11264_s3 + $0xa30] sm:$0xff]  ;;  %v682_v57 = vld [vmem:[%s11264_s3 + $0x9d8] sm:$0xff] }
  0x43   :  { %5649 = vmatpush1.bf16.msra.mxu0 %v5648_v5  ;;  %v5728_v54 = vpack.c.bf16 %v668_v53, %v655_v52  ;;  %v680_v55 = vld [vmem:[%s11264_s3 + $0x9c8] sm:$0xff]  ;;  %v695_v59 = vld [vmem:[%s11264_s3 + $0xa40] sm:$0xff]  ;;  %v681_v0 = vld [vmem:[%s11264_s3 + $0x9d0] sm:$0xff] }
  0x44   :  { %5713 = vmatpush1.bf16.msra.mxu1 %v5712_v6  ;;  %5651 = vmatprep.subr.bf16.mxu0 %v5650_v10  ;;  %v5666_v58 = vpack.c.bf16 %v693_v56, %v680_v55  ;;  %v679_v60 = vld [vmem:[%s11264_s3 + $0x9c0] sm:$0xff]  ;;  %v692_v61 = vld [vmem:[%s11264_s3 + $0xa28] sm:$0xff]  ;;  %v5730_v62 = vpack.c.bf16 %v695_v59, %v682_v57  ;;  %v694_v1 = vld [vmem:[%s11264_s3 + $0xa38] sm:$0xff] }
  0x45   :  { %5715 = vmatprep.subr.bf16.mxu1 %v5714_v12  ;;  %v5668_v63 = vpack.c.bf16 %v692_v61, %v679_v60  ;;  %v5732_v2 = vpack.c.bf16 %v694_v1, %v681_v0  ;;  %v706_v3 = vld [vmem:[%s11264_s3 + $0xa98] sm:$0xff]  ;;  %v719_v4 = vld [vmem:[%s11264_s3 + $0xb00] sm:$0xff]  ;;  %v708_v5 = vld [vmem:[%s11264_s3 + $0xaa8] sm:$0xff] }
  0x46   :  { %v5670_v6 = vpack.c.bf16 %v719_v4, %v706_v3  ;;  %v721_v7 = vld [vmem:[%s11264_s3 + $0xb10] sm:$0xff]  ;;  %v718_v9 = vld [vmem:[%s11264_s3 + $0xaf8] sm:$0xff]  ;;  %v707_v12 = vld [vmem:[%s11264_s3 + $0xaa0] sm:$0xff] }
  0x47   :  { %5653 = vmatpush1.bf16.msra.mxu0 %v5652_v16  ;;  %v705_v8 = vld [vmem:[%s11264_s3 + $0xa90] sm:$0xff]  ;;  %v5734_v10 = vpack.c.bf16 %v721_v7, %v708_v5  ;;  %v720_v13 = vld [vmem:[%s11264_s3 + $0xb08] sm:$0xff]  ;;  %v734_v17 = vld [vmem:[%s11264_s3 + $0xb78] sm:$0xff] }
  0x48   :  { %5717 = vmatpush1.bf16.msra.mxu1 %v5716_v18  ;;  %5655 = vmatprep.subr.bf16.mxu0 %v5654_v22  ;;  %v5672_v11 = vpack.c.bf16 %v718_v9, %v705_v8  ;;  %v5736_v14 = vpack.c.bf16 %v720_v13, %v707_v12  ;;  %v732_v15 = vld [vmem:[%s11264_s3 + $0xb68] sm:$0xff]  ;;  %v745_v16 = vld [vmem:[%s11264_s3 + $0xbd0] sm:$0xff]  ;;  %v747_v19 = vld [vmem:[%s11264_s3 + $0xbe0] sm:$0xff] }
  0x49   :  { %5719 = vmatprep.subr.bf16.mxu1 %v5718_v26  ;;  %v5674_v18 = vpack.c.bf16 %v745_v16, %v732_v15  ;;  %v731_v20 = vld [vmem:[%s11264_s3 + $0xb60] sm:$0xff]  ;;  %v744_v21 = vld [vmem:[%s11264_s3 + $0xbc8] sm:$0xff]  ;;  %v5738_v22 = vpack.c.bf16 %v747_v19, %v734_v17  ;;  %v733_v24 = vld [vmem:[%s11264_s3 + $0xb70] sm:$0xff] }
  0x4a   :  { %v5676_v23 = vpack.c.bf16 %v744_v21, %v731_v20  ;;  %v746_v25 = vld [vmem:[%s11264_s3 + $0xbd8] sm:$0xff]  ;;  %v771_v28 = vld [vmem:[%s11264_s3 + $0xca0] sm:$0xff]  ;;  %v760_v29 = vld [vmem:[%s11264_s3 + $0xc48] sm:$0xff] }
  0x4b   :  { %5657 = vmatpush1.bf16.msra.mxu0 %v5656_v27  ;;  %v5740_v26 = vpack.c.bf16 %v746_v25, %v733_v24  ;;  %v758_v27 = vld [vmem:[%s11264_s3 + $0xc38] sm:$0xff]  ;;  %v773_v31 = vld [vmem:[%s11264_s3 + $0xcb0] sm:$0xff]  ;;  %v759_v36 = vld [vmem:[%s11264_s3 + $0xc40] sm:$0xff] }
  0x4c   :  { %5721 = vmatpush1.bf16.msra.mxu1 %v5720_v30  ;;  %5659 = vmatprep.subr.bf16.mxu0 %v5658_v34  ;;  %v5678_v30 = vpack.c.bf16 %v771_v28, %v758_v27  ;;  %v757_v32 = vld [vmem:[%s11264_s3 + $0xc30] sm:$0xff]  ;;  %v770_v33 = vld [vmem:[%s11264_s3 + $0xc98] sm:$0xff]  ;;  %v5742_v34 = vpack.c.bf16 %v773_v31, %v760_v29  ;;  %v772_v37 = vld [vmem:[%s11264_s3 + $0xca8] sm:$0xff] }
  0x4d   :  { %5723 = vmatprep.subr.bf16.mxu1 %v5722_v38  ;;  %v5680_v35 = vpack.c.bf16 %v770_v33, %v757_v32  ;;  %v5744_v38 = vpack.c.bf16 %v772_v37, %v759_v36  ;;  %v385_v40 = vld [vmem:[%s11264_s3 + $0x90] sm:$0xff]  ;;  %v374_v41 = vld [vmem:[%s11264_s3 + $0x38] sm:$0xff]  ;;  %v387_v43 = vld [vmem:[%s11264_s3 + $0xa0] sm:$0xff] }
  0x4e   :  { %v5810_v44 = vpack.c.bf16 %v387_v43, %v374_v41  ;;  %v384_v12 = vld [vmem:[%s11264_s3 + $0x88] sm:$0xff]  ;;  %v373_v13 = vld [vmem:[%s11264_s3 + $0x30] sm:$0xff]  ;;  %v398_v15 = vld [vmem:[%s11264_s3 + $0xf8] sm:$0xff] }
  0x4f   :  { %5661 = vmatpush1.bf16.msra.mxu0 %v5660_v39  ;;  %v372_v39 = vld [vmem:[%s11264_s3 + $0x28] sm:$0xff]  ;;  %v411_v16 = vld [vmem:[%s11264_s3 + $0x160] sm:$0xff]  ;;  %v397_v21 = vld [vmem:[%s11264_s3 + $0xf0] sm:$0xff] }
  0x50   :  { %5725 = vmatpush1.bf16.msra.mxu1 %v5724_v42  ;;  %5663 = vmatprep.subr.bf16.mxu0 %v5662_v46  ;;  %v5746_v42 = vpack.c.bf16 %v385_v40, %v372_v39  ;;  %v400_v17 = vld [vmem:[%s11264_s3 + $0x108] sm:$0xff]  ;;  %v410_v25 = vld [vmem:[%s11264_s3 + $0x158] sm:$0xff]  ;;  %v439_v32 = vld [vmem:[%s11264_s3 + $0x240] sm:$0xff] }
  0x51   :  { %5727 = vmatprep.subr.bf16.mxu1 %v5726_v50  ;;  %v412_v27 = vld [vmem:[%s11264_s3 + $0x168] sm:$0xff]  ;;  %v426_v31 = vld [vmem:[%s11264_s3 + $0x1d8] sm:$0xff]  ;;  %v5752_v33 = vpack.c.bf16 %v410_v25, %v397_v21  ;;  %v543_v25 = vld [vmem:[%s11264_s3 + $0x580] sm:$0xff] }
  0x52   :  { %v424_v29 = vld [vmem:[%s11264_s3 + $0x1c8] sm:$0xff]  ;;  %v438_v39 = vld [vmem:[%s11264_s3 + $0x238] sm:$0xff]  ;;  %v5818_v43 = vpack.c.bf16 %v439_v32, %v426_v31 }
  0x53   :  { %5665 = vmatpush1.bf16.msra.mxu0 %v5664_v51  ;;  %v436_v36 = vld [vmem:[%s11264_s3 + $0x228] sm:$0xff]  ;;  %v450_v40 = vld [vmem:[%s11264_s3 + $0x298] sm:$0xff] }
  0x54   :  { %5729 = vmatpush1.bf16.msra.mxu1 %v5728_v54  ;;  %5667 = vmatprep.subr.bf16.mxu0 %v5666_v58  ;;  %v528_v21 = vld [vmem:[%s11264_s3 + $0x508] sm:$0xff] }
  0x55   :  { %5731 = vmatprep.subr.bf16.mxu1 %v5730_v62 }
  0x57   :  { %5669 = vmatpush1.bf16.msra.mxu0 %v5668_v63 }
  0x58   :  { %5733 = vmatpush1.bf16.msra.mxu1 %v5732_v2  ;;  %5671 = vmatprep.subr.bf16.mxu0 %v5670_v6 }
  0x59   :  { %5735 = vmatprep.subr.bf16.mxu1 %v5734_v10 }
  0x5b   :  { %5673 = vmatpush1.bf16.msra.mxu0 %v5672_v11  ;;  %v371_v11 = vld [vmem:[%s11264_s3 + $0x20] sm:$0xff] }
  0x5c   :  { %5737 = vmatpush1.bf16.msra.mxu1 %v5736_v14  ;;  %5675 = vmatprep.subr.bf16.mxu0 %v5674_v18  ;;  %v386_v14 = vld [vmem:[%s11264_s3 + $0x98] sm:$0xff]  ;;  %v413_v18 = vld [vmem:[%s11264_s3 + $0x170] sm:$0xff]  ;;  %v5748_v19 = vpack.c.bf16 %v384_v12, %v371_v11  ;;  %v504_v11 = vld [vmem:[%s11264_s3 + $0x448] sm:$0xff] }
  0x5d   :  { %5739 = vmatprep.subr.bf16.mxu1 %v5738_v22  ;;  %v5812_v20 = vpack.c.bf16 %v386_v14, %v373_v13  ;;  %v5814_v24 = vpack.c.bf16 %v413_v18, %v400_v17  ;;  %v517_v12 = vld [vmem:[%s11264_s3 + $0x4b0] sm:$0xff] }
  0x5e   :  { %v5830_v18 = vpack.c.bf16 %v517_v12, %v504_v11 }
  0x5f   :  { %5677 = vmatpush1.bf16.msra.mxu0 %v5676_v23  ;;  %v5750_v23 = vpack.c.bf16 %v411_v16, %v398_v15  ;;  %v501_v15 = vld [vmem:[%s11264_s3 + $0x430] sm:$0xff]  ;;  %v514_v16 = vld [vmem:[%s11264_s3 + $0x498] sm:$0xff] }
  0x60   :  { %5741 = vmatpush1.bf16.msra.mxu1 %v5740_v26  ;;  %5679 = vmatprep.subr.bf16.mxu0 %v5678_v30  ;;  %v399_v26 = vld [vmem:[%s11264_s3 + $0x100] sm:$0xff]  ;;  %v437_v30 = vld [vmem:[%s11264_s3 + $0x230] sm:$0xff] }
  0x61   :  { %5743 = vmatprep.subr.bf16.mxu1 %v5742_v34  ;;  %v5816_v34 = vpack.c.bf16 %v412_v27, %v399_v26  ;;  %v5768_v26 = vpack.c.bf16 %v514_v16, %v501_v15  ;;  %v632_v15 = vld [vmem:[%s11264_s3 + $0x848] sm:$0xff]  ;;  %v645_v16 = vld [vmem:[%s11264_s3 + $0x8b0] sm:$0xff] }
  0x63   :  { %5681 = vmatpush1.bf16.msra.mxu0 %v5680_v35  ;;  %v423_v35 = vld [vmem:[%s11264_s3 + $0x1c0] sm:$0xff] }
  0x64   :  { %5745 = vmatpush1.bf16.msra.mxu1 %v5744_v38  ;;  %5747 = vmatprep.subr.bf16.mxu0 %v5746_v42  ;;  %v425_v38 = vld [vmem:[%s11264_s3 + $0x1d0] sm:$0xff]  ;;  %v5754_v42 = vpack.c.bf16 %v437_v30, %v424_v29  ;;  %v527_v29 = vld [vmem:[%s11264_s3 + $0x500] sm:$0xff]  ;;  %v540_v30 = vld [vmem:[%s11264_s3 + $0x568] sm:$0xff] }
  0x65   :  { %5811 = vmatprep.subr.bf16.mxu1 %v5810_v44  ;;  %v463_v44 = vld [vmem:[%s11264_s3 + $0x300] sm:$0xff] }
  0x99   :  { %v7688_v45 = vpop.permute.xlu0 %109 }
  0x9d   :  { %v7696_v53 = vpop.permute.xlu0 %114 }
  0xf8   :  { %v183_v46 = vpop.f32.mrb[0].mxu0 }
  0xf9   :  { %v184_v47 = vadd.f32 %v183_v46, %v7688_v45  ;;  %v7691_v48 = vpop.f32.mrb[0].mxu1  ;;  %v185_v49 = vpop.f32.mrb[1].mxu0  ;;  %v452_v46 = vld [vmem:[%s11264_s3 + $0x2a8] sm:$0xff] }
  0xfa   :  { %v186_v50 = vadd.f32 %v185_v49, %v7688_v45  ;;  %v7694_v51 = vpop.f32.mrb[1].mxu1  ;;  %v5756_v49 = vpack.c.bf16 %v436_v36, %v423_v35  ;;  %v554_v35 = vld [vmem:[%s11264_s3 + $0x5d8] sm:$0xff]  ;;  %v567_v36 = vld [vmem:[%s11264_s3 + $0x640] sm:$0xff] }
  0xfb   :  { %v271_v52 = vsub.f32 0.0, %v184_v47  ;;  %v465_v47 = vld [vmem:[%s11264_s3 + $0x310] sm:$0xff] }
  0xfc   :  { %v272_v54 = vsub.f32 0.0, %v186_v50  ;;  %v189_v55 = vpop.f32.mrb[2].mxu0  ;;  %v5820_v50 = vpack.c.bf16 %v438_v39, %v425_v38  ;;  %v556_v38 = vld [vmem:[%s11264_s3 + $0x5e8] sm:$0xff]  ;;  %v569_v39 = vld [vmem:[%s11264_s3 + $0x650] sm:$0xff] }
  0xfd   :  { %v279_v56 = vmul.f32 1.442695, %v271_v52  ;;  %v190_v57 = vadd.f32 %v189_v55, %v7696_v53  ;;  %v7699_v58 = vpop.f32.mrb[2].mxu1  ;;  %v191_v59 = vpop.f32.mrb[3].mxu0  ;;  %v449_v52 = vld [vmem:[%s11264_s3 + $0x290] sm:$0xff]  ;;  %v5758_v55 = vpack.c.bf16 %v463_v44, %v450_v40  ;;  %v5772_v40 = vpack.c.bf16 %v540_v30, %v527_v29  ;;  %v566_v44 = vld [vmem:[%s11264_s3 + $0x638] sm:$0xff] }
  0xfe   :  { %v281_v60 = vmul.f32 1.442695, %v272_v54  ;;  %v192_v61 = vadd.f32 %v191_v59, %v7696_v53  ;;  %v7702_v62 = vpop.f32.mrb[3].mxu1  ;;  %v462_v54 = vld [vmem:[%s11264_s3 + $0x2f8] sm:$0xff]  ;;  %v464_v59 = vld [vmem:[%s11264_s3 + $0x308] sm:$0xff]  ;;  %v671_v30 = vld [vmem:[%s11264_s3 + $0x980] sm:$0xff] }
  0xff   :  { %6906 = vpow2.f32 %v279_v56  ;;  %v275_v63 = vsub.f32 0.0, %v190_v57  ;;  %v5822_v56 = vpack.c.bf16 %v465_v47, %v452_v46  ;;  %v451_v57 = vld [vmem:[%s11264_s3 + $0x2a0] sm:$0xff]  ;;  %v5774_v46 = vpack.c.bf16 %v567_v36, %v554_v35  ;;  %v658_v29 = vld [vmem:[%s11264_s3 + $0x918] sm:$0xff]  ;;  %v657_v35 = vld [vmem:[%s11264_s3 + $0x910] sm:$0xff] }
 0x100   :  { %v276_v0 = vsub.f32 0.0, %v192_v61  ;;  %6908 = vpow2.f32 %v281_v60  ;;  %v476_v60 = vld [vmem:[%s11264_s3 + $0x368] sm:$0xff]  ;;  %v489_v61 = vld [vmem:[%s11264_s3 + $0x3d0] sm:$0xff]  ;;  %v5838_v47 = vpack.c.bf16 %v569_v39, %v556_v38  ;;  %v670_v36 = vld [vmem:[%s11264_s3 + $0x978] sm:$0xff]  ;;  %v5790_v38 = vpack.c.bf16 %v671_v30, %v658_v29 }
 0x101   :  { %v287_v1 = vmul.f32 1.442695, %v275_v63  ;;  %v478_v63 = vld [vmem:[%s11264_s3 + $0x378] sm:$0xff]  ;;  %v761_v29 = vld [vmem:[%s11264_s3 + $0xc50] sm:$0xff] }
 0x102   :  { %v289_v2 = vmul.f32 1.442695, %v276_v0  ;;  %v491_v0 = vld [vmem:[%s11264_s3 + $0x3e0] sm:$0xff]  ;;  %v774_v30 = vld [vmem:[%s11264_s3 + $0xcb8] sm:$0xff] }
 0x103   :  { %6910 = vpow2.f32 %v287_v1  ;;  %v5760_v1 = vpack.c.bf16 %v462_v54, %v449_v52  ;;  %v580_v52 = vld [vmem:[%s11264_s3 + $0x6a8] sm:$0xff]  ;;  %v593_v54 = vld [vmem:[%s11264_s3 + $0x710] sm:$0xff] }
 0x104   :  { %6912 = vpow2.f32 %v289_v2  ;;  %v5824_v2 = vpack.c.bf16 %v464_v59, %v451_v57 }
 0x109   :  { %v6907_v3 = vpop.eup %6906 }
 0x10a   :  { %v6909_v4 = vpop.eup %6908  ;;  %v295_v5 = vadd.f32 1.0, %v6907_v3  ;;  %v475_v3 = vld [vmem:[%s11264_s3 + $0x360] sm:$0xff] }
 0x10b   :  { %v296_v6 = vadd.f32 1.0, %v6909_v4  ;;  %v488_v4 = vld [vmem:[%s11264_s3 + $0x3c8] sm:$0xff] }
 0x10c   :  { %v5764_v13 = vpack.c.bf16 %v488_v4, %v475_v3  ;;  %v606_v3 = vld [vmem:[%s11264_s3 + $0x778] sm:$0xff]  ;;  %v619_v4 = vld [vmem:[%s11264_s3 + $0x7e0] sm:$0xff] }
 0x10d   :  { %v6911_v7 = vpop.eup %6910  ;;  %6914 = vrcp.f32 %v296_v6  ;;  %v5826_v6 = vpack.c.bf16 %v491_v0, %v478_v63  ;;  %v5778_v63 = vpack.c.bf16 %v593_v54, %v580_v52  ;;  %v5782_v11 = vpack.c.bf16 %v619_v4, %v606_v3  ;;  %v683_v52 = vld [vmem:[%s11264_s3 + $0x9e0] sm:$0xff]  ;;  %v696_v54 = vld [vmem:[%s11264_s3 + $0xa48] sm:$0xff]  ;;  %v709_v3 = vld [vmem:[%s11264_s3 + $0xab0] sm:$0xff] }
 0x10e   :  { %v6913_v8 = vpop.eup %6912  ;;  %6916 = vrcp.f32 %v295_v5  ;;  %v299_v9 = vadd.f32 1.0, %v6911_v7  ;;  %v5762_v5 = vpack.c.bf16 %v489_v61, %v476_v60  ;;  %v477_v7 = vld [vmem:[%s11264_s3 + $0x370] sm:$0xff]  ;;  %v579_v60 = vld [vmem:[%s11264_s3 + $0x6a0] sm:$0xff]  ;;  %v592_v61 = vld [vmem:[%s11264_s3 + $0x708] sm:$0xff] }
 0x10f   :  { %v300_v10 = vadd.f32 1.0, %v6913_v8  ;;  %v490_v8 = vld [vmem:[%s11264_s3 + $0x3d8] sm:$0xff] }
 0x110   :  { %v5828_v14 = vpack.c.bf16 %v490_v8, %v477_v7  ;;  %v5780_v7 = vpack.c.bf16 %v592_v61, %v579_v60  ;;  %v710_v60 = vld [vmem:[%s11264_s3 + $0xab8] sm:$0xff]  ;;  %v723_v61 = vld [vmem:[%s11264_s3 + $0xb20] sm:$0xff] }
 0x111   :  { %6918 = vrcp.f32 %v300_v10  ;;  %v515_v10 = vld [vmem:[%s11264_s3 + $0x4a0] sm:$0xff]  ;;  %v722_v4 = vld [vmem:[%s11264_s3 + $0xb18] sm:$0xff] }
 0x112   :  { %6920 = vrcp.f32 %v299_v9  ;;  %v502_v9 = vld [vmem:[%s11264_s3 + $0x438] sm:$0xff] }
 0x113   :  { %v5766_v17 = vpack.c.bf16 %v515_v10, %v502_v9  ;;  %v605_v9 = vld [vmem:[%s11264_s3 + $0x770] sm:$0xff]  ;;  %v618_v10 = vld [vmem:[%s11264_s3 + $0x7d8] sm:$0xff] }
 0x117   :  { %v7731_v22 = vpop.eup %6914 }
 0x118   :  { %v7742_v28 = vpop.eup %6916  ;;  %847 = vmatprep.mubr.f32.mxu0 %v7731_v22  ;;  %924 = vmatprep.mubr.f32.mxu1 %v7731_v22 }
 0x119   :  { %848 = vmatmul.mubr.f32.vlgmr.msra.gmra.mrb[4].mxu0 %v7742_v28  ;;  %925 = vmatmul.mubr.f32.vlgmr.msra.gmra.mrb[4].mxu1 %v7742_v28 }
 0x11a   :  { %5749 = vmatpush1.bf16.msra.mxu0 %v5748_v19  ;;  %5813 = vmatpush1.bf16.msra.mxu1 %v5812_v20  ;;  %v503_v19 = vld [vmem:[%s11264_s3 + $0x440] sm:$0xff]  ;;  %v516_v20 = vld [vmem:[%s11264_s3 + $0x4a8] sm:$0xff] }
 0x11b   :  { %v7766_v37 = vpop.eup %6918  ;;  %5751 = vmatprep.subr.bf16.mxu0 %v5750_v23  ;;  %5815 = vmatprep.subr.bf16.mxu1 %v5814_v24  ;;  %v541_v23 = vld [vmem:[%s11264_s3 + $0x570] sm:$0xff]  ;;  %v530_v24 = vld [vmem:[%s11264_s3 + $0x518] sm:$0xff]  ;;  %v5832_v27 = vpack.c.bf16 %v516_v20, %v503_v19  ;;  %v5784_v19 = vpack.c.bf16 %v618_v10, %v605_v9  ;;  %v736_v9 = vld [vmem:[%s11264_s3 + $0xb88] sm:$0xff] }
 0x11c   :  { %v7777_v41 = vpop.eup %6920  ;;  %853 = vmatprep.mubr.f32.mxu0 %v7766_v37  ;;  %930 = vmatprep.mubr.f32.mxu1 %v7766_v37  ;;  %v5770_v31 = vpack.c.bf16 %v541_v23, %v528_v21  ;;  %v5834_v32 = vpack.c.bf16 %v543_v25, %v530_v24  ;;  %v631_v21 = vld [vmem:[%s11264_s3 + $0x840] sm:$0xff]  ;;  %v644_v23 = vld [vmem:[%s11264_s3 + $0x8a8] sm:$0xff]  ;;  %v5786_v24 = vpack.c.bf16 %v645_v16, %v632_v15  ;;  %v749_v10 = vld [vmem:[%s11264_s3 + $0xbf0] sm:$0xff] }
 0x11d   :  { %854 = vmatmul.mubr.f32.gmra.mrb[6].mxu0 %v7777_v41  ;;  %931 = vmatmul.mubr.f32.gmra.mrb[6].mxu1 %v7777_v41  ;;  %v735_v15 = vld [vmem:[%s11264_s3 + $0xb80] sm:$0xff]  ;;  %v748_v16 = vld [vmem:[%s11264_s3 + $0xbe8] sm:$0xff] }
 0x11e   :  { %5753 = vmatpush1.bf16.msra.mxu0 %v5752_v33  ;;  %5817 = vmatpush1.bf16.msra.mxu1 %v5816_v34  ;;  %v529_v33 = vld [vmem:[%s11264_s3 + $0x510] sm:$0xff]  ;;  %v542_v34 = vld [vmem:[%s11264_s3 + $0x578] sm:$0xff] }
 0x11f   :  { %1001 = vmatprep.mubr.f32.mxu0 %v7731_v22  ;;  %1078 = vmatprep.mubr.f32.mxu1 %v7731_v22 }
 0x120   :  { %5755 = vmatprep.subr.bf16.mxu0 %v5754_v42  ;;  %5819 = vmatprep.subr.bf16.mxu1 %v5818_v43  ;;  %v5836_v42 = vpack.c.bf16 %v542_v34, %v529_v33  ;;  %v553_v43 = vld [vmem:[%s11264_s3 + $0x5d0] sm:$0xff]  ;;  %v5788_v33 = vpack.c.bf16 %v644_v23, %v631_v21  ;;  %v762_v21 = vld [vmem:[%s11264_s3 + $0xc58] sm:$0xff]  ;;  %v775_v23 = vld [vmem:[%s11264_s3 + $0xcc0] sm:$0xff] }
 0x121   :  { %v5776_v57 = vpack.c.bf16 %v566_v44, %v553_v43  ;;  %v684_v43 = vld [vmem:[%s11264_s3 + $0x9e8] sm:$0xff]  ;;  %v697_v44 = vld [vmem:[%s11264_s3 + $0xa50] sm:$0xff] }
 0x122   :  { %5757 = vmatpush1.bf16.msra.mxu0 %v5756_v49  ;;  %5821 = vmatpush1.bf16.msra.mxu1 %v5820_v50  ;;  %v555_v49 = vld [vmem:[%s11264_s3 + $0x5e0] sm:$0xff]  ;;  %v568_v50 = vld [vmem:[%s11264_s3 + $0x648] sm:$0xff] }
 0x123   :  { %5759 = vmatprep.subr.bf16.mxu0 %v5758_v55  ;;  %5823 = vmatprep.subr.bf16.mxu1 %v5822_v56  ;;  %v582_v55 = vld [vmem:[%s11264_s3 + $0x6b8] sm:$0xff]  ;;  %v595_v56 = vld [vmem:[%s11264_s3 + $0x720] sm:$0xff]  ;;  %v5840_v59 = vpack.c.bf16 %v568_v50, %v555_v49  ;;  %v5792_v49 = vpack.c.bf16 %v670_v36, %v657_v35  ;;  %v376_v35 = vld [vmem:[%s11264_s3 + $0x48] sm:$0xff] }
 0x124   :  { %v5842_v0 = vpack.c.bf16 %v595_v56, %v582_v55  ;;  %v5794_v55 = vpack.c.bf16 %v697_v44, %v684_v43  ;;  %v389_v36 = vld [vmem:[%s11264_s3 + $0xb0] sm:$0xff] }
 0x125   :  { %v5874_v43 = vpack.c.bf16 %v389_v36, %v376_v35  ;;  %v479_v35 = vld [vmem:[%s11264_s3 + $0x380] sm:$0xff]  ;;  %v492_v36 = vld [vmem:[%s11264_s3 + $0x3e8] sm:$0xff] }
 0x126   :  { %5761 = vmatpush1.bf16.msra.mxu0 %v5760_v1  ;;  %5825 = vmatpush1.bf16.msra.mxu1 %v5824_v2  ;;  %v581_v1 = vld [vmem:[%s11264_s3 + $0x6b0] sm:$0xff]  ;;  %v594_v2 = vld [vmem:[%s11264_s3 + $0x718] sm:$0xff] }
 0x127   :  { %5763 = vmatprep.subr.bf16.mxu0 %v5762_v5  ;;  %5827 = vmatprep.subr.bf16.mxu1 %v5826_v6  ;;  %v608_v5 = vld [vmem:[%s11264_s3 + $0x788] sm:$0xff]  ;;  %v621_v6 = vld [vmem:[%s11264_s3 + $0x7f0] sm:$0xff]  ;;  %v5844_v8 = vpack.c.bf16 %v594_v2, %v581_v1  ;;  %v5796_v1 = vpack.c.bf16 %v696_v54, %v683_v52  ;;  %v402_v52 = vld [vmem:[%s11264_s3 + $0x118] sm:$0xff] }
 0x128   :  { %v5846_v12 = vpack.c.bf16 %v621_v6, %v608_v5  ;;  %v5798_v5 = vpack.c.bf16 %v723_v61, %v710_v60  ;;  %v415_v54 = vld [vmem:[%s11264_s3 + $0x180] sm:$0xff]  ;;  %v401_v60 = vld [vmem:[%s11264_s3 + $0x110] sm:$0xff]  ;;  %v414_v61 = vld [vmem:[%s11264_s3 + $0x178] sm:$0xff] }
 0x12a   :  { %5765 = vmatpush1.bf16.msra.mxu0 %v5764_v13  ;;  %5829 = vmatpush1.bf16.msra.mxu1 %v5828_v14  ;;  %v607_v13 = vld [vmem:[%s11264_s3 + $0x780] sm:$0xff]  ;;  %v620_v14 = vld [vmem:[%s11264_s3 + $0x7e8] sm:$0xff] }
 0x12b   :  { %5767 = vmatprep.subr.bf16.mxu0 %v5766_v17  ;;  %5831 = vmatprep.subr.bf16.mxu1 %v5830_v18  ;;  %v634_v17 = vld [vmem:[%s11264_s3 + $0x858] sm:$0xff]  ;;  %v647_v18 = vld [vmem:[%s11264_s3 + $0x8c0] sm:$0xff]  ;;  %v5848_v20 = vpack.c.bf16 %v620_v14, %v607_v13  ;;  %v5800_v13 = vpack.c.bf16 %v722_v4, %v709_v3  ;;  %v428_v3 = vld [vmem:[%s11264_s3 + $0x1e8] sm:$0xff] }
 0x12c   :  { %v5850_v25 = vpack.c.bf16 %v647_v18, %v634_v17  ;;  %v5802_v17 = vpack.c.bf16 %v749_v10, %v736_v9  ;;  %v441_v4 = vld [vmem:[%s11264_s3 + $0x250] sm:$0xff]  ;;  %v427_v9 = vld [vmem:[%s11264_s3 + $0x1e0] sm:$0xff]  ;;  %v440_v10 = vld [vmem:[%s11264_s3 + $0x248] sm:$0xff] }
 0x12e   :  { %5769 = vmatpush1.bf16.msra.mxu0 %v5768_v26  ;;  %5833 = vmatpush1.bf16.msra.mxu1 %v5832_v27  ;;  %v633_v26 = vld [vmem:[%s11264_s3 + $0x850] sm:$0xff]  ;;  %v646_v27 = vld [vmem:[%s11264_s3 + $0x8b8] sm:$0xff] }
 0x12f   :  { %5771 = vmatprep.subr.bf16.mxu0 %v5770_v31  ;;  %5835 = vmatprep.subr.bf16.mxu1 %v5834_v32  ;;  %v660_v31 = vld [vmem:[%s11264_s3 + $0x928] sm:$0xff]  ;;  %v673_v32 = vld [vmem:[%s11264_s3 + $0x990] sm:$0xff]  ;;  %v5852_v34 = vpack.c.bf16 %v646_v27, %v633_v26  ;;  %v5804_v26 = vpack.c.bf16 %v748_v16, %v735_v15  ;;  %v454_v15 = vld [vmem:[%s11264_s3 + $0x2b8] sm:$0xff] }
 0x130   :  { %v5854_v39 = vpack.c.bf16 %v673_v32, %v660_v31  ;;  %v5806_v31 = vpack.c.bf16 %v775_v23, %v762_v21  ;;  %v467_v16 = vld [vmem:[%s11264_s3 + $0x320] sm:$0xff]  ;;  %v453_v21 = vld [vmem:[%s11264_s3 + $0x2b0] sm:$0xff]  ;;  %v466_v23 = vld [vmem:[%s11264_s3 + $0x318] sm:$0xff] }
 0x132   :  { %5773 = vmatpush1.bf16.msra.mxu0 %v5772_v40  ;;  %5837 = vmatpush1.bf16.msra.mxu1 %v5836_v42  ;;  %v659_v40 = vld [vmem:[%s11264_s3 + $0x920] sm:$0xff]  ;;  %v672_v42 = vld [vmem:[%s11264_s3 + $0x988] sm:$0xff] }
 0x133   :  { %5775 = vmatprep.subr.bf16.mxu0 %v5774_v46  ;;  %5839 = vmatprep.subr.bf16.mxu1 %v5838_v47  ;;  %v686_v46 = vld [vmem:[%s11264_s3 + $0x9f8] sm:$0xff]  ;;  %v699_v47 = vld [vmem:[%s11264_s3 + $0xa60] sm:$0xff]  ;;  %v5856_v50 = vpack.c.bf16 %v672_v42, %v659_v40  ;;  %v5808_v40 = vpack.c.bf16 %v774_v30, %v761_v29  ;;  %v480_v29 = vld [vmem:[%s11264_s3 + $0x388] sm:$0xff] }
 0x134   :  { %v5858_v56 = vpack.c.bf16 %v699_v47, %v686_v46  ;;  %v375_v46 = vld [vmem:[%s11264_s3 + $0x40] sm:$0xff]  ;;  %v388_v47 = vld [vmem:[%s11264_s3 + $0xa8] sm:$0xff]  ;;  %v493_v30 = vld [vmem:[%s11264_s3 + $0x3f0] sm:$0xff] }
 0x136   :  { %5777 = vmatpush1.bf16.msra.mxu0 %v5776_v57  ;;  %5841 = vmatpush1.bf16.msra.mxu1 %v5840_v59  ;;  %v685_v57 = vld [vmem:[%s11264_s3 + $0x9f0] sm:$0xff]  ;;  %v698_v59 = vld [vmem:[%s11264_s3 + $0xa58] sm:$0xff] }
 0x137   :  { %5779 = vmatprep.subr.bf16.mxu0 %v5778_v63  ;;  %5843 = vmatprep.subr.bf16.mxu1 %v5842_v0  ;;  %v712_v63 = vld [vmem:[%s11264_s3 + $0xac8] sm:$0xff]  ;;  %v725_v0 = vld [vmem:[%s11264_s3 + $0xb30] sm:$0xff]  ;;  %v5860_v2 = vpack.c.bf16 %v698_v59, %v685_v57  ;;  %v5876_v57 = vpack.c.bf16 %v388_v47, %v375_v46 }
 0x138   :  { %v5862_v6 = vpack.c.bf16 %v725_v0, %v712_v63  ;;  %v5878_v63 = vpack.c.bf16 %v415_v54, %v402_v52  ;;  %v508_v46 = vld [vmem:[%s11264_s3 + $0x468] sm:$0xff]  ;;  %v521_v47 = vld [vmem:[%s11264_s3 + $0x4d0] sm:$0xff]  ;;  %v518_v54 = vld [vmem:[%s11264_s3 + $0x4b8] sm:$0xff] }
 0x139   :  { %v505_v52 = vld [vmem:[%s11264_s3 + $0x450] sm:$0xff] }
 0x13a   :  { %5781 = vmatpush1.bf16.msra.mxu0 %v5780_v7  ;;  %5845 = vmatpush1.bf16.msra.mxu1 %v5844_v8  ;;  %v711_v7 = vld [vmem:[%s11264_s3 + $0xac0] sm:$0xff]  ;;  %v724_v8 = vld [vmem:[%s11264_s3 + $0xb28] sm:$0xff] }
 0x13b   :  { %5783 = vmatprep.subr.bf16.mxu0 %v5782_v11  ;;  %5847 = vmatprep.subr.bf16.mxu1 %v5846_v12  ;;  %v738_v11 = vld [vmem:[%s11264_s3 + $0xb98] sm:$0xff]  ;;  %v751_v12 = vld [vmem:[%s11264_s3 + $0xc00] sm:$0xff]  ;;  %v5864_v14 = vpack.c.bf16 %v724_v8, %v711_v7  ;;  %v5880_v7 = vpack.c.bf16 %v414_v61, %v401_v60  ;;  %v532_v60 = vld [vmem:[%s11264_s3 + $0x528] sm:$0xff] }
 0x13c   :  { %v5866_v18 = vpack.c.bf16 %v751_v12, %v738_v11  ;;  %v5882_v11 = vpack.c.bf16 %v441_v4, %v428_v3  ;;  %v545_v61 = vld [vmem:[%s11264_s3 + $0x590] sm:$0xff]  ;;  %v531_v3 = vld [vmem:[%s11264_s3 + $0x520] sm:$0xff]  ;;  %v544_v4 = vld [vmem:[%s11264_s3 + $0x588] sm:$0xff] }
 0x13e   :  { %5785 = vmatpush1.bf16.msra.mxu0 %v5784_v19  ;;  %5849 = vmatpush1.bf16.msra.mxu1 %v5848_v20  ;;  %v737_v19 = vld [vmem:[%s11264_s3 + $0xb90] sm:$0xff]  ;;  %v750_v20 = vld [vmem:[%s11264_s3 + $0xbf8] sm:$0xff] }
 0x13f   :  { %5787 = vmatprep.subr.bf16.mxu0 %v5786_v24  ;;  %5851 = vmatprep.subr.bf16.mxu1 %v5850_v25  ;;  %v764_v24 = vld [vmem:[%s11264_s3 + $0xc68] sm:$0xff]  ;;  %v777_v25 = vld [vmem:[%s11264_s3 + $0xcd0] sm:$0xff]  ;;  %v5868_v27 = vpack.c.bf16 %v750_v20, %v737_v19  ;;  %v5884_v19 = vpack.c.bf16 %v440_v10, %v427_v9  ;;  %v558_v9 = vld [vmem:[%s11264_s3 + $0x5f8] sm:$0xff] }
 0x140   :  { %v5870_v32 = vpack.c.bf16 %v777_v25, %v764_v24  ;;  %v5886_v24 = vpack.c.bf16 %v467_v16, %v454_v15  ;;  %v571_v10 = vld [vmem:[%s11264_s3 + $0x660] sm:$0xff]  ;;  %v557_v15 = vld [vmem:[%s11264_s3 + $0x5f0] sm:$0xff]  ;;  %v570_v16 = vld [vmem:[%s11264_s3 + $0x658] sm:$0xff] }
 0x142   :  { %5789 = vmatpush1.bf16.msra.mxu0 %v5788_v33  ;;  %5853 = vmatpush1.bf16.msra.mxu1 %v5852_v34  ;;  %v763_v33 = vld [vmem:[%s11264_s3 + $0xc60] sm:$0xff]  ;;  %v776_v34 = vld [vmem:[%s11264_s3 + $0xcc8] sm:$0xff] }
 0x143   :  { %5791 = vmatprep.subr.bf16.mxu0 %v5790_v38  ;;  %5855 = vmatprep.subr.bf16.mxu1 %v5854_v39  ;;  %v378_v38 = vld [vmem:[%s11264_s3 + $0x58] sm:$0xff]  ;;  %v391_v39 = vld [vmem:[%s11264_s3 + $0xc0] sm:$0xff]  ;;  %v5872_v42 = vpack.c.bf16 %v776_v34, %v763_v33  ;;  %v5888_v33 = vpack.c.bf16 %v466_v23, %v453_v21  ;;  %v584_v21 = vld [vmem:[%s11264_s3 + $0x6c8] sm:$0xff] }
 0x144   :  { %v5938_v44 = vpack.c.bf16 %v391_v39, %v378_v38  ;;  %v5890_v38 = vpack.c.bf16 %v493_v30, %v480_v29  ;;  %v597_v23 = vld [vmem:[%s11264_s3 + $0x730] sm:$0xff]  ;;  %v583_v29 = vld [vmem:[%s11264_s3 + $0x6c0] sm:$0xff]  ;;  %v596_v30 = vld [vmem:[%s11264_s3 + $0x728] sm:$0xff] }
 0x146   :  { %5793 = vmatpush1.bf16.msra.mxu0 %v5792_v49  ;;  %5857 = vmatpush1.bf16.msra.mxu1 %v5856_v50  ;;  %v377_v49 = vld [vmem:[%s11264_s3 + $0x50] sm:$0xff]  ;;  %v390_v50 = vld [vmem:[%s11264_s3 + $0xb8] sm:$0xff] }
 0x147   :  { %5795 = vmatprep.subr.bf16.mxu0 %v5794_v55  ;;  %5859 = vmatprep.subr.bf16.mxu1 %v5858_v56  ;;  %v404_v55 = vld [vmem:[%s11264_s3 + $0x128] sm:$0xff]  ;;  %v417_v56 = vld [vmem:[%s11264_s3 + $0x190] sm:$0xff]  ;;  %v5940_v59 = vpack.c.bf16 %v390_v50, %v377_v49  ;;  %v5892_v49 = vpack.c.bf16 %v492_v36, %v479_v35  ;;  %v610_v35 = vld [vmem:[%s11264_s3 + $0x798] sm:$0xff] }
 0x148   :  { %v5942_v0 = vpack.c.bf16 %v417_v56, %v404_v55  ;;  %v5958_v56 = vpack.c.bf16 %v521_v47, %v508_v46  ;;  %v623_v36 = vld [vmem:[%s11264_s3 + $0x800] sm:$0xff]  ;;  %v622_v46 = vld [vmem:[%s11264_s3 + $0x7f8] sm:$0xff] }
 0x149   :  { %v5910_v47 = vpack.c.bf16 %v623_v36, %v610_v35 }
 0x14a   :  { %5797 = vmatpush1.bf16.msra.mxu0 %v5796_v1  ;;  %5861 = vmatpush1.bf16.msra.mxu1 %v5860_v2  ;;  %v403_v1 = vld [vmem:[%s11264_s3 + $0x120] sm:$0xff]  ;;  %v416_v2 = vld [vmem:[%s11264_s3 + $0x188] sm:$0xff] }
 0x14b   :  { %5799 = vmatprep.subr.bf16.mxu0 %v5798_v5  ;;  %5863 = vmatprep.subr.bf16.mxu1 %v5862_v6  ;;  %v430_v5 = vld [vmem:[%s11264_s3 + $0x1f8] sm:$0xff]  ;;  %v443_v6 = vld [vmem:[%s11264_s3 + $0x260] sm:$0xff]  ;;  %v5944_v8 = vpack.c.bf16 %v416_v2, %v403_v1  ;;  %v5896_v1 = vpack.c.bf16 %v518_v54, %v505_v52  ;;  %v636_v52 = vld [vmem:[%s11264_s3 + $0x868] sm:$0xff] }
 0x14c   :  { %v5946_v12 = vpack.c.bf16 %v443_v6, %v430_v5  ;;  %v5898_v5 = vpack.c.bf16 %v545_v61, %v532_v60  ;;  %v649_v54 = vld [vmem:[%s11264_s3 + $0x8d0] sm:$0xff]  ;;  %v635_v61 = vld [vmem:[%s11264_s3 + $0x860] sm:$0xff] }
 0x14e   :  { %5801 = vmatpush1.bf16.msra.mxu0 %v5800_v13  ;;  %5865 = vmatpush1.bf16.msra.mxu1 %v5864_v14  ;;  %v429_v13 = vld [vmem:[%s11264_s3 + $0x1f0] sm:$0xff]  ;;  %v442_v14 = vld [vmem:[%s11264_s3 + $0x258] sm:$0xff] }
 0x14f   :  { %5803 = vmatprep.subr.bf16.mxu0 %v5802_v17  ;;  %5867 = vmatprep.subr.bf16.mxu1 %v5866_v18  ;;  %v456_v17 = vld [vmem:[%s11264_s3 + $0x2c8] sm:$0xff]  ;;  %v469_v18 = vld [vmem:[%s11264_s3 + $0x330] sm:$0xff]  ;;  %v5948_v20 = vpack.c.bf16 %v442_v14, %v429_v13  ;;  %v5900_v13 = vpack.c.bf16 %v544_v4, %v531_v3  ;;  %v650_v3 = vld [vmem:[%s11264_s3 + $0x8d8] sm:$0xff] }
 0x150   :  { %v5950_v25 = vpack.c.bf16 %v469_v18, %v456_v17  ;;  %v5902_v17 = vpack.c.bf16 %v571_v10, %v558_v9  ;;  %v662_v4 = vld [vmem:[%s11264_s3 + $0x938] sm:$0xff] }
 0x152   :  { %5805 = vmatpush1.bf16.msra.mxu0 %v5804_v26  ;;  %5869 = vmatpush1.bf16.msra.mxu1 %v5868_v27  ;;  %v455_v26 = vld [vmem:[%s11264_s3 + $0x2c0] sm:$0xff]  ;;  %v468_v27 = vld [vmem:[%s11264_s3 + $0x328] sm:$0xff] }
 0x153   :  { %5807 = vmatprep.subr.bf16.mxu0 %v5806_v31  ;;  %5871 = vmatprep.subr.bf16.mxu1 %v5870_v32  ;;  %v482_v31 = vld [vmem:[%s11264_s3 + $0x398] sm:$0xff]  ;;  %v495_v32 = vld [vmem:[%s11264_s3 + $0x400] sm:$0xff]  ;;  %v5952_v34 = vpack.c.bf16 %v468_v27, %v455_v26  ;;  %v5904_v26 = vpack.c.bf16 %v570_v16, %v557_v15  ;;  %v676_v16 = vld [vmem:[%s11264_s3 + $0x9a8] sm:$0xff] }
 0x154   :  { %v5954_v39 = vpack.c.bf16 %v495_v32, %v482_v31  ;;  %v5906_v31 = vpack.c.bf16 %v597_v23, %v584_v21  ;;  %v663_v15 = vld [vmem:[%s11264_s3 + $0x940] sm:$0xff] }
 0x155   :  { %v5984_v23 = vpack.c.bf16 %v676_v16, %v663_v15  ;;  %v1482_v15 = vld [vmem:[%s11264_s3 + $0x70] sm:$0xff] }
 0x156   :  { %5809 = vmatpush1.bf16.msra.mxu0 %v5808_v40  ;;  %5873 = vmatpush1.bf16.msra.mxu1 %v5872_v42  ;;  %v481_v40 = vld [vmem:[%s11264_s3 + $0x390] sm:$0xff]  ;;  %v494_v42 = vld [vmem:[%s11264_s3 + $0x3f8] sm:$0xff] }
 0x157   :  { %5875 = vmatprep.subr.bf16.mxu0 %v5874_v43  ;;  %5939 = vmatprep.subr.bf16.mxu1 %v5938_v44  ;;  %v506_v43 = vld [vmem:[%s11264_s3 + $0x458] sm:$0xff]  ;;  %v519_v44 = vld [vmem:[%s11264_s3 + $0x4c0] sm:$0xff]  ;;  %v5956_v50 = vpack.c.bf16 %v494_v42, %v481_v40  ;;  %v263_v40 = vadd.f32 %v7694_v51, %v7688_v45  ;;  %v5908_v42 = vpack.c.bf16 %v596_v30, %v583_v29  ;;  %v689_v29 = vld [vmem:[%s11264_s3 + $0xa10] sm:$0xff] }
 0x158   :  { %v5894_v55 = vpack.c.bf16 %v519_v44, %v506_v43  ;;  %v609_v44 = vld [vmem:[%s11264_s3 + $0x790] sm:$0xff]  ;;  %v611_v51 = vld [vmem:[%s11264_s3 + $0x7a0] sm:$0xff]  ;;  %v702_v30 = vld [vmem:[%s11264_s3 + $0xa78] sm:$0xff] }
 0x159   :  { %1002 = vmatmul.mubr.f32.vlgmr.msra.gmra.mrb[8].mxu0 %v7742_v28  ;;  %1079 = vmatmul.mubr.f32.vlgmr.msra.gmra.mrb[8].mxu1 %v7742_v28  ;;  %v5988_v36 = vpack.c.bf16 %v702_v30, %v689_v29  ;;  %v1508_v29 = vld [vmem:[%s11264_s3 + $0x140] sm:$0xff] }
 0x15a   :  { %1007 = vmatprep.mubr.f32.mxu0 %v7766_v37  ;;  %1084 = vmatprep.mubr.f32.mxu1 %v7766_v37 }
 0x15b   :  { %5877 = vmatpush1.bf16.msra.mxu0 %v5876_v57  ;;  %5941 = vmatpush1.bf16.msra.mxu1 %v5940_v59  ;;  %v507_v57 = vld [vmem:[%s11264_s3 + $0x460] sm:$0xff]  ;;  %v520_v59 = vld [vmem:[%s11264_s3 + $0x4c8] sm:$0xff] }
 0x15c   :  { %5879 = vmatprep.subr.bf16.mxu0 %v5878_v63  ;;  %5943 = vmatprep.subr.bf16.mxu1 %v5942_v0  ;;  %v534_v63 = vld [vmem:[%s11264_s3 + $0x538] sm:$0xff]  ;;  %v547_v0 = vld [vmem:[%s11264_s3 + $0x5a0] sm:$0xff]  ;;  %v5960_v2 = vpack.c.bf16 %v520_v59, %v507_v57  ;;  %v274_v57 = vsub.f32 0.0, %v263_v40  ;;  %v5912_v59 = vpack.c.bf16 %v622_v46, %v609_v44  ;;  %v728_v44 = vld [vmem:[%s11264_s3 + $0xb48] sm:$0xff] }
 0x15d   :  { %1008 = vmatmul.mubr.f32.gmra.mrb[10].mxu0 %v7777_v41  ;;  %1085 = vmatmul.mubr.f32.gmra.mrb[10].mxu1 %v7777_v41  ;;  %v5962_v6 = vpack.c.bf16 %v547_v0, %v534_v63  ;;  %v648_v63 = vld [vmem:[%s11264_s3 + $0x8c8] sm:$0xff]  ;;  %v5914_v0 = vpack.c.bf16 %v649_v54, %v636_v52  ;;  %v739_v54 = vld [vmem:[%s11264_s3 + $0xba0] sm:$0xff] }
 0x15e   :  { %1155 = vmatprep.mubr.f32.mxu0 %v7731_v22  ;;  %1232 = vmatprep.mubr.f32.mxu1 %v7731_v22  ;;  %v5916_v9 = vpack.c.bf16 %v648_v63, %v635_v61  ;;  %v740_v46 = vld [vmem:[%s11264_s3 + $0xba8] sm:$0xff]  ;;  %v766_v61 = vld [vmem:[%s11264_s3 + $0xc78] sm:$0xff] }
 0x15f   :  { %5881 = vmatpush1.bf16.msra.mxu0 %v5880_v7  ;;  %5945 = vmatpush1.bf16.msra.mxu1 %v5944_v8  ;;  %v533_v7 = vld [vmem:[%s11264_s3 + $0x530] sm:$0xff]  ;;  %v546_v8 = vld [vmem:[%s11264_s3 + $0x598] sm:$0xff] }
 0x160   :  { %5883 = vmatprep.subr.bf16.mxu0 %v5882_v11  ;;  %5947 = vmatprep.subr.bf16.mxu1 %v5946_v12  ;;  %v560_v11 = vld [vmem:[%s11264_s3 + $0x608] sm:$0xff]  ;;  %v573_v12 = vld [vmem:[%s11264_s3 + $0x670] sm:$0xff]  ;;  %v5964_v14 = vpack.c.bf16 %v546_v8, %v533_v7  ;;  %v285_v8 = vmul.f32 1.442695, %v274_v57 }
 0x161   :  { %v5966_v18 = vpack.c.bf16 %v573_v12, %v560_v11  ;;  %v677_v7 = vld [vmem:[%s11264_s3 + $0x9b0] sm:$0xff]  ;;  %v674_v12 = vld [vmem:[%s11264_s3 + $0x998] sm:$0xff] }
 0x162   :  { %v661_v11 = vld [vmem:[%s11264_s3 + $0x930] sm:$0xff]  ;;  %6922 = vpow2.f32 %v285_v8 }
 0x163   :  { %5885 = vmatpush1.bf16.msra.mxu0 %v5884_v19  ;;  %5949 = vmatpush1.bf16.msra.mxu1 %v5948_v20  ;;  %v559_v19 = vld [vmem:[%s11264_s3 + $0x600] sm:$0xff]  ;;  %v572_v20 = vld [vmem:[%s11264_s3 + $0x668] sm:$0xff]  ;;  %v5920_v21 = vpack.c.bf16 %v674_v12, %v661_v11 }
 0x164   :  { %5887 = vmatprep.subr.bf16.mxu0 %v5886_v24  ;;  %5951 = vmatprep.subr.bf16.mxu1 %v5950_v25  ;;  %v586_v24 = vld [vmem:[%s11264_s3 + $0x6d8] sm:$0xff]  ;;  %v599_v25 = vld [vmem:[%s11264_s3 + $0x740] sm:$0xff]  ;;  %v5968_v27 = vpack.c.bf16 %v572_v20, %v559_v19  ;;  %v780_v11 = vld [vmem:[%s11264_s3 + $0xce8] sm:$0xff] }
 0x165   :  { %v5970_v32 = vpack.c.bf16 %v599_v25, %v586_v24  ;;  %v690_v19 = vld [vmem:[%s11264_s3 + $0xa18] sm:$0xff]  ;;  %v703_v20 = vld [vmem:[%s11264_s3 + $0xa80] sm:$0xff]  ;;  %v700_v25 = vld [vmem:[%s11264_s3 + $0xa68] sm:$0xff] }
 0x166   :  { %v687_v24 = vld [vmem:[%s11264_s3 + $0xa00] sm:$0xff] }
 0x167   :  { %5889 = vmatpush1.bf16.msra.mxu0 %v5888_v33  ;;  %5953 = vmatpush1.bf16.msra.mxu1 %v5952_v34  ;;  %v585_v33 = vld [vmem:[%s11264_s3 + $0x6d0] sm:$0xff]  ;;  %v598_v34 = vld [vmem:[%s11264_s3 + $0x738] sm:$0xff]  ;;  %v5924_v35 = vpack.c.bf16 %v700_v25, %v687_v24  ;;  %v587_v12 = vld [vmem:[%s11264_s3 + $0x6e0] sm:$0xff] }
 0x168   :  { %5891 = vmatprep.subr.bf16.mxu0 %v5890_v38  ;;  %5955 = vmatprep.subr.bf16.mxu1 %v5954_v39  ;;  %v612_v38 = vld [vmem:[%s11264_s3 + $0x7a8] sm:$0xff]  ;;  %v625_v39 = vld [vmem:[%s11264_s3 + $0x810] sm:$0xff]  ;;  %v5972_v43 = vpack.c.bf16 %v598_v34, %v585_v33 }
 0x169   :  { %v716_v33 = vld [vmem:[%s11264_s3 + $0xae8] sm:$0xff]  ;;  %v729_v34 = vld [vmem:[%s11264_s3 + $0xb50] sm:$0xff] }
 0x16a   :  { %v1481_v24 = vld [vmem:[%s11264_s3 + $0x68] sm:$0xff]  ;;  %v613_v25 = vld [vmem:[%s11264_s3 + $0x7b0] sm:$0xff] }
 0x16b   :  { %5893 = vmatpush1.bf16.msra.mxu0 %v5892_v49  ;;  %5957 = vmatpush1.bf16.msra.mxu1 %v5956_v50  ;;  %v5974_v49 = vpack.c.bf16 %v625_v39, %v612_v38  ;;  %v624_v50 = vld [vmem:[%s11264_s3 + $0x808] sm:$0xff]  ;;  %v713_v38 = vld [vmem:[%s11264_s3 + $0xad0] sm:$0xff]  ;;  %v726_v39 = vld [vmem:[%s11264_s3 + $0xb38] sm:$0xff] }
 0x16c   :  { %5895 = vmatprep.subr.bf16.mxu0 %v5894_v55  ;;  %5959 = vmatprep.subr.bf16.mxu1 %v5958_v56  ;;  %v638_v55 = vld [vmem:[%s11264_s3 + $0x878] sm:$0xff]  ;;  %v651_v56 = vld [vmem:[%s11264_s3 + $0x8e0] sm:$0xff]  ;;  %v5976_v60 = vpack.c.bf16 %v624_v50, %v611_v51  ;;  %v5928_v50 = vpack.c.bf16 %v726_v39, %v713_v38  ;;  %v6923_v63 = vpop.eup %6922 }
 0x16d   :  { %v755_v51 = vld [vmem:[%s11264_s3 + $0xc20] sm:$0xff]  ;;  %v1507_v38 = vld [vmem:[%s11264_s3 + $0x138] sm:$0xff] }
 0x16e   :  { %v639_v39 = vld [vmem:[%s11264_s3 + $0x880] sm:$0xff] }
 0x16f   :  { %5897 = vmatpush1.bf16.msra.mxu0 %v5896_v1  ;;  %5961 = vmatpush1.bf16.msra.mxu1 %v5960_v2  ;;  %v5978_v1 = vpack.c.bf16 %v651_v56, %v638_v55  ;;  %v637_v2 = vld [vmem:[%s11264_s3 + $0x870] sm:$0xff]  ;;  %v752_v55 = vld [vmem:[%s11264_s3 + $0xc08] sm:$0xff] }
 0x170   :  { %5899 = vmatprep.subr.bf16.mxu0 %v5898_v5  ;;  %5963 = vmatprep.subr.bf16.mxu1 %v5962_v6  ;;  %v675_v5 = vld [vmem:[%s11264_s3 + $0x9a0] sm:$0xff]  ;;  %v664_v6 = vld [vmem:[%s11264_s3 + $0x948] sm:$0xff]  ;;  %v5980_v10 = vpack.c.bf16 %v650_v3, %v637_v2  ;;  %v781_v2 = vld [vmem:[%s11264_s3 + $0xcf0] sm:$0xff]  ;;  %v5932_v3 = vpack.c.bf16 %v752_v55, %v739_v54 }
 0x171   :  { %v1533_v54 = vld [vmem:[%s11264_s3 + $0x208] sm:$0xff]  ;;  %v665_v55 = vld [vmem:[%s11264_s3 + $0x950] sm:$0xff] }
 0x173   :  { %5901 = vmatpush1.bf16.msra.mxu0 %v5900_v13  ;;  %5965 = vmatpush1.bf16.msra.mxu1 %v5964_v14  ;;  %v5918_v13 = vpack.c.bf16 %v675_v5, %v662_v4  ;;  %v5982_v14 = vpack.c.bf16 %v677_v7, %v664_v6  ;;  %v765_v5 = vld [vmem:[%s11264_s3 + $0xc70] sm:$0xff]  ;;  %v778_v6 = vld [vmem:[%s11264_s3 + $0xcd8] sm:$0xff]  ;;  %v298_v7 = vadd.f32 1.0, %v6923_v63 }
 0x174   :  { %5903 = vmatprep.subr.bf16.mxu0 %v5902_v17  ;;  %5967 = vmatprep.subr.bf16.mxu1 %v5966_v18  ;;  %v688_v17 = vld [vmem:[%s11264_s3 + $0xa08] sm:$0xff]  ;;  %v701_v18 = vld [vmem:[%s11264_s3 + $0xa70] sm:$0xff]  ;;  %v5936_v16 = vpack.c.bf16 %v778_v6, %v765_v5  ;;  %v691_v5 = vld [vmem:[%s11264_s3 + $0xa20] sm:$0xff] }
 0x175   :  { %6924 = vrcp.f32 %v298_v7  ;;  %v704_v6 = vld [vmem:[%s11264_s3 + $0xa88] sm:$0xff] }
 0x176   :  { %v1573_v7 = vld [vmem:[%s11264_s3 + $0x348] sm:$0xff] }
 0x177   :  { %5905 = vmatpush1.bf16.msra.mxu0 %v5904_v26  ;;  %5969 = vmatpush1.bf16.msra.mxu1 %v5968_v27  ;;  %v5922_v26 = vpack.c.bf16 %v701_v18, %v688_v17  ;;  %v5986_v27 = vpack.c.bf16 %v703_v20, %v690_v19  ;;  %v379_v20 = vld [vmem:[%s11264_s3 + $0x60] sm:$0xff] }
 0x178   :  { %5907 = vmatprep.subr.bf16.mxu0 %v5906_v31  ;;  %5971 = vmatprep.subr.bf16.mxu1 %v5970_v32  ;;  %v714_v31 = vld [vmem:[%s11264_s3 + $0xad8] sm:$0xff]  ;;  %v727_v32 = vld [vmem:[%s11264_s3 + $0xb40] sm:$0xff] }
 0x179   :  { %v5926_v40 = vpack.c.bf16 %v727_v32, %v714_v31  ;;  %v405_v32 = vld [vmem:[%s11264_s3 + $0x130] sm:$0xff] }
 0x17b   :  { %5909 = vmatpush1.bf16.msra.mxu0 %v5908_v42  ;;  %5973 = vmatpush1.bf16.msra.mxu1 %v5972_v43  ;;  %v5990_v42 = vpack.c.bf16 %v729_v34, %v716_v33  ;;  %v715_v43 = vld [vmem:[%s11264_s3 + $0xae0] sm:$0xff]  ;;  %v418_v33 = vld [vmem:[%s11264_s3 + $0x198] sm:$0xff] }
 0x17c   :  { %5911 = vmatprep.subr.bf16.mxu0 %v5910_v47  ;;  %5975 = vmatprep.subr.bf16.mxu1 %v5974_v49  ;;  %v753_v47 = vld [vmem:[%s11264_s3 + $0xc10] sm:$0xff]  ;;  %v742_v49 = vld [vmem:[%s11264_s3 + $0xbb8] sm:$0xff]  ;;  %v5992_v52 = vpack.c.bf16 %v728_v44, %v715_v43  ;;  %v6008_v44 = vpack.c.bf16 %v418_v33, %v405_v32  ;;  %v756_v32 = vld [vmem:[%s11264_s3 + $0xc28] sm:$0xff] }
 0x17d   :  { %v5930_v56 = vpack.c.bf16 %v753_v47, %v740_v46  ;;  %v5994_v57 = vpack.c.bf16 %v755_v51, %v742_v49  ;;  %v1534_v43 = vld [vmem:[%s11264_s3 + $0x210] sm:$0xff]  ;;  %v431_v47 = vld [vmem:[%s11264_s3 + $0x200] sm:$0xff]  ;;  %v444_v49 = vld [vmem:[%s11264_s3 + $0x268] sm:$0xff] }
 0x17e   :  { %v1625_v33 = vld [vmem:[%s11264_s3 + $0x4e8] sm:$0xff] }
 0x17f   :  { %5913 = vmatpush1.bf16.msra.mxu0 %v5912_v59  ;;  %5977 = vmatpush1.bf16.msra.mxu1 %v5976_v60  ;;  %v741_v59 = vld [vmem:[%s11264_s3 + $0xbb0] sm:$0xff]  ;;  %v754_v60 = vld [vmem:[%s11264_s3 + $0xc18] sm:$0xff] }
 0x180   :  { %5915 = vmatprep.subr.bf16.mxu0 %v5914_v0  ;;  %5979 = vmatprep.subr.bf16.mxu1 %v5978_v1  ;;  %v779_v0 = vld [vmem:[%s11264_s3 + $0xce0] sm:$0xff]  ;;  %v768_v1 = vld [vmem:[%s11264_s3 + $0xc88] sm:$0xff]  ;;  %v5996_v4 = vpack.c.bf16 %v754_v60, %v741_v59  ;;  %v1547_v59 = vld [vmem:[%s11264_s3 + $0x278] sm:$0xff] }
 0x181   :  { %v5934_v8 = vpack.c.bf16 %v779_v0, %v766_v61  ;;  %v1560_v60 = vld [vmem:[%s11264_s3 + $0x2e0] sm:$0xff]  ;;  %v6012_v61 = vpack.c.bf16 %v444_v49, %v431_v47  ;;  %v457_v0 = vld [vmem:[%s11264_s3 + $0x2d0] sm:$0xff]  ;;  %v782_v47 = vld [vmem:[%s11264_s3 + $0xcf8] sm:$0xff] }
 0x182   :  { %v1651_v49 = vld [vmem:[%s11264_s3 + $0x5b8] sm:$0xff] }
 0x183   :  { %5917 = vmatpush1.bf16.msra.mxu0 %v5916_v9  ;;  %5981 = vmatpush1.bf16.msra.mxu1 %v5980_v10  ;;  %v5998_v9 = vpack.c.bf16 %v781_v2, %v768_v1  ;;  %v767_v10 = vld [vmem:[%s11264_s3 + $0xc80] sm:$0xff]  ;;  %v470_v1 = vld [vmem:[%s11264_s3 + $0x338] sm:$0xff] }
 0x184   :  { %5919 = vmatprep.subr.bf16.mxu0 %v5918_v13  ;;  %5983 = vmatprep.subr.bf16.mxu1 %v5982_v14  ;;  %v600_v13 = vld [vmem:[%s11264_s3 + $0x748] sm:$0xff]  ;;  %v6000_v17 = vpack.c.bf16 %v780_v11, %v767_v10  ;;  %v483_v11 = vld [vmem:[%s11264_s3 + $0x3a0] sm:$0xff] }
 0x185   :  { %v1469_v14 = vld [vmem:[%s11264_s3 + $0x8] sm:$0xff]  ;;  %v6002_v18 = vpack.c.bf16 %v600_v13, %v587_v12  ;;  %v6018_v13 = vpack.c.bf16 %v704_v6, %v691_v5 }
 0x186   :  { %v6034_v19 = vpack.c.bf16 %v1482_v15, %v1469_v14  ;;  %v496_v12 = vld [vmem:[%s11264_s3 + $0x408] sm:$0xff]  ;;  %v1572_v15 = vld [vmem:[%s11264_s3 + $0x340] sm:$0xff] }
 0x187   :  { %5921 = vmatpush1.bf16.msra.mxu0 %v5920_v21  ;;  %5985 = vmatpush1.bf16.msra.mxu1 %v5984_v23  ;;  %v392_v21 = vld [vmem:[%s11264_s3 + $0xc8] sm:$0xff]  ;;  %v1468_v23 = vld [vmem:[%s11264_s3] sm:$0xff] }
 0x188   :  { %5923 = vmatprep.subr.bf16.mxu0 %v5922_v26  ;;  %5987 = vmatprep.subr.bf16.mxu1 %v5986_v27  ;;  %v626_v26 = vld [vmem:[%s11264_s3 + $0x818] sm:$0xff]  ;;  %v6004_v30 = vpack.c.bf16 %v392_v21, %v379_v20  ;;  %v6036_v31 = vpack.c.bf16 %v1481_v24, %v1468_v23  ;;  %v1612_v20 = vld [vmem:[%s11264_s3 + $0x480] sm:$0xff]  ;;  %v6020_v21 = vpack.c.bf16 %v496_v12, %v483_v11  ;;  %v509_v24 = vld [vmem:[%s11264_s3 + $0x470] sm:$0xff] }
 0x189   :  { %v1495_v27 = vld [vmem:[%s11264_s3 + $0xd8] sm:$0xff]  ;;  %v6006_v34 = vpack.c.bf16 %v626_v26, %v613_v25  ;;  %v267_v12 = vadd.f32 %v7699_v58, %v7696_v53 }
 0x18a   :  { %v522_v25 = vld [vmem:[%s11264_s3 + $0x4d8] sm:$0xff] }
 0x18b   :  { %5925 = vmatpush1.bf16.msra.mxu0 %v5924_v35  ;;  %5989 = vmatpush1.bf16.msra.mxu1 %v5988_v36  ;;  %v6038_v35 = vpack.c.bf16 %v1508_v29, %v1495_v27  ;;  %v1494_v36 = vld [vmem:[%s11264_s3 + $0xd0] sm:$0xff]  ;;  %v1715_v58 = vld [vmem:[%s11264_s3 + $0x7b8] sm:$0xff] }
 0x18c   :  { %5927 = vmatprep.subr.bf16.mxu0 %v5926_v40  ;;  %5991 = vmatprep.subr.bf16.mxu1 %v5990_v42  ;;  %v652_v40 = vld [vmem:[%s11264_s3 + $0x8e8] sm:$0xff]  ;;  %v6040_v46 = vpack.c.bf16 %v1507_v38, %v1494_v36  ;;  %v1598_v29 = vld [vmem:[%s11264_s3 + $0x410] sm:$0xff]  ;;  %v535_v38 = vld [vmem:[%s11264_s3 + $0x540] sm:$0xff] }
 0x18d   :  { %v1521_v42 = vld [vmem:[%s11264_s3 + $0x1a8] sm:$0xff]  ;;  %v6010_v51 = vpack.c.bf16 %v652_v40, %v639_v39 }
 0x18e   :  { %v548_v39 = vld [vmem:[%s11264_s3 + $0x5a8] sm:$0xff] }
 0x18f   :  { %5929 = vmatpush1.bf16.msra.mxu0 %v5928_v50  ;;  %5993 = vmatpush1.bf16.msra.mxu1 %v5992_v52  ;;  %v6042_v50 = vpack.c.bf16 %v1534_v43, %v1521_v42  ;;  %v1520_v52 = vld [vmem:[%s11264_s3 + $0x1a0] sm:$0xff] }
 0x190   :  { %5931 = vmatprep.subr.bf16.mxu0 %v5930_v56  ;;  %5995 = vmatprep.subr.bf16.mxu1 %v5994_v57  ;;  %v8567_v56 = vpop.eup %6924  ;;  %v678_v57 = vld [vmem:[%s11264_s3 + $0x9b8] sm:$0xff]  ;;  %v6044_v63 = vpack.c.bf16 %v1533_v54, %v1520_v52  ;;  %v1624_v43 = vld [vmem:[%s11264_s3 + $0x4e0] sm:$0xff]  ;;  %v561_v54 = vld [vmem:[%s11264_s3 + $0x610] sm:$0xff] }
 0x191   :  { %v6014_v2 = vpack.c.bf16 %v678_v57, %v665_v55  ;;  %v574_v55 = vld [vmem:[%s11264_s3 + $0x678] sm:$0xff] }
 0x193   :  { %5933 = vmatpush1.bf16.msra.mxu0 %v5932_v3  ;;  %5997 = vmatpush1.bf16.msra.mxu1 %v5996_v4  ;;  %v6046_v3 = vpack.c.bf16 %v1560_v60, %v1547_v59  ;;  %v1559_v4 = vld [vmem:[%s11264_s3 + $0x2d8] sm:$0xff]  ;;  %v1650_v60 = vld [vmem:[%s11264_s3 + $0x5b0] sm:$0xff] }
 0x194   :  { %5935 = vmatprep.subr.bf16.mxu0 %v5934_v8  ;;  %5999 = vmatprep.subr.bf16.mxu1 %v5998_v9  ;;  %v1586_v8 = vld [vmem:[%s11264_s3 + $0x3b0] sm:$0xff]  ;;  %v6016_v9 = vpack.c.bf16 %v470_v1, %v457_v0  ;;  %v1471_v1 = vld [vmem:[%s11264_s3 + $0x18] sm:$0xff] }
 0x195   :  { %v6050_v14 = vpack.c.bf16 %v1586_v8, %v1573_v7  ;;  %v1690_v0 = vld [vmem:[%s11264_s3 + $0x6f0] sm:$0xff]  ;;  %v1676_v8 = vld [vmem:[%s11264_s3 + $0x680] sm:$0xff] }
 0x197   :  { %5937 = vmatpush1.bf16.msra.mxu0 %v5936_v16  ;;  %6001 = vmatpush1.bf16.msra.mxu1 %v6000_v17  ;;  %v1585_v16 = vld [vmem:[%s11264_s3 + $0x3a8] sm:$0xff]  ;;  %v717_v17 = vld [vmem:[%s11264_s3 + $0xaf0] sm:$0xff] }
 0x198   :  { %6003 = vmatprep.subr.bf16.mxu0 %v6002_v18  ;;  %6035 = vmatprep.subr.bf16.mxu1 %v6034_v19  ;;  %v730_v18 = vld [vmem:[%s11264_s3 + $0xb58] sm:$0xff]  ;;  %v6052_v23 = vpack.c.bf16 %v1585_v16, %v1572_v15 }
 0x199   :  { %v1599_v19 = vld [vmem:[%s11264_s3 + $0x418] sm:$0xff]  ;;  %v6022_v26 = vpack.c.bf16 %v730_v18, %v717_v17 }
 0x19a   :  { %1156 = vmatmul.mubr.f32.vlgmr.msra.gmra.mrb[12].mxu0 %v7742_v28  ;;  %1233 = vmatmul.mubr.f32.vlgmr.msra.gmra.mrb[12].mxu1 %v7742_v28  ;;  %v6054_v27 = vpack.c.bf16 %v1612_v20, %v1599_v19  ;;  %v1496_v19 = vld [vmem:[%s11264_s3 + $0xe0] sm:$0xff] }
 0x19b   :  { %1161 = vmatprep.mubr.f32.mxu0 %v7766_v37  ;;  %1238 = vmatprep.mubr.f32.mxu1 %v7766_v37 }
 0x19c   :  { %6005 = vmatpush3.bf16.msra.mxu0 %v6004_v30  ;;  %6037 = vmatpush1.bf16.msra.mxu1 %v6036_v31  ;;  %v1611_v30 = vld [vmem:[%s11264_s3 + $0x478] sm:$0xff]  ;;  %v743_v31 = vld [vmem:[%s11264_s3 + $0xbc0] sm:$0xff] }
 0x19d   :  { %6007 = vmatprep.subr.bf16.mxu0 %v6006_v34  ;;  %6039 = vmatprep.subr.bf16.mxu1 %v6038_v35  ;;  %v1638_v34 = vld [vmem:[%s11264_s3 + $0x550] sm:$0xff]  ;;  %v6024_v35 = vpack.c.bf16 %v522_v25, %v509_v24  ;;  %v6056_v36 = vpack.c.bf16 %v1611_v30, %v1598_v29  ;;  %v6026_v40 = vpack.c.bf16 %v756_v32, %v743_v31  ;;  %v1536_v29 = vld [vmem:[%s11264_s3 + $0x220] sm:$0xff] }
 0x19e   :  { %1162 = vmatmul.mubr.f32.gmra.mrb[14].mxu0 %v7777_v41  ;;  %1239 = vmatmul.mubr.f32.gmra.mrb[14].mxu1 %v7777_v41  ;;  %v6058_v42 = vpack.c.bf16 %v1638_v34, %v1625_v33  ;;  %v1742_v24 = vld [vmem:[%s11264_s3 + $0x890] sm:$0xff]  ;;  %v1741_v34 = vld [vmem:[%s11264_s3 + $0x888] sm:$0xff] }
 0x19f   :  { %1309 = vmatprep.mubr.f32.mxu0 %v7731_v22  ;;  %1948 = vmatprep.mubr.f32.mxu1 %v8567_v56  ;;  %v1546_v22 = vld [vmem:[%s11264_s3 + $0x270] sm:$0xff] }
 0x1a0   :  { %6009 = vmatpush3.bf16.msra.mxu0 %v6008_v44  ;;  %6041 = vmatpush1.bf16.msra.mxu1 %v6040_v46  ;;  %v6048_v10 = vpack.c.bf16 %v1559_v4, %v1546_v22  ;;  %v1637_v44 = vld [vmem:[%s11264_s3 + $0x548] sm:$0xff]  ;;  %v769_v46 = vld [vmem:[%s11264_s3 + $0xc90] sm:$0xff]  ;;  %v269_v22 = vadd.f32 %v7702_v62, %v7696_v53  ;;  %v6032_v4 = vpack.c.bf16 %v574_v55, %v561_v54  ;;  %v1703_v62 = vld [vmem:[%s11264_s3 + $0x758] sm:$0xff] }
 0x1a1   :  { %6011 = vmatprep.subr.bf16.mxu0 %v6010_v51  ;;  %6043 = vmatprep.subr.bf16.mxu1 %v6042_v50  ;;  %v1664_v51 = vld [vmem:[%s11264_s3 + $0x620] sm:$0xff]  ;;  %v6028_v50 = vpack.c.bf16 %v548_v39, %v535_v38  ;;  %v6060_v52 = vpack.c.bf16 %v1637_v44, %v1624_v43  ;;  %v6030_v57 = vpack.c.bf16 %v782_v47, %v769_v46  ;;  %v1702_v53 = vld [vmem:[%s11264_s3 + $0x750] sm:$0xff]  ;;  %v1755_v38 = vld [vmem:[%s11264_s3 + $0x8f8] sm:$0xff] }
 0x1a2   :  { %v6062_v59 = vpack.c.bf16 %v1664_v51, %v1651_v49  ;;  %v278_v15 = vsub.f32 0.0, %v269_v22  ;;  %v6072_v31 = vpack.c.bf16 %v1715_v58, %v1702_v53  ;;  %v1768_v39 = vld [vmem:[%s11264_s3 + $0x960] sm:$0xff]  ;;  %v1562_v43 = vld [vmem:[%s11264_s3 + $0x2f0] sm:$0xff]  ;;  %v1767_v49 = vld [vmem:[%s11264_s3 + $0x958] sm:$0xff] }
 0x1a3   :  { %v6078_v47 = vpack.c.bf16 %v1768_v39, %v1755_v38  ;;  %v1548_v51 = vld [vmem:[%s11264_s3 + $0x280] sm:$0xff]  ;;  %v1781_v54 = vld [vmem:[%s11264_s3 + $0x9c8] sm:$0xff]  ;;  %v1794_v55 = vld [vmem:[%s11264_s3 + $0xa30] sm:$0xff] }
 0x1a4   :  { %6013 = vmatpush3.bf16.msra.mxu0 %v6012_v61  ;;  %6045 = vmatpush1.bf16.msra.mxu1 %v6044_v63  ;;  %v1663_v61 = vld [vmem:[%s11264_s3 + $0x618] sm:$0xff]  ;;  %v1677_v63 = vld [vmem:[%s11264_s3 + $0x688] sm:$0xff]  ;;  %v293_v30 = vmul.f32 1.442695, %v278_v15  ;;  %v1652_v39 = vld [vmem:[%s11264_s3 + $0x5c0] sm:$0xff] }
 0x1a5   :  { %6015 = vmatprep.subr.bf16.mxu0 %v6014_v2  ;;  %6047 = vmatprep.subr.bf16.mxu1 %v6046_v3  ;;  %v1484_v2 = vld [vmem:[%s11264_s3 + $0x80] sm:$0xff]  ;;  %v261_v3 = vadd.f32 %v7691_v48, %v7688_v45  ;;  %v6064_v5 = vpack.c.bf16 %v1663_v61, %v1650_v60  ;;  %v6066_v6 = vpack.c.bf16 %v1690_v0, %v1677_v63  ;;  %v1470_v45 = vld [vmem:[%s11264_s3 + $0x10] sm:$0xff]  ;;  %v1483_v48 = vld [vmem:[%s11264_s3 + $0x78] sm:$0xff] }
 0x1a6   :  { %v6098_v7 = vpack.c.bf16 %v1484_v2, %v1471_v1  ;;  %v6100_v17 = vpack.c.bf16 %v1483_v48, %v1470_v45  ;;  %v6082_v63 = vpack.c.bf16 %v1794_v55, %v1781_v54  ;;  %v1780_v0 = vld [vmem:[%s11264_s3 + $0x9c0] sm:$0xff]  ;;  %v1793_v1 = vld [vmem:[%s11264_s3 + $0xa28] sm:$0xff]  ;;  %v1574_v2 = vld [vmem:[%s11264_s3 + $0x350] sm:$0xff] }
 0x1a7   :  { %v273_v11 = vsub.f32 0.0, %v261_v3  ;;  %v1587_v22 = vld [vmem:[%s11264_s3 + $0x3b8] sm:$0xff]  ;;  %v1833_v15 = vld [vmem:[%s11264_s3 + $0xb68] sm:$0xff] }
 0x1a8   :  { %6017 = vmatpush3.bf16.msra.mxu0 %v6016_v9  ;;  %6049 = vmatpush1.bf16.msra.mxu1 %v6048_v10  ;;  %v1689_v9 = vld [vmem:[%s11264_s3 + $0x6e8] sm:$0xff]  ;;  %v1716_v10 = vld [vmem:[%s11264_s3 + $0x7c0] sm:$0xff]  ;;  %v6116_v45 = vpack.c.bf16 %v1587_v22, %v1574_v2  ;;  %v1871_v38 = vld [vmem:[%s11264_s3 + $0xc98] sm:$0xff] }
 0x1a9   :  { %6019 = vmatprep.subr.bf16.mxu0 %v6018_v13  ;;  %6051 = vmatprep.subr.bf16.mxu1 %v6050_v14  ;;  %v1497_v13 = vld [vmem:[%s11264_s3 + $0xe8] sm:$0xff]  ;;  %v1510_v14 = vld [vmem:[%s11264_s3 + $0x150] sm:$0xff]  ;;  %v6068_v16 = vpack.c.bf16 %v1689_v9, %v1676_v8  ;;  %v6070_v18 = vpack.c.bf16 %v1716_v10, %v1703_v62  ;;  %v283_v25 = vmul.f32 1.442695, %v273_v11  ;;  %v6084_v8 = vpack.c.bf16 %v1793_v1, %v1780_v0  ;;  %v1819_v10 = vld [vmem:[%s11264_s3 + $0xaf8] sm:$0xff] }
 0x1aa   :  { %v6102_v20 = vpack.c.bf16 %v1510_v14, %v1497_v13  ;;  %v1806_v62 = vld [vmem:[%s11264_s3 + $0xa90] sm:$0xff]  ;;  %v1600_v11 = vld [vmem:[%s11264_s3 + $0x420] sm:$0xff]  ;;  %v1613_v14 = vld [vmem:[%s11264_s3 + $0x488] sm:$0xff] }
 0x1ab   :  { %6926 = vpow2.f32 %v283_v25  ;;  %v6088_v58 = vpack.c.bf16 %v1819_v10, %v1806_v62  ;;  %v1845_v25 = vld [vmem:[%s11264_s3 + $0xbc8] sm:$0xff]  ;;  %v1498_v22 = vld [vmem:[%s11264_s3 + $0xf0] sm:$0xff]  ;;  %v1744_v62 = vld [vmem:[%s11264_s3 + $0x8a0] sm:$0xff] }
 0x1ac   :  { %6021 = vmatpush3.bf16.msra.mxu0 %v6020_v21  ;;  %6053 = vmatpush1.bf16.msra.mxu1 %v6052_v23  ;;  %v1509_v21 = vld [vmem:[%s11264_s3 + $0x148] sm:$0xff]  ;;  %6928 = vpow2.f32 %v293_v30  ;;  %v1859_v30 = vld [vmem:[%s11264_s3 + $0xc38] sm:$0xff] }
 0x1ad   :  { %6023 = vmatprep.subr.bf16.mxu0 %v6022_v26  ;;  %6055 = vmatprep.subr.bf16.mxu1 %v6054_v27  ;;  %v1729_v23 = vld [vmem:[%s11264_s3 + $0x828] sm:$0xff]  ;;  %v277_v26 = vsub.f32 0.0, %v267_v12  ;;  %v1523_v27 = vld [vmem:[%s11264_s3 + $0x1b8] sm:$0xff]  ;;  %v6104_v32 = vpack.c.bf16 %v1509_v21, %v1496_v19  ;;  %v6120_v21 = vpack.c.bf16 %v1613_v14, %v1600_v11  ;;  %v1524_v14 = vld [vmem:[%s11264_s3 + $0x1c0] sm:$0xff] }
 0x1ae   :  { %v6074_v33 = vpack.c.bf16 %v1742_v24, %v1729_v23  ;;  %v1832_v24 = vld [vmem:[%s11264_s3 + $0xb60] sm:$0xff]  ;;  %v1485_v54 = vld [vmem:[%s11264_s3 + $0x88] sm:$0xff] }
 0x1b0   :  { %6025 = vmatpush3.bf16.msra.mxu0 %v6024_v35  ;;  %6057 = vmatpush1.bf16.msra.mxu1 %v6056_v36  ;;  %v1522_v35 = vld [vmem:[%s11264_s3 + $0x1b0] sm:$0xff]  ;;  %v1535_v36 = vld [vmem:[%s11264_s3 + $0x218] sm:$0xff] }
 0x1b1   :  { %6027 = vmatprep.subr.bf16.mxu0 %v6026_v40  ;;  %6059 = vmatprep.subr.bf16.mxu1 %v6058_v42  ;;  %v291_v40 = vmul.f32 1.442695, %v277_v26  ;;  %v1549_v42 = vld [vmem:[%s11264_s3 + $0x288] sm:$0xff]  ;;  %v6108_v46 = vpack.c.bf16 %v1535_v36, %v1522_v35  ;;  %v1626_v26 = vld [vmem:[%s11264_s3 + $0x4f0] sm:$0xff] }
 0x1b2   :  { %v1858_v36 = vld [vmem:[%s11264_s3 + $0xc30] sm:$0xff] }
 0x1b3   :  { %6930 = vpow2.f32 %v291_v40 }
 0x1b4   :  { %6029 = vmatpush3.bf16.msra.mxu0 %v6028_v50  ;;  %6061 = vmatpush1.bf16.msra.mxu1 %v6060_v52  ;;  %v6110_v50 = vpack.c.bf16 %v1562_v43, %v1549_v42  ;;  %v1561_v52 = vld [vmem:[%s11264_s3 + $0x2e8] sm:$0xff] }
 0x1b5   :  { %6031 = vmatprep.subr.bf16.mxu0 %v6030_v57  ;;  %6063 = vmatprep.subr.bf16.mxu1 %v6062_v59  ;;  %v1575_v57 = vld [vmem:[%s11264_s3 + $0x358] sm:$0xff]  ;;  %v1588_v59 = vld [vmem:[%s11264_s3 + $0x3c0] sm:$0xff]  ;;  %v6112_v61 = vpack.c.bf16 %v1561_v52, %v1548_v51  ;;  %v6927_v9 = vpop.eup %6926  ;;  %v1665_v42 = vld [vmem:[%s11264_s3 + $0x628] sm:$0xff] }
 0x1b6   :  { %v6114_v3 = vpack.c.bf16 %v1588_v59, %v1575_v57  ;;  %v6929_v12 = vpop.eup %6928  ;;  %v297_v53 = vadd.f32 1.0, %v6927_v9  ;;  %v1473_v43 = vld [vmem:[%s11264_s3 + $0x28] sm:$0xff]  ;;  %v1472_v52 = vld [vmem:[%s11264_s3 + $0x20] sm:$0xff]  ;;  %v1691_v57 = vld [vmem:[%s11264_s3 + $0x6f8] sm:$0xff] }
 0x1b7   :  { %v1499_v59 = vld [vmem:[%s11264_s3 + $0xf8] sm:$0xff]  ;;  %v6164_v0 = vpack.c.bf16 %v1485_v54, %v1472_v52  ;;  %v1538_v9 = vld [vmem:[%s11264_s3 + $0x230] sm:$0xff] }
 0x1b8   :  { %6033 = vmatpush3.bf16.msra.mxu0 %v6032_v4  ;;  %6065 = vmatpush1.bf16.msra.mxu1 %v6064_v5  ;;  %v1807_v4 = vld [vmem:[%s11264_s3 + $0xa98] sm:$0xff]  ;;  %v1820_v5 = vld [vmem:[%s11264_s3 + $0xb00] sm:$0xff]  ;;  %6932 = vrcp.f32 %v297_v53  ;;  %v1602_v52 = vld [vmem:[%s11264_s3 + $0x430] sm:$0xff] }
 0x1b9   :  { %6067 = vmatprep.subr.bf16.mxu1 %v6066_v6  ;;  %6099 = vmatprep.subr.bf16.mxu0 %v6098_v7  ;;  %v1601_v6 = vld [vmem:[%s11264_s3 + $0x428] sm:$0xff]  ;;  %v1614_v7 = vld [vmem:[%s11264_s3 + $0x490] sm:$0xff]  ;;  %v6086_v48 = vpack.c.bf16 %v1820_v5, %v1807_v4  ;;  %v1511_v4 = vld [vmem:[%s11264_s3 + $0x158] sm:$0xff] }
 0x1ba   :  { %v6118_v13 = vpack.c.bf16 %v1614_v7, %v1601_v6  ;;  %v1717_v7 = vld [vmem:[%s11264_s3 + $0x7c8] sm:$0xff]  ;;  %v6168_v10 = vpack.c.bf16 %v1511_v4, %v1498_v22  ;;  %v1551_v53 = vld [vmem:[%s11264_s3 + $0x298] sm:$0xff] }
 0x1bb   :  { %1310 = vmatmul.mubr.f32.vlgmr.msra.gmra.mrb[16].mxu0 %v7742_v28  ;;  %v1728_v28 = vld [vmem:[%s11264_s3 + $0x820] sm:$0xff]  ;;  %v1615_v54 = vld [vmem:[%s11264_s3 + $0x498] sm:$0xff] }
 0x1bc   :  { %1314 = vmatprep.mubr.f32.mxu0 %v7766_v37  ;;  %6069 = vmatpush1.bf16.msra.mxu1 %v6068_v16  ;;  %v6106_v37 = vpack.c.bf16 %v1536_v29, %v1523_v27  ;;  %v6076_v44 = vpack.c.bf16 %v1741_v34, %v1728_v28  ;;  %v1846_v16 = vld [vmem:[%s11264_s3 + $0xbd0] sm:$0xff]  ;;  %v1639_v29 = vld [vmem:[%s11264_s3 + $0x558] sm:$0xff]  ;;  %v6092_v34 = vpack.c.bf16 %v1845_v25, %v1832_v24  ;;  %v1756_v25 = vld [vmem:[%s11264_s3 + $0x900] sm:$0xff] }
 0x1bd   :  { %6101 = vmatpush1.bf16.msra.mxu0 %v6100_v17  ;;  %6071 = vmatprep.subr.bf16.mxu1 %v6070_v18  ;;  %v1627_v17 = vld [vmem:[%s11264_s3 + $0x4f8] sm:$0xff]  ;;  %v1640_v18 = vld [vmem:[%s11264_s3 + $0x560] sm:$0xff]  ;;  %v6931_v19 = vpop.eup %6930  ;;  %v6090_v23 = vpack.c.bf16 %v1846_v16, %v1833_v15  ;;  %v6124_v35 = vpack.c.bf16 %v1639_v29, %v1626_v26  ;;  %v1537_v15 = vld [vmem:[%s11264_s3 + $0x228] sm:$0xff] }
 0x1be   :  { %6103 = vmatprep.subr.bf16.mxu0 %v6102_v20  ;;  %v302_v20 = vadd.f32 1.0, %v6929_v12  ;;  %v6122_v27 = vpack.c.bf16 %v1640_v18, %v1627_v17  ;;  %v301_v28 = vadd.f32 1.0, %v6931_v19  ;;  %v1743_v18 = vld [vmem:[%s11264_s3 + $0x898] sm:$0xff]  ;;  %v1757_v19 = vld [vmem:[%s11264_s3 + $0x908] sm:$0xff]  ;;  %v1550_v26 = vld [vmem:[%s11264_s3 + $0x290] sm:$0xff] }
 0x1bf   :  { %1315 = vmatmul.mubr.f32.gmra.mrb[18].mxu0 %v7777_v41  ;;  %v1754_v41 = vld [vmem:[%s11264_s3 + $0x8f0] sm:$0xff] }
 0x1c0   :  { %6073 = vmatpush1.bf16.msra.mxu1 %v6072_v31  ;;  %2025 = vmatprep.mubr.f32.mxu0 %v8567_v56  ;;  %v6080_v60 = vpack.c.bf16 %v1767_v49, %v1754_v41  ;;  %v1872_v31 = vld [vmem:[%s11264_s3 + $0xca0] sm:$0xff]  ;;  %6934 = vrcp.f32 %v302_v20  ;;  %v6096_v41 = vpack.c.bf16 %v1871_v38, %v1858_v36  ;;  %v6128_v49 = vpack.c.bf16 %v1665_v42, %v1652_v39  ;;  %v1770_v20 = vld [vmem:[%s11264_s3 + $0x970] sm:$0xff]  ;;  %v1589_v39 = vld [vmem:[%s11264_s3 + $0x3c8] sm:$0xff] }
 0x1c1   :  { %6105 = vmatpush1.bf16.msra.mxu0 %v6104_v32  ;;  %6075 = vmatprep.subr.bf16.mxu1 %v6074_v33  ;;  %v1653_v32 = vld [vmem:[%s11264_s3 + $0x5c8] sm:$0xff]  ;;  %v1666_v33 = vld [vmem:[%s11264_s3 + $0x630] sm:$0xff]  ;;  %6936 = vrcp.f32 %v301_v28  ;;  %v6142_v29 = vpack.c.bf16 %v1770_v20, %v1757_v19  ;;  %v1796_v28 = vld [vmem:[%s11264_s3 + $0xa40] sm:$0xff] }
 0x1c2   :  { %6107 = vmatprep.subr.bf16.mxu0 %v6106_v37  ;;  %v6094_v37 = vpack.c.bf16 %v1872_v31, %v1859_v30  ;;  %v6126_v40 = vpack.c.bf16 %v1666_v33, %v1653_v32  ;;  %v8937_v5 = vpop.eup %6932  ;;  %v1769_v30 = vld [vmem:[%s11264_s3 + $0x968] sm:$0xff]  ;;  %v1590_v32 = vld [vmem:[%s11264_s3 + $0x3d0] sm:$0xff]  ;;  %v1783_v33 = vld [vmem:[%s11264_s3 + $0x9d8] sm:$0xff] }
 0x1c3   :  { %v1577_v31 = vld [vmem:[%s11264_s3 + $0x368] sm:$0xff]  ;;  %v1782_v36 = vld [vmem:[%s11264_s3 + $0x9d0] sm:$0xff]  ;;  %v1576_v38 = vld [vmem:[%s11264_s3 + $0x360] sm:$0xff] }
 0x1c4   :  { %6077 = vmatpush1.bf16.msra.mxu1 %v6076_v44  ;;  %v1486_v44 = vld [vmem:[%s11264_s3 + $0x90] sm:$0xff]  ;;  %v1795_v42 = vld [vmem:[%s11264_s3 + $0xa38] sm:$0xff]  ;;  %v1860_v20 = vld [vmem:[%s11264_s3 + $0xc40] sm:$0xff] }
 0x1c5   :  { %6109 = vmatpush1.bf16.msra.mxu0 %v6108_v46  ;;  %6079 = vmatprep.subr.bf16.mxu1 %v6078_v47  ;;  %v1679_v46 = vld [vmem:[%s11264_s3 + $0x698] sm:$0xff]  ;;  %v1692_v47 = vld [vmem:[%s11264_s3 + $0x700] sm:$0xff]  ;;  %v6162_v51 = vpack.c.bf16 %v1486_v44, %v1473_v43 }
 0x1c6   :  { %6111 = vmatprep.subr.bf16.mxu0 %v6110_v50  ;;  %v1678_v50 = vld [vmem:[%s11264_s3 + $0x690] sm:$0xff]  ;;  %v6130_v55 = vpack.c.bf16 %v1692_v47, %v1679_v46  ;;  %v1603_v43 = vld [vmem:[%s11264_s3 + $0x438] sm:$0xff]  ;;  %v1616_v44 = vld [vmem:[%s11264_s3 + $0x4a0] sm:$0xff] }
 0x1c7   :  { %v6132_v1 = vpack.c.bf16 %v1691_v57, %v1678_v50  ;;  %v1809_v46 = vld [vmem:[%s11264_s3 + $0xaa8] sm:$0xff]  ;;  %v1822_v47 = vld [vmem:[%s11264_s3 + $0xb10] sm:$0xff]  ;;  %v1808_v50 = vld [vmem:[%s11264_s3 + $0xaa0] sm:$0xff] }
 0x1c8   :  { %6081 = vmatpush1.bf16.msra.mxu1 %v6080_v60  ;;  %v1512_v60 = vld [vmem:[%s11264_s3 + $0x160] sm:$0xff]  ;;  %v1821_v57 = vld [vmem:[%s11264_s3 + $0xb08] sm:$0xff] }
 0x1c9   :  { %6113 = vmatpush1.bf16.msra.mxu0 %v6112_v61  ;;  %6083 = vmatprep.subr.bf16.mxu1 %v6082_v63  ;;  %v1705_v61 = vld [vmem:[%s11264_s3 + $0x768] sm:$0xff]  ;;  %v1718_v63 = vld [vmem:[%s11264_s3 + $0x7d0] sm:$0xff]  ;;  %v6166_v2 = vpack.c.bf16 %v1512_v60, %v1499_v59  ;;  %v6152_v22 = vpack.c.bf16 %v1821_v57, %v1808_v50  ;;  %v1540_v57 = vld [vmem:[%s11264_s3 + $0x240] sm:$0xff] }
 0x1ca   :  { %6115 = vmatprep.subr.bf16.mxu0 %v6114_v3  ;;  %v1704_v3 = vld [vmem:[%s11264_s3 + $0x760] sm:$0xff]  ;;  %v6134_v6 = vpack.c.bf16 %v1718_v63, %v1705_v61  ;;  %v1629_v59 = vld [vmem:[%s11264_s3 + $0x508] sm:$0xff]  ;;  %v1642_v60 = vld [vmem:[%s11264_s3 + $0x570] sm:$0xff] }
 0x1cb   :  { %v6136_v11 = vpack.c.bf16 %v1717_v7, %v1704_v3  ;;  %v1835_v61 = vld [vmem:[%s11264_s3 + $0xb78] sm:$0xff]  ;;  %v1848_v63 = vld [vmem:[%s11264_s3 + $0xbe0] sm:$0xff]  ;;  %v1834_v7 = vld [vmem:[%s11264_s3 + $0xb70] sm:$0xff] }
 0x1cc   :  { %6085 = vmatpush1.bf16.msra.mxu1 %v6084_v8  ;;  %v1525_v8 = vld [vmem:[%s11264_s3 + $0x1c8] sm:$0xff] }
 0x1cd   :  { %6117 = vmatpush1.bf16.msra.mxu0 %v6116_v45  ;;  %6087 = vmatprep.subr.bf16.mxu1 %v6086_v48  ;;  %v8948_v45 = vpop.eup %6934  ;;  %v1731_v48 = vld [vmem:[%s11264_s3 + $0x838] sm:$0xff]  ;;  %v6170_v12 = vpack.c.bf16 %v1538_v9, %v1525_v8  ;;  %v1628_v8 = vld [vmem:[%s11264_s3 + $0x500] sm:$0xff]  ;;  %v1641_v9 = vld [vmem:[%s11264_s3 + $0x568] sm:$0xff] }
 0x1ce   :  { %6119 = vmatprep.subr.bf16.mxu0 %v6118_v13  ;;  %v1730_v13 = vld [vmem:[%s11264_s3 + $0x830] sm:$0xff]  ;;  %v8967_v16 = vpop.eup %6936  ;;  %v6138_v17 = vpack.c.bf16 %v1744_v62, %v1731_v48  ;;  %v6154_v48 = vpack.c.bf16 %v1848_v63, %v1835_v61  ;;  %v1847_v62 = vld [vmem:[%s11264_s3 + $0xbd8] sm:$0xff]  ;;  %v1513_v50 = vld [vmem:[%s11264_s3 + $0x168] sm:$0xff] }
 0x1cf   :  { %v1732_v61 = vld [vmem:[%s11264_s3 + $0x840] sm:$0xff]  ;;  %v1745_v63 = vld [vmem:[%s11264_s3 + $0x8a8] sm:$0xff] }
 0x1d0   :  { %6089 = vmatpush1.bf16.msra.mxu1 %v6088_v58  ;;  %v1564_v58 = vld [vmem:[%s11264_s3 + $0x300] sm:$0xff] }
 0x1d1   :  { %6121 = vmatpush1.bf16.msra.mxu0 %v6120_v21  ;;  %6091 = vmatprep.subr.bf16.mxu1 %v6090_v23  ;;  %v6172_v21 = vpack.c.bf16 %v1537_v15, %v1524_v14  ;;  %v6140_v23 = vpack.c.bf16 %v1743_v18, %v1730_v13  ;;  %v6174_v24 = vpack.c.bf16 %v1564_v58, %v1551_v53  ;;  %v1874_v13 = vld [vmem:[%s11264_s3 + $0xcb0] sm:$0xff] }
 0x1d2   :  { %6123 = vmatprep.subr.bf16.mxu0 %v6122_v27  ;;  %v1563_v27 = vld [vmem:[%s11264_s3 + $0x2f8] sm:$0xff]  ;;  %v6156_v53 = vpack.c.bf16 %v1847_v62, %v1834_v7  ;;  %v1566_v7 = vld [vmem:[%s11264_s3 + $0x310] sm:$0xff] }
 0x1d3   :  { %v1758_v62 = vld [vmem:[%s11264_s3 + $0x910] sm:$0xff] }
 0x1d4   :  { %6093 = vmatpush1.bf16.msra.mxu1 %v6092_v34  ;;  %v6176_v34 = vpack.c.bf16 %v1563_v27, %v1550_v26  ;;  %v1681_v26 = vld [vmem:[%s11264_s3 + $0x6a8] sm:$0xff]  ;;  %v1694_v27 = vld [vmem:[%s11264_s3 + $0x710] sm:$0xff] }
 0x1d5   :  { %6125 = vmatpush1.bf16.msra.mxu0 %v6124_v35  ;;  %6095 = vmatprep.subr.bf16.mxu1 %v6094_v37  ;;  %v6144_v35 = vpack.c.bf16 %v1769_v30, %v1756_v25  ;;  %v6178_v37 = vpack.c.bf16 %v1590_v32, %v1577_v31  ;;  %v1873_v25 = vld [vmem:[%s11264_s3 + $0xca8] sm:$0xff]  ;;  %v1488_v30 = vld [vmem:[%s11264_s3 + $0xa0] sm:$0xff] }
 0x1d6   :  { %6127 = vmatprep.subr.bf16.mxu0 %v6126_v40  ;;  %v6146_v40 = vpack.c.bf16 %v1796_v28, %v1783_v33  ;;  %v6160_v32 = vpack.c.bf16 %v1873_v25, %v1860_v20  ;;  %v6194_v33 = vpack.c.bf16 %v1694_v27, %v1681_v26  ;;  %v1680_v28 = vld [vmem:[%s11264_s3 + $0x6a0] sm:$0xff]  ;;  %v1591_v25 = vld [vmem:[%s11264_s3 + $0x3d8] sm:$0xff] }
 0x1d7   :  { %v1784_v20 = vld [vmem:[%s11264_s3 + $0x9e0] sm:$0xff]  ;;  %v1811_v26 = vld [vmem:[%s11264_s3 + $0xab8] sm:$0xff] }
 0x1d8   :  { %6097 = vmatpush1.bf16.msra.mxu1 %v6096_v41  ;;  %v6180_v41 = vpack.c.bf16 %v1589_v39, %v1576_v38  ;;  %v1707_v38 = vld [vmem:[%s11264_s3 + $0x778] sm:$0xff]  ;;  %v1720_v39 = vld [vmem:[%s11264_s3 + $0x7e0] sm:$0xff] }
 0x1d9   :  { %6129 = vmatpush1.bf16.msra.mxu0 %v6128_v49  ;;  %6163 = vmatprep.subr.bf16.mxu1 %v6162_v51  ;;  %v6148_v49 = vpack.c.bf16 %v1795_v42, %v1782_v36  ;;  %v6182_v51 = vpack.c.bf16 %v1616_v44, %v1603_v43  ;;  %v1487_v36 = vld [vmem:[%s11264_s3 + $0x98] sm:$0xff]  ;;  %v1514_v42 = vld [vmem:[%s11264_s3 + $0x170] sm:$0xff]  ;;  %v1824_v27 = vld [vmem:[%s11264_s3 + $0xb20] sm:$0xff] }
 0x1da   :  { %6131 = vmatprep.subr.bf16.mxu0 %v6130_v55  ;;  %v6150_v55 = vpack.c.bf16 %v1822_v47, %v1809_v46  ;;  %v1706_v46 = vld [vmem:[%s11264_s3 + $0x770] sm:$0xff]  ;;  %v1719_v47 = vld [vmem:[%s11264_s3 + $0x7d8] sm:$0xff] }
 0x1db   :  { %1949 = vmatmul.mubr.f32.vlgmr.msra.gmra.mrb[16].mxu1 %v8937_v5 }
 0x1dc   :  { %1954 = vmatprep.mubr.f32.mxu1 %v8948_v45  ;;  %6165 = vmatpush1.bf16.msra.mxu1 %v6164_v0 }
 0x1dd   :  { %6133 = vmatpush1.bf16.msra.mxu0 %v6132_v1  ;;  %6167 = vmatprep.subr.bf16.mxu1 %v6166_v2  ;;  %v6184_v2 = vpack.c.bf16 %v1615_v54, %v1602_v52  ;;  %v1733_v52 = vld [vmem:[%s11264_s3 + $0x848] sm:$0xff]  ;;  %v1746_v54 = vld [vmem:[%s11264_s3 + $0x8b0] sm:$0xff] }
 0x1de   :  { %6135 = vmatprep.subr.bf16.mxu0 %v6134_v6  ;;  %v6186_v6 = vpack.c.bf16 %v1642_v60, %v1629_v59  ;;  %v6200_v59 = vpack.c.bf16 %v1719_v47, %v1706_v46  ;;  %v1836_v47 = vld [vmem:[%s11264_s3 + $0xb80] sm:$0xff] }
 0x1df   :  { %1955 = vmatmul.mubr.f32.gmra.mrb[18].mxu1 %v8967_v16 }
 0x1e0   :  { %6169 = vmatpush1.bf16.msra.mxu1 %v6168_v10  ;;  %2102 = vmatprep.mubr.f32.mxu1 %v8567_v56  ;;  %v1655_v10 = vld [vmem:[%s11264_s3 + $0x5d8] sm:$0xff] }
 0x1e1   :  { %6137 = vmatpush1.bf16.msra.mxu0 %v6136_v11  ;;  %6171 = vmatprep.subr.bf16.mxu1 %v6170_v12  ;;  %v1668_v11 = vld [vmem:[%s11264_s3 + $0x640] sm:$0xff]  ;;  %v1861_v12 = vld [vmem:[%s11264_s3 + $0xc48] sm:$0xff] }
 0x1e2   :  { %6139 = vmatprep.subr.bf16.mxu0 %v6138_v17  ;;  %v6188_v17 = vpack.c.bf16 %v1641_v9, %v1628_v8  ;;  %v6190_v19 = vpack.c.bf16 %v1668_v11, %v1655_v10  ;;  %v6204_v8 = vpack.c.bf16 %v1745_v63, %v1732_v61  ;;  %v1771_v10 = vld [vmem:[%s11264_s3 + $0x978] sm:$0xff]  ;;  %v1552_v11 = vld [vmem:[%s11264_s3 + $0x2a0] sm:$0xff]  ;;  %v1862_v63 = vld [vmem:[%s11264_s3 + $0xc50] sm:$0xff] }
 0x1e4   :  { %6173 = vmatpush1.bf16.msra.mxu1 %v6172_v21  ;;  %v1654_v21 = vld [vmem:[%s11264_s3 + $0x5d0] sm:$0xff] }
 0x1e5   :  { %6141 = vmatpush1.bf16.msra.mxu0 %v6140_v23  ;;  %6175 = vmatprep.subr.bf16.mxu1 %v6174_v24  ;;  %v1667_v23 = vld [vmem:[%s11264_s3 + $0x638] sm:$0xff]  ;;  %v6158_v24 = vpack.c.bf16 %v1874_v13, %v1861_v12  ;;  %v1565_v13 = vld [vmem:[%s11264_s3 + $0x308] sm:$0xff] }
 0x1e6   :  { %6143 = vmatprep.subr.bf16.mxu0 %v6142_v29  ;;  %v1475_v29 = vld [vmem:[%s11264_s3 + $0x38] sm:$0xff]  ;;  %v6192_v31 = vpack.c.bf16 %v1667_v23, %v1654_v21  ;;  %v1797_v21 = vld [vmem:[%s11264_s3 + $0xa48] sm:$0xff]  ;;  %v1578_v23 = vld [vmem:[%s11264_s3 + $0x370] sm:$0xff] }
 0x1e8   :  { %6177 = vmatpush1.bf16.msra.mxu1 %v6176_v34  ;;  %v1693_v34 = vld [vmem:[%s11264_s3 + $0x708] sm:$0xff] }
 0x1e9   :  { %6145 = vmatpush1.bf16.msra.mxu0 %v6144_v35  ;;  %6179 = vmatprep.subr.bf16.mxu1 %v6178_v37  ;;  %v6226_v35 = vpack.c.bf16 %v1488_v30, %v1475_v29  ;;  %v1474_v37 = vld [vmem:[%s11264_s3 + $0x30] sm:$0xff]  ;;  %v6196_v43 = vpack.c.bf16 %v1693_v34, %v1680_v28  ;;  %v1605_v29 = vld [vmem:[%s11264_s3 + $0x448] sm:$0xff]  ;;  %v1823_v34 = vld [vmem:[%s11264_s3 + $0xb18] sm:$0xff] }
 0x1ea   :  { %6147 = vmatprep.subr.bf16.mxu0 %v6146_v40  ;;  %v1501_v40 = vld [vmem:[%s11264_s3 + $0x108] sm:$0xff]  ;;  %v6228_v44 = vpack.c.bf16 %v1487_v36, %v1474_v37  ;;  %v1618_v30 = vld [vmem:[%s11264_s3 + $0x4b0] sm:$0xff] }
 0x1eb   :  { %v1810_v28 = vld [vmem:[%s11264_s3 + $0xab0] sm:$0xff]  ;;  %v6246_v37 = vpack.c.bf16 %v1618_v30, %v1605_v29  ;;  %v1617_v36 = vld [vmem:[%s11264_s3 + $0x4a8] sm:$0xff]  ;;  %v1735_v29 = vld [vmem:[%s11264_s3 + $0x858] sm:$0xff] }
 0x1ec   :  { %6181 = vmatpush1.bf16.msra.mxu1 %v6180_v41  ;;  %v849_v0 = vpop.f32.mrb[4].mxu0  ;;  %v926_v1 = vpop.f32.mrb[4].mxu1  ;;  %v6198_v41 = vpack.c.bf16 %v1720_v39, %v1707_v38  ;;  %v1837_v38 = vld [vmem:[%s11264_s3 + $0xb88] sm:$0xff]  ;;  %v1850_v39 = vld [vmem:[%s11264_s3 + $0xbf0] sm:$0xff]  ;;  %v1748_v30 = vld [vmem:[%s11264_s3 + $0x8c0] sm:$0xff] }
 0x1ed   :  { %6149 = vmatpush1.bf16.msra.mxu0 %v6148_v49  ;;  %1321 = vst.msk [vmem:[#allocation2] sm:$0xff] %vm1320_vm0, %v849_v0  ;;  %1346 = vst.msk [vmem:[#allocation2 + $0x30] sm:$0xff] %vm1320_vm0, %v926_v1  ;;  %6183 = vmatprep.subr.bf16.mxu1 %v6182_v51  ;;  %v928_v3 = vpop.f32.mrb[5].mxu1  ;;  %v851_v4 = vpop.f32.mrb[5].mxu0  ;;  %v6230_v49 = vpack.c.bf16 %v1514_v42, %v1501_v40  ;;  %v1500_v51 = vld [vmem:[%s11264_s3 + $0x100] sm:$0xff]  ;;  %v1631_v40 = vld [vmem:[%s11264_s3 + $0x518] sm:$0xff]  ;;  %v6218_v46 = vpack.c.bf16 %v1850_v39, %v1837_v38 }
 0x1ee   :  { %6151 = vmatprep.subr.bf16.mxu0 %v6150_v55  ;;  %1358 = vst.msk [vmem:[#allocation2 + $0x48] sm:$0xff] %vm1320_vm0, %v928_v3  ;;  %1326 = vrot.lane.b32.xlu0 %v849_v0, %s6982_s12  ;;  %1334 = vst.msk [vmem:[#allocation2 + $0x18] sm:$0xff] %vm1320_vm0, %v851_v4  ;;  %v1527_v55 = vld [vmem:[%s11264_s3 + $0x1d8] sm:$0xff]  ;;  %v6232_v60 = vpack.c.bf16 %v1513_v50, %v1500_v51  ;;  %v1526_v0 = vld [vmem:[%s11264_s3 + $0x1d0] sm:$0xff] }
 0x1ef   :  { %1338 = vrot.lane.b32.xlu1 %v851_v4, %s6982_s12  ;;  %v1772_v4 = vld [vmem:[%s11264_s3 + $0x980] sm:$0xff]  ;;  %v1643_v50 = vld [vmem:[%s11264_s3 + $0x578] sm:$0xff] }
 0x1f0   :  { %6185 = vmatpush1.bf16.msra.mxu1 %v6184_v2  ;;  %v855_v14 = vpop.f32.mrb[6].mxu0  ;;  %v932_v15 = vpop.f32.mrb[6].mxu1  ;;  %v6234_v2 = vpack.c.bf16 %v1540_v57, %v1527_v55  ;;  %v1644_v42 = vld [vmem:[%s11264_s3 + $0x580] sm:$0xff]  ;;  %v1657_v55 = vld [vmem:[%s11264_s3 + $0x5e8] sm:$0xff]  ;;  %v1670_v57 = vld [vmem:[%s11264_s3 + $0x650] sm:$0xff] }
 0x1f1   :  { %6153 = vmatpush1.bf16.msra.mxu0 %v6152_v22  ;;  %1323 = vst.msk [vmem:[#allocation2 + $0x8] sm:$0xf] %vm1322_vm1, %v855_v14  ;;  %1347 = vst.msk [vmem:[#allocation2 + $0x38] sm:$0xf] %vm1322_vm1, %v932_v15  ;;  %6187 = vmatprep.subr.bf16.mxu1 %v6186_v6  ;;  %v934_v18 = vpop.f32.mrb[7].mxu1  ;;  %v857_v58 = vpop.f32.mrb[7].mxu0  ;;  %v6250_v51 = vpack.c.bf16 %v1644_v42, %v1631_v40 }
 0x1f2   :  { %6155 = vmatprep.subr.bf16.mxu0 %v6154_v48  ;;  %1359 = vst.msk [vmem:[#allocation2 + $0x50] sm:$0xf] %vm1322_vm1, %v934_v18  ;;  %1350 = vrot.lane.b32.xlu0 %v926_v1, %s6982_s12  ;;  %1335 = vst.msk [vmem:[#allocation2 + $0x20] sm:$0xf] %vm1322_vm1, %v857_v58  ;;  %v6202_v1 = vpack.c.bf16 %v1746_v54, %v1733_v52  ;;  %v1759_v22 = vld [vmem:[%s11264_s3 + $0x918] sm:$0xff]  ;;  %v1553_v6 = vld [vmem:[%s11264_s3 + $0x2a8] sm:$0xff] }
 0x1f3   :  { %1328 = vrot.lane.b32.xlu1 %v855_v14, %s6982_s12  ;;  %v6206_v48 = vpack.c.bf16 %v1772_v4, %v1759_v22  ;;  %v6238_v12 = vpack.c.bf16 %v1566_v7, %v1553_v6  ;;  %v1785_v14 = vld [vmem:[%s11264_s3 + $0x9e8] sm:$0xff]  ;;  %v1863_v52 = vld [vmem:[%s11264_s3 + $0xc58] sm:$0xff]  ;;  %v1876_v54 = vld [vmem:[%s11264_s3 + $0xcc0] sm:$0xff] }
 0x1f4   :  { %6189 = vmatpush1.bf16.msra.mxu1 %v6188_v17  ;;  %v1579_v17 = vld [vmem:[%s11264_s3 + $0x378] sm:$0xff]  ;;  %v6222_v61 = vpack.c.bf16 %v1876_v54, %v1863_v52  ;;  %v1477_v22 = vld [vmem:[%s11264_s3 + $0x48] sm:$0xff]  ;;  %v1490_v4 = vld [vmem:[%s11264_s3 + $0xb0] sm:$0xff] }
 0x1f5   :  { %6157 = vmatpush1.bf16.msra.mxu0 %v6156_v53  ;;  %6191 = vmatprep.subr.bf16.mxu1 %v6190_v19  ;;  %v6208_v53 = vpack.c.bf16 %v1771_v10, %v1758_v62  ;;  %v1683_v6 = vld [vmem:[%s11264_s3 + $0x6b8] sm:$0xff]  ;;  %v1696_v7 = vld [vmem:[%s11264_s3 + $0x720] sm:$0xff]  ;;  %v1682_v62 = vld [vmem:[%s11264_s3 + $0x6b0] sm:$0xff] }
 0x1f6   :  { %6159 = vmatprep.subr.bf16.mxu0 %v6158_v24  ;;  %1362 = vrot.lane.b32.xlu0 %v928_v3, %s6982_s12  ;;  %v1539_v3 = vld [vmem:[%s11264_s3 + $0x238] sm:$0xff]  ;;  %v1476_v10 = vld [vmem:[%s11264_s3 + $0x40] sm:$0xff]  ;;  %v1761_v40 = vld [vmem:[%s11264_s3 + $0x928] sm:$0xff] }
 0x1f7   :  { %1352 = vrot.lane.b32.xlu1 %v932_v15, %s6982_s12  ;;  %v6236_v9 = vpack.c.bf16 %v1539_v3, %v1526_v0  ;;  %v1798_v15 = vld [vmem:[%s11264_s3 + $0xa50] sm:$0xff]  ;;  %v1875_v0 = vld [vmem:[%s11264_s3 + $0xcb8] sm:$0xff]  ;;  %v1669_v3 = vld [vmem:[%s11264_s3 + $0x648] sm:$0xff] }
 0x1f8   :  { %6193 = vmatpush1.bf16.msra.mxu1 %v6192_v31  ;;  %v6210_v19 = vpack.c.bf16 %v1798_v15, %v1785_v14  ;;  %v6212_v31 = vpack.c.bf16 %v1797_v21, %v1784_v20  ;;  %v1503_v14 = vld [vmem:[%s11264_s3 + $0x118] sm:$0xff]  ;;  %v1516_v15 = vld [vmem:[%s11264_s3 + $0x180] sm:$0xff]  ;;  %v1502_v21 = vld [vmem:[%s11264_s3 + $0x110] sm:$0xff] }
 0x1f9   :  { %6161 = vmatpush1.bf16.msra.mxu0 %v6160_v32  ;;  %6195 = vmatprep.subr.bf16.mxu1 %v6194_v33  ;;  %v6244_v32 = vpack.c.bf16 %v1591_v25, %v1578_v23  ;;  %v6214_v33 = vpack.c.bf16 %v1824_v27, %v1811_v26  ;;  %v1708_v20 = vld [vmem:[%s11264_s3 + $0x780] sm:$0xff]  ;;  %v1515_v23 = vld [vmem:[%s11264_s3 + $0x178] sm:$0xff]  ;;  %v1721_v25 = vld [vmem:[%s11264_s3 + $0x7e8] sm:$0xff] }
 0x1fa   :  { %6227 = vmatprep.subr.bf16.mxu0 %v6226_v35  ;;  %1340 = vrot.lane.b32.xlu0 %v857_v58, %s6982_s12  ;;  %v6240_v58 = vpack.c.bf16 %v1565_v13, %v1552_v11  ;;  %v1604_v35 = vld [vmem:[%s11264_s3 + $0x440] sm:$0xff]  ;;  %v1489_v11 = vld [vmem:[%s11264_s3 + $0xa8] sm:$0xff]  ;;  %v1695_v13 = vld [vmem:[%s11264_s3 + $0x718] sm:$0xff] }
 0x1fb   :  { %1364 = vrot.lane.b32.xlu1 %v934_v18, %s6982_s12  ;;  %v1592_v18 = vld [vmem:[%s11264_s3 + $0x3e0] sm:$0xff]  ;;  %v1529_v26 = vld [vmem:[%s11264_s3 + $0x1e8] sm:$0xff]  ;;  %v1542_v27 = vld [vmem:[%s11264_s3 + $0x250] sm:$0xff] }
 0x1fc   :  { %2026 = vmatmul.mubr.f32.vlgmr.msra.gmra.mrb[20].mxu0 %v8937_v5  ;;  %6197 = vmatpush1.bf16.msra.mxu1 %v6196_v43  ;;  %v6242_v24 = vpack.c.bf16 %v1592_v18, %v1579_v17  ;;  %v6216_v43 = vpack.c.bf16 %v1823_v34, %v1810_v28  ;;  %v1709_v17 = vld [vmem:[%s11264_s3 + $0x788] sm:$0xff]  ;;  %v1722_v18 = vld [vmem:[%s11264_s3 + $0x7f0] sm:$0xff]  ;;  %v1528_v34 = vld [vmem:[%s11264_s3 + $0x1e0] sm:$0xff] }
 0x1fd   :  { %2031 = vmatprep.mubr.f32.mxu0 %v8948_v45  ;;  %6229 = vmatpush1.bf16.msra.mxu0 %v6228_v44  ;;  %v6248_v44 = vpack.c.bf16 %v1617_v36, %v1604_v35  ;;  %v1734_v28 = vld [vmem:[%s11264_s3 + $0x850] sm:$0xff]  ;;  %v1541_v35 = vld [vmem:[%s11264_s3 + $0x248] sm:$0xff]  ;;  %v1747_v36 = vld [vmem:[%s11264_s3 + $0x8b8] sm:$0xff] }
 0x1fe   :  { %6199 = vmatprep.subr.bf16.mxu1 %v6198_v41  ;;  %6231 = vmatprep.subr.bf16.mxu0 %v6230_v49  ;;  %v1849_v41 = vld [vmem:[%s11264_s3 + $0xbe8] sm:$0xff]  ;;  %v1630_v49 = vld [vmem:[%s11264_s3 + $0x510] sm:$0xff]  ;;  %v1555_v38 = vld [vmem:[%s11264_s3 + $0x2b8] sm:$0xff] }
 0x1ff   :  { %v1568_v39 = vld [vmem:[%s11264_s3 + $0x320] sm:$0xff]  ;;  %v1774_v42 = vld [vmem:[%s11264_s3 + $0x990] sm:$0xff]  ;;  %v1581_v52 = vld [vmem:[%s11264_s3 + $0x388] sm:$0xff] }
 0x200   :  { %2032 = vmatmul.mubr.f32.gmra.mrb[22].mxu0 %v8967_v16  ;;  %6201 = vmatpush1.bf16.msra.mxu1 %v6200_v59  ;;  %v6220_v59 = vpack.c.bf16 %v1849_v41, %v1836_v47  ;;  %v1760_v47 = vld [vmem:[%s11264_s3 + $0x920] sm:$0xff]  ;;  %v1554_v41 = vld [vmem:[%s11264_s3 + $0x2b0] sm:$0xff] }
 0x201   :  { %6233 = vmatpush1.bf16.msra.mxu0 %v6232_v60  ;;  %2179 = vmatprep.mubr.f32.mxu0 %v8567_v56  ;;  %v6252_v60 = vpack.c.bf16 %v1643_v50, %v1630_v49  ;;  %v1567_v49 = vld [vmem:[%s11264_s3 + $0x318] sm:$0xff]  ;;  %v1773_v50 = vld [vmem:[%s11264_s3 + $0x988] sm:$0xff]  ;;  %v1594_v54 = vld [vmem:[%s11264_s3 + $0x3f0] sm:$0xff] }
 0x202   :  { %6203 = vmatprep.subr.bf16.mxu1 %v6202_v1  ;;  %6235 = vmatprep.subr.bf16.mxu0 %v6234_v2  ;;  %v1656_v1 = vld [vmem:[%s11264_s3 + $0x5e0] sm:$0xff]  ;;  %v6254_v2 = vpack.c.bf16 %v1670_v57, %v1657_v55  ;;  %v1787_v55 = vld [vmem:[%s11264_s3 + $0x9f8] sm:$0xff] }
 0x203   :  { %v1800_v57 = vld [vmem:[%s11264_s3 + $0xa60] sm:$0xff] }
 0x204   :  { %6205 = vmatpush1.bf16.msra.mxu1 %v6204_v8  ;;  %v6224_v8 = vpack.c.bf16 %v1875_v0, %v1862_v63  ;;  %v1786_v63 = vld [vmem:[%s11264_s3 + $0x9f0] sm:$0xff]  ;;  %v1580_v0 = vld [vmem:[%s11264_s3 + $0x380] sm:$0xff] }
 0x205   :  { %6237 = vmatpush1.bf16.msra.mxu0 %v6236_v9  ;;  %6207 = vmatprep.subr.bf16.mxu1 %v6206_v48  ;;  %v6256_v9 = vpack.c.bf16 %v1669_v3, %v1656_v1  ;;  %v6290_v48 = vpack.c.bf16 %v1490_v4, %v1477_v22  ;;  %v1593_v1 = vld [vmem:[%s11264_s3 + $0x3e8] sm:$0xff]  ;;  %v1799_v3 = vld [vmem:[%s11264_s3 + $0xa58] sm:$0xff]  ;;  %v1620_v4 = vld [vmem:[%s11264_s3 + $0x4c0] sm:$0xff] }
 0x206   :  { %6239 = vmatprep.subr.bf16.mxu0 %v6238_v12  ;;  %v6258_v12 = vpack.c.bf16 %v1696_v7, %v1683_v6  ;;  %v1607_v22 = vld [vmem:[%s11264_s3 + $0x458] sm:$0xff]  ;;  %v1813_v6 = vld [vmem:[%s11264_s3 + $0xac8] sm:$0xff]  ;;  %v1826_v7 = vld [vmem:[%s11264_s3 + $0xb30] sm:$0xff] }
 0x208   :  { %6209 = vmatpush1.bf16.msra.mxu1 %v6208_v53  ;;  %v6292_v53 = vpack.c.bf16 %v1489_v11, %v1476_v10  ;;  %v1606_v10 = vld [vmem:[%s11264_s3 + $0x450] sm:$0xff]  ;;  %v1619_v11 = vld [vmem:[%s11264_s3 + $0x4b8] sm:$0xff] }
 0x209   :  { %6241 = vmatpush1.bf16.msra.mxu0 %v6240_v58  ;;  %6211 = vmatprep.subr.bf16.mxu1 %v6210_v19  ;;  %v6260_v58 = vpack.c.bf16 %v1695_v13, %v1682_v62  ;;  %v6294_v19 = vpack.c.bf16 %v1516_v15, %v1503_v14  ;;  %v1812_v62 = vld [vmem:[%s11264_s3 + $0xac0] sm:$0xff]  ;;  %v1825_v13 = vld [vmem:[%s11264_s3 + $0xb28] sm:$0xff]  ;;  %v1646_v15 = vld [vmem:[%s11264_s3 + $0x590] sm:$0xff] }
 0x20a   :  { %6243 = vmatprep.subr.bf16.mxu0 %v6242_v24  ;;  %v6262_v24 = vpack.c.bf16 %v1722_v18, %v1709_v17  ;;  %v1633_v14 = vld [vmem:[%s11264_s3 + $0x528] sm:$0xff]  ;;  %v1839_v17 = vld [vmem:[%s11264_s3 + $0xb98] sm:$0xff]  ;;  %v1852_v18 = vld [vmem:[%s11264_s3 + $0xc00] sm:$0xff] }
 0x20c   :  { %6213 = vmatpush1.bf16.msra.mxu1 %v6212_v31  ;;  %v6296_v31 = vpack.c.bf16 %v1515_v23, %v1502_v21  ;;  %v6280_v23 = vpack.c.bf16 %v1825_v13, %v1812_v62  ;;  %v1517_v62 = vld [vmem:[%s11264_s3 + $0x188] sm:$0xff]  ;;  %v1544_v13 = vld [vmem:[%s11264_s3 + $0x260] sm:$0xff] }
 0x20d   :  { %6245 = vmatpush1.bf16.msra.mxu0 %v6244_v32  ;;  %6215 = vmatprep.subr.bf16.mxu1 %v6214_v33  ;;  %v6264_v32 = vpack.c.bf16 %v1721_v25, %v1708_v20  ;;  %v6298_v33 = vpack.c.bf16 %v1542_v27, %v1529_v26  ;;  %v1838_v25 = vld [vmem:[%s11264_s3 + $0xb90] sm:$0xff]  ;;  %v1632_v26 = vld [vmem:[%s11264_s3 + $0x520] sm:$0xff]  ;;  %v1645_v27 = vld [vmem:[%s11264_s3 + $0x588] sm:$0xff] }
 0x20e   :  { %6247 = vmatprep.subr.bf16.mxu0 %v6246_v37  ;;  %v6266_v37 = vpack.c.bf16 %v1748_v30, %v1735_v29  ;;  %v6282_v29 = vpack.c.bf16 %v1852_v18, %v1839_v17  ;;  %v1851_v30 = vld [vmem:[%s11264_s3 + $0xbf8] sm:$0xff]  ;;  %v1736_v17 = vld [vmem:[%s11264_s3 + $0x860] sm:$0xff]  ;;  %v1749_v18 = vld [vmem:[%s11264_s3 + $0x8c8] sm:$0xff] }
 0x210   :  { %6217 = vmatpush1.bf16.msra.mxu1 %v6216_v43  ;;  %v6300_v43 = vpack.c.bf16 %v1541_v35, %v1528_v34 }
 0x211   :  { %6249 = vmatpush1.bf16.msra.mxu0 %v6248_v44  ;;  %6219 = vmatprep.subr.bf16.mxu1 %v6218_v46  ;;  %v6268_v44 = vpack.c.bf16 %v1747_v36, %v1734_v28  ;;  %v6302_v46 = vpack.c.bf16 %v1568_v39, %v1555_v38  ;;  %v1878_v28 = vld [vmem:[%s11264_s3 + $0xcd0] sm:$0xff]  ;;  %v6284_v39 = vpack.c.bf16 %v1851_v30, %v1838_v25  ;;  %v1557_v25 = vld [vmem:[%s11264_s3 + $0x2c8] sm:$0xff] }
 0x212   :  { %6251 = vmatprep.subr.bf16.mxu0 %v6250_v51  ;;  %v6270_v51 = vpack.c.bf16 %v1774_v42, %v1761_v40  ;;  %v1864_v42 = vld [vmem:[%s11264_s3 + $0xc60] sm:$0xff] }
 0x214   :  { %6221 = vmatpush1.bf16.msra.mxu1 %v6220_v59  ;;  %v6304_v59 = vpack.c.bf16 %v1567_v49, %v1554_v41  ;;  %v1685_v41 = vld [vmem:[%s11264_s3 + $0x6c8] sm:$0xff]  ;;  %v1698_v49 = vld [vmem:[%s11264_s3 + $0x730] sm:$0xff] }
 0x215   :  { %6253 = vmatpush1.bf16.msra.mxu0 %v6252_v60  ;;  %6223 = vmatprep.subr.bf16.mxu1 %v6222_v61  ;;  %v6272_v60 = vpack.c.bf16 %v1773_v50, %v1760_v47  ;;  %v6306_v61 = vpack.c.bf16 %v1594_v54, %v1581_v52  ;;  %v1877_v47 = vld [vmem:[%s11264_s3 + $0xcc8] sm:$0xff]  ;;  %v1492_v50 = vld [vmem:[%s11264_s3 + $0xc0] sm:$0xff] }
 0x216   :  { %6255 = vmatprep.subr.bf16.mxu0 %v6254_v2  ;;  %v6274_v2 = vpack.c.bf16 %v1800_v57, %v1787_v55  ;;  %v6288_v54 = vpack.c.bf16 %v1877_v47, %v1864_v42  ;;  %v6322_v55 = vpack.c.bf16 %v1698_v49, %v1685_v41  ;;  %v1684_v57 = vld [vmem:[%s11264_s3 + $0x6c0] sm:$0xff]  ;;  %v1582_v47 = vld [vmem:[%s11264_s3 + $0x390] sm:$0xff]  ;;  %v1595_v49 = vld [vmem:[%s11264_s3 + $0x3f8] sm:$0xff] }
 0x218   :  { %6225 = vmatpush1.bf16.msra.mxu1 %v6224_v8  ;;  %v6308_v8 = vpack.c.bf16 %v1593_v1, %v1580_v0  ;;  %v1711_v0 = vld [vmem:[%s11264_s3 + $0x798] sm:$0xff]  ;;  %v1724_v1 = vld [vmem:[%s11264_s3 + $0x800] sm:$0xff] }
 0x219   :  { %6257 = vmatpush1.bf16.msra.mxu0 %v6256_v9  ;;  %6291 = vmatprep.subr.bf16.mxu1 %v6290_v48  ;;  %v6276_v9 = vpack.c.bf16 %v1799_v3, %v1786_v63  ;;  %v6310_v48 = vpack.c.bf16 %v1620_v4, %v1607_v22  ;;  %v1491_v63 = vld [vmem:[%s11264_s3 + $0xb8] sm:$0xff]  ;;  %v1518_v3 = vld [vmem:[%s11264_s3 + $0x190] sm:$0xff] }
 0x21a   :  { %6259 = vmatprep.subr.bf16.mxu0 %v6258_v12  ;;  %v6278_v12 = vpack.c.bf16 %v1826_v7, %v1813_v6  ;;  %v1710_v6 = vld [vmem:[%s11264_s3 + $0x790] sm:$0xff]  ;;  %v1723_v7 = vld [vmem:[%s11264_s3 + $0x7f8] sm:$0xff] }
 0x21b   :  { %2103 = vmatmul.mubr.f32.vlgmr.msra.gmra.mrb[20].mxu1 %v8937_v5 }
 0x21c   :  { %2108 = vmatprep.mubr.f32.mxu1 %v8948_v45  ;;  %6293 = vmatpush1.bf16.msra.mxu1 %v6292_v53 }
 0x21d   :  { %6261 = vmatpush1.bf16.msra.mxu0 %v6260_v58  ;;  %6295 = vmatprep.subr.bf16.mxu1 %v6294_v19  ;;  %v6312_v19 = vpack.c.bf16 %v1619_v11, %v1606_v10  ;;  %v1737_v10 = vld [vmem:[%s11264_s3 + $0x868] sm:$0xff]  ;;  %v1750_v11 = vld [vmem:[%s11264_s3 + $0x8d0] sm:$0xff] }
 0x21e   :  { %6263 = vmatprep.subr.bf16.mxu0 %v6262_v24  ;;  %v6314_v24 = vpack.c.bf16 %v1646_v15, %v1633_v14  ;;  %v6328_v14 = vpack.c.bf16 %v1723_v7, %v1710_v6 }
 0x21f   :  { %2109 = vmatmul.mubr.f32.gmra.mrb[22].mxu1 %v8967_v16 }
 0x220   :  { %6297 = vmatpush1.bf16.msra.mxu1 %v6296_v31  ;;  %2256 = vmatprep.mubr.f32.mxu1 %v8567_v56  ;;  %v1659_v31 = vld [vmem:[%s11264_s3 + $0x5f8] sm:$0xff] }
 0x221   :  { %6265 = vmatpush1.bf16.msra.mxu0 %v6264_v32  ;;  %6299 = vmatprep.subr.bf16.mxu1 %v6298_v33  ;;  %v1672_v32 = vld [vmem:[%s11264_s3 + $0x660] sm:$0xff]  ;;  %v1865_v33 = vld [vmem:[%s11264_s3 + $0xc68] sm:$0xff] }
 0x222   :  { %6267 = vmatprep.subr.bf16.mxu0 %v6266_v37  ;;  %v6316_v37 = vpack.c.bf16 %v1645_v27, %v1632_v26  ;;  %v6318_v40 = vpack.c.bf16 %v1672_v32, %v1659_v31  ;;  %v1570_v26 = vld [vmem:[%s11264_s3 + $0x330] sm:$0xff]  ;;  %v6332_v27 = vpack.c.bf16 %v1749_v18, %v1736_v17  ;;  %v1775_v32 = vld [vmem:[%s11264_s3 + $0x998] sm:$0xff] }
 0x223   :  { %v1762_v31 = vld [vmem:[%s11264_s3 + $0x930] sm:$0xff] }
 0x224   :  { %6301 = vmatpush1.bf16.msra.mxu1 %v6300_v43  ;;  %v1658_v43 = vld [vmem:[%s11264_s3 + $0x5f0] sm:$0xff] }
 0x225   :  { %6269 = vmatpush1.bf16.msra.mxu0 %v6268_v44  ;;  %6303 = vmatprep.subr.bf16.mxu1 %v6302_v46  ;;  %v1671_v44 = vld [vmem:[%s11264_s3 + $0x658] sm:$0xff]  ;;  %v6286_v46 = vpack.c.bf16 %v1878_v28, %v1865_v33  ;;  %v1556_v33 = vld [vmem:[%s11264_s3 + $0x2c0] sm:$0xff]  ;;  %v6366_v28 = vpack.c.bf16 %v1570_v26, %v1557_v25  ;;  %v1701_v26 = vld [vmem:[%s11264_s3 + $0x748] sm:$0xff] }
 0x226   :  { %6271 = vmatprep.subr.bf16.mxu0 %v6270_v51  ;;  %v1479_v51 = vld [vmem:[%s11264_s3 + $0x58] sm:$0xff]  ;;  %v6320_v52 = vpack.c.bf16 %v1671_v44, %v1658_v43  ;;  %v1788_v44 = vld [vmem:[%s11264_s3 + $0xa00] sm:$0xff] }
 0x227   :  { %v1688_v25 = vld [vmem:[%s11264_s3 + $0x6e0] sm:$0xff] }
 0x228   :  { %6305 = vmatpush1.bf16.msra.mxu1 %v6304_v59  ;;  %v1697_v59 = vld [vmem:[%s11264_s3 + $0x728] sm:$0xff] }
 0x229   :  { %6273 = vmatpush1.bf16.msra.mxu0 %v6272_v60  ;;  %6307 = vmatprep.subr.bf16.mxu1 %v6306_v61  ;;  %v6354_v60 = vpack.c.bf16 %v1492_v50, %v1479_v51  ;;  %v1478_v61 = vld [vmem:[%s11264_s3 + $0x50] sm:$0xff]  ;;  %v6324_v22 = vpack.c.bf16 %v1697_v59, %v1684_v57  ;;  %v1815_v51 = vld [vmem:[%s11264_s3 + $0xad8] sm:$0xff]  ;;  %v1828_v50 = vld [vmem:[%s11264_s3 + $0xb40] sm:$0xff]  ;;  %v6372_v57 = vpack.c.bf16 %v1595_v49, %v1582_v47 }
 0x22a   :  { %6275 = vmatprep.subr.bf16.mxu0 %v6274_v2  ;;  %v1505_v2 = vld [vmem:[%s11264_s3 + $0x128] sm:$0xff]  ;;  %v6356_v4 = vpack.c.bf16 %v1491_v63, %v1478_v61  ;;  %v6342_v59 = vpack.c.bf16 %v1828_v50, %v1815_v51  ;;  %v1827_v61 = vld [vmem:[%s11264_s3 + $0xb38] sm:$0xff]  ;;  %v1608_v63 = vld [vmem:[%s11264_s3 + $0x460] sm:$0xff] }
 0x22b   :  { %v1712_v47 = vld [vmem:[%s11264_s3 + $0x7a0] sm:$0xff]  ;;  %v1519_v49 = vld [vmem:[%s11264_s3 + $0x198] sm:$0xff]  ;;  %v1725_v50 = vld [vmem:[%s11264_s3 + $0x808] sm:$0xff] }
 0x22c   :  { %6309 = vmatpush1.bf16.msra.mxu1 %v6308_v8  ;;  %v9466_v53 = vpop.f32.mrb[8].mxu0  ;;  %v1080_v58 = vpop.f32.mrb[8].mxu1  ;;  %v6326_v8 = vpack.c.bf16 %v1724_v1, %v1711_v0  ;;  %v1621_v1 = vld [vmem:[%s11264_s3 + $0x4c8] sm:$0xff] }
 0x22d   :  { %6277 = vmatpush1.bf16.msra.mxu0 %v6276_v9  ;;  %1370 = vst.msk [vmem:[#allocation2 + $0x60] sm:$0xff] %vm1320_vm0, %v9466_v53  ;;  %1394 = vst.msk [vmem:[#allocation2 + $0x90] sm:$0xff] %vm1320_vm0, %v1080_v58  ;;  %v1082_v20 = vpop.f32.mrb[9].mxu1  ;;  %6311 = vmatprep.subr.bf16.mxu1 %v6310_v48  ;;  %v1005_v21 = vpop.f32.mrb[9].mxu0  ;;  %v6358_v9 = vpack.c.bf16 %v1518_v3, %v1505_v2  ;;  %v1504_v48 = vld [vmem:[%s11264_s3 + $0x120] sm:$0xff]  ;;  %v1841_v2 = vld [vmem:[%s11264_s3 + $0xba8] sm:$0xff]  ;;  %v6376_v7 = vpack.c.bf16 %v1621_v1, %v1608_v63 }
 0x22e   :  { %1406 = vst.msk [vmem:[#allocation2 + $0xa8] sm:$0xff] %vm1320_vm0, %v1082_v20  ;;  %6279 = vmatprep.subr.bf16.mxu0 %v6278_v12  ;;  %1398 = vrot.lane.b32.xlu0 %v1080_v58, %s6982_s12  ;;  %1382 = vst.msk [vmem:[#allocation2 + $0x78] sm:$0xff] %vm1320_vm0, %v1005_v21  ;;  %v1531_v12 = vld [vmem:[%s11264_s3 + $0x1f8] sm:$0xff]  ;;  %v6360_v15 = vpack.c.bf16 %v1517_v62, %v1504_v48  ;;  %v1530_v58 = vld [vmem:[%s11264_s3 + $0x1f0] sm:$0xff] }
 0x22f   :  { %1386 = vrot.lane.b32.xlu1 %v1005_v21, %s6982_s12  ;;  %v1543_v21 = vld [vmem:[%s11264_s3 + $0x258] sm:$0xff]  ;;  %v1854_v3 = vld [vmem:[%s11264_s3 + $0xc10] sm:$0xff]  ;;  %v1853_v48 = vld [vmem:[%s11264_s3 + $0xc08] sm:$0xff] }
 0x230   :  { %6313 = vmatpush1.bf16.msra.mxu1 %v6312_v19  ;;  %v9499_v34 = vpop.f32.mrb[10].mxu0  ;;  %v1086_v35 = vpop.f32.mrb[10].mxu1  ;;  %v6330_v19 = vpack.c.bf16 %v1750_v11, %v1737_v10  ;;  %v1634_v62 = vld [vmem:[%s11264_s3 + $0x530] sm:$0xff]  ;;  %v1647_v11 = vld [vmem:[%s11264_s3 + $0x598] sm:$0xff]  ;;  %v1545_v1 = vld [vmem:[%s11264_s3 + $0x268] sm:$0xff] }
 0x231   :  { %6281 = vmatpush1.bf16.msra.mxu0 %v6280_v23  ;;  %1371 = vst.msk [vmem:[#allocation2 + $0x68] sm:$0xf] %vm1322_vm1, %v9499_v34  ;;  %1395 = vst.msk [vmem:[#allocation2 + $0x98] sm:$0xf] %vm1322_vm1, %v1086_v35  ;;  %v1088_v36 = vpop.f32.mrb[11].mxu1  ;;  %6315 = vmatprep.subr.bf16.mxu1 %v6314_v24  ;;  %v1011_v38 = vpop.f32.mrb[11].mxu0  ;;  %v6380_v18 = vpack.c.bf16 %v1647_v11, %v1634_v62 }
 0x232   :  { %1407 = vst.msk [vmem:[#allocation2 + $0xb0] sm:$0xf] %vm1322_vm1, %v1088_v36  ;;  %6283 = vmatprep.subr.bf16.mxu0 %v6282_v29  ;;  %1410 = vrot.lane.b32.xlu0 %v1082_v20, %s6982_s12  ;;  %1383 = vst.msk [vmem:[#allocation2 + $0x80] sm:$0xf] %vm1322_vm1, %v1011_v38  ;;  %v6362_v20 = vpack.c.bf16 %v1544_v13, %v1531_v12  ;;  %v1763_v23 = vld [vmem:[%s11264_s3 + $0x938] sm:$0xff]  ;;  %v1776_v24 = vld [vmem:[%s11264_s3 + $0x9a0] sm:$0xff]  ;;  %v6364_v29 = vpack.c.bf16 %v1543_v21, %v1530_v58 }
 0x233   :  { %1388 = vrot.lane.b32.xlu1 %v1011_v38, %s6982_s12  ;;  %v6334_v30 = vpack.c.bf16 %v1776_v24, %v1763_v23  ;;  %v1583_v38 = vld [vmem:[%s11264_s3 + $0x398] sm:$0xff]  ;;  %v1880_v13 = vld [vmem:[%s11264_s3 + $0xce0] sm:$0xff]  ;;  %v1673_v24 = vld [vmem:[%s11264_s3 + $0x668] sm:$0xff] }
 0x234   :  { %6317 = vmatpush1.bf16.msra.mxu1 %v6316_v37  ;;  %v1789_v37 = vld [vmem:[%s11264_s3 + $0xa08] sm:$0xff]  ;;  %v1867_v12 = vld [vmem:[%s11264_s3 + $0xc78] sm:$0xff]  ;;  %v1660_v21 = vld [vmem:[%s11264_s3 + $0x600] sm:$0xff] }
 0x235   :  { %6285 = vmatpush1.bf16.msra.mxu0 %v6284_v39  ;;  %6319 = vmatprep.subr.bf16.mxu1 %v6318_v40  ;;  %v1596_v39 = vld [vmem:[%s11264_s3 + $0x400] sm:$0xff]  ;;  %v6336_v40 = vpack.c.bf16 %v1775_v32, %v1762_v31  ;;  %v6350_v58 = vpack.c.bf16 %v1880_v13, %v1867_v12  ;;  %v6384_v31 = vpack.c.bf16 %v1673_v24, %v1660_v21  ;;  %v1738_v63 = vld [vmem:[%s11264_s3 + $0x870] sm:$0xff] }
 0x236   :  { %6287 = vmatprep.subr.bf16.mxu0 %v6286_v46  ;;  %1400 = vrot.lane.b32.xlu0 %v1086_v35, %s6982_s12  ;;  %v1569_v35 = vld [vmem:[%s11264_s3 + $0x328] sm:$0xff]  ;;  %v6370_v41 = vpack.c.bf16 %v1596_v39, %v1583_v38  ;;  %v6418_v32 = vpack.c.bf16 %v1701_v26, %v1688_v25  ;;  %v1714_v38 = vld [vmem:[%s11264_s3 + $0x7b0] sm:$0xff]  ;;  %v1727_v39 = vld [vmem:[%s11264_s3 + $0x818] sm:$0xff] }
 0x237   :  { %1412 = vrot.lane.b32.xlu1 %v1088_v36, %s6982_s12  ;;  %v1802_v36 = vld [vmem:[%s11264_s3 + $0xa70] sm:$0xff]  ;;  %v6368_v42 = vpack.c.bf16 %v1569_v35, %v1556_v33  ;;  %v1801_v46 = vld [vmem:[%s11264_s3 + $0xa68] sm:$0xff]  ;;  %v1764_v11 = vld [vmem:[%s11264_s3 + $0x940] sm:$0xff] }
 0x238   :  { %6321 = vmatpush1.bf16.msra.mxu1 %v6320_v52  ;;  %v6338_v43 = vpack.c.bf16 %v1802_v36, %v1789_v37  ;;  %v1609_v52 = vld [vmem:[%s11264_s3 + $0x468] sm:$0xff]  ;;  %v1686_v33 = vld [vmem:[%s11264_s3 + $0x6d0] sm:$0xff]  ;;  %v1699_v36 = vld [vmem:[%s11264_s3 + $0x738] sm:$0xff] }
 0x239   :  { %6289 = vmatpush1.bf16.msra.mxu0 %v6288_v54  ;;  %6323 = vmatprep.subr.bf16.mxu1 %v6322_v55  ;;  %v1622_v54 = vld [vmem:[%s11264_s3 + $0x4d0] sm:$0xff]  ;;  %v6340_v55 = vpack.c.bf16 %v1801_v46, %v1788_v44  ;;  %v1493_v35 = vld [vmem:[%s11264_s3 + $0xc8] sm:$0xff]  ;;  %v6388_v44 = vpack.c.bf16 %v1699_v36, %v1686_v33  ;;  %v6422_v46 = vpack.c.bf16 %v1727_v39, %v1714_v38  ;;  %v1584_v26 = vld [vmem:[%s11264_s3 + $0x3a0] sm:$0xff] }
 0x23a   :  { %6355 = vmatprep.subr.bf16.mxu0 %v6354_v60  ;;  %v1814_v60 = vld [vmem:[%s11264_s3 + $0xad0] sm:$0xff]  ;;  %v6374_v0 = vpack.c.bf16 %v1622_v54, %v1609_v52  ;;  %v1740_v52 = vld [vmem:[%s11264_s3 + $0x880] sm:$0xff]  ;;  %v1753_v54 = vld [vmem:[%s11264_s3 + $0x8e8] sm:$0xff] }
 0x23b   :  { %v6344_v6 = vpack.c.bf16 %v1827_v61, %v1814_v60  ;;  %v6392_v60 = vpack.c.bf16 %v1725_v50, %v1712_v47  ;;  %v6426_v61 = vpack.c.bf16 %v1753_v54, %v1740_v52  ;;  %v1558_v12 = vld [vmem:[%s11264_s3 + $0x2d0] sm:$0xff]  ;;  %v1817_v33 = vld [vmem:[%s11264_s3 + $0xae8] sm:$0xff]  ;;  %v1844_v47 = vld [vmem:[%s11264_s3 + $0xbc0] sm:$0xff] }
 0x23c   :  { %2180 = vmatmul.mubr.f32.vlgmr.msra.gmra.mrb[24].mxu0 %v8937_v5  ;;  %6325 = vmatpush1.bf16.msra.mxu1 %v6324_v22  ;;  %v1635_v22 = vld [vmem:[%s11264_s3 + $0x538] sm:$0xff]  ;;  %v1790_v25 = vld [vmem:[%s11264_s3 + $0xa10] sm:$0xff] }
 0x23d   :  { %2185 = vmatprep.mubr.f32.mxu0 %v8948_v45  ;;  %6357 = vmatpush1.bf16.msra.mxu0 %v6356_v4  ;;  %v1648_v4 = vld [vmem:[%s11264_s3 + $0x5a0] sm:$0xff] }
 0x23e   :  { %6327 = vmatprep.subr.bf16.mxu1 %v6326_v8  ;;  %6359 = vmatprep.subr.bf16.mxu0 %v6358_v9  ;;  %v6346_v8 = vpack.c.bf16 %v1854_v3, %v1841_v2  ;;  %v1840_v9 = vld [vmem:[%s11264_s3 + $0xba0] sm:$0xff]  ;;  %v6378_v10 = vpack.c.bf16 %v1648_v4, %v1635_v22  ;;  %v1751_v3 = vld [vmem:[%s11264_s3 + $0x8d8] sm:$0xff]  ;;  %v1766_v22 = vld [vmem:[%s11264_s3 + $0x950] sm:$0xff] }
 0x23f   :  { %v6348_v17 = vpack.c.bf16 %v1853_v48, %v1840_v9  ;;  %v1779_v4 = vld [vmem:[%s11264_s3 + $0x9b8] sm:$0xff]  ;;  %v6396_v62 = vpack.c.bf16 %v1751_v3, %v1738_v63  ;;  %v1649_v63 = vld [vmem:[%s11264_s3 + $0x5a8] sm:$0xff] }
 0x240   :  { %2186 = vmatmul.mubr.f32.gmra.mrb[26].mxu0 %v8967_v16  ;;  %6329 = vmatpush1.bf16.msra.mxu1 %v6328_v14  ;;  %v1661_v14 = vld [vmem:[%s11264_s3 + $0x608] sm:$0xff]  ;;  %v1855_v3 = vld [vmem:[%s11264_s3 + $0xc18] sm:$0xff] }
 0x241   :  { %6361 = vmatpush1.bf16.msra.mxu0 %v6360_v15  ;;  %2333 = vmatprep.mubr.f32.mxu0 %v8567_v56  ;;  %v1674_v15 = vld [vmem:[%s11264_s3 + $0x670] sm:$0xff] }
 0x242   :  { %6331 = vmatprep.subr.bf16.mxu1 %v6330_v19  ;;  %6363 = vmatprep.subr.bf16.mxu0 %v6362_v20  ;;  %v1866_v19 = vld [vmem:[%s11264_s3 + $0xc70] sm:$0xff]  ;;  %v1879_v20 = vld [vmem:[%s11264_s3 + $0xcd8] sm:$0xff]  ;;  %v6382_v23 = vpack.c.bf16 %v1674_v15, %v1661_v14  ;;  %v1777_v14 = vld [vmem:[%s11264_s3 + $0x9a8] sm:$0xff] }
 0x243   :  { %v1792_v15 = vld [vmem:[%s11264_s3 + $0xa20] sm:$0xff] }
 0x244   :  { %6333 = vmatpush1.bf16.msra.mxu1 %v6332_v27  ;;  %v1687_v27 = vld [vmem:[%s11264_s3 + $0x6d8] sm:$0xff] }
 0x245   :  { %6365 = vmatpush1.bf16.msra.mxu0 %v6364_v29  ;;  %6335 = vmatprep.subr.bf16.mxu1 %v6334_v30  ;;  %v1700_v29 = vld [vmem:[%s11264_s3 + $0x740] sm:$0xff]  ;;  %v6352_v30 = vpack.c.bf16 %v1879_v20, %v1866_v19 }
 0x246   :  { %6367 = vmatprep.subr.bf16.mxu0 %v6366_v28  ;;  %v1480_v28 = vld [vmem:[%s11264_s3 + $0x60] sm:$0xff]  ;;  %v6386_v37 = vpack.c.bf16 %v1700_v29, %v1687_v27  ;;  %v1597_v27 = vld [vmem:[%s11264_s3 + $0x408] sm:$0xff] }
 0x248   :  { %6337 = vmatpush1.bf16.msra.mxu1 %v6336_v40  ;;  %v1713_v40 = vld [vmem:[%s11264_s3 + $0x7a8] sm:$0xff] }
 0x249   :  { %6369 = vmatpush1.bf16.msra.mxu0 %v6368_v42  ;;  %6339 = vmatprep.subr.bf16.mxu1 %v6338_v43  ;;  %v1726_v42 = vld [vmem:[%s11264_s3 + $0x810] sm:$0xff]  ;;  %v6420_v43 = vpack.c.bf16 %v1493_v35, %v1480_v28 }
 0x24a   :  { %6371 = vmatprep.subr.bf16.mxu0 %v6370_v41  ;;  %v1506_v41 = vld [vmem:[%s11264_s3 + $0x130] sm:$0xff]  ;;  %v6390_v51 = vpack.c.bf16 %v1726_v42, %v1713_v40  ;;  %v1816_v40 = vld [vmem:[%s11264_s3 + $0xae0] sm:$0xff] }
 0x24b   :  { %v1830_v28 = vld [vmem:[%s11264_s3 + $0xb50] sm:$0xff] }
 0x24c   :  { %6341 = vmatpush1.bf16.msra.mxu1 %v6340_v55  ;;  %v1739_v55 = vld [vmem:[%s11264_s3 + $0x878] sm:$0xff]  ;;  %v1610_v42 = vld [vmem:[%s11264_s3 + $0x470] sm:$0xff] }
 0x24d   :  { %6373 = vmatpush1.bf16.msra.mxu0 %v6372_v57  ;;  %6343 = vmatprep.subr.bf16.mxu1 %v6342_v59  ;;  %v1752_v57 = vld [vmem:[%s11264_s3 + $0x8e0] sm:$0xff]  ;;  %v6424_v59 = vpack.c.bf16 %v1519_v49, %v1506_v41  ;;  %v1857_v41 = vld [vmem:[%s11264_s3 + $0xc28] sm:$0xff]  ;;  %v1843_v49 = vld [vmem:[%s11264_s3 + $0xbb8] sm:$0xff] }
 0x24e   :  { %6375 = vmatprep.subr.bf16.mxu0 %v6374_v0  ;;  %v1532_v0 = vld [vmem:[%s11264_s3 + $0x200] sm:$0xff]  ;;  %v6394_v2 = vpack.c.bf16 %v1752_v57, %v1739_v55 }
 0x24f   :  { %v6428_v9 = vpack.c.bf16 %v1545_v1, %v1532_v0 }
 0x250   :  { %6345 = vmatpush1.bf16.msra.mxu1 %v6344_v6  ;;  %v1765_v6 = vld [vmem:[%s11264_s3 + $0x948] sm:$0xff] }
 0x251   :  { %6377 = vmatpush1.bf16.msra.mxu0 %v6376_v7  ;;  %6347 = vmatprep.subr.bf16.mxu1 %v6346_v8  ;;  %v1778_v7 = vld [vmem:[%s11264_s3 + $0x9b0] sm:$0xff] }
 0x252   :  { %6379 = vmatprep.subr.bf16.mxu0 %v6378_v10  ;;  %v6430_v10 = vpack.c.bf16 %v1779_v4, %v1766_v22  ;;  %v6398_v13 = vpack.c.bf16 %v1778_v7, %v1765_v6  ;;  %v1870_v22 = vld [vmem:[%s11264_s3 + $0xc90] sm:$0xff]  ;;  %v1883_v4 = vld [vmem:[%s11264_s3 + $0xcf8] sm:$0xff]  ;;  %v1869_v7 = vld [vmem:[%s11264_s3 + $0xc88] sm:$0xff] }
 0x254   :  { %6349 = vmatpush1.bf16.msra.mxu1 %v6348_v17  ;;  %v1805_v17 = vld [vmem:[%s11264_s3 + $0xa88] sm:$0xff] }
 0x255   :  { %6381 = vmatpush1.bf16.msra.mxu0 %v6380_v18  ;;  %6351 = vmatprep.subr.bf16.mxu1 %v6350_v58  ;;  %v1791_v18 = vld [vmem:[%s11264_s3 + $0xa18] sm:$0xff]  ;;  %v1804_v58 = vld [vmem:[%s11264_s3 + $0xa80] sm:$0xff]  ;;  %v6434_v24 = vpack.c.bf16 %v1805_v17, %v1792_v15 }
 0x256   :  { %6383 = vmatprep.subr.bf16.mxu0 %v6382_v23  ;;  %v6400_v23 = vpack.c.bf16 %v1777_v14, %v1764_v11  ;;  %v6402_v29 = vpack.c.bf16 %v1804_v58, %v1791_v18  ;;  %v6446_v11 = vpack.c.bf16 %v1883_v4, %v1870_v22  ;;  %v1868_v17 = vld [vmem:[%s11264_s3 + $0xc80] sm:$0xff]  ;;  %v1881_v18 = vld [vmem:[%s11264_s3 + $0xce8] sm:$0xff] }
 0x258   :  { %6353 = vmatpush1.bf16.msra.mxu1 %v6352_v30  ;;  %v1803_v30 = vld [vmem:[%s11264_s3 + $0xa78] sm:$0xff] }
 0x259   :  { %6385 = vmatpush1.bf16.msra.mxu0 %v6384_v31  ;;  %6419 = vmatprep.subr.bf16.mxu1 %v6418_v32  ;;  %v1818_v31 = vld [vmem:[%s11264_s3 + $0xaf0] sm:$0xff]  ;;  %v1831_v32 = vld [vmem:[%s11264_s3 + $0xb58] sm:$0xff]  ;;  %v6404_v38 = vpack.c.bf16 %v1803_v30, %v1790_v25 }
 0x25a   :  { %6387 = vmatprep.subr.bf16.mxu0 %v6386_v37  ;;  %v6436_v37 = vpack.c.bf16 %v1597_v27, %v1584_v26  ;;  %v6438_v39 = vpack.c.bf16 %v1831_v32, %v1818_v31 }
 0x25b   :  { %2257 = vmatmul.mubr.f32.vlgmr.msra.gmra.mrb[24].mxu1 %v8937_v5 }
 0x25c   :  { %2262 = vmatprep.mubr.f32.mxu1 %v8948_v45  ;;  %6421 = vmatpush3.bf16.msra.mxu1 %v6420_v43  ;;  %v1623_v43 = vld [vmem:[%s11264_s3 + $0x4d8] sm:$0xff] }
 0x25d   :  { %6389 = vmatpush1.bf16.msra.mxu0 %v6388_v44  ;;  %6423 = vmatprep.subr.bf16.mxu1 %v6422_v46  ;;  %v6406_v44 = vpack.c.bf16 %v1830_v28, %v1817_v33  ;;  %v1829_v46 = vld [vmem:[%s11264_s3 + $0xb48] sm:$0xff]  ;;  %v6440_v52 = vpack.c.bf16 %v1623_v43, %v1610_v42 }
 0x25e   :  { %6391 = vmatprep.subr.bf16.mxu0 %v6390_v51  ;;  %v1856_v51 = vld [vmem:[%s11264_s3 + $0xc20] sm:$0xff]  ;;  %v6408_v57 = vpack.c.bf16 %v1829_v46, %v1816_v40 }
 0x25f   :  { %2263 = vmatmul.mubr.f32.gmra.mrb[26].mxu1 %v8967_v16 }
 0x260   :  { %6425 = vmatpush3.bf16.msra.mxu1 %v6424_v59  ;;  %2410 = vmatprep.mubr.f32.mxu1 %v8567_v56  ;;  %v1327_v8 = vpop.permute.xlu0 %1326  ;;  %v1571_v56 = vld [vmem:[%s11264_s3 + $0x338] sm:$0xff]  ;;  %v6442_v59 = vpack.c.bf16 %v1857_v41, %v1844_v47 }
 0x261   :  { %6393 = vmatpush1.bf16.msra.mxu0 %v6392_v60  ;;  %1332 = vst.msk [vmem:[#allocation2 + $0xc] sm:$0xff] %vm1320_vm0, %v1327_v8  ;;  %6427 = vmatprep.subr.bf16.mxu1 %v6426_v61  ;;  %v1339_v48 = vpop.permute.xlu1 %1338  ;;  %v6432_v20 = vpack.c.bf16 %v1571_v56, %v1558_v12  ;;  %v1842_v60 = vld [vmem:[%s11264_s3 + $0xbb0] sm:$0xff]  ;;  %v1636_v61 = vld [vmem:[%s11264_s3 + $0x540] sm:$0xff]  ;;  %v1675_v56 = vld [vmem:[%s11264_s3 + $0x678] sm:$0xff] }
 0x262   :  { %6395 = vmatprep.subr.bf16.mxu0 %v6394_v2  ;;  %1344 = vst.msk [vmem:[#allocation2 + $0x24] sm:$0xff] %vm1320_vm0, %v1339_v48  ;;  %v6410_v2 = vpack.c.bf16 %v1856_v51, %v1843_v49  ;;  %v1882_v8 = vld [vmem:[%s11264_s3 + $0xcf0] sm:$0xff] }
 0x263   :  { %v1662_v12 = vld [vmem:[%s11264_s3 + $0x610] sm:$0xff]  ;;  %v6414_v15 = vpack.c.bf16 %v1882_v8, %v1869_v7 }
 0x264   :  { %6429 = vmatpush3.bf16.msra.mxu1 %v6428_v9  ;;  %v1351_v19 = vpop.permute.xlu0 %1350  ;;  %v6444_v9 = vpack.c.bf16 %v1649_v63, %v1636_v61  ;;  %v6448_v58 = vpack.c.bf16 %v1675_v56, %v1662_v12 }
 0x265   :  { %6397 = vmatpush1.bf16.msra.mxu0 %v6396_v62  ;;  %1356 = vst.msk [vmem:[#allocation2 + $0x3c] sm:$0xff] %vm1320_vm0, %v1351_v19  ;;  %6431 = vmatprep.subr.bf16.mxu1 %v6430_v10  ;;  %v1329_v21 = vpop.permute.xlu1 %1328  ;;  %v6412_v10 = vpack.c.bf16 %v1855_v3, %v1842_v60  ;;  %v6416_v19 = vpack.c.bf16 %v1881_v18, %v1868_v17 }
 0x266   :  { %6399 = vmatprep.subr.bf16.mxu0 %v6398_v13  ;;  %1333 = vst.msk [vmem:[#allocation2 + $0x14] sm:$0xf] %vm1322_vm1, %v1329_v21 }
 0x268   :  { %6433 = vmatpush3.bf16.msra.mxu1 %v6432_v20  ;;  %v1363_v35 = vpop.permute.xlu0 %1362 }
 0x269   :  { %6401 = vmatpush1.bf16.msra.mxu0 %v6400_v23  ;;  %1368 = vst.msk [vmem:[#allocation2 + $0x54] sm:$0xff] %vm1320_vm0, %v1363_v35  ;;  %6435 = vmatprep.subr.bf16.mxu1 %v6434_v24  ;;  %v1353_v36 = vpop.permute.xlu1 %1352 }
 0x26a   :  { %6403 = vmatprep.subr.bf16.mxu0 %v6402_v29  ;;  %1357 = vst.msk [vmem:[#allocation2 + $0x44] sm:$0xf] %vm1322_vm1, %v1353_v36 }
 0x26c   :  { %6437 = vmatpush3.bf16.msra.mxu1 %v6436_v37  ;;  %v1341_v50 = vpop.permute.xlu0 %1340 }
 0x26d   :  { %6405 = vmatpush1.bf16.msra.mxu0 %v6404_v38  ;;  %v1234_v54 = vpop.f32.mrb[12].mxu1  ;;  %1345 = vst.msk [vmem:[#allocation2 + $0x2c] sm:$0xf] %vm1322_vm1, %v1341_v50  ;;  %v1157_v55 = vpop.f32.mrb[12].mxu0  ;;  %6439 = vmatprep.subr.bf16.mxu1 %v6438_v39 }
 0x26e   :  { %1442 = vst.msk [vmem:[#allocation2 + $0xf0] sm:$0xff] %vm1320_vm0, %v1234_v54  ;;  %1418 = vst.msk [vmem:[#allocation2 + $0xc0] sm:$0xff] %vm1320_vm0, %v1157_v55  ;;  %v1236_v0 = vpop.f32.mrb[13].mxu1  ;;  %6407 = vmatprep.subr.bf16.mxu0 %v6406_v44  ;;  %v1365_v1 = vpop.permute.xlu1 %1364  ;;  %1446 = vrot.lane.b32.xlu1 %v1234_v54, %s6982_s12 }
 0x26f   :  { %1454 = vst.msk [vmem:[#allocation2 + $0x108] sm:$0xff] %vm1320_vm0, %v1236_v0  ;;  %1422 = vrot.lane.b32.xlu0 %v1157_v55, %s6982_s12  ;;  %v9909_v6 = vpop.f32.mrb[13].mxu0 }
 0x270   :  { %1369 = vst.msk [vmem:[#allocation2 + $0x5c] sm:$0xf] %vm1322_vm1, %v1365_v1  ;;  %6441 = vmatpush3.bf16.msra.mxu1 %v6440_v52 }
 0x271   :  { %1430 = vst.msk [vmem:[#allocation2 + $0xd8] sm:$0xff] %vm1320_vm0, %v9909_v6  ;;  %6409 = vmatpush1.bf16.msra.mxu0 %v6408_v57  ;;  %v1163_v48 = vpop.f32.mrb[14].mxu0  ;;  %v1240_v62 = vpop.f32.mrb[14].mxu1  ;;  %6443 = vmatprep.subr.bf16.mxu1 %v6442_v59 }
 0x272   :  { %1419 = vst.msk [vmem:[#allocation2 + $0xc8] sm:$0xf] %vm1322_vm1, %v1163_v48  ;;  %1443 = vst.msk [vmem:[#allocation2 + $0xf8] sm:$0xf] %vm1322_vm1, %v1240_v62  ;;  %v1242_v13 = vpop.f32.mrb[15].mxu1  ;;  %6411 = vmatprep.subr.bf16.mxu0 %v6410_v2  ;;  %1458 = vrot.lane.b32.xlu1 %v1236_v0, %s6982_s12  ;;  %v9928_v14 = vpop.f32.mrb[15].mxu0 }
 0x273   :  { %1455 = vst.msk [vmem:[#allocation2 + $0x110] sm:$0xf] %vm1322_vm1, %v1242_v13  ;;  %1448 = vrot.lane.b32.xlu0 %v1240_v62, %s6982_s12  ;;  %1431 = vst.msk [vmem:[#allocation2 + $0xe0] sm:$0xf] %vm1322_vm1, %v9928_v14 }
 0x274   :  { %6445 = vmatpush3.bf16.msra.mxu1 %v6444_v9 }
 0x275   :  { %6413 = vmatpush1.bf16.msra.mxu0 %v6412_v10  ;;  %6447 = vmatprep.subr.bf16.mxu1 %v6446_v11 }
 0x276   :  { %6415 = vmatprep.subr.bf16.mxu0 %v6414_v15  ;;  %1424 = vrot.lane.b32.xlu1 %v1163_v48, %s6982_s12 }
 0x277   :  { %1460 = vrot.lane.b32.xlu0 %v1242_v13, %s6982_s12 }
 0x278   :  { %6449 = vmatpush3.bf16.msra.mxu1 %v6448_v58 }
 0x279   :  { %6417 = vmatpush1.bf16.msra.mxu0 %v6416_v19 }
 0x27b   :  { %2411 = vmatmul.mubr.f32.vlgmr.msra.gmra.mrb[28].mxu1 %v8937_v5 }
 0x27c   :  { %2334 = vmatmul.mubr.f32.vlgmr.msra.gmra.mrb[28].mxu0 %v8937_v5  ;;  %2415 = vmatprep.mubr.f32.mxu1 %v8948_v45 }
 0x27d   :  { %2339 = vmatprep.mubr.f32.mxu0 %v8948_v45 }
 0x27f   :  { %2416 = vmatmul.mubr.f32.gmra.mrb[30].mxu1 %v8967_v16 }
 0x280   :  { %2340 = vmatmul.mubr.f32.gmra.mrb[30].mxu0 %v8967_v16 }
 0x28e   :  { %v5165_v20 = vpop.f32.mrb[16].mxu0 }
 0x28f   :  { %v5166_v21 = vpop.f32.mrb[17].mxu0 }
 0x290   :  { %v5167_v23 = vadd.f32 %v5166_v21, %v5165_v20  ;;  %v2579_v21 = vld [vmem:[%s11265_s4 + $0x10] sm:$0xff] }
 0x291   :  { %5478 = vmatprep.mubr.f32.mxu1 %v2579_v21 }
 0x292   :  { %1466 = vst.msk [vmem:[#allocation2 + $0x120] sm:$0xff] %vm1320_vm0, %v5167_v23  ;;  %v5168_v24 = vpop.f32.mrb[18].mxu0  ;;  %v2632_v23 = vld [vmem:[%s11266_s5 + $0x8] sm:$0xf] }
 0x293   :  { %v5169_v25 = vpop.f32.mrb[19].mxu0 }
 0x294   :  { %v5170_v26 = vadd.f32 %v5169_v25, %v5168_v24 }
 0x296   :  { %1467 = vst.msk [vmem:[#allocation2 + $0x128] sm:$0xf] %vm1322_vm1, %v5170_v26 }
 0x2a0   :  { %v1399_v27 = vpop.permute.xlu0 %1398 }
 0x2a1   :  { %1404 = vst.msk [vmem:[#allocation2 + $0x9c] sm:$0xff] %vm1320_vm0, %v1399_v27  ;;  %v1387_v5 = vpop.permute.xlu1 %1386 }
 0x2a2   :  { %1392 = vst.msk [vmem:[#allocation2 + $0x84] sm:$0xff] %vm1320_vm0, %v1387_v5 }
 0x2a4   :  { %v1411_v45 = vpop.permute.xlu0 %1410 }
 0x2a5   :  { %1416 = vst.msk [vmem:[#allocation2 + $0xb4] sm:$0xff] %vm1320_vm0, %v1411_v45  ;;  %v1389_v16 = vpop.permute.xlu1 %1388 }
 0x2a6   :  { %1393 = vst.msk [vmem:[#allocation2 + $0x8c] sm:$0xf] %vm1322_vm1, %v1389_v16 }
 0x2a8   :  { %v1401_v29 = vpop.permute.xlu0 %1400 }
 0x2a9   :  { %1405 = vst.msk [vmem:[#allocation2 + $0xa4] sm:$0xf] %vm1322_vm1, %v1401_v29  ;;  %v1413_v30 = vpop.permute.xlu1 %1412 }
 0x2aa   :  { %1417 = vst.msk [vmem:[#allocation2 + $0xbc] sm:$0xf] %vm1322_vm1, %v1413_v30 }
 0x2ae   :  { %v1950_v31 = vpop.f32.mrb[16].mxu1 }
 0x2af   :  { %2433 = vst.msk [vmem:[#allocation2 + $0xc] sm:$0xff] %vm2429_vm2, %v1950_v31  ;;  %v1952_v32 = vpop.f32.mrb[17].mxu1  ;;  %2423 = vrot.lane.b32.xlu0 %v1950_v31, %s6982_s12 }
 0x2b0   :  { %2445 = vst.msk [vmem:[#allocation2 + $0x24] sm:$0xff] %vm2429_vm2, %v1952_v32  ;;  %2437 = vrot.lane.b32.xlu1 %v1952_v32, %s6982_s12 }
 0x2b2   :  { %v1956_v33 = vpop.f32.mrb[18].mxu1 }
 0x2b3   :  { %2434 = vst.msk [vmem:[#allocation2 + $0x14] sm:$0xf] %vm2431_vm3, %v1956_v33  ;;  %v1958_v28 = vpop.f32.mrb[19].mxu1 }
 0x2b4   :  { %2446 = vst.msk [vmem:[#allocation2 + $0x2c] sm:$0xf] %vm2431_vm3, %v1958_v28  ;;  %2425 = vrot.lane.b32.xlu1 %v1956_v33, %s6982_s12 }
 0x2b8   :  { %2439 = vrot.lane.b32.xlu1 %v1958_v28, %s6982_s12 }
 0x2ba   :  { %v2585_v31 = vld [vmem:[#allocation2 + $0x10] sm:$0xff] }
 0x2cf   :  { %v2027_v35 = vpop.f32.mrb[20].mxu0 }
 0x2d0   :  { %2457 = vst.msk [vmem:[#allocation2 + $0x3c] sm:$0xff] %vm2429_vm2, %v2027_v35  ;;  %2449 = vrot.lane.b32.xlu0 %v2027_v35, %s6982_s12  ;;  %v2029_v37 = vpop.f32.mrb[21].mxu0 }
 0x2d1   :  { %2469 = vst.msk [vmem:[#allocation2 + $0x54] sm:$0xff] %vm2429_vm2, %v2029_v37 }
 0x2d3   :  { %v2033_v36 = vpop.f32.mrb[22].mxu0 }
 0x2d4   :  { %2458 = vst.msk [vmem:[#allocation2 + $0x44] sm:$0xf] %vm2431_vm3, %v2033_v36  ;;  %2461 = vrot.lane.b32.xlu0 %v2029_v37, %s6982_s12  ;;  %2451 = vrot.lane.b32.xlu1 %v2033_v36, %s6982_s12  ;;  %v2035_v38 = vpop.f32.mrb[23].mxu0  ;;  %v2588_v36 = vld [vmem:[#allocation2 + $0x28] sm:$0xff] }
 0x2d5   :  { %2470 = vst.msk [vmem:[#allocation2 + $0x5c] sm:$0xf] %vm2431_vm3, %v2035_v38 }
 0x2d8   :  { %2463 = vrot.lane.b32.xlu1 %v2035_v38, %s6982_s12 }
 0x2e0   :  { %v1447_v39 = vpop.permute.xlu1 %1446 }
 0x2e1   :  { %1452 = vst.msk [vmem:[#allocation2 + $0xfc] sm:$0xff] %vm1320_vm0, %v1447_v39  ;;  %v1423_v40 = vpop.permute.xlu0 %1422 }
 0x2e2   :  { %1428 = vst.msk [vmem:[#allocation2 + $0xcc] sm:$0xff] %vm1320_vm0, %v1423_v40 }
 0x2e4   :  { %v1459_v42 = vpop.permute.xlu1 %1458 }
 0x2e5   :  { %1464 = vst.msk [vmem:[#allocation2 + $0x114] sm:$0xff] %vm1320_vm0, %v1459_v42  ;;  %v1449_v43 = vpop.permute.xlu0 %1448 }
 0x2e6   :  { %1453 = vst.msk [vmem:[#allocation2 + $0x104] sm:$0xf] %vm1322_vm1, %v1449_v43 }
 0x2e8   :  { %v1425_v44 = vpop.permute.xlu1 %1424 }
 0x2e9   :  { %v1461_v46 = vpop.permute.xlu0 %1460  ;;  %1429 = vst.msk [vmem:[#allocation2 + $0xd4] sm:$0xf] %vm1322_vm1, %v1425_v44 }
 0x2ea   :  { %1465 = vst.msk [vmem:[#allocation2 + $0x11c] sm:$0xf] %vm1322_vm1, %v1461_v46 }
 0x2ee   :  { %v9978_v47 = vpop.f32.mrb[20].mxu1 }
 0x2ef   :  { %v9980_v41 = vpop.f32.mrb[21].mxu1 }
 0x2f0   :  { %2493 = vst.msk [vmem:[#allocation2 + $0x84] sm:$0xff] %vm2429_vm2, %v9980_v41 }
 0x2f2   :  { %v9984_v49 = vpop.f32.mrb[22].mxu1 }
 0x2f3   :  { %v2112_v51 = vpop.f32.mrb[23].mxu1 }
 0x2f4   :  { %2494 = vst.msk [vmem:[#allocation2 + $0x8c] sm:$0xf] %vm2431_vm3, %v2112_v51  ;;  %2487 = vrot.lane.b32.xlu1 %v2112_v51, %s6982_s12 }
 0x2fb   :  { %v2600_v58 = vld [vmem:[#allocation2 + $0x88] sm:$0xff] }
 0x30f   :  { %v2181_v50 = vpop.f32.mrb[24].mxu0 }
 0x310   :  { %2505 = vst.msk [vmem:[#allocation2 + $0x9c] sm:$0xff] %vm2429_vm2, %v2181_v50  ;;  %2497 = vrot.lane.b32.xlu0 %v2181_v50, %s6982_s12  ;;  %v2183_v52 = vpop.f32.mrb[25].mxu0 }
 0x311   :  { %2517 = vst.msk [vmem:[#allocation2 + $0xb4] sm:$0xff] %vm2429_vm2, %v2183_v52  ;;  %2509 = vrot.lane.b32.xlu1 %v2183_v52, %s6982_s12 }
 0x313   :  { %v2187_v54 = vpop.f32.mrb[26].mxu0 }
 0x314   :  { %2506 = vst.msk [vmem:[#allocation2 + $0xa4] sm:$0xf] %vm2431_vm3, %v2187_v54  ;;  %v2189_v55 = vpop.f32.mrb[27].mxu0 }
 0x315   :  { %2518 = vst.msk [vmem:[#allocation2 + $0xbc] sm:$0xf] %vm2431_vm3, %v2189_v55  ;;  %2499 = vrot.lane.b32.xlu1 %v2187_v54, %s6982_s12 }
 0x319   :  { %2511 = vrot.lane.b32.xlu1 %v2189_v55, %s6982_s12 }
 0x31b   :  { %v2603_v33 = vld [vmem:[#allocation2 + $0xa0] sm:$0xff] }
 0x31c   :  { %v2606_v39 = vld [vmem:[#allocation2 + $0xb8] sm:$0xff] }
 0x321   :  { %v2424_v57 = vpop.permute.xlu0 %2423 }
 0x322   :  { %2430 = vst.msk [vmem:[#allocation2] sm:$0xff] %vm2429_vm2, %v2424_v57  ;;  %v2438_v59 = vpop.permute.xlu1 %2437 }
 0x323   :  { %2443 = vst.msk [vmem:[#allocation2 + $0x18] sm:$0xff] %vm2429_vm2, %v2438_v59  ;;  %v2591_v59 = vld [vmem:[#allocation2 + $0x40] sm:$0xff] }
 0x326   :  { %v2426_v60 = vpop.permute.xlu1 %2425 }
 0x327   :  { %2432 = vst.msk [vmem:[#allocation2 + $0x8] sm:$0xf] %vm2431_vm3, %v2426_v60 }
 0x329   :  { %v2583_v20 = vld [vmem:[#allocation2] sm:$0xff] }
 0x32a   :  { %v2440_v61 = vpop.permute.xlu1 %2439  ;;  %v2586_v5 = vld [vmem:[#allocation2 + $0x18] sm:$0xff] }
 0x32b   :  { %2444 = vst.msk [vmem:[#allocation2 + $0x20] sm:$0xf] %vm2431_vm3, %v2440_v61  ;;  %v6456_v32 = vpack.c.bf16 %v2586_v5, %v2585_v31 }
 0x32e   :  { %v2258_v63 = vpop.f32.mrb[24].mxu1 }
 0x32f   :  { %2529 = vst.msk [vmem:[#allocation2 + $0xcc] sm:$0xff] %vm2429_vm2, %v2258_v63  ;;  %v10001_v0 = vpop.f32.mrb[25].mxu1  ;;  %2521 = vrot.lane.b32.xlu0 %v2258_v63, %s6982_s12 }
 0x332   :  { %v2264_v1 = vpop.f32.mrb[26].mxu1  ;;  %v2587_v35 = vld [vmem:[#allocation2 + $0x20] sm:$0xff] }
 0x333   :  { %2530 = vst.msk [vmem:[#allocation2 + $0xd4] sm:$0xf] %vm2431_vm3, %v2264_v1  ;;  %v10005_v2 = vpop.f32.mrb[27].mxu1  ;;  %2533 = vrot.lane.b32.xlu0 %v10001_v0, %s6982_s12  ;;  %2523 = vrot.lane.b32.xlu1 %v2264_v1, %s6982_s12  ;;  %v6460_v38 = vpack.c.bf16 %v2588_v36, %v2587_v35  ;;  %v2582_v35 = vld [vmem:[%s11265_s4 + $0x28] sm:$0xf]  ;;  %v2819_v36 = vld [vmem:[%s11267_s6 + $0x70] sm:$0xff] }
 0x33a   :  { %v2609_v61 = vld [vmem:[#allocation2 + $0xd0] sm:$0xff] }
 0x342   :  { %v2450_v3 = vpop.permute.xlu0 %2449 }
 0x343   :  { %2455 = vst.msk [vmem:[#allocation2 + $0x30] sm:$0xff] %vm2429_vm2, %v2450_v3  ;;  %v2594_v3 = vld [vmem:[#allocation2 + $0x58] sm:$0xff] }
 0x346   :  { %v2462_v22 = vpop.permute.xlu0 %2461  ;;  %v2452_v4 = vpop.permute.xlu1 %2451 }
 0x347   :  { %2467 = vst.msk [vmem:[#allocation2 + $0x48] sm:$0xff] %vm2429_vm2, %v2462_v22 }
 0x348   :  { %2456 = vst.msk [vmem:[#allocation2 + $0x38] sm:$0xf] %vm2431_vm3, %v2452_v4 }
 0x34a   :  { %v2464_v7 = vpop.permute.xlu1 %2463  ;;  %v2589_v43 = vld [vmem:[#allocation2 + $0x30] sm:$0xff] }
 0x34b   :  { %2468 = vst.msk [vmem:[#allocation2 + $0x50] sm:$0xf] %vm2431_vm3, %v2464_v7 }
 0x34e   :  { %v5203_v8 = vpop.f32.mrb[28].mxu1  ;;  %v2592_v50 = vld [vmem:[#allocation2 + $0x48] sm:$0xff] }
 0x34f   :  { %v2335_v9 = vpop.f32.mrb[28].mxu0  ;;  %v5204_v48 = vpop.f32.mrb[29].mxu1  ;;  %v2590_v42 = vld [vmem:[#allocation2 + $0x38] sm:$0xff]  ;;  %v6468_v60 = vpack.c.bf16 %v2592_v50, %v2591_v59  ;;  %v2849_v59 = vld [vmem:[%s11267_s6 + $0x160] sm:$0xff] }
 0x350   :  { %2553 = vst.msk [vmem:[#allocation2 + $0xfc] sm:$0xff] %vm2429_vm2, %v2335_v9  ;;  %v2337_v62 = vpop.f32.mrb[29].mxu0  ;;  %v5205_v10 = vadd.f32 %v5204_v48, %v5203_v8  ;;  %v6464_v44 = vpack.c.bf16 %v2590_v42, %v2589_v43  ;;  %v2805_v42 = vld [vmem:[%s11267_s6] sm:$0xff]  ;;  %v2818_v43 = vld [vmem:[%s11267_s6 + $0x68] sm:$0xff] }
 0x351   :  { %2565 = vst.msk [vmem:[#allocation2 + $0x114] sm:$0xff] %vm2429_vm2, %v2337_v62  ;;  %2557 = vrot.lane.b32.xlu0 %v2337_v62, %s6982_s12 }
 0x352   :  { %v5206_v11 = vpop.f32.mrb[30].mxu1  ;;  %v2593_v1 = vld [vmem:[#allocation2 + $0x50] sm:$0xff] }
 0x353   :  { %v2341_v12 = vpop.f32.mrb[30].mxu0  ;;  %v5207_v56 = vpop.f32.mrb[31].mxu1  ;;  %v6472_v22 = vpack.c.bf16 %v2594_v3, %v2593_v1  ;;  %v2835_v3 = vld [vmem:[%s11267_s6 + $0xf0] sm:$0xff] }
 0x354   :  { %2554 = vst.msk [vmem:[#allocation2 + $0x104] sm:$0xf] %vm2431_vm3, %v2341_v12  ;;  %v2343_v13 = vpop.f32.mrb[31].mxu0  ;;  %v5208_v15 = vadd.f32 %v5207_v56, %v5206_v11 }
 0x355   :  { %2566 = vst.msk [vmem:[#allocation2 + $0x11c] sm:$0xf] %vm2431_vm3, %v2343_v13  ;;  %2569 = vrot.lane.b32.xlu0 %v5205_v10, %s6982_s12 }
 0x356   :  { %2571 = vrot.lane.b32.xlu1 %v5208_v15, %s6982_s12 }
 0x359   :  { %2559 = vrot.lane.b32.xlu0 %v2343_v13, %s6982_s12 }
 0x35a   :  { %1436 = vrot.lane.b32.xlu1 %v9928_v14, %s6982_s12  ;;  %v2631_v14 = vld [vmem:[%s11266_s5] sm:$0xff] }
 0x35b   :  { %v2615_v48 = vld [vmem:[#allocation2 + $0x100] sm:$0xff] }
 0x35d   :  { %1434 = vrot.lane.b32.xlu0 %v9909_v6, %s6982_s12  ;;  %v2584_v6 = vld [vmem:[#allocation2 + $0x8] sm:$0xff] }
 0x35e   :  { %2535 = vrot.lane.b32.xlu1 %v10005_v2, %s6982_s12 }
 0x361   :  { %1374 = vrot.lane.b32.xlu0 %v9466_v53, %s6982_s12  ;;  %v2578_v53 = vld [vmem:[%s11265_s4 + $0x8] sm:$0xff] }
 0x362   :  { %2475 = vrot.lane.b32.xlu1 %v9984_v49, %s6982_s12  ;;  %2707 = vmatprep.mubr.f32.mxu0 %v2578_v53 }
 0x365   :  { %2473 = vrot.lane.b32.xlu0 %v9978_v47, %s6982_s12 }
 0x366   :  { %v2488_v17 = vpop.permute.xlu1 %2487  ;;  %2545 = vrot.lane.b32.xlu1 %v2335_v9, %s6982_s12 }
 0x367   :  { %2492 = vst.msk [vmem:[#allocation2 + $0x80] sm:$0xf] %vm2431_vm3, %v2488_v17  ;;  %v2618_v17 = vld [vmem:[#allocation2 + $0x118] sm:$0xff] }
 0x369   :  { %1376 = vrot.lane.b32.xlu0 %v9499_v34, %s6982_s12  ;;  %v6452_v34 = vpack.c.bf16 %v2584_v6, %v2583_v20 }
 0x36a   :  { %2485 = vrot.lane.b32.xlu1 %v9980_v41, %s6982_s12 }
 0x36d   :  { %2547 = vrot.lane.b32.xlu0 %v2341_v12, %s6982_s12 }
 0x36e   :  { %v2599_v18 = vld [vmem:[#allocation2 + $0x80] sm:$0xff]  ;;  %2640 = vperm.xlu1 %6904, %v2632_v23  }
 0x36f   :  { %v6450_v19 = vpack.c.bf16 %v2600_v58, %v2599_v18 }
 0x371   :  { %2635 = vperm.xlu0 %6903, %v2631_v14   ;;  %6451 = vmatprep.subr.bf16.mxu0 %v6450_v19 }
 0x372   :  { %6453 = vmatpush3.bf16.msra.mxu0 %v6452_v34  ;;  %v10076_v34 = vld [vmem:[#allocation2 + $0x130] sm:$0xff] }
 0x373   :  { %v6494_v21 = vpack.c.bf16 %v10076_v34, %v10076_v34 }
 0x382   :  { %v2498_v24 = vpop.permute.xlu0 %2497 }
 0x383   :  { %2503 = vst.msk [vmem:[#allocation2 + $0x90] sm:$0xff] %vm2429_vm2, %v2498_v24  ;;  %v2510_v25 = vpop.permute.xlu1 %2509 }
 0x384   :  { %2515 = vst.msk [vmem:[#allocation2 + $0xa8] sm:$0xff] %vm2429_vm2, %v2510_v25 }
 0x387   :  { %v2500_v26 = vpop.permute.xlu1 %2499 }
 0x388   :  { %2504 = vst.msk [vmem:[#allocation2 + $0x98] sm:$0xf] %vm2431_vm3, %v2500_v26 }
 0x38a   :  { %v2601_v45 = vld [vmem:[#allocation2 + $0x90] sm:$0xff] }
 0x38b   :  { %v2512_v27 = vpop.permute.xlu1 %2511  ;;  %v2604_v29 = vld [vmem:[#allocation2 + $0xa8] sm:$0xff] }
 0x38c   :  { %2516 = vst.msk [vmem:[#allocation2 + $0xb0] sm:$0xf] %vm2431_vm3, %v2512_v27  ;;  %v6458_v28 = vpack.c.bf16 %v2604_v29, %v2603_v33  ;;  %v2581_v33 = vld [vmem:[%s11265_s4 + $0x20] sm:$0xf] }
 0x38f   :  { %v2602_v16 = vld [vmem:[#allocation2 + $0x98] sm:$0xff] }
 0x390   :  { %v6454_v30 = vpack.c.bf16 %v2602_v16, %v2601_v45 }
 0x392   :  { %6455 = vmatprep.subr.bf16.mxu0 %v6454_v30 }
 0x393   :  { %6457 = vmatpush3.bf16.msra.mxu0 %v6456_v32  ;;  %v2605_v37 = vld [vmem:[#allocation2 + $0xb0] sm:$0xff]  ;;  %v2577_v32 = vld [vmem:[%s11265_s4] sm:$0xff] }
 0x394   :  { %6459 = vmatprep.subr.bf16.mxu0 %v6458_v28  ;;  %v6462_v40 = vpack.c.bf16 %v2606_v39, %v2605_v37  ;;  %v2580_v28 = vld [vmem:[%s11265_s4 + $0x18] sm:$0xf]  ;;  %v2806_v37 = vld [vmem:[%s11267_s6 + $0x8] sm:$0xff] }
 0x395   :  { %v10109_v39 = vpack.c.bf16 %v2819_v36, %v2806_v37 }
 0x397   :  { %6461 = vmatpush3.bf16.msra.mxu0 %v6460_v38  ;;  %v2810_v38 = vld [vmem:[%s11267_s6 + $0x28] sm:$0xff] }
 0x398   :  { %6463 = vmatprep.subr.bf16.mxu0 %v6462_v40  ;;  %v2823_v40 = vld [vmem:[%s11267_s6 + $0x90] sm:$0xff] }
 0x39b   :  { %6465 = vmatpush3.bf16.msra.mxu0 %v6464_v44  ;;  %v10120_v44 = vpack.c.bf16 %v2823_v40, %v2810_v38 }
 0x3a1   :  { %v2522_v46 = vpop.permute.xlu0 %2521 }
 0x3a2   :  { %2527 = vst.msk [vmem:[#allocation2 + $0xc0] sm:$0xff] %vm2429_vm2, %v2522_v46  ;;  %v10122_v46 = vpack.c.bf16 %v2818_v43, %v2805_v42 }
 0x3a5   :  { %v2534_v41 = vpop.permute.xlu0 %2533  ;;  %v2524_v51 = vpop.permute.xlu1 %2523 }
 0x3a6   :  { %2539 = vst.msk [vmem:[#allocation2 + $0xd8] sm:$0xff] %vm2429_vm2, %v2534_v41  ;;  %v2809_v41 = vld [vmem:[%s11267_s6 + $0x20] sm:$0xff] }
 0x3a7   :  { %2528 = vst.msk [vmem:[#allocation2 + $0xc8] sm:$0xf] %vm2431_vm3, %v2524_v51  ;;  %v2822_v51 = vld [vmem:[%s11267_s6 + $0x88] sm:$0xff] }
 0x3a8   :  { %v10131_v50 = vpack.c.bf16 %v2822_v51, %v2809_v41 }
 0x3a9   :  { %v2607_v52 = vld [vmem:[#allocation2 + $0xc0] sm:$0xff] }
 0x3ad   :  { %v2610_v55 = vld [vmem:[#allocation2 + $0xd8] sm:$0xff] }
 0x3ae   :  { %v2608_v54 = vld [vmem:[#allocation2 + $0xc8] sm:$0xff]  ;;  %v6470_v63 = vpack.c.bf16 %v2610_v55, %v2609_v61  ;;  %v2836_v55 = vld [vmem:[%s11267_s6 + $0xf8] sm:$0xff] }
 0x3af   :  { %v6466_v57 = vpack.c.bf16 %v2608_v54, %v2607_v52  ;;  %v2832_v52 = vld [vmem:[%s11267_s6 + $0xd8] sm:$0xff]  ;;  %v2845_v54 = vld [vmem:[%s11267_s6 + $0x140] sm:$0xff] }
 0x3b0   :  { %v2844_v61 = vld [vmem:[%s11267_s6 + $0x138] sm:$0xff] }
 0x3b1   :  { %6467 = vmatprep.subr.bf16.mxu0 %v6466_v57  ;;  %v10145_v57 = vpack.c.bf16 %v2845_v54, %v2832_v52 }
 0x3b2   :  { %6469 = vmatpush3.bf16.msra.mxu0 %v6468_v60  ;;  %v2831_v60 = vld [vmem:[%s11267_s6 + $0xd0] sm:$0xff] }
 0x3b3   :  { %6471 = vmatprep.subr.bf16.mxu0 %v6470_v63  ;;  %v10156_v63 = vpack.c.bf16 %v2849_v59, %v2836_v55  ;;  %v10158_v1 = vpack.c.bf16 %v2844_v61, %v2831_v60  ;;  %v2807_v61 = vld [vmem:[%s11267_s6 + $0x10] sm:$0xff] }
 0x3b6   :  { %6473 = vmatpush3.bf16.msra.mxu0 %v6472_v22  ;;  %v2848_v22 = vld [vmem:[%s11267_s6 + $0x158] sm:$0xff] }
 0x3c3   :  { %v2558_v4 = vpop.permute.xlu0 %2557 }
 0x3c4   :  { %2563 = vst.msk [vmem:[#allocation2 + $0x108] sm:$0xff] %vm2429_vm2, %v2558_v4  ;;  %v10167_v4 = vpack.c.bf16 %v2848_v22, %v2835_v3  ;;  %v2820_v3 = vld [vmem:[%s11267_s6 + $0x78] sm:$0xff]  ;;  %v2813_v22 = vld [vmem:[%s11267_s6 + $0x40] sm:$0xff] }
 0x3c7   :  { %v2570_v7 = vpop.permute.xlu0 %2569 }
 0x3c8   :  { %2575 = vst.msk [vmem:[#allocation2 + $0x120] sm:$0xff] %vm2429_vm2, %v2570_v7  ;;  %v2572_v8 = vpop.permute.xlu1 %2571  ;;  %v2858_v7 = vld [vmem:[%s11267_s6 + $0x1a8] sm:$0xff] }
 0x3c9   :  { %2576 = vst.msk [vmem:[#allocation2 + $0x128] sm:$0xf] %vm2431_vm3, %v2572_v8  ;;  %v2871_v8 = vld [vmem:[%s11267_s6 + $0x210] sm:$0xff] }
 0x3cb   :  { %v2560_v9 = vpop.permute.xlu0 %2559  ;;  %v2616_v62 = vld [vmem:[#allocation2 + $0x108] sm:$0xff] }
 0x3cc   :  { %2564 = vst.msk [vmem:[#allocation2 + $0x110] sm:$0xf] %vm2431_vm3, %v2560_v9  ;;  %v1437_v10 = vpop.permute.xlu1 %1436  ;;  %v6482_v11 = vpack.c.bf16 %v2616_v62, %v2615_v48  ;;  %v2862_v9 = vld [vmem:[%s11267_s6 + $0x1c8] sm:$0xff]  ;;  %v10181_v48 = vpack.c.bf16 %v2871_v8, %v2858_v7  ;;  %v2875_v62 = vld [vmem:[%s11267_s6 + $0x230] sm:$0xff] }
 0x3cd   :  { %1441 = vst.msk [vmem:[#allocation2 + $0xec] sm:$0xf] %vm1322_vm1, %v1437_v10  ;;  %v2857_v10 = vld [vmem:[%s11267_s6 + $0x1a0] sm:$0xff]  ;;  %v2826_v7 = vld [vmem:[%s11267_s6 + $0xa8] sm:$0xff] }
 0x3ce   :  { %2542 = vst.msk [vmem:[#allocation2 + $0xec] sm:$0xf] %vm2431_vm3, %v10005_v2  ;;  %6483 = vmatprep.subr.bf16.mxu1 %v6482_v11  ;;  %v2834_v8 = vld [vmem:[%s11267_s6 + $0xe8] sm:$0xff] }
 0x3cf   :  { %6485 = vmatpush3.bf16.msra.mxu1 %v6482_v11  ;;  %v1435_v12 = vpop.permute.xlu0 %1434  ;;  %v2619_v2 = vld [vmem:[#allocation2 + $0x120] sm:$0xff]  ;;  %v2870_v11 = vld [vmem:[%s11267_s6 + $0x208] sm:$0xff] }
 0x3d0   :  { %1440 = vst.msk [vmem:[#allocation2 + $0xe4] sm:$0xff] %vm1320_vm0, %v1435_v12  ;;  %v2536_v56 = vpop.permute.xlu1 %2535  ;;  %v2620_v53 = vld [vmem:[#allocation2 + $0x128] sm:$0xff]  ;;  %v10192_v12 = vpack.c.bf16 %v2875_v62, %v2862_v9  ;;  %v2847_v9 = vld [vmem:[%s11267_s6 + $0x150] sm:$0xff]  ;;  %v10280_v62 = vpack.c.bf16 %v2820_v3, %v2807_v61 }
 0x3d1   :  { %2541 = vst.msk [vmem:[#allocation2 + $0xe4] sm:$0xff] %vm2429_vm2, %v10001_v0  ;;  %v6490_v18 = vpack.c.bf16 %v2620_v53, %v2619_v2  ;;  %v2884_v53 = vld [vmem:[%s11267_s6 + $0x278] sm:$0xff]  ;;  %v2830_v61 = vld [vmem:[%s11267_s6 + $0xc8] sm:$0xff] }
 0x3d2   :  { %2540 = vst.msk [vmem:[#allocation2 + $0xe0] sm:$0xf] %vm2431_vm3, %v2536_v56  ;;  %v10194_v56 = vpack.c.bf16 %v2870_v11, %v2857_v10  ;;  %v2840_v10 = vld [vmem:[%s11267_s6 + $0x118] sm:$0xff]  ;;  %v2853_v11 = vld [vmem:[%s11267_s6 + $0x180] sm:$0xff] }
 0x3d3   :  { %v1375_v13 = vpop.permute.xlu0 %1374  ;;  %v2617_v15 = vld [vmem:[#allocation2 + $0x110] sm:$0xff] }
 0x3d4   :  { %1380 = vst.msk [vmem:[#allocation2 + $0x6c] sm:$0xff] %vm1320_vm0, %v1375_v13  ;;  %v2476_v6 = vpop.permute.xlu1 %2475  ;;  %v6486_v14 = vpack.c.bf16 %v2618_v17, %v2617_v15  ;;  %v2861_v13 = vld [vmem:[%s11267_s6 + $0x1c0] sm:$0xff]  ;;  %v2874_v15 = vld [vmem:[%s11267_s6 + $0x228] sm:$0xff] }
 0x3d5   :  { %2481 = vst.msk [vmem:[#allocation2 + $0x6c] sm:$0xff] %vm2429_vm2, %v9978_v47  ;;  %v10203_v17 = vpack.c.bf16 %v2874_v15, %v2861_v13  ;;  %v10288_v13 = vpack.c.bf16 %v2826_v7, %v2813_v22  ;;  %v2833_v15 = vld [vmem:[%s11267_s6 + $0xe0] sm:$0xff] }
 0x3d6   :  { %2480 = vst.msk [vmem:[#allocation2 + $0x68] sm:$0xf] %vm2431_vm3, %v2476_v6  ;;  %6487 = vmatprep.subr.bf16.mxu1 %v6486_v14  ;;  %v2897_v6 = vld [vmem:[%s11267_s6 + $0x2e0] sm:$0xff] }
 0x3d7   :  { %v2474_v58 = vpop.permute.xlu0 %2473  ;;  %6489 = vmatpush3.bf16.msra.mxu1 %v6486_v14  ;;  %v2888_v14 = vld [vmem:[%s11267_s6 + $0x298] sm:$0xff]  ;;  %v10217_v2 = vpack.c.bf16 %v2897_v6, %v2884_v53  ;;  %v2846_v53 = vld [vmem:[%s11267_s6 + $0x148] sm:$0xff] }
 0x3d8   :  { %2479 = vst.msk [vmem:[#allocation2 + $0x60] sm:$0xff] %vm2429_vm2, %v2474_v58  ;;  %6491 = vmatprep.subr.bf16.mxu1 %v6490_v18  ;;  %v2546_v0 = vpop.permute.xlu1 %2545  ;;  %v2612_v20 = vld [vmem:[#allocation2 + $0xe8] sm:$0xff]  ;;  %v2883_v58 = vld [vmem:[%s11267_s6 + $0x270] sm:$0xff] }
 0x3d9   :  { %v2611_v19 = vld [vmem:[#allocation2 + $0xe0] sm:$0xff]  ;;  %2551 = vst.msk [vmem:[#allocation2 + $0xf0] sm:$0xff] %vm2429_vm2, %v2546_v0  ;;  %v2896_v0 = vld [vmem:[%s11267_s6 + $0x2d8] sm:$0xff] }
 0x3da   :  { %v6474_v47 = vpack.c.bf16 %v2612_v20, %v2611_v19  ;;  %v10230_v20 = vpack.c.bf16 %v2896_v0, %v2883_v58  ;;  %v2852_v58 = vld [vmem:[%s11267_s6 + $0x178] sm:$0xff] }
 0x3db   :  { %v1377_v23 = vpop.permute.xlu0 %1376  ;;  %6493 = vmatpush3.bf16.msra.mxu1 %v6490_v18  ;;  %v2901_v18 = vld [vmem:[%s11267_s6 + $0x300] sm:$0xff]  ;;  %v2860_v0 = vld [vmem:[%s11267_s6 + $0x1b8] sm:$0xff] }
 0x3dc   :  { %6475 = vmatprep.subr.bf16.mxu0 %v6474_v47  ;;  %1381 = vst.msk [vmem:[#allocation2 + $0x74] sm:$0xf] %vm1322_vm1, %v1377_v23  ;;  %v2486_v24 = vpop.permute.xlu1 %2485  ;;  %6495 = vmatprep.subr.bf16.mxu1 %v6494_v21  ;;  %v10228_v19 = vpack.c.bf16 %v2901_v18, %v2888_v14  ;;  %v2900_v47 = vld [vmem:[%s11267_s6 + $0x2f8] sm:$0xff]  ;;  %v10298_v14 = vpack.c.bf16 %v2847_v9, %v2834_v8  ;;  %v2839_v18 = vld [vmem:[%s11267_s6 + $0x110] sm:$0xff] }
 0x3dd   :  { %2482 = vst.msk [vmem:[#allocation2 + $0x74] sm:$0xf] %vm2431_vm3, %v9984_v49  ;;  %v2596_v27 = vld [vmem:[#allocation2 + $0x68] sm:$0xff]  ;;  %v2808_v23 = vld [vmem:[%s11267_s6 + $0x18] sm:$0xff]  ;;  %v2811_v9 = vld [vmem:[%s11267_s6 + $0x30] sm:$0xff] }
 0x3de   :  { %2491 = vst.msk [vmem:[#allocation2 + $0x78] sm:$0xff] %vm2429_vm2, %v2486_v24 }
 0x3df   :  { %v2548_v25 = vpop.permute.xlu0 %2547  ;;  %6497 = vmatpush3.bf16.msra.mxu1 %v6494_v21  ;;  %v2595_v26 = vld [vmem:[#allocation2 + $0x60] sm:$0xff] }
 0x3e0   :  { %2552 = vst.msk [vmem:[#allocation2 + $0xf8] sm:$0xf] %vm2431_vm3, %v2548_v25  ;;  %v6476_v5 = vpack.c.bf16 %v2596_v27, %v2595_v26  ;;  %6499 = vmatprep.subr.bf16.mxu1 %v6494_v21  ;;  %v2613_v29 = vld [vmem:[#allocation2 + $0xf0] sm:$0xff]  ;;  %v2821_v25 = vld [vmem:[%s11267_s6 + $0x80] sm:$0xff]  ;;  %v2814_v26 = vld [vmem:[%s11267_s6 + $0x48] sm:$0xff] }
 0x3e1   :  { %v2827_v27 = vld [vmem:[%s11267_s6 + $0xb0] sm:$0xff] }
 0x3e2   :  { %6477 = vmatpush3.bf16.msra.mxu0 %v6476_v5  ;;  %v10255_v5 = vpack.c.bf16 %v2821_v25, %v2808_v23  ;;  %v2866_v23 = vld [vmem:[%s11267_s6 + $0x1e8] sm:$0xff]  ;;  %v2879_v25 = vld [vmem:[%s11267_s6 + $0x250] sm:$0xff] }
 0x3e3   :  { %6501 = vmatpush3.bf16.msra.mxu1 %v6494_v21 }
 0x3e4   :  { %6503 = vmatprep.subr.bf16.mxu1 %v6494_v21  ;;  %v2597_v45 = vld [vmem:[#allocation2 + $0x70] sm:$0xff] }
 0x3e5   :  { %v2598_v16 = vld [vmem:[#allocation2 + $0x78] sm:$0xff] }
 0x3e6   :  { %v6480_v49 = vpack.c.bf16 %v2598_v16, %v2597_v45  ;;  %v10257_v45 = vpack.c.bf16 %v2827_v27, %v2814_v26  ;;  %v10329_v26 = vpack.c.bf16 %v2846_v53, %v2833_v15  ;;  %v10331_v27 = vpack.c.bf16 %v2852_v58, %v2839_v18  ;;  %v2851_v15 = vld [vmem:[%s11267_s6 + $0x170] sm:$0xff]  ;;  %v2856_v18 = vld [vmem:[%s11267_s6 + $0x198] sm:$0xff] }
 0x3e7   :  { %6505 = vmatpush3.bf16.msra.mxu1 %v6494_v21  ;;  %v2614_v30 = vld [vmem:[#allocation2 + $0xf8] sm:$0xff]  ;;  %v2843_v53 = vld [vmem:[%s11267_s6 + $0x130] sm:$0xff] }
 0x3e8   :  { %v6478_v31 = vpack.c.bf16 %v2614_v30, %v2613_v29  ;;  %6507 = vmatprep.subr.bf16.mxu1 %v6494_v21 }
 0x3ea   :  { %6479 = vmatprep.subr.bf16.mxu0 %v6478_v31 }
 0x3eb   :  { %6481 = vmatpush3.bf16.msra.mxu0 %v6480_v49  ;;  %6509 = vmatpush3.bf16.msra.mxu1 %v6494_v21 }
 0x3ec   :  { %6511 = vmatprep.subr.bf16.mxu1 %v6494_v21  ;;  %6547 = vmatprep.subr.bf16.mxu0 %v10120_v44 }
 0x3ed   :  { %v2641_v49 = vpop.permute.xlu1 %2640 }
 0x3ee   :  { %2708 = vmatmul.mubr.f32.vlgmr.msra.gmra.mrb[32].mxu0 %v2577_v32 }
 0x3ef   :  { %6513 = vmatpush3.bf16.msra.mxu1 %v6494_v21  ;;  %2712 = vmatprep.mubr.f32.mxu0 %v2581_v33  ;;  %v2887_v21 = vld [vmem:[%s11267_s6 + $0x290] sm:$0xff] }
 0x3f0   :  { %6515 = vmatprep.subr.bf16.mxu1 %v10109_v39  ;;  %6549 = vmatpush1.bf16.msra.mxu0 %v10131_v50  ;;  %v10242_v24 = vpack.c.bf16 %v2900_v47, %v2887_v21  ;;  %v2636_v31 = vpop.permute.xlu0 %2635  ;;  %v10313_v21 = vpack.c.bf16 %v2853_v11, %v2840_v10  ;;  %v2873_v47 = vld [vmem:[%s11267_s6 + $0x220] sm:$0xff]  ;;  %v2824_v10 = vld [vmem:[%s11267_s6 + $0x98] sm:$0xff]  ;;  %v2838_v11 = vld [vmem:[%s11267_s6 + $0x108] sm:$0xff] }
 0x3f1   :  { %6551 = vmatprep.subr.bf16.mxu0 %v10156_v63  ;;  %v10442_v58 = vpack.c.bf16 %v2824_v10, %v2811_v9  ;;  %v2889_v9 = vld [vmem:[%s11267_s6 + $0x2a0] sm:$0xff]  ;;  %v2902_v10 = vld [vmem:[%s11267_s6 + $0x308] sm:$0xff] }
 0x3f2   :  { %2713 = vmatmul.mubr.f32.gmra.mrb[34].mxu0 %v2580_v28  ;;  %5479 = vmatmul.mubr.f32.vlgmr.msra.gmra.mrb[32].mxu1 %v2582_v35 }
 0x3f3   :  { %2979 = vmatprep.mubr.f32.mxu1 %v10076_v34  ;;  %3133 = vmatprep.mubr.f32.mxu0 %v10076_v34 }
 0x3f4   :  { %6517 = vmatpush1.bf16.msra.mxu1 %v10122_v46  ;;  %6553 = vmatpush1.bf16.msra.mxu0 %v10167_v4 }
 0x3f5   :  { %6519 = vmatprep.subr.bf16.mxu1 %v10145_v57  ;;  %6555 = vmatprep.subr.bf16.mxu0 %v10192_v12 }
 0x3f8   :  { %6521 = vmatpush1.bf16.msra.mxu1 %v10158_v1  ;;  %6557 = vmatpush1.bf16.msra.mxu0 %v10203_v17 }
 0x3f9   :  { %6523 = vmatprep.subr.bf16.mxu1 %v10181_v48  ;;  %6559 = vmatprep.subr.bf16.mxu0 %v10228_v19 }
 0x3fc   :  { %6525 = vmatpush1.bf16.msra.mxu1 %v10194_v56  ;;  %6561 = vmatpush1.bf16.msra.mxu0 %v10242_v24 }
 0x3fd   :  { %6527 = vmatprep.subr.bf16.mxu1 %v10217_v2  ;;  %6579 = vmatprep.subr.bf16.mxu0 %v10257_v45 }
 0x400   :  { %6529 = vmatpush1.bf16.msra.mxu1 %v10230_v20 }
 0x401   :  { %6531 = vmatprep.subr.bf16.mxu1 %v10255_v5 }
 0x4c1   :  { %v5241_v16 = vpop.f32.mrb[32].mxu0 }
 0x4c2   :  { %v5242_v29 = vpop.f32.mrb[33].mxu0 }
 0x4c3   :  { %v5243_v30 = vadd.f32 %v5242_v29, %v5241_v16  ;;  %v2859_v16 = vld [vmem:[%s11267_s6 + $0x1b0] sm:$0xff]  ;;  %v2872_v29 = vld [vmem:[%s11267_s6 + $0x218] sm:$0xff] }
 0x4c5   :  { %v5244_v32 = vpop.f32.mrb[34].mxu0  ;;  %v5480_v33 = vpop.f32.mrb[32].mxu1  ;;  %v2710_v28 = vadd.f32 %v5243_v30, %v2636_v31  ;;  %v10343_v31 = vpack.c.bf16 %v2873_v47, %v2860_v0  ;;  %v2837_v0 = vld [vmem:[%s11267_s6 + $0x100] sm:$0xff]  ;;  %v2850_v47 = vld [vmem:[%s11267_s6 + $0x168] sm:$0xff] }
 0x4c6   :  { %v5245_v35 = vpop.f32.mrb[35].mxu0  ;;  %v2784_v37 = vpop.f32.mrb[33].mxu1 }
 0x4c7   :  { %v5246_v36 = vadd.f32 %v5245_v35, %v5244_v32  ;;  %v2785_v38 = vadd.f32 %v2784_v37, %v2710_v28  ;;  %v2865_v32 = vld [vmem:[%s11267_s6 + $0x1e0] sm:$0xff]  ;;  %v2886_v28 = vld [vmem:[%s11267_s6 + $0x288] sm:$0xff]  ;;  %v2899_v35 = vld [vmem:[%s11267_s6 + $0x2f0] sm:$0xff] }
 0x4c8   :  { %v2892_v37 = vld [vmem:[%s11267_s6 + $0x2b8] sm:$0xff] }
 0x4c9   :  { %v2793_v40 = vsub.f32 0.0, %v2785_v38  ;;  %v2715_v42 = vadd.f32 %v5246_v36, %v2641_v49  ;;  %v10345_v49 = vpack.c.bf16 %v2879_v25, %v2866_v23  ;;  %v2905_v36 = vld [vmem:[%s11267_s6 + $0x320] sm:$0xff]  ;;  %v10374_v38 = vpack.c.bf16 %v2872_v29, %v2859_v16  ;;  %v2864_v16 = vld [vmem:[%s11267_s6 + $0x1d8] sm:$0xff] }
 0x4ca   :  { %v10452_v23 = vpack.c.bf16 %v2851_v15, %v2838_v11  ;;  %v10454_v25 = vpack.c.bf16 %v2856_v18, %v2843_v53  ;;  %v2877_v29 = vld [vmem:[%s11267_s6 + $0x240] sm:$0xff]  ;;  %v2816_v11 = vld [vmem:[%s11267_s6 + $0x58] sm:$0xff]  ;;  %v10533_v53 = vpack.c.bf16 %v2902_v10, %v2889_v9  ;;  %v2894_v10 = vld [vmem:[%s11267_s6 + $0x2c8] sm:$0xff] }
 0x4cb   :  { %v2795_v43 = vmul.f32 1.442695, %v2793_v40  ;;  %v2790_v41 = vadd.f32 %v5480_v33, %v2715_v42  ;;  %v2878_v33 = vld [vmem:[%s11267_s6 + $0x248] sm:$0xff]  ;;  %v2885_v42 = vld [vmem:[%s11267_s6 + $0x280] sm:$0xff]  ;;  %v2880_v9 = vld [vmem:[%s11267_s6 + $0x258] sm:$0xff] }
 0x4cc   :  { %v10376_v40 = vpack.c.bf16 %v2878_v33, %v2865_v32  ;;  %v2869_v32 = vld [vmem:[%s11267_s6 + $0x200] sm:$0xff]  ;;  %v2882_v33 = vld [vmem:[%s11267_s6 + $0x268] sm:$0xff] }
 0x4cd   :  { %6938 = vpow2.f32 %v2795_v43  ;;  %v2794_v51 = vsub.f32 0.0, %v2790_v41  ;;  %v2898_v43 = vld [vmem:[%s11267_s6 + $0x2e8] sm:$0xff]  ;;  %v10386_v41 = vpack.c.bf16 %v2899_v35, %v2886_v28  ;;  %v10474_v28 = vpack.c.bf16 %v2850_v47, %v2837_v0  ;;  %v2829_v15 = vld [vmem:[%s11267_s6 + $0xc0] sm:$0xff]  ;;  %v2815_v0 = vld [vmem:[%s11267_s6 + $0x50] sm:$0xff] }
 0x4ce   :  { %v10412_v3 = vpack.c.bf16 %v2898_v43, %v2885_v42  ;;  %v10478_v35 = vpack.c.bf16 %v2877_v29, %v2864_v16  ;;  %v2890_v42 = vld [vmem:[%s11267_s6 + $0x2a8] sm:$0xff]  ;;  %v10491_v43 = vpack.c.bf16 %v2882_v33, %v2869_v32  ;;  %v10537_v18 = vpack.c.bf16 %v2829_v15, %v2816_v11  ;;  %v2828_v47 = vld [vmem:[%s11267_s6 + $0xb8] sm:$0xff]  ;;  %v2855_v29 = vld [vmem:[%s11267_s6 + $0x190] sm:$0xff] }
 0x4cf   :  { %v2797_v52 = vmul.f32 1.442695, %v2794_v51  ;;  %v10388_v51 = vpack.c.bf16 %v2905_v36, %v2892_v37  ;;  %v2863_v37 = vld [vmem:[%s11267_s6 + $0x1d0] sm:$0xff]  ;;  %v2876_v36 = vld [vmem:[%s11267_s6 + $0x238] sm:$0xff]  ;;  %v2842_v16 = vld [vmem:[%s11267_s6 + $0x128] sm:$0xff]  ;;  %v10553_v32 = vpack.c.bf16 %v2828_v47, %v2815_v0 }
 0x4d0   :  { %v10556_v33 = vpack.c.bf16 %v2855_v29, %v2842_v16  ;;  %v2907_v11 = vld [vmem:[%s11267_s6 + $0x330] sm:$0xff]  ;;  %v2893_v0 = vld [vmem:[%s11267_s6 + $0x2c0] sm:$0xff] }
 0x4d1   :  { %6940 = vpow2.f32 %v2797_v52  ;;  %v2891_v52 = vld [vmem:[%s11267_s6 + $0x2b0] sm:$0xff] }
 0x4d7   :  { %v6939_v54 = vpop.eup %6938 }
 0x4d8   :  { %v2799_v55 = vadd.f32 1.0, %v6939_v54  ;;  %v2904_v54 = vld [vmem:[%s11267_s6 + $0x318] sm:$0xff] }
 0x4d9   :  { %v10414_v22 = vpack.c.bf16 %v2904_v54, %v2891_v52  ;;  %v2903_v52 = vld [vmem:[%s11267_s6 + $0x310] sm:$0xff] }
 0x4da   :  { %6942 = vrcp.f32 %v2799_v55  ;;  %v2812_v55 = vld [vmem:[%s11267_s6 + $0x38] sm:$0xff]  ;;  %v2895_v54 = vld [vmem:[%s11267_s6 + $0x2d0] sm:$0xff] }
 0x4db   :  { %v6941_v59 = vpop.eup %6940 }
 0x4dc   :  { %v2800_v60 = vadd.f32 1.0, %v6941_v59  ;;  %v2825_v59 = vld [vmem:[%s11267_s6 + $0xa0] sm:$0xff] }
 0x4dd   :  { %v10418_v7 = vpack.c.bf16 %v2825_v59, %v2812_v55  ;;  %v2908_v55 = vld [vmem:[%s11267_s6 + $0x338] sm:$0xff]  ;;  %v10508_v59 = vpack.c.bf16 %v2876_v36, %v2863_v37  ;;  %v2841_v37 = vld [vmem:[%s11267_s6 + $0x120] sm:$0xff]  ;;  %v2854_v36 = vld [vmem:[%s11267_s6 + $0x188] sm:$0xff] }
 0x4de   :  { %6944 = vrcp.f32 %v2800_v60  ;;  %v2817_v60 = vld [vmem:[%s11267_s6 + $0x60] sm:$0xff] }
 0x4df   :  { %v10420_v8 = vpack.c.bf16 %v2830_v61, %v2817_v60  ;;  %v10513_v60 = vpack.c.bf16 %v2903_v52, %v2890_v42  ;;  %v10515_v61 = vpack.c.bf16 %v2908_v55, %v2895_v54  ;;  %v2868_v42 = vld [vmem:[%s11267_s6 + $0x1f8] sm:$0xff]  ;;  %v2881_v52 = vld [vmem:[%s11267_s6 + $0x260] sm:$0xff]  ;;  %v10577_v54 = vpack.c.bf16 %v2854_v36, %v2841_v37  ;;  %v2867_v55 = vld [vmem:[%s11267_s6 + $0x1f0] sm:$0xff] }
 0x4e0   :  { %v10600_v15 = vpack.c.bf16 %v2880_v9, %v2867_v55 }
 0x4e4   :  { %v10296_v6 = vpop.eup %6942 }
 0x4e5   :  { %3702 = vrot.lane.b32.xlu0 %v10296_v6, %s6982_s12  ;;  %5103 = vmatmul.mubr.msk.f32.vlgmr.msra.gmra.mrb[34].mxu1 %vm1320_vm0, %v10296_v6 }
 0x4e6   :  { %6533 = vmatpush1.bf16.msra.mxu1 %v10280_v62  ;;  %5107 = vmatmul.mubr.msk.f32.vlgmr.msra.gmra.mrb[36].mxu0 %vm1320_vm0, %v10296_v6 }
 0x4e7   :  { %6581 = vmatpush1.bf16.msra.mxu0 %v10288_v13  ;;  %2985 = vmatprep.mubr.f32.mxu1 %v10076_v34 }
 0x4e8   :  { %v10339_v30 = vpop.eup %6944  ;;  %6535 = vmatprep.subr.bf16.mxu1 %v10298_v14  ;;  %3139 = vmatprep.mubr.f32.mxu0 %v10076_v34 }
 0x4e9   :  { %6583 = vmatprep.subr.bf16.mxu0 %v10313_v21  ;;  %3704 = vrot.lane.b32.xlu1 %v10339_v30, %s6982_s12 }
 0x4ea   :  { %5104 = vmatmul.mubr.msk.f32.gmra.mrb[36].mxu1 %vm1320_vm0, %v10339_v30  ;;  %5108 = vmatmul.mubr.msk.f32.gmra.mrb[38].mxu0 %vm1320_vm0, %v10339_v30 }
 0x4eb   :  { %6537 = vmatpush1.bf16.msra.mxu1 %v10329_v26  ;;  %6585 = vmatpush1.bf16.msra.mxu0 %v10331_v27 }
 0x4ec   :  { %6539 = vmatprep.subr.bf16.mxu1 %v10343_v31  ;;  %6587 = vmatprep.subr.bf16.mxu0 %v10345_v49 }
 0x4ed   :  { %3056 = vmatprep.mubr.f32.mxu1 %v10076_v34  ;;  %3287 = vmatprep.mubr.f32.mxu0 %v10076_v34 }
 0x4ef   :  { %6541 = vmatpush1.bf16.msra.mxu1 %v10374_v38  ;;  %6589 = vmatpush1.bf16.msra.mxu0 %v10376_v40 }
 0x4f0   :  { %6543 = vmatprep.subr.bf16.mxu1 %v10386_v41  ;;  %6591 = vmatprep.subr.bf16.mxu0 %v10388_v51 }
 0x4f3   :  { %6545 = vmatpush1.bf16.msra.mxu1 %v10412_v3  ;;  %6593 = vmatpush1.bf16.msra.mxu0 %v10414_v22 }
 0x4f4   :  { %6563 = vmatprep.subr.bf16.mxu1 %v10418_v7  ;;  %6611 = vmatprep.subr.bf16.mxu0 %v10420_v8 }
 0x4f6   :  { %5105 = vmatmul.mubr.msk.f32.vlgmr.msra.gmra.mrb[38].mxu1 %vm1320_vm0, %v10296_v6  ;;  %5111 = vmatmul.mubr.msk.f32.vlgmr.msra.gmra.mrb[40].mxu0 %vm1320_vm0, %v10296_v6 }
 0x4f7   :  { %6565 = vmatpush1.bf16.msra.mxu1 %v10442_v58  ;;  %6613 = vmatpush3.bf16.msra.mxu0 %v10420_v8 }
 0x4f8   :  { %3062 = vmatprep.mubr.f32.mxu1 %v10076_v34  ;;  %3293 = vmatprep.mubr.f32.mxu0 %v10076_v34 }
 0x4f9   :  { %6567 = vmatprep.subr.bf16.mxu1 %v10452_v23  ;;  %6615 = vmatprep.subr.bf16.mxu0 %v10454_v25 }
 0x4fa   :  { %5106 = vmatmul.mubr.msk.f32.gmra.mrb[40].mxu1 %vm1320_vm0, %v10339_v30  ;;  %5112 = vmatmul.mubr.msk.f32.gmra.mrb[42].mxu0 %vm1320_vm0, %v10339_v30 }
 0x4fb   :  { %6569 = vmatpush1.bf16.msra.mxu1 %v10474_v28  ;;  %6617 = vmatpush3.bf16.msra.mxu0 %v10454_v25 }
 0x4fc   :  { %5497 = vmatprep.mubr.msk.f32.mxu0 %vm1320_vm0, %v10296_v6  ;;  %6571 = vmatprep.subr.bf16.mxu1 %v10478_v35 }
 0x4fd   :  { %6619 = vmatprep.subr.bf16.mxu0 %v10491_v43  ;;  %3210 = vmatprep.mubr.f32.mxu1 %v10076_v34 }
 0x4ff   :  { %6573 = vmatpush1.bf16.msra.mxu1 %v10508_v59  ;;  %6621 = vmatpush3.bf16.msra.mxu0 %v10491_v43 }
 0x500   :  { %6575 = vmatprep.subr.bf16.mxu1 %v10513_v60  ;;  %6623 = vmatprep.subr.bf16.mxu0 %v10515_v61 }
 0x503   :  { %6577 = vmatpush1.bf16.msra.mxu1 %v10533_v53  ;;  %6625 = vmatpush3.bf16.msra.mxu0 %v10515_v61 }
 0x504   :  { %6595 = vmatprep.subr.bf16.mxu1 %v10537_v18  ;;  %6643 = vmatprep.subr.bf16.mxu0 %v10255_v5  ;;  %v10580_v5 = vpack.c.bf16 %v2881_v52, %v2868_v42 }
 0x506   :  { %5109 = vmatmul.mubr.msk.f32.vlgmr.msra.gmra.mrb[42].mxu1 %vm1320_vm0, %v10296_v6  ;;  %5498 = vmatmul.mubr.msk.f32.vlgmr.msra.gmra.mrb[44].mxu0 %vm1320_vm0, %v10339_v30 }
 0x507   :  { %6597 = vmatpush1.bf16.msra.mxu1 %v10553_v32  ;;  %3216 = vmatprep.mubr.f32.mxu1 %v10076_v34 }
 0x508   :  { %6599 = vmatprep.subr.bf16.mxu1 %v10556_v33  ;;  %6645 = vmatpush1.bf16.msra.mxu0 %v10280_v62  ;;  %v10604_v62 = vpack.c.bf16 %v2907_v11, %v2894_v10 }
 0x509   :  { %6647 = vmatprep.subr.bf16.mxu0 %v10298_v14  ;;  %3851 = vmatprep.mubr.f32.mxu0 %v10076_v34  ;;  %v2906_v14 = vld [vmem:[%s11267_s6 + $0x328] sm:$0xff] }
 0x50a   :  { %5110 = vmatmul.mubr.msk.f32.gmra.mrb[44].mxu1 %vm1320_vm0, %v10339_v30  ;;  %v10615_v47 = vpack.c.bf16 %v2906_v14, %v2893_v0 }
 0x50b   :  { %6601 = vmatpush1.bf16.msra.mxu1 %v10577_v54  ;;  %3364 = vmatprep.mubr.f32.mxu1 %v10076_v34 }
 0x50c   :  { %6603 = vmatprep.subr.bf16.mxu1 %v10580_v5  ;;  %6649 = vmatpush1.bf16.msra.mxu0 %v10329_v26 }
 0x50d   :  { %6651 = vmatprep.subr.bf16.mxu0 %v10343_v31 }
 0x50f   :  { %6605 = vmatpush1.bf16.msra.mxu1 %v10600_v15 }
 0x510   :  { %6607 = vmatprep.subr.bf16.mxu1 %v10604_v62  ;;  %6653 = vmatpush1.bf16.msra.mxu0 %v10374_v38 }
 0x511   :  { %6655 = vmatprep.subr.bf16.mxu0 %v10386_v41 }
 0x513   :  { %6609 = vmatpush1.bf16.msra.mxu1 %v10615_v47 }
 0x514   :  { %6627 = vmatprep.subr.bf16.mxu1 %v10109_v39  ;;  %6657 = vmatpush1.bf16.msra.mxu0 %v10412_v3 }
 0x515   :  { %6675 = vmatprep.subr.bf16.mxu0 %v10418_v7 }
 0x516   :  { %5113 = vmatmul.mubr.msk.f32.vlgmr.msra.gmra.mrb[46].mxu1 %vm1320_vm0, %v10296_v6 }
 0x517   :  { %3370 = vmatprep.mubr.f32.mxu1 %v10076_v34  ;;  %6629 = vmatpush1.bf16.msra.mxu1 %v10122_v46 }
 0x518   :  { %6631 = vmatprep.subr.bf16.mxu1 %v10145_v57 }
 0x51a   :  { %5114 = vmatmul.mubr.msk.f32.gmra.mrb[48].mxu1 %vm1320_vm0, %v10339_v30 }
 0x51b   :  { %6633 = vmatpush1.bf16.msra.mxu1 %v10158_v1  ;;  %3774 = vmatprep.mubr.f32.mxu1 %v10076_v34 }
 0x51c   :  { %6635 = vmatprep.subr.bf16.mxu1 %v10181_v48 }
 0x51f   :  { %6637 = vmatpush1.bf16.msra.mxu1 %v10194_v56 }
 0x520   :  { %6639 = vmatprep.subr.bf16.mxu1 %v10217_v2 }
 0x523   :  { %6641 = vmatpush1.bf16.msra.mxu1 %v10230_v20 }
 0x524   :  { %6659 = vmatprep.subr.bf16.mxu1 %v10120_v44 }
 0x557   :  { %v3703_v39 = vpop.permute.xlu0 %3702 }
 0x558   :  { %5117 = vmatmul.mubr.msk.f32.vlgmr.msra.gmra.mrb[50].mxu1 %vm1320_vm0, %v3703_v39  ;;  %5119 = vmatmul.mubr.msk.f32.vlgmr.msra.gmra.mrb[46].mxu0 %vm1320_vm0, %v3703_v39 }
 0x559   :  { %6661 = vmatpush1.bf16.msra.mxu1 %v10131_v50  ;;  %6677 = vmatpush1.bf16.msra.mxu0 %v10442_v58 }
 0x55a   :  { %3780 = vmatprep.mubr.f32.mxu1 %v10076_v34  ;;  %3857 = vmatprep.mubr.f32.mxu0 %v10076_v34 }
 0x55b   :  { %v3705_v46 = vpop.permute.xlu1 %3704  ;;  %6663 = vmatprep.subr.bf16.mxu1 %v10156_v63  ;;  %6679 = vmatprep.subr.bf16.mxu0 %v10452_v23 }
 0x55c   :  { %5118 = vmatmul.mubr.msk.f32.gmra.mrb[52].mxu1 %vm1320_vm0, %v3705_v46  ;;  %5120 = vmatmul.mubr.msk.f32.gmra.mrb[48].mxu0 %vm1320_vm0, %v3705_v46 }
 0x55d   :  { %6665 = vmatpush1.bf16.msra.mxu1 %v10167_v4  ;;  %6681 = vmatpush1.bf16.msra.mxu0 %v10474_v28 }
 0x55e   :  { %6667 = vmatprep.subr.bf16.mxu1 %v10192_v12  ;;  %6683 = vmatprep.subr.bf16.mxu0 %v10478_v35 }
 0x55f   :  { %3928 = vmatprep.mubr.f32.mxu1 %v10076_v34  ;;  %4005 = vmatprep.mubr.f32.mxu0 %v10076_v34 }
 0x561   :  { %6669 = vmatpush1.bf16.msra.mxu1 %v10203_v17  ;;  %6685 = vmatpush1.bf16.msra.mxu0 %v10508_v59 }
 0x562   :  { %6671 = vmatprep.subr.bf16.mxu1 %v10228_v19  ;;  %6687 = vmatprep.subr.bf16.mxu0 %v10513_v60 }
 0x565   :  { %6673 = vmatpush1.bf16.msra.mxu1 %v10242_v24  ;;  %6689 = vmatpush1.bf16.msra.mxu0 %v10533_v53 }
 0x566   :  { %6691 = vmatprep.subr.bf16.mxu1 %v10257_v45  ;;  %6707 = vmatprep.subr.bf16.mxu0 %v10537_v18 }
 0x568   :  { %5121 = vmatmul.mubr.msk.f32.vlgmr.msra.gmra.mrb[54].mxu1 %vm1320_vm0, %v3703_v39  ;;  %5123 = vmatmul.mubr.msk.f32.vlgmr.msra.gmra.mrb[50].mxu0 %vm1320_vm0, %v3703_v39 }
 0x569   :  { %6693 = vmatpush1.bf16.msra.mxu1 %v10288_v13  ;;  %6709 = vmatpush1.bf16.msra.mxu0 %v10553_v32 }
 0x56a   :  { %3934 = vmatprep.mubr.f32.mxu1 %v10076_v34  ;;  %4011 = vmatprep.mubr.f32.mxu0 %v10076_v34 }
 0x56b   :  { %6695 = vmatprep.subr.bf16.mxu1 %v10313_v21  ;;  %6711 = vmatprep.subr.bf16.mxu0 %v10556_v33 }
 0x56c   :  { %5122 = vmatmul.mubr.msk.f32.gmra.mrb[56].mxu1 %vm1320_vm0, %v3705_v46  ;;  %5124 = vmatmul.mubr.msk.f32.gmra.mrb[52].mxu0 %vm1320_vm0, %v3705_v46 }
 0x56d   :  { %6697 = vmatpush1.bf16.msra.mxu1 %v10331_v27  ;;  %6713 = vmatpush1.bf16.msra.mxu0 %v10577_v54 }
 0x56e   :  { %6699 = vmatprep.subr.bf16.mxu1 %v10345_v49  ;;  %6715 = vmatprep.subr.bf16.mxu0 %v10580_v5 }
 0x56f   :  { %4082 = vmatprep.mubr.f32.mxu1 %v10076_v34  ;;  %4159 = vmatprep.mubr.f32.mxu0 %v10076_v34 }
 0x571   :  { %6701 = vmatpush1.bf16.msra.mxu1 %v10376_v40  ;;  %6717 = vmatpush1.bf16.msra.mxu0 %v10600_v15 }
 0x572   :  { %6703 = vmatprep.subr.bf16.mxu1 %v10388_v51  ;;  %6719 = vmatprep.subr.bf16.mxu0 %v10604_v62 }
 0x575   :  { %6705 = vmatpush1.bf16.msra.mxu1 %v10414_v22  ;;  %6721 = vmatpush1.bf16.msra.mxu0 %v10615_v47 }
 0x576   :  { %6723 = vmatprep.subr.bf16.mxu1 %v10420_v8 }
 0x578   :  { %5125 = vmatmul.mubr.msk.f32.vlgmr.msra.gmra.mrb[58].mxu1 %vm1320_vm0, %v3703_v39  ;;  %5127 = vmatmul.mubr.msk.f32.vlgmr.msra.gmra.mrb[54].mxu0 %vm1320_vm0, %v3703_v39 }
 0x579   :  { %6725 = vmatpush3.bf16.msra.mxu1 %v10420_v8  ;;  %4088 = vmatprep.mubr.f32.mxu1 %v10076_v34 }
 0x57a   :  { %4165 = vmatprep.mubr.f32.mxu0 %v10076_v34  ;;  %6727 = vmatprep.subr.bf16.mxu1 %v10454_v25 }
 0x57c   :  { %5126 = vmatmul.mubr.msk.f32.gmra.mrb[60].mxu1 %vm1320_vm0, %v3705_v46  ;;  %5128 = vmatmul.mubr.msk.f32.gmra.mrb[56].mxu0 %vm1320_vm0, %v3705_v46 }
 0x57d   :  { %6729 = vmatpush3.bf16.msra.mxu1 %v10454_v25  ;;  %5516 = vmatprep.mubr.msk.f32.mxu1 %vm1320_vm0, %v3703_v39 }
 0x57e   :  { %6731 = vmatprep.subr.bf16.mxu1 %v10491_v43 }
 0x581   :  { %6733 = vmatpush3.bf16.msra.mxu1 %v10491_v43 }
 0x582   :  { %6735 = vmatprep.subr.bf16.mxu1 %v10515_v61 }
 0x585   :  { %6737 = vmatpush3.bf16.msra.mxu1 %v10515_v61 }
 0x588   :  { %5517 = vmatmul.mubr.msk.f32.vlgmr.msra.gmra.mrb[62].mxu1 %vm1320_vm0, %v3705_v46 }
 0x5b8   :  { %v2981_v34 = vpop.f32.mrb[34].mxu1 }
 0x5b9   :  { %3452 = vst.msk [vmem:[#allocation2] sm:$0xff] %vm1320_vm0, %v2981_v34  ;;  %v10701_v44 = vpop.f32.mrb[36].mxu0  ;;  %3456 = vrot.lane.b32.xlu0 %v2981_v34, %s6982_s12  ;;  %v2983_v50 = vpop.f32.mrb[35].mxu1 }
 0x5ba   :  { %3500 = vst.msk [vmem:[#allocation2 + $0x60] sm:$0xff] %vm1320_vm0, %v10701_v44  ;;  %v3137_v57 = vpop.f32.mrb[37].mxu0  ;;  %3464 = vst.msk [vmem:[#allocation2 + $0x18] sm:$0xff] %vm1320_vm0, %v2983_v50  ;;  %3468 = vrot.lane.b32.xlu1 %v2983_v50, %s6982_s12 }
 0x5bb   :  { %3512 = vst.msk [vmem:[#allocation2 + $0x78] sm:$0xff] %vm1320_vm0, %v3137_v57 }
 0x5bd   :  { %v2987_v63 = vpop.f32.mrb[36].mxu1  ;;  %v10709_v1 = vpop.f32.mrb[38].mxu0  ;;  %3516 = vrot.lane.b32.xlu0 %v3137_v57, %s6982_s12 }
 0x5be   :  { %3453 = vst.msk [vmem:[#allocation2 + $0x8] sm:$0xf] %vm1322_vm1, %v2987_v63  ;;  %3501 = vst.msk [vmem:[#allocation2 + $0x68] sm:$0xf] %vm1322_vm1, %v10709_v1  ;;  %v3143_v4 = vpop.f32.mrb[39].mxu0  ;;  %v2989_v48 = vpop.f32.mrb[37].mxu1  ;;  %3458 = vrot.lane.b32.xlu1 %v2987_v63, %s6982_s12 }
 0x5bf   :  { %3513 = vst.msk [vmem:[#allocation2 + $0x80] sm:$0xf] %vm1322_vm1, %v3143_v4  ;;  %3465 = vst.msk [vmem:[#allocation2 + $0x20] sm:$0xf] %vm1322_vm1, %v2989_v48 }
 0x5c1   :  { %3470 = vrot.lane.b32.xlu0 %v2989_v48, %s6982_s12 }
 0x5c2   :  { %3518 = vrot.lane.b32.xlu1 %v3143_v4, %s6982_s12 }
 0x5c9   :  { %v3058_v12 = vpop.f32.mrb[38].mxu1  ;;  %v3289_v56 = vpop.f32.mrb[40].mxu0 }
 0x5ca   :  { %3476 = vst.msk [vmem:[#allocation2 + $0x30] sm:$0xff] %vm1320_vm0, %v3058_v12  ;;  %3548 = vst.msk [vmem:[#allocation2 + $0xc0] sm:$0xff] %vm1320_vm0, %v3289_v56  ;;  %v3291_v17 = vpop.f32.mrb[41].mxu0  ;;  %3480 = vrot.lane.b32.xlu0 %v3058_v12, %s6982_s12  ;;  %v3060_v2 = vpop.f32.mrb[39].mxu1 }
 0x5cb   :  { %3560 = vst.msk [vmem:[#allocation2 + $0xd8] sm:$0xff] %vm1320_vm0, %v3291_v17  ;;  %3488 = vst.msk [vmem:[#allocation2 + $0x48] sm:$0xff] %vm1320_vm0, %v3060_v2 }
 0x5cd   :  { %v3064_v19 = vpop.f32.mrb[40].mxu1  ;;  %v3295_v20 = vpop.f32.mrb[42].mxu0 }
 0x5ce   :  { %3477 = vst.msk [vmem:[#allocation2 + $0x38] sm:$0xf] %vm1322_vm1, %v3064_v19  ;;  %3549 = vst.msk [vmem:[#allocation2 + $0xc8] sm:$0xf] %vm1322_vm1, %v3295_v20  ;;  %v10727_v24 = vpop.f32.mrb[43].mxu0  ;;  %3552 = vrot.lane.b32.xlu0 %v3289_v56, %s6982_s12  ;;  %3482 = vrot.lane.b32.xlu1 %v3064_v19, %s6982_s12  ;;  %v3066_v45 = vpop.f32.mrb[41].mxu1 }
 0x5cf   :  { %3561 = vst.msk [vmem:[#allocation2 + $0xe0] sm:$0xf] %vm1322_vm1, %v10727_v24  ;;  %3489 = vst.msk [vmem:[#allocation2 + $0x50] sm:$0xf] %vm1322_vm1, %v3066_v45  ;;  %v4456_v19 = vld [vmem:[%s11269_s8 + $0x8] sm:$0xf] }
 0x5d2   :  { %3492 = vrot.lane.b32.xlu0 %v3060_v2, %s6982_s12  ;;  %3554 = vrot.lane.b32.xlu1 %v3295_v20, %s6982_s12  ;;  %v4455_v2 = vld [vmem:[%s11269_s8] sm:$0xff] }
 0x5d6   :  { %3564 = vrot.lane.b32.xlu0 %v3291_v17, %s6982_s12  ;;  %3494 = vrot.lane.b32.xlu1 %v3066_v45, %s6982_s12 }
 0x5d9   :  { %v3212_v13 = vpop.f32.mrb[42].mxu1  ;;  %v5499_v6 = vpop.f32.mrb[44].mxu0 }
 0x5da   :  { %3524 = vst.msk [vmem:[#allocation2 + $0x90] sm:$0xff] %vm1320_vm0, %v3212_v13  ;;  %v3443_v21 = vpop.f32.mrb[45].mxu0  ;;  %3528 = vrot.lane.b32.xlu0 %v3212_v13, %s6982_s12  ;;  %v3214_v26 = vpop.f32.mrb[43].mxu1 }
 0x5db   :  { %3597 = vst.msk [vmem:[#allocation2 + $0x128] sm:$0xf] %vm1322_vm1, %v5499_v6 }
 0x5dc   :  { %3596 = vst.msk [vmem:[#allocation2 + $0x120] sm:$0xff] %vm1320_vm0, %v3443_v21  ;;  %3536 = vst.msk [vmem:[#allocation2 + $0xa8] sm:$0xff] %vm1320_vm0, %v3214_v26 }
 0x5dd   :  { %v3218_v27 = vpop.f32.mrb[44].mxu1 }
 0x5de   :  { %3525 = vst.msk [vmem:[#allocation2 + $0x98] sm:$0xf] %vm1322_vm1, %v3218_v27  ;;  %3540 = vrot.lane.b32.xlu0 %v3214_v26, %s6982_s12  ;;  %v3220_v30 = vpop.f32.mrb[45].mxu1 }
 0x5df   :  { %3537 = vst.msk [vmem:[#allocation2 + $0xb0] sm:$0xf] %vm1322_vm1, %v3220_v30  ;;  %3542 = vrot.lane.b32.xlu1 %v3220_v30, %s6982_s12 }
 0x5e2   :  { %3530 = vrot.lane.b32.xlu0 %v3218_v27, %s6982_s12 }
 0x5e9   :  { %v3366_v31 = vpop.f32.mrb[46].mxu1 }
 0x5ea   :  { %3572 = vst.msk [vmem:[#allocation2 + $0xf0] sm:$0xff] %vm1320_vm0, %v3366_v31  ;;  %3576 = vrot.lane.b32.xlu1 %v3366_v31, %s6982_s12  ;;  %v3368_v49 = vpop.f32.mrb[47].mxu1 }
 0x5eb   :  { %3584 = vst.msk [vmem:[#allocation2 + $0x108] sm:$0xff] %vm1320_vm0, %v3368_v49 }
 0x5ed   :  { %v3372_v38 = vpop.f32.mrb[48].mxu1 }
 0x5ee   :  { %3573 = vst.msk [vmem:[#allocation2 + $0xf8] sm:$0xf] %vm1322_vm1, %v3372_v38  ;;  %3588 = vrot.lane.b32.xlu1 %v3368_v49, %s6982_s12  ;;  %3578 = vrot.lane.b32.xlu0 %v3372_v38, %s6982_s12  ;;  %v3374_v40 = vpop.f32.mrb[49].mxu1 }
 0x5ef   :  { %3585 = vst.msk [vmem:[#allocation2 + $0x110] sm:$0xf] %vm1322_vm1, %v3374_v40 }
 0x5f2   :  { %3590 = vrot.lane.b32.xlu0 %v3374_v40, %s6982_s12 }
 0x62b   :  { %v3853_v41 = vpop.f32.mrb[46].mxu0  ;;  %v3457_v51 = vpop.permute.xlu0 %3456 }
 0x62c   :  { %3462 = vst.msk [vmem:[#allocation2 + $0xc] sm:$0xff] %vm1320_vm0, %v3457_v51  ;;  %v3776_v3 = vpop.f32.mrb[50].mxu1  ;;  %v3855_v22 = vpop.f32.mrb[47].mxu0 }
 0x62d   :  { %4257 = vst.msk [vmem:[#allocation2 + $0xc] sm:$0xff] %vm2429_vm2, %v3776_v3  ;;  %v3469_v7 = vpop.permute.xlu1 %3468  ;;  %4249 = vrot.lane.b32.xlu0 %v3776_v3, %s6982_s12  ;;  %v3778_v8 = vpop.f32.mrb[51].mxu1 }
 0x62e   :  { %3474 = vst.msk [vmem:[#allocation2 + $0x24] sm:$0xff] %vm1320_vm0, %v3469_v7  ;;  %4261 = vrot.lane.b32.xlu1 %v3778_v8, %s6982_s12 }
 0x62f   :  { %4269 = vst.msk [vmem:[#allocation2 + $0x24] sm:$0xff] %vm2429_vm2, %v3778_v8  ;;  %v3859_v58 = vpop.f32.mrb[48].mxu0  ;;  %v3517_v23 = vpop.permute.xlu0 %3516 }
 0x630   :  { %3522 = vst.msk [vmem:[#allocation2 + $0x84] sm:$0xff] %vm1320_vm0, %v3517_v23  ;;  %v3782_v25 = vpop.f32.mrb[52].mxu1  ;;  %v3861_v28 = vpop.f32.mrb[49].mxu0 }
 0x631   :  { %v3459_v35 = vpop.permute.xlu1 %3458  ;;  %4273 = vrot.lane.b32.xlu0 %v3853_v41, %s6982_s12  ;;  %v3784_v43 = vpop.f32.mrb[53].mxu1 }
 0x632   :  { %3463 = vst.msk [vmem:[#allocation2 + $0x14] sm:$0xf] %vm1322_vm1, %v3459_v35  ;;  %4251 = vrot.lane.b32.xlu1 %v3782_v25, %s6982_s12 }
 0x633   :  { %4258 = vst.msk [vmem:[#allocation2 + $0x14] sm:$0xf] %vm2431_vm3, %v3782_v25  ;;  %v3471_v59 = vpop.permute.xlu0 %3470 }
 0x634   :  { %3475 = vst.msk [vmem:[#allocation2 + $0x2c] sm:$0xf] %vm1322_vm1, %v3471_v59 }
 0x635   :  { %4270 = vst.msk [vmem:[#allocation2 + $0x2c] sm:$0xf] %vm2431_vm3, %v3784_v43  ;;  %v3519_v60 = vpop.permute.xlu1 %3518  ;;  %4285 = vrot.lane.b32.xlu0 %v3855_v22, %s6982_s12 }
 0x636   :  { %3523 = vst.msk [vmem:[#allocation2 + $0x8c] sm:$0xf] %vm1322_vm1, %v3519_v60  ;;  %4275 = vrot.lane.b32.xlu1 %v3859_v58, %s6982_s12 }
 0x63a   :  { %4263 = vrot.lane.b32.xlu1 %v3784_v43, %s6982_s12 }
 0x63b   :  { %v4007_v61 = vpop.f32.mrb[50].mxu0  ;;  %v10773_v53 = vpop.f32.mrb[54].mxu1 }
 0x63c   :  { %v3481_v18 = vpop.permute.xlu0 %3480  ;;  %v4009_v16 = vpop.f32.mrb[51].mxu0  ;;  %4321 = vrot.lane.b32.xlu0 %v4007_v61, %s6982_s12 }
 0x63d   :  { %3486 = vst.msk [vmem:[#allocation2 + $0x3c] sm:$0xff] %vm1320_vm0, %v3481_v18  ;;  %v10777_v29 = vpop.f32.mrb[55].mxu1  ;;  %v4409_v18 = vld [vmem:[#allocation2 + $0x10] sm:$0xff] }
 0x63e   :  { %4281 = vst.msk [vmem:[#allocation2 + $0x3c] sm:$0xff] %vm2429_vm2, %v3853_v41  ;;  %4317 = vst.msk [vmem:[#allocation2 + $0x84] sm:$0xff] %vm2429_vm2, %v10777_v29  ;;  %4287 = vrot.lane.b32.xlu1 %v3861_v28, %s6982_s12 }
 0x63f   :  { %v4013_v32 = vpop.f32.mrb[52].mxu0  ;;  %v10783_v33 = vpop.f32.mrb[56].mxu1 }
 0x640   :  { %v3553_v37 = vpop.permute.xlu0 %3552  ;;  %v3483_v36 = vpop.permute.xlu1 %3482 }
 0x641   :  { %3558 = vst.msk [vmem:[#allocation2 + $0xcc] sm:$0xff] %vm1320_vm0, %v3553_v37  ;;  %v3938_v42 = vpop.f32.mrb[57].mxu1  ;;  %v4015_v52 = vpop.f32.mrb[53].mxu0 }
 0x642   :  { %3487 = vst.msk [vmem:[#allocation2 + $0x44] sm:$0xf] %vm1322_vm1, %v3483_v36  ;;  %4333 = vrot.lane.b32.xlu1 %v4009_v16, %s6982_s12 }
 0x643   :  { %4282 = vst.msk [vmem:[#allocation2 + $0x44] sm:$0xf] %vm2431_vm3, %v3859_v58  ;;  %4318 = vst.msk [vmem:[#allocation2 + $0x8c] sm:$0xf] %vm2431_vm3, %v3938_v42 }
 0x644   :  { %v3493_v54 = vpop.permute.xlu0 %3492  ;;  %v3555_v5 = vpop.permute.xlu1 %3554 }
 0x645   :  { %3498 = vst.msk [vmem:[#allocation2 + $0x54] sm:$0xff] %vm1320_vm0, %v3493_v54 }
 0x646   :  { %3559 = vst.msk [vmem:[#allocation2 + $0xd4] sm:$0xf] %vm1322_vm1, %v3555_v5  ;;  %4323 = vrot.lane.b32.xlu1 %v4013_v32, %s6982_s12 }
 0x647   :  { %4293 = vst.msk [vmem:[#allocation2 + $0x54] sm:$0xff] %vm2429_vm2, %v3855_v22 }
 0x648   :  { %v3565_v55 = vpop.permute.xlu0 %3564  ;;  %v3495_v9 = vpop.permute.xlu1 %3494 }
 0x649   :  { %3570 = vst.msk [vmem:[#allocation2 + $0xe4] sm:$0xff] %vm1320_vm0, %v3565_v55  ;;  %v4412_v55 = vld [vmem:[#allocation2 + $0x28] sm:$0xff] }
 0x64a   :  { %3499 = vst.msk [vmem:[#allocation2 + $0x5c] sm:$0xf] %vm1322_vm1, %v3495_v9  ;;  %4311 = vrot.lane.b32.xlu1 %v3938_v42, %s6982_s12  ;;  %v4424_v8 = vld [vmem:[#allocation2 + $0x88] sm:$0xff] }
 0x64b   :  { %4294 = vst.msk [vmem:[#allocation2 + $0x5c] sm:$0xf] %vm2431_vm3, %v3861_v28  ;;  %v4161_v10 = vpop.f32.mrb[54].mxu0  ;;  %v4084_v11 = vpop.f32.mrb[58].mxu1 }
 0x64c   :  { %v3529_v15 = vpop.permute.xlu0 %3528  ;;  %4353 = vst.msk [vmem:[#allocation2 + $0xcc] sm:$0xff] %vm2429_vm2, %v4084_v11  ;;  %v4163_v62 = vpop.f32.mrb[55].mxu0  ;;  %4345 = vrot.lane.b32.xlu0 %v4084_v11, %s6982_s12 }
 0x64d   :  { %3534 = vst.msk [vmem:[#allocation2 + $0x9c] sm:$0xff] %vm1320_vm0, %v3529_v15  ;;  %v4086_v0 = vpop.f32.mrb[59].mxu1 }
 0x64e   :  { %4329 = vst.msk [vmem:[#allocation2 + $0x9c] sm:$0xff] %vm2429_vm2, %v4007_v61  ;;  %4365 = vst.msk [vmem:[#allocation2 + $0xe4] sm:$0xff] %vm2429_vm2, %v4086_v0  ;;  %4335 = vrot.lane.b32.xlu1 %v4015_v52, %s6982_s12 }
 0x64f   :  { %v4167_v14 = vpop.f32.mrb[56].mxu0  ;;  %v4090_v47 = vpop.f32.mrb[60].mxu1 }
 0x650   :  { %v3541_v39 = vpop.permute.xlu0 %3540  ;;  %4354 = vst.msk [vmem:[#allocation2 + $0xd4] sm:$0xf] %vm2431_vm3, %v4090_v47  ;;  %v4169_v46 = vpop.f32.mrb[57].mxu0  ;;  %4381 = vrot.lane.b32.xlu0 %v4163_v62, %s6982_s12 }
 0x651   :  { %3546 = vst.msk [vmem:[#allocation2 + $0xb4] sm:$0xff] %vm1320_vm0, %v3541_v39  ;;  %v3543_v34 = vpop.permute.xlu1 %3542  ;;  %v10807_v50 = vpop.f32.mrb[61].mxu1 }
 0x652   :  { %4341 = vst.msk [vmem:[#allocation2 + $0xb4] sm:$0xff] %vm2429_vm2, %v4009_v16  ;;  %4347 = vrot.lane.b32.xlu1 %v4090_v47, %s6982_s12 }
 0x653   :  { %3547 = vst.msk [vmem:[#allocation2 + $0xbc] sm:$0xf] %vm1322_vm1, %v3543_v34 }
 0x654   :  { %4342 = vst.msk [vmem:[#allocation2 + $0xbc] sm:$0xf] %vm2431_vm3, %v4015_v52  ;;  %v3531_v57 = vpop.permute.xlu0 %3530  ;;  %4357 = vrot.lane.b32.xlu0 %v4086_v0, %s6982_s12 }
 0x655   :  { %3535 = vst.msk [vmem:[#allocation2 + $0xa4] sm:$0xf] %vm1322_vm1, %v3531_v57 }
 0x656   :  { %4330 = vst.msk [vmem:[#allocation2 + $0xa4] sm:$0xf] %vm2431_vm3, %v4013_v32 }
 0x658   :  { %4383 = vrot.lane.b32.xlu0 %v4169_v46, %s6982_s12 }
 0x65b   :  { %v5518_v63 = vpop.f32.mrb[62].mxu1  ;;  %v4430_v11 = vld [vmem:[#allocation2 + $0xb8] sm:$0xff] }
 0x65c   :  { %v3577_v4 = vpop.permute.xlu1 %3576  ;;  %4395 = vrot.lane.b32.xlu1 %v5518_v63, %s6982_s12  ;;  %v4238_v48 = vpop.f32.mrb[63].mxu1 }
 0x65d   :  { %3582 = vst.msk [vmem:[#allocation2 + $0xfc] sm:$0xff] %vm1320_vm0, %v3577_v4  ;;  %4393 = vrot.lane.b32.xlu0 %v4238_v48, %s6982_s12  ;;  %v4427_v32 = vld [vmem:[#allocation2 + $0xa0] sm:$0xff] }
 0x65e   :  { %4377 = vst.msk [vmem:[#allocation2 + $0xfc] sm:$0xff] %vm2429_vm2, %v4161_v10 }
 0x660   :  { %v3589_v12 = vpop.permute.xlu1 %3588  ;;  %v3579_v56 = vpop.permute.xlu0 %3578  ;;  %3566 = vrot.lane.b32.xlu1 %v10727_v24, %s6982_s12 }
 0x661   :  { %3594 = vst.msk [vmem:[#allocation2 + $0x114] sm:$0xff] %vm1320_vm0, %v3589_v12  ;;  %3504 = vrot.lane.b32.xlu0 %v10701_v44, %s6982_s12  ;;  %v4402_v44 = vld [vmem:[%s11268_s7 + $0x8] sm:$0xff] }
 0x662   :  { %3583 = vst.msk [vmem:[#allocation2 + $0x104] sm:$0xf] %vm1322_vm1, %v3579_v56  ;;  %4531 = vmatprep.mubr.f32.mxu0 %v4402_v44  ;;  %v4415_v44 = vld [vmem:[#allocation2 + $0x40] sm:$0xff] }
 0x663   :  { %4389 = vst.msk [vmem:[#allocation2 + $0x114] sm:$0xff] %vm2429_vm2, %v4163_v62 }
 0x664   :  { %4378 = vst.msk [vmem:[#allocation2 + $0x104] sm:$0xf] %vm2431_vm3, %v4167_v14  ;;  %v3591_v17 = vpop.permute.xlu0 %3590  ;;  %4359 = vrot.lane.b32.xlu1 %v10807_v50, %s6982_s12 }
 0x665   :  { %3595 = vst.msk [vmem:[#allocation2 + $0x11c] sm:$0xf] %vm1322_vm1, %v3591_v17  ;;  %4297 = vrot.lane.b32.xlu0 %v10773_v53, %s6982_s12 }
 0x666   :  { %4390 = vst.msk [vmem:[#allocation2 + $0x11c] sm:$0xf] %vm2431_vm3, %v4169_v46 }
 0x668   :  { %4299 = vrot.lane.b32.xlu1 %v10783_v33, %s6982_s12 }
 0x669   :  { %3506 = vrot.lane.b32.xlu0 %v10709_v1, %s6982_s12  ;;  %v4403_v1 = vld [vmem:[%s11268_s7 + $0x10] sm:$0xff] }
 0x66a   :  { %5551 = vmatprep.mubr.f32.mxu1 %v4403_v1 }
 0x66b   :  { %v4439_v37 = vld [vmem:[#allocation2 + $0x100] sm:$0xff] }
 0x66c   :  { %4369 = vrot.lane.b32.xlu1 %v4161_v10, %s6982_s12 }
 0x66d   :  { %4371 = vrot.lane.b32.xlu0 %v4167_v14, %s6982_s12  ;;  %v4442_v63 = vld [vmem:[#allocation2 + $0x118] sm:$0xff] }
 0x670   :  { %4309 = vrot.lane.b32.xlu1 %v10777_v29, %s6982_s12 }
 0x671   :  { %4459 = vperm.xlu0 %6903, %v4455_v2  }
 0x674   :  { %4464 = vperm.xlu1 %6904, %v4456_v19   ;;  %v4433_v19 = vld [vmem:[#allocation2 + $0xd0] sm:$0xff] }
 0x69f   :  { %v4250_v20 = vpop.permute.xlu0 %4249 }
 0x6a0   :  { %4255 = vst.msk [vmem:[#allocation2] sm:$0xff] %vm2429_vm2, %v4250_v20  ;;  %v4262_v24 = vpop.permute.xlu1 %4261 }
 0x6a1   :  { %4267 = vst.msk [vmem:[#allocation2 + $0x18] sm:$0xff] %vm2429_vm2, %v4262_v24 }
 0x6a3   :  { %v4274_v45 = vpop.permute.xlu0 %4273 }
 0x6a4   :  { %4279 = vst.msk [vmem:[#allocation2 + $0x30] sm:$0xff] %vm2429_vm2, %v4274_v45  ;;  %v4252_v13 = vpop.permute.xlu1 %4251 }
 0x6a5   :  { %4256 = vst.msk [vmem:[#allocation2 + $0x8] sm:$0xf] %vm2431_vm3, %v4252_v13 }
 0x6a7   :  { %v4286_v6 = vpop.permute.xlu0 %4285  ;;  %v4407_v25 = vld [vmem:[#allocation2] sm:$0xff] }
 0x6a8   :  { %4291 = vst.msk [vmem:[#allocation2 + $0x48] sm:$0xff] %vm2429_vm2, %v4286_v6  ;;  %v4276_v21 = vpop.permute.xlu1 %4275  ;;  %v4410_v60 = vld [vmem:[#allocation2 + $0x18] sm:$0xff] }
 0x6a9   :  { %4280 = vst.msk [vmem:[#allocation2 + $0x38] sm:$0xf] %vm2431_vm3, %v4276_v21  ;;  %v6744_v29 = vpack.c.bf16 %v4410_v60, %v4409_v18  ;;  %v6955_v21 = vld [vmem:[#allocation2 + $0x130] sm:$0xff]  ;;  %v4406_v60 = vld [vmem:[%s11268_s7 + $0x28] sm:$0xf]  ;;  %v4758_v18 = vld [vmem:[%s11270_s9 + $0x80] sm:$0xff] }
 0x6ab   :  { %v4413_v47 = vld [vmem:[#allocation2 + $0x30] sm:$0xff] }
 0x6ac   :  { %v4264_v26 = vpop.permute.xlu1 %4263  ;;  %v4408_v3 = vld [vmem:[#allocation2 + $0x8] sm:$0xff] }
 0x6ad   :  { %4268 = vst.msk [vmem:[#allocation2 + $0x20] sm:$0xf] %vm2431_vm3, %v4264_v26  ;;  %v6740_v35 = vpack.c.bf16 %v4408_v3, %v4407_v25  ;;  %v4418_v26 = vld [vmem:[#allocation2 + $0x58] sm:$0xff] }
 0x6ae   :  { %v4322_v27 = vpop.permute.xlu0 %4321 }
 0x6af   :  { %4327 = vst.msk [vmem:[#allocation2 + $0x90] sm:$0xff] %vm2429_vm2, %v4322_v27  ;;  %v4416_v56 = vld [vmem:[#allocation2 + $0x48] sm:$0xff] }
 0x6b0   :  { %v4288_v30 = vpop.permute.xlu1 %4287  ;;  %v4414_v0 = vld [vmem:[#allocation2 + $0x38] sm:$0xff]  ;;  %v6756_v1 = vpack.c.bf16 %v4416_v56, %v4415_v44 }
 0x6b1   :  { %4292 = vst.msk [vmem:[#allocation2 + $0x50] sm:$0xf] %vm2431_vm3, %v4288_v30  ;;  %v6752_v46 = vpack.c.bf16 %v4414_v0, %v4413_v47 }
 0x6b4   :  { %v4334_v31 = vpop.permute.xlu1 %4333  ;;  %v4411_v54 = vld [vmem:[#allocation2 + $0x20] sm:$0xff] }
 0x6b5   :  { %4339 = vst.msk [vmem:[#allocation2 + $0xa8] sm:$0xff] %vm2429_vm2, %v4334_v31  ;;  %v6748_v10 = vpack.c.bf16 %v4412_v55, %v4411_v54  ;;  %v4761_v55 = vld [vmem:[%s11270_s9 + $0x98] sm:$0xff] }
 0x6b6   :  { %v4425_v43 = vld [vmem:[#allocation2 + $0x90] sm:$0xff] }
 0x6b8   :  { %v4324_v49 = vpop.permute.xlu1 %4323  ;;  %v4417_v13 = vld [vmem:[#allocation2 + $0x50] sm:$0xff] }
 0x6b9   :  { %4328 = vst.msk [vmem:[#allocation2 + $0x98] sm:$0xf] %vm2431_vm3, %v4324_v49  ;;  %v6760_v30 = vpack.c.bf16 %v4418_v26, %v4417_v13  ;;  %v4792_v26 = vld [vmem:[%s11270_s9 + $0x190] sm:$0xff] }
 0x6bc   :  { %v4312_v38 = vpop.permute.xlu1 %4311  ;;  %v4428_v61 = vld [vmem:[#allocation2 + $0xa8] sm:$0xff] }
 0x6bd   :  { %4316 = vst.msk [vmem:[#allocation2 + $0x80] sm:$0xf] %vm2431_vm3, %v4312_v38  ;;  %v6746_v42 = vpack.c.bf16 %v4428_v61, %v4427_v32  ;;  %v4404_v61 = vld [vmem:[%s11268_s7 + $0x18] sm:$0xf] }
 0x6be   :  { %v4346_v40 = vpop.permute.xlu0 %4345 }
 0x6bf   :  { %4351 = vst.msk [vmem:[#allocation2 + $0xc0] sm:$0xff] %vm2429_vm2, %v4346_v40 }
 0x6c0   :  { %v4336_v41 = vpop.permute.xlu1 %4335  ;;  %v4426_v58 = vld [vmem:[#allocation2 + $0x98] sm:$0xff] }
 0x6c1   :  { %4340 = vst.msk [vmem:[#allocation2 + $0xb0] sm:$0xf] %vm2431_vm3, %v4336_v41  ;;  %v6742_v59 = vpack.c.bf16 %v4426_v58, %v4425_v43  ;;  %v4401_v43 = vld [vmem:[%s11268_s7] sm:$0xff] }
 0x6c2   :  { %v4382_v51 = vpop.permute.xlu0 %4381 }
 0x6c3   :  { %4387 = vst.msk [vmem:[#allocation2 + $0x108] sm:$0xff] %vm2429_vm2, %v4382_v51 }
 0x6c4   :  { %v4348_v22 = vpop.permute.xlu1 %4347  ;;  %v4423_v7 = vld [vmem:[#allocation2 + $0x80] sm:$0xff] }
 0x6c5   :  { %4352 = vst.msk [vmem:[#allocation2 + $0xc8] sm:$0xf] %vm2431_vm3, %v4348_v22  ;;  %v6738_v23 = vpack.c.bf16 %v4424_v8, %v4423_v7 }
 0x6c6   :  { %v4358_v28 = vpop.permute.xlu0 %4357  ;;  %v4431_v34 = vld [vmem:[#allocation2 + $0xc0] sm:$0xff] }
 0x6c7   :  { %4363 = vst.msk [vmem:[#allocation2 + $0xd8] sm:$0xff] %vm2429_vm2, %v4358_v28  ;;  %6739 = vmatprep.subr.bf16.mxu0 %v6738_v23 }
 0x6c8   :  { %6741 = vmatpush3.bf16.msra.mxu0 %v6740_v35  ;;  %v4429_v5 = vld [vmem:[#allocation2 + $0xb0] sm:$0xff] }
 0x6c9   :  { %6743 = vmatprep.subr.bf16.mxu0 %v6742_v59  ;;  %v6750_v62 = vpack.c.bf16 %v4430_v11, %v4429_v5  ;;  %v4405_v59 = vld [vmem:[%s11268_s7 + $0x20] sm:$0xf]  ;;  %v4760_v5 = vld [vmem:[%s11270_s9 + $0x90] sm:$0xff]  ;;  %v4775_v11 = vld [vmem:[%s11270_s9 + $0x108] sm:$0xff] }
 0x6ca   :  { %v4384_v16 = vpop.permute.xlu0 %4383  ;;  %v4440_v36 = vld [vmem:[#allocation2 + $0x108] sm:$0xff] }
 0x6cb   :  { %4388 = vst.msk [vmem:[#allocation2 + $0x110] sm:$0xf] %vm2431_vm3, %v4384_v16  ;;  %v6770_v52 = vpack.c.bf16 %v4440_v36, %v4439_v37  ;;  %v4759_v16 = vld [vmem:[%s11270_s9 + $0x88] sm:$0xff]  ;;  %v4790_v36 = vld [vmem:[%s11270_s9 + $0x180] sm:$0xff] }
 0x6cc   :  { %6745 = vmatpush3.bf16.msra.mxu0 %v6744_v29  ;;  %v4432_v14 = vld [vmem:[#allocation2 + $0xc8] sm:$0xff]  ;;  %v4742_v29 = vld [vmem:[%s11270_s9] sm:$0xff]  ;;  %v6802_v32 = vpack.c.bf16 %v4759_v16, %v4758_v18  ;;  %v4748_v16 = vld [vmem:[%s11270_s9 + $0x30] sm:$0xff] }
 0x6cd   :  { %6747 = vmatprep.subr.bf16.mxu0 %v6746_v42  ;;  %6771 = vmatprep.subr.bf16.mxu1 %v6770_v52  ;;  %v6754_v48 = vpack.c.bf16 %v4432_v14, %v4431_v34  ;;  %v4743_v37 = vld [vmem:[%s11270_s9 + $0x8] sm:$0xff] }
 0x6ce   :  { %6773 = vmatpush3.bf16.msra.mxu1 %v6770_v52  ;;  %v4396_v9 = vpop.permute.xlu1 %4395  ;;  %v4434_v17 = vld [vmem:[#allocation2 + $0xd8] sm:$0xff]  ;;  %v4791_v42 = vld [vmem:[%s11270_s9 + $0x188] sm:$0xff]  ;;  %v6804_v52 = vpack.c.bf16 %v4743_v37, %v4742_v29 }
 0x6cf   :  { %4400 = vst.msk [vmem:[#allocation2 + $0x128] sm:$0xf] %vm2431_vm3, %v4396_v9  ;;  %v4394_v15 = vpop.permute.xlu0 %4393  ;;  %v6758_v45 = vpack.c.bf16 %v4434_v17, %v4433_v19  ;;  %v6834_v54 = vpack.c.bf16 %v4791_v42, %v4790_v36  ;;  %v4774_v9 = vld [vmem:[%s11270_s9 + $0x100] sm:$0xff]  ;;  %v4779_v18 = vld [vmem:[%s11270_s9 + $0x128] sm:$0xff]  ;;  %v4749_v29 = vld [vmem:[%s11270_s9 + $0x38] sm:$0xff] }
 0x6d0   :  { %4399 = vst.msk [vmem:[#allocation2 + $0x120] sm:$0xff] %vm2429_vm2, %v4394_v15  ;;  %6749 = vmatpush3.bf16.msra.mxu0 %v6748_v10  ;;  %v6806_v10 = vpack.c.bf16 %v4761_v55, %v4760_v5  ;;  %v4744_v15 = vld [vmem:[%s11270_s9 + $0x10] sm:$0xff]  ;;  %v6836_v0 = vpack.c.bf16 %v4775_v11, %v4774_v9  ;;  %v6816_v36 = vpack.c.bf16 %v4749_v29, %v4748_v16  ;;  %v4766_v5 = vld [vmem:[%s11270_s9 + $0xc0] sm:$0xff]  ;;  %v4767_v55 = vld [vmem:[%s11270_s9 + $0xc8] sm:$0xff] }
 0x6d1   :  { %6751 = vmatprep.subr.bf16.mxu0 %v6750_v62  ;;  %v4745_v62 = vld [vmem:[%s11270_s9 + $0x18] sm:$0xff]  ;;  %v4796_v42 = vld [vmem:[%s11270_s9 + $0x1b0] sm:$0xff]  ;;  %v6818_v11 = vpack.c.bf16 %v4767_v55, %v4766_v5 }
 0x6d2   :  { %v3567_v39 = vpop.permute.xlu1 %3566  ;;  %v4441_v57 = vld [vmem:[#allocation2 + $0x110] sm:$0xff]  ;;  %v6808_v14 = vpack.c.bf16 %v4745_v62, %v4744_v15  ;;  %v4781_v15 = vld [vmem:[%s11270_s9 + $0x138] sm:$0xff]  ;;  %v4750_v62 = vld [vmem:[%s11270_s9 + $0x40] sm:$0xff] }
 0x6d3   :  { %3571 = vst.msk [vmem:[#allocation2 + $0xec] sm:$0xf] %vm1322_vm1, %v3567_v39  ;;  %v3505_v4 = vpop.permute.xlu0 %3504  ;;  %v6774_v12 = vpack.c.bf16 %v4442_v63, %v4441_v57  ;;  %v4780_v9 = vld [vmem:[%s11270_s9 + $0x130] sm:$0xff]  ;;  %v4757_v29 = vld [vmem:[%s11270_s9 + $0x78] sm:$0xff] }
 0x6d4   :  { %4366 = vst.msk [vmem:[#allocation2 + $0xec] sm:$0xf] %vm2431_vm3, %v10807_v50  ;;  %6753 = vmatpush3.bf16.msra.mxu0 %v6752_v46  ;;  %v4756_v16 = vld [vmem:[%s11270_s9 + $0x70] sm:$0xff] }
 0x6d5   :  { %3510 = vst.msk [vmem:[#allocation2 + $0x6c] sm:$0xff] %vm1320_vm0, %v3505_v4  ;;  %6755 = vmatprep.subr.bf16.mxu0 %v6754_v48  ;;  %6775 = vmatprep.subr.bf16.mxu1 %v6774_v12 }
 0x6d6   :  { %4305 = vst.msk [vmem:[#allocation2 + $0x6c] sm:$0xff] %vm2429_vm2, %v10773_v53  ;;  %v4360_v2 = vpop.permute.xlu1 %4359  ;;  %6777 = vmatpush3.bf16.msra.mxu1 %v6774_v12  ;;  %v4444_v20 = vld [vmem:[#allocation2 + $0x128] sm:$0xff]  ;;  %v6782_v53 = vpack.c.bf16 %v6955_v21, %v6955_v21 }
 0x6d7   :  { %4364 = vst.msk [vmem:[#allocation2 + $0xe0] sm:$0xf] %vm2431_vm3, %v4360_v2  ;;  %v4298_v24 = vpop.permute.xlu0 %4297  ;;  %v4443_v50 = vld [vmem:[#allocation2 + $0x120] sm:$0xff] }
 0x6d8   :  { %4303 = vst.msk [vmem:[#allocation2 + $0x60] sm:$0xff] %vm2429_vm2, %v4298_v24  ;;  %6757 = vmatpush3.bf16.msra.mxu0 %v6756_v1  ;;  %v6778_v6 = vpack.c.bf16 %v4444_v20, %v4443_v50 }
 0x6d9   :  { %6759 = vmatprep.subr.bf16.mxu0 %v6758_v45 }
 0x6da   :  { %v4300_v27 = vpop.permute.xlu1 %4299  ;;  %6779 = vmatprep.subr.bf16.mxu1 %v6778_v6 }
 0x6db   :  { %4304 = vst.msk [vmem:[#allocation2 + $0x68] sm:$0xf] %vm2431_vm3, %v4300_v27  ;;  %v3507_v31 = vpop.permute.xlu0 %3506  ;;  %6781 = vmatpush3.bf16.msra.mxu1 %v6778_v6  ;;  %v4436_v40 = vld [vmem:[#allocation2 + $0xe8] sm:$0xff]  ;;  %v6983_v6 = vmov 1983009808   ;;  %v4793_v27 = vld [vmem:[%s11270_s9 + $0x198] sm:$0xff] }
 0x6dc   :  { %3511 = vst.msk [vmem:[#allocation2 + $0x74] sm:$0xf] %vm1322_vm1, %v3507_v31  ;;  %6761 = vmatpush3.bf16.msra.mxu0 %v6760_v30  ;;  %6783 = vmatprep.subr.bf16.mxu1 %v6782_v53  ;;  %v4633_v21 = vunpack.c.l.s4 %v6983_v6  ;;  %v6838_v31 = vpack.c.bf16 %v4793_v27, %v4792_v26 }
 0x6dd   :  { %4306 = vst.msk [vmem:[#allocation2 + $0x74] sm:$0xf] %vm2431_vm3, %v10783_v33 }
 0x6de   :  { %v4370_v49 = vpop.permute.xlu1 %4369  ;;  %v4435_v38 = vld [vmem:[#allocation2 + $0xe0] sm:$0xff] }
 0x6df   :  { %4375 = vst.msk [vmem:[#allocation2 + $0xf0] sm:$0xff] %vm2429_vm2, %v4370_v49  ;;  %v4372_v41 = vpop.permute.xlu0 %4371  ;;  %6785 = vmatpush3.bf16.msra.mxu1 %v6782_v53  ;;  %v6762_v51 = vpack.c.bf16 %v4436_v40, %v4435_v38  ;;  %v4419_v22 = vld [vmem:[#allocation2 + $0x60] sm:$0xff]  ;;  %v4763_v38 = vld [vmem:[%s11270_s9 + $0xa8] sm:$0xff]  ;;  %v4776_v40 = vld [vmem:[%s11270_s9 + $0x110] sm:$0xff] }
 0x6e0   :  { %4376 = vst.msk [vmem:[#allocation2 + $0xf8] sm:$0xf] %vm2431_vm3, %v4372_v41  ;;  %6787 = vmatprep.subr.bf16.mxu1 %v6782_v53  ;;  %v4762_v49 = vld [vmem:[%s11270_s9 + $0xa0] sm:$0xff] }
 0x6e1   :  { %6763 = vmatprep.subr.bf16.mxu0 %v6762_v51  ;;  %v6810_v51 = vpack.c.bf16 %v4763_v38, %v4762_v49  ;;  %v4784_v49 = vld [vmem:[%s11270_s9 + $0x150] sm:$0xff] }
 0x6e2   :  { %v4310_v3 = vpop.permute.xlu1 %4309  ;;  %v4420_v7 = vld [vmem:[#allocation2 + $0x68] sm:$0xff] }
 0x6e3   :  { %4315 = vst.msk [vmem:[#allocation2 + $0x78] sm:$0xff] %vm2429_vm2, %v4310_v3  ;;  %6789 = vmatpush3.bf16.msra.mxu1 %v6782_v53  ;;  %v6764_v8 = vpack.c.bf16 %v4420_v7, %v4419_v22  ;;  %v4777_v3 = vld [vmem:[%s11270_s9 + $0x118] sm:$0xff]  ;;  %v4746_v22 = vld [vmem:[%s11270_s9 + $0x20] sm:$0xff]  ;;  %v4747_v7 = vld [vmem:[%s11270_s9 + $0x28] sm:$0xff] }
 0x6e4   :  { %6791 = vmatprep.subr.bf16.mxu1 %v6782_v53  ;;  %v4421_v25 = vld [vmem:[#allocation2 + $0x70] sm:$0xff] }
 0x6e5   :  { %6765 = vmatpush3.bf16.msra.mxu0 %v6764_v8  ;;  %v4634_v8 = vunpack.c.0.s8 %v4633_v21  ;;  %v4800_v21 = vld [vmem:[%s11270_s9 + $0x1d0] sm:$0xff] }
 0x6e6   :  { %v4437_v33 = vld [vmem:[#allocation2 + $0xf0] sm:$0xff] }
 0x6e7   :  { %6793 = vmatpush3.bf16.msra.mxu1 %v6782_v53  ;;  %v4438_v58 = vld [vmem:[#allocation2 + $0xf8] sm:$0xff] }
 0x6e8   :  { %v6766_v23 = vpack.c.bf16 %v4438_v58, %v4437_v33  ;;  %6795 = vmatprep.subr.bf16.mxu1 %v6782_v53  ;;  %v6840_v58 = vpack.c.bf16 %v4777_v3, %v4776_v40  ;;  %v4755_v3 = vld [vmem:[%s11270_s9 + $0x68] sm:$0xff] }
 0x6ea   :  { %6767 = vmatprep.subr.bf16.mxu0 %v6766_v23  ;;  %v4422_v28 = vld [vmem:[#allocation2 + $0x78] sm:$0xff]  ;;  %v6812_v23 = vpack.c.bf16 %v4747_v7, %v4746_v22 }
 0x6eb   :  { %6797 = vmatpush3.bf16.msra.mxu1 %v6782_v53  ;;  %v6768_v35 = vpack.c.bf16 %v4422_v28, %v4421_v25  ;;  %v4794_v25 = vld [vmem:[%s11270_s9 + $0x1a0] sm:$0xff]  ;;  %v4795_v28 = vld [vmem:[%s11270_s9 + $0x1a8] sm:$0xff] }
 0x6ec   :  { %6799 = vmatprep.subr.bf16.mxu1 %v6782_v53 }
 0x6ed   :  { %6769 = vmatpush3.bf16.msra.mxu0 %v6768_v35  ;;  %v6842_v35 = vpack.c.bf16 %v4795_v28, %v4794_v25 }
 0x6ee   :  { %6803 = vmatprep.subr.bf16.mxu0 %v6802_v32 }
 0x6ef   :  { %6801 = vmatpush3.bf16.msra.mxu1 %v6782_v53  ;;  %v4635_v53 = vlaneseq }
 0x6f0   :  { %4532 = vmatmul.mubr.f32.vlgmr.msra.gmra.mrb[58].mxu0 %v4401_v43  ;;  %6835 = vmatprep.subr.bf16.mxu1 %v6834_v54  ;;  %v4460_v57 = vpop.permute.xlu0 %4459  ;;  %v4764_v43 = vld [vmem:[%s11270_s9 + $0xb0] sm:$0xff] }
 0x6f1   :  { %4536 = vmatprep.mubr.f32.mxu0 %v4405_v59  ;;  %6805 = vmatpush3.bf16.msra.mxu0 %v6804_v52  ;;  %v4636_v33 = vshrl.u32 %v4635_v53, 7  ;;  %v4765_v59 = vld [vmem:[%s11270_s9 + $0xb8] sm:$0xff] }
 0x6f2   :  { %5552 = vmatmul.mubr.f32.vlgmr.msra.gmra.mrb[64].mxu1 %v4406_v60  ;;  %6807 = vmatprep.subr.bf16.mxu0 %v6806_v10  ;;  %v4778_v60 = vld [vmem:[%s11270_s9 + $0x120] sm:$0xff]  ;;  %v4797_v52 = vld [vmem:[%s11270_s9 + $0x1b8] sm:$0xff] }
 0x6f3   :  { %6837 = vmatpush3.bf16.msra.mxu1 %v6836_v0  ;;  %v4465_v44 = vpop.permute.xlu1 %4464  ;;  %v10986_v32 = vsub.s32 %v4634_v8, %v4636_v33  ;;  %v6844_v37 = vpack.c.bf16 %v4779_v18, %v4778_v60  ;;  %v6846_v54 = vpack.c.bf16 %v4797_v52, %v4796_v42  ;;  %v4751_v0 = vld [vmem:[%s11270_s9 + $0x48] sm:$0xff]  ;;  %v4801_v53 = vld [vmem:[%s11270_s9 + $0x1d8] sm:$0xff]  ;;  %v4786_v60 = vld [vmem:[%s11270_s9 + $0x160] sm:$0xff]  ;;  %v6832_v42 = vpack.c.bf16 %v4757_v29, %v4756_v16 }
 0x6f4   :  { %4537 = vmatmul.mubr.f32.gmra.mrb[60].mxu0 %v4404_v61  ;;  %6839 = vmatprep.subr.bf16.mxu1 %v6838_v31  ;;  %v6814_v61 = vpack.c.bf16 %v4765_v59, %v4764_v43  ;;  %v6854_v27 = vpack.c.bf16 %v4801_v53, %v4800_v21  ;;  %v4771_v31 = vld [vmem:[%s11270_s9 + $0xe8] sm:$0xff]  ;;  %v4772_v43 = vld [vmem:[%s11270_s9 + $0xf0] sm:$0xff]  ;;  %v4773_v59 = vld [vmem:[%s11270_s9 + $0xf8] sm:$0xff] }
 0x6f5   :  { %6809 = vmatpush3.bf16.msra.mxu0 %v6808_v14  ;;  %v4787_v18 = vld [vmem:[%s11270_s9 + $0x168] sm:$0xff]  ;;  %v4804_v52 = vld [vmem:[%s11270_s9 + $0x1f0] sm:$0xff]  ;;  %v4825_v21 = vld [vmem:[%s11270_s9 + $0x298] sm:$0xff] }
 0x6f6   :  { %6811 = vmatprep.subr.bf16.mxu0 %v6810_v51  ;;  %v4754_v51 = vld [vmem:[%s11270_s9 + $0x60] sm:$0xff]  ;;  %v4815_v16 = vld [vmem:[%s11270_s9 + $0x248] sm:$0xff]  ;;  %v4832_v29 = vld [vmem:[%s11270_s9 + $0x2d0] sm:$0xff] }
 0x6f7   :  { %6841 = vmatpush3.bf16.msra.mxu1 %v6840_v58  ;;  %v6828_v33 = vpack.c.bf16 %v4755_v3, %v4754_v51  ;;  %v4802_v58 = vld [vmem:[%s11270_s9 + $0x1e0] sm:$0xff] }
 0x6f8   :  { %6843 = vmatprep.subr.bf16.mxu1 %v6842_v35 }
 0x6f9   :  { %6813 = vmatpush3.bf16.msra.mxu0 %v6812_v23  ;;  %v4803_v23 = vld [vmem:[%s11270_s9 + $0x1e8] sm:$0xff] }
 0x6fa   :  { %6815 = vmatprep.subr.bf16.mxu0 %v6814_v61  ;;  %v6858_v35 = vpack.c.bf16 %v4803_v23, %v4802_v58  ;;  %v6830_v61 = vpack.c.bf16 %v4773_v59, %v4772_v43  ;;  %v4829_v58 = vld [vmem:[%s11270_s9 + $0x2b8] sm:$0xff]  ;;  %v4830_v43 = vld [vmem:[%s11270_s9 + $0x2c0] sm:$0xff]  ;;  %v4831_v59 = vld [vmem:[%s11270_s9 + $0x2c8] sm:$0xff] }
 0x6fb   :  { %6845 = vmatpush3.bf16.msra.mxu1 %v6844_v37 }
 0x6fc   :  { %6847 = vmatprep.subr.bf16.mxu1 %v6846_v54  ;;  %v4805_v54 = vld [vmem:[%s11270_s9 + $0x1f8] sm:$0xff] }
 0x6fd   :  { %6817 = vmatpush3.bf16.msra.mxu0 %v6816_v36  ;;  %v6860_v36 = vpack.c.bf16 %v4787_v18, %v4786_v60  ;;  %v6862_v5 = vpack.c.bf16 %v4805_v54, %v4804_v52  ;;  %v4814_v18 = vld [vmem:[%s11270_s9 + $0x240] sm:$0xff]  ;;  %v4816_v52 = vld [vmem:[%s11270_s9 + $0x250] sm:$0xff]  ;;  %v4817_v54 = vld [vmem:[%s11270_s9 + $0x258] sm:$0xff] }
 0x6fe   :  { %6819 = vmatprep.subr.bf16.mxu0 %v6818_v11  ;;  %v4822_v11 = vld [vmem:[%s11270_s9 + $0x280] sm:$0xff] }
 0x7c3   :  { %v5317_v47 = vpop.f32.mrb[58].mxu0 }
 0x7c4   :  { %v5318_v39 = vpop.f32.mrb[59].mxu0 }
 0x7c5   :  { %v5319_v46 = vadd.f32 %v5318_v39, %v5317_v47  ;;  %v5553_v34 = vpop.f32.mrb[64].mxu1  ;;  %v6848_v39 = vpack.c.bf16 %v4781_v15, %v4780_v9  ;;  %v4788_v9 = vld [vmem:[%s11270_s9 + $0x170] sm:$0xff] }
 0x7c6   :  { %v4608_v63 = vpop.f32.mrb[65].mxu1 }
 0x7c7   :  { %v5320_v4 = vpop.f32.mrb[60].mxu0  ;;  %v4534_v48 = vadd.f32 %v5319_v46, %v4460_v57  ;;  %v6820_v46 = vpack.c.bf16 %v4751_v0, %v4750_v62  ;;  %v4799_v57 = vld [vmem:[%s11270_s9 + $0x1c8] sm:$0xff]  ;;  %6849 = vmatpush3.bf16.msra.mxu1 %v6848_v39 }
 0x7c8   :  { %v5321_v12 = vpop.f32.mrb[61].mxu0  ;;  %v4823_v62 = vld [vmem:[%s11270_s9 + $0x288] sm:$0xff] }
 0x7c9   :  { %v4609_v56 = vadd.f32 %v4608_v63, %v4534_v48  ;;  %v5322_v17 = vadd.f32 %v5321_v12, %v5320_v4  ;;  %v4768_v12 = vld [vmem:[%s11270_s9 + $0xd0] sm:$0xff]  ;;  %6821 = vmatpush3.bf16.msra.mxu0 %v6820_v46 }
 0x7cb   :  { %v4617_v2 = vsub.f32 0.0, %v4609_v56  ;;  %v4539_v1 = vadd.f32 %v5322_v17, %v4465_v44  ;;  %v4769_v56 = vld [vmem:[%s11270_s9 + $0xd8] sm:$0xff]  ;;  %v4782_v17 = vld [vmem:[%s11270_s9 + $0x140] sm:$0xff] }
 0x7cd   :  { %v4619_v19 = vmul.f32 1.442695, %v4617_v2  ;;  %v4614_v20 = vadd.f32 %v5553_v34, %v4539_v1  ;;  %v4798_v34 = vld [vmem:[%s11270_s9 + $0x1c0] sm:$0xff]  ;;  %v6822_v2 = vpack.c.bf16 %v4769_v56, %v4768_v12  ;;  %v4783_v1 = vld [vmem:[%s11270_s9 + $0x148] sm:$0xff] }
 0x7ce   :  { %v6850_v48 = vpack.c.bf16 %v4799_v57, %v4798_v34 }
 0x7cf   :  { %6946 = vpow2.f32 %v4619_v19  ;;  %v4618_v24 = vsub.f32 0.0, %v4614_v20  ;;  %v4752_v19 = vld [vmem:[%s11270_s9 + $0x50] sm:$0xff]  ;;  %v4753_v20 = vld [vmem:[%s11270_s9 + $0x58] sm:$0xff]  ;;  %6823 = vmatprep.subr.bf16.mxu0 %v6822_v2 }
 0x7d0   :  { %6851 = vmatprep.subr.bf16.mxu1 %v6850_v48  ;;  %v6824_v6 = vpack.c.bf16 %v4753_v20, %v4752_v19 }
 0x7d1   :  { %v4621_v45 = vmul.f32 1.442695, %v4618_v24 }
 0x7d2   :  { %6825 = vmatpush3.bf16.msra.mxu0 %v6824_v6  ;;  %v4824_v6 = vld [vmem:[%s11270_s9 + $0x290] sm:$0xff] }
 0x7d3   :  { %6948 = vpow2.f32 %v4621_v45 }
 0x7d9   :  { %v6947_v50 = vpop.eup %6946 }
 0x7da   :  { %v4623_v13 = vadd.f32 1.0, %v6947_v50 }
 0x7dc   :  { %6950 = vrcp.f32 %v4623_v13  ;;  %v6852_v13 = vpack.c.bf16 %v4783_v1, %v4782_v17 }
 0x7dd   :  { %v6949_v30 = vpop.eup %6948 }
 0x7de   :  { %v4624_v41 = vadd.f32 1.0, %v6949_v30  ;;  %v4770_v30 = vld [vmem:[%s11270_s9 + $0xe0] sm:$0xff]  ;;  %6853 = vmatpush3.bf16.msra.mxu1 %v6852_v13 }
 0x7df   :  { %v6826_v40 = vpack.c.bf16 %v4771_v31, %v4770_v30  ;;  %6855 = vmatprep.subr.bf16.mxu1 %v6854_v27  ;;  %v6870_v30 = vpack.c.bf16 %v4825_v21, %v4824_v6  ;;  %v4808_v31 = vld [vmem:[%s11270_s9 + $0x210] sm:$0xff] }
 0x7e0   :  { %6952 = vrcp.f32 %v4624_v41  ;;  %v4785_v41 = vld [vmem:[%s11270_s9 + $0x158] sm:$0xff] }
 0x7e1   :  { %v6856_v8 = vpack.c.bf16 %v4785_v41, %v4784_v49  ;;  %6827 = vmatprep.subr.bf16.mxu0 %v6826_v40  ;;  %v4809_v49 = vld [vmem:[%s11270_s9 + $0x218] sm:$0xff]  ;;  %v4826_v40 = vld [vmem:[%s11270_s9 + $0x2a0] sm:$0xff]  ;;  %v4827_v41 = vld [vmem:[%s11270_s9 + $0x2a8] sm:$0xff] }
 0x7e2   :  { %6829 = vmatpush3.bf16.msra.mxu0 %v6828_v33  ;;  %v6874_v3 = vpack.c.bf16 %v4827_v41, %v4826_v40  ;;  %v4828_v33 = vld [vmem:[%s11270_s9 + $0x2b0] sm:$0xff] }
 0x7e3   :  { %6857 = vmatpush3.bf16.msra.mxu1 %v6856_v8  ;;  %6831 = vmatprep.subr.bf16.mxu0 %v6830_v61  ;;  %v6882_v61 = vpack.c.bf16 %v4831_v59, %v4830_v43 }
 0x7e4   :  { %6859 = vmatprep.subr.bf16.mxu1 %v6858_v35  ;;  %v4813_v35 = vld [vmem:[%s11270_s9 + $0x238] sm:$0xff] }
 0x7e6   :  { %v6951_v10 = vpop.eup %6950  ;;  %6833 = vmatpush3.bf16.msra.mxu0 %v6832_v42 }
 0x7e7   :  { %v4638_v14 = vrot.slane %v6951_v10, %v10986_v32  ;;  %v4667_v47 = vcombine.high %v6951_v10, %v6951_v10  ;;  %4630 = vst.msk [vmem:[#allocation3] sm:$0x1] %vm4629_vm4, %v6951_v10  ;;  %v4789_v10 = vld [vmem:[%s11270_s9 + $0x178] sm:$0xff]  ;;  %6861 = vmatpush3.bf16.msra.mxu1 %v6860_v36  ;;  %v6884_v36 = vpack.c.bf16 %v4815_v16, %v4814_v18 }
 0x7e8   :  { %v6864_v15 = vpack.c.bf16 %v4789_v10, %v4788_v9  ;;  %6863 = vmatprep.subr.bf16.mxu1 %v6862_v5  ;;  %v4834_v5 = vld [vmem:[%s11270_s9 + $0x2e0] sm:$0xff]  ;;  %v6888_v9 = vpack.c.bf16 %v4817_v54, %v4816_v52 }
 0x7e9   :  { %4639 = vrot.lane.b32.xlu0 %v4638_v14, %s6982_s12  ;;  %v4652_v63 = vcombine.high %v4638_v14, %v4638_v14  ;;  %v11022_v4 = vrot.slane %v4667_v47, %v10986_v32  ;;  %v4643_v45 = vrot.slane %v4638_v14, 7  ;;  %v6866_v14 = vpack.c.bf16 %v4823_v62, %v4822_v11  ;;  %v4818_v11 = vld [vmem:[%s11270_s9 + $0x260] sm:$0xff]  ;;  %v4836_v62 = vld [vmem:[%s11270_s9 + $0x2f0] sm:$0xff] }
 0x7ea   :  { %v6953_v44 = vpop.eup %6952 }
 0x7eb   :  { %4655 = vrot.lane.b32.xlu1 %v4652_v63, %s6982_s12  ;;  %v4689_v24 = vcombine.high %v11022_v4, %v11022_v4  ;;  %4654 = vst.msk [vmem:[#allocation3 + $0x2] sm:$0x1] %vm4629_vm4, %v4652_v63  ;;  %4676 = vst.msk [vmem:[#allocation3 + $0x4] sm:$0x1] %vm4629_vm4, %v11022_v4  ;;  %v11050_v50 = vrot.slane %v6953_v44, %v10986_v32  ;;  %v4659_v26 = vrot.slane %v4652_v63, 7  ;;  %v4644_v22 = vrot.slane %v4643_v45, 2 }
 0x7ec   :  { %4704 = vst.msk [vmem:[#allocation3 + $0x8] sm:$0x1] %vm4629_vm4, %v6953_v44  ;;  %v4681_v7 = vrot.slane %v11022_v4, 7  ;;  %6867 = vmatprep.subr.bf16.mxu0 %v6866_v14  ;;  %6865 = vmatpush3.bf16.msra.mxu1 %v6864_v15  ;;  %v4807_v45 = vld [vmem:[%s11270_s9 + $0x208] sm:$0xff] }
 0x7ed   :  { %4677 = vrot.lane.b32.xlu0 %v11022_v4, %s6982_s12  ;;  %4691 = vst.msk [vmem:[#allocation3 + $0x6] sm:$0x1] %vm4629_vm4, %v4689_v24  ;;  %v4725_v38 = vcombine.high %v11050_v50, %v11050_v50  ;;  %v4660_v25 = vrot.slane %v4659_v26, 2  ;;  %v4696_v28 = vrot.slane %v4689_v24, 7  ;;  %v4717_v0 = vrot.slane %v11050_v50, 7  ;;  %v4819_v15 = vld [vmem:[%s11270_s9 + $0x268] sm:$0xff] }
 0x7ee   :  { %v4682_v37 = vrot.slane %v4681_v7, 2  ;;  %v4811_v7 = vld [vmem:[%s11270_s9 + $0x228] sm:$0xff]  ;;  %v6892_v14 = vpack.c.bf16 %v4819_v15, %v4818_v11 }
 0x7ef   :  { %4692 = vrot.lane.b32.xlu1 %v4689_v24, %s6982_s12  ;;  %4727 = vst.msk [vmem:[#allocation3 + $0xa] sm:$0x1] %vm4629_vm4, %v4725_v38  ;;  %v4697_v55 = vrot.slane %v4696_v28, 2  ;;  %v4732_v47 = vrot.slane %v4725_v38, 7  ;;  %v4718_v39 = vrot.slane %v4717_v0, 2  ;;  %v4806_v24 = vld [vmem:[%s11270_s9 + $0x200] sm:$0xff] }
 0x7f0   :  { %v6868_v26 = vpack.c.bf16 %v4807_v45, %v4806_v24  ;;  %v4812_v28 = vld [vmem:[%s11270_s9 + $0x230] sm:$0xff]  ;;  %v4837_v0 = vld [vmem:[%s11270_s9 + $0x2f8] sm:$0xff] }
 0x7f1   :  { %4645 = vrot.lane.b32.xlu0 %v4644_v22, %s6982_s12  ;;  %v4733_v46 = vrot.slane %v4732_v47, 2  ;;  %v6880_v60 = vpack.c.bf16 %v4813_v35, %v4812_v28  ;;  %v6894_v47 = vpack.c.bf16 %v4837_v0, %v4836_v62 }
 0x7f3   :  { %4661 = vrot.lane.b32.xlu1 %v4660_v25, %s6982_s12 }
 0x7f5   :  { %4683 = vrot.lane.b32.xlu0 %v4682_v37, %s6982_s12 }
 0x7f7   :  { %4698 = vrot.lane.b32.xlu1 %v4697_v55, %s6982_s12 }
 0x7f9   :  { %4713 = vrot.lane.b32.xlu0 %v11050_v50, %s6982_s12 }
 0x7fb   :  { %4728 = vrot.lane.b32.xlu1 %v4725_v38, %s6982_s12 }
 0x7fd   :  { %4719 = vrot.lane.b32.xlu0 %v4718_v39, %s6982_s12 }
 0x7ff   :  { %4734 = vrot.lane.b32.xlu1 %v4733_v46, %s6982_s12 }
 0x85b   :  { %v4640_v34 = vpop.permute.xlu0 %4639 }
 0x85c   :  { %4642 = vst.msk [vmem:[#allocation3 + $0x1] sm:$0x1] %vm4629_vm4, %v4640_v34 }
 0x85d   :  { %4651 = vst.msk [vmem:[#allocation3 + $0x1] sm:$0x1] %vm4648_vm5, %v4644_v22  ;;  %v4656_v57 = vpop.permute.xlu1 %4655  ;;  %v4810_v22 = vld [vmem:[%s11270_s9 + $0x220] sm:$0xff] }
 0x85e   :  { %4658 = vst.msk [vmem:[#allocation3 + $0x3] sm:$0x1] %vm4629_vm4, %v4656_v57  ;;  %v6876_v23 = vpack.c.bf16 %v4811_v7, %v4810_v22 }
 0x85f   :  { %4666 = vst.msk [vmem:[#allocation3 + $0x3] sm:$0x1] %vm4648_vm5, %v4660_v25  ;;  %v4678_v63 = vpop.permute.xlu0 %4677  ;;  %v6878_v25 = vpack.c.bf16 %v4829_v58, %v4828_v33 }
 0x860   :  { %4680 = vst.msk [vmem:[#allocation3 + $0x5] sm:$0x1] %vm4629_vm4, %v4678_v63  ;;  %v5131_v63 = vld [vmem:[%s11271_s10] ss:$0 sm:$0xff] }
 0x861   :  { %4688 = vst.msk [vmem:[#allocation3 + $0x5] sm:$0x1] %vm4648_vm5, %v4682_v37  ;;  %v4693_v4 = vpop.permute.xlu1 %4692  ;;  %v4833_v37 = vld [vmem:[%s11270_s9 + $0x2d8] sm:$0xff] }
 0x862   :  { %4695 = vst.msk [vmem:[#allocation3 + $0x7] sm:$0x1] %vm4629_vm4, %v4693_v4  ;;  %v6886_v42 = vpack.c.bf16 %v4833_v37, %v4832_v29 }
 0x863   :  { %4703 = vst.msk [vmem:[#allocation3 + $0x7] sm:$0x1] %vm4648_vm5, %v4697_v55  ;;  %v4646_v48 = vpop.permute.xlu0 %4645  ;;  %v4835_v55 = vld [vmem:[%s11270_s9 + $0x2e8] sm:$0xff] }
 0x864   :  { %4649 = vst.msk [vmem:[#allocation3] sm:$0x1] %vm4648_vm5, %v4646_v48  ;;  %v6890_v10 = vpack.c.bf16 %v4835_v55, %v4834_v5 }
 0x865   :  { %v4662_v12 = vpop.permute.xlu1 %4661 }
 0x866   :  { %4664 = vst.msk [vmem:[#allocation3 + $0x2] sm:$0x1] %vm4648_vm5, %v4662_v12 }
 0x867   :  { %v4684_v56 = vpop.permute.xlu0 %4683 }
 0x868   :  { %4686 = vst.msk [vmem:[#allocation3 + $0x4] sm:$0x1] %vm4648_vm5, %v4684_v56 }
 0x869   :  { %v4699_v17 = vpop.permute.xlu1 %4698 }
 0x86a   :  { %4701 = vst.msk [vmem:[#allocation3 + $0x6] sm:$0x1] %vm4648_vm5, %v4699_v17 }
 0x86b   :  { %v4714_v44 = vpop.permute.xlu0 %4713 }
 0x86c   :  { %4716 = vst.msk [vmem:[#allocation3 + $0x9] sm:$0x1] %vm4629_vm4, %v4714_v44 }
 0x86d   :  { %4724 = vst.msk [vmem:[#allocation3 + $0x9] sm:$0x1] %vm4648_vm5, %v4718_v39  ;;  %v4729_v2 = vpop.permute.xlu1 %4728  ;;  %v4820_v39 = vld [vmem:[%s11270_s9 + $0x270] sm:$0xff] }
 0x86e   :  { %4731 = vst.msk [vmem:[#allocation3 + $0xb] sm:$0x1] %vm4629_vm4, %v4729_v2 }
 0x86f   :  { %4739 = vst.msk [vmem:[#allocation3 + $0xb] sm:$0x1] %vm4648_vm5, %v4733_v46  ;;  %v4720_v1 = vpop.permute.xlu0 %4719  ;;  %v4821_v46 = vld [vmem:[%s11270_s9 + $0x278] sm:$0xff]  ;;  %s6984_s9 = smov [#allocation4]  }
 0x870   :  { %4722 = vst.msk [vmem:[#allocation3 + $0x8] sm:$0x1] %vm4648_vm5, %v4720_v1  ;;  %v6896_v34 = vpack.c.bf16 %v4821_v46, %v4820_v39  ;;  %s5095_s3 = sshll.u32 %s6984_s9, 4  ;;  %s5096_s3 = int_to_ptr.vmem [resolvable:$true] %s5095_s3 }
 0x871   :  { %v4735_v19 = vpop.permute.xlu1 %4734  ;;  %v4740_v20 = vld [vmem:[#allocation3] sm:$0xff]  ;;  %s6956_s17 = scalar_lea.vmem %s5096_s3, 32  ;;  %p6961_p1 = scmp.lt.s32.totalorder %s5096_s3, %s5096_s3 }
 0x872   :  { %4737 = vst.msk [vmem:[#allocation3 + $0xa] sm:$0x1] %vm4648_vm5, %v4735_v19  ;;  %v4854_v50 = vrot.slane %v4740_v20, %v10986_v32  ;;  %v4847_v13 = vcombine.high %v4740_v20, %v4740_v20  ;;  %p6957_p0 = scmp.ne.s32.totalorder %s5096_s3, %s6956_s17  ;;  %p6962_p2 = scmp.lt.s32.totalorder %s6956_s17, %s6956_s17 }
 0x874   :  { %v4862_v53 = vcombine.high %v4854_v50, %v4854_v50  ;;  %v4861_v27 = vrot.slane %v4847_v13, %v10986_v32  ;;  %v6872_v32 = vpack.c.bf16 %v4809_v49, %v4808_v31  ;;  %p6963_p3 = por %p6962_p2, %p6961_p1 }
 0x876   :  { %4942 = vmatprep.mubr.f32.mxu0 %v4862_v53  ;;  %v4863_v38 = vcombine.high %v4861_v27, %v4861_v27  ;;  %p6964_p4 = pnand %p6963_p3, %p6957_p0 }
 0x877   :  { %4943 = vmatmul.mubr.f32.vlgmr.msra.gmra.mrb[62].mxu0 %v4854_v50 }
 0x878   :  { %6869 = vmatpush3.bf16.msra.mxu0 %v6868_v26  ;;  %5012 = vmatprep.mubr.f32.mxu1 %v4863_v38 }
 0x879   :  { %5013 = vmatmul.mubr.f32.vlgmr.msra.gmra.mrb[66].mxu1 %v4861_v27  ;;  %6871 = vmatprep.subr.bf16.mxu0 %v6870_v30  ;;  %v5132_v51 = vld.sshfl [vmem:[#allocation3 + $0x8] sm:$0x33 pattern:$0x76325410] }
 0x87a   :  { %v4871_v8 = vcombine.high %v5132_v51, %v5132_v51 }
 0x87c   :  { %6873 = vmatpush3.bf16.msra.mxu0 %v6872_v32  ;;  %5082 = vmatprep.mubr.f32.mxu0 %v4871_v8 }
 0x87d   :  { %6875 = vmatprep.subr.bf16.mxu0 %v6874_v3 }
 0x880   :  { %6877 = vmatpush3.bf16.msra.mxu0 %v6876_v23 }
 0x881   :  { %6879 = vmatprep.subr.bf16.mxu0 %v6878_v25 }
 0x884   :  { %6881 = vmatpush3.bf16.msra.mxu0 %v6880_v60 }
 0x885   :  { %6883 = vmatprep.subr.bf16.mxu0 %v6882_v61 }
 0x888   :  { %6885 = vmatpush3.bf16.msra.mxu0 %v6884_v36 }
 0x889   :  { %6887 = vmatprep.subr.bf16.mxu0 %v6886_v42 }
 0x88c   :  { %6889 = vmatpush3.bf16.msra.mxu0 %v6888_v9 }
 0x88d   :  { %6891 = vmatprep.subr.bf16.mxu0 %v6890_v10 }
 0x890   :  { %6893 = vmatpush3.bf16.msra.mxu0 %v6892_v14 }
 0x891   :  { %6895 = vmatprep.subr.bf16.mxu0 %v6894_v47 }
 0x894   :  { %6897 = vmatpush3.bf16.msra.mxu0 %v6896_v34 }
 0x897   :  { %5083 = vmatmul.mubr.f32.vlgmr.msra.gmra.mrb[64].mxu0 %v5132_v51 }
 0x94a   :  { %v5373_v57 = vpop.f32.mrb[62].mxu0 }
 0x94b   :  { %v5374_v4 = vpop.f32.mrb[63].mxu0 }
 0x94c   :  { %v5375_v48 = vadd.f32 %v5374_v4, %v5373_v57  ;;  %v5408_v12 = vpop.f32.mrb[66].mxu1 }
 0x94d   :  { %v5409_v56 = vpop.f32.mrb[67].mxu1 }
 0x94e   :  { %v4945_v17 = vadd.f32 %v5375_v48, %v5131_v63  ;;  %v5410_v44 = vadd.f32 %v5409_v56, %v5408_v12 }
 0x950   :  { %v5015_v2 = vadd.f32 %v5410_v44, %v4945_v17 }
 0x96a   :  { %v5443_v1 = vpop.f32.mrb[64].mxu0 }
 0x96b   :  { %v5444_v19 = vpop.f32.mrb[65].mxu0 }
 0x96c   :  { %v5445_v20 = vadd.f32 %v5444_v19, %v5443_v1 }
 0x96e   :  { %v5085_v24 = vadd.f32 %v5445_v20, %v5015_v2 }
 0x970   :  { %5088 = vst [vmem:[#allocation4] sm:$0x3] %v5085_v24 }
 0x971   :  { %6967 = shalt.err (!%p6964_p4)
}
 0x972   :  { %s6968_s1 = scalar_lea.hbm %s11272_s11, 32 }
 0x973   :  { %p6969_p5 = scmp.ne.s32.totalorder %s11272_s11, %s6968_s1  ;;  %p6972_p6 = scmp.lt.u32.totalorder %s6968_s1, %s11272_s11 }
 0x975   :  { %p6974_p7 = pnand %p6972_p6, %p6969_p5 }
 0x977   :  { %6977 = shalt.err (!%p6974_p7)
}
 0x978   :  { %5098 = dma.vmem_to_hbm [thread:$0]  %s5096_s3, 32, %s11272_s11, [#allocation5]  }
 0x979   :  { %6978 = dma.done.wait [#allocation5], 32  }
 0x97a   :  { %6979 = vsyncadd [#allocation5], 4294967264 }
 0x97b   :  { %5102 = vsyncpa [#allocation5], 1 }

</bundles_post_ra>
